<compile_context>
chip_gen: v7x
topology: tpu7x:2x2x1
jax: 0.10.0
libtpu: 0.0.40
codegen_flags: <defaults>
</compile_context>

<pallas_src>
import jax
import jax.numpy as jnp
from jax import lax
from jax.experimental import pallas as pl
from jax.experimental.pallas import tpu as pltpu

NUM_CLASSES = 10
EPS = 1e-5
DROP_PROB = 0.5
KEEP_PROB = 1.0 - DROP_PROB

K = 5                 # conv kernel size (stride 1, padding 2)
C1, C2 = 16, 32       # real conv output channels
C_PAD = 128           # lane-dense padded channel count for the conv GEMM columns
KD1 = 32              # layer-1 contraction dim: 5*5*1 = 25, padded to a multiple of 8
KD2 = K * K * C1      # layer-2 contraction dim: 400
HIDDEN = 128          # fc1 width
POOL_OUT = 7          # final spatial size (28 -> 14 -> 7)


def _vmem_spec():
    return pl.BlockSpec(memory_space=pltpu.MemorySpace.VMEM)


def _call(kernel, n_in, out_shape):
    return pl.pallas_call(
        kernel,
        out_shape=out_shape,
        in_specs=[_vmem_spec()] * n_in,
        out_specs=_vmem_spec(),
    )


# ---------------- Pallas kernels ----------------

def conv1_fused_kernel(p_ref, w_ref, b_ref, gamma_ref, beta_ref, o_ref):
    """Layer-1 fused im2col-GEMM + bias + training-mode BN + ReLU + 2x2 maxpool.

    p_ref:  (4*Q, Kd) bf16 im2col patches, corner-major: block c (c = 2*dy + dx)
            holds conv-output positions (h, w) = (2*ho + dy, 2*wo + dx),
            row-ordered (n, ho, wo).
    w_ref:  (Kd, 128) bf16 weights, Cout zero-padded to 128 lanes.
    b_ref / gamma_ref / beta_ref: (1, 128) f32 (zero-padded).
    o_ref:  (Q, 128) bf16 pooled output, rows ordered (n, ho, wo).
    """
    q = o_ref.shape[0]

    # Single merged GEMM over all four corner blocks: one MXU weight push, one
    # uninterrupted 4Q-row LHS stream, f32 accumulation.
    y = jnp.dot(p_ref[...], w_ref[...],
                preferred_element_type=jnp.float32) + b_ref[...]

    # One-pass batch statistics over all 4*Q rows (= every (n, h, w) position):
    # a single axis-0 reduction per quantity.
    inv_m = 1.0 / (4 * q)
    mean = jnp.sum(y, axis=0, keepdims=True) * inv_m
    var = jnp.maximum(jnp.sum(y * y, axis=0, keepdims=True) * inv_m - mean * mean,
                      0.0)                                 # biased var (training BN)
    scale = gamma_ref[...] * lax.rsqrt(var + EPS)          # rsqrt -> EUP slot
    shift = beta_ref[...] - mean * scale
    # TODO(synk): moving_mean / moving_var running-stat updates are module state
    # with no effect on this forward output; not emitted here.

    # Running-max epilogue: BN affine + ReLU is one FMA + max per element, maxpool
    # folds in as a running max over the 4 corner blocks.  392-row slices of the
    # f32 GEMM result are 8-sublane aligned (no realignment copies).
    pooled = jnp.maximum(y[0:q] * scale + shift, 0.0)
    for c in range(1, 4):
        pooled = jnp.maximum(pooled,
                             jnp.maximum(y[c * q:(c + 1) * q] * scale + shift, 0.0))
    o_ref[...] = pooled.astype(o_ref.dtype)


def conv2_fused_kernel(p0_ref, p1_ref, p2_ref, p3_ref,
                       w_ref, b_ref, gamma_ref, beta_ref, o_ref):
    """Layer-2 fused im2col-GEMM + bias + BN + ReLU + 2x2 maxpool.

    The four corner patch blocks arrive as four separate full refs (Q=98 is not an
    8/16-sublane multiple, so slicing one concatenated ref at 98-row offsets would
    force sublane-realignment copies).  Output is de-padded to the C2 real channels.
    """
    w = w_ref[...]
    bias = b_ref[...]
    ys = [jnp.dot(p[...], w, preferred_element_type=jnp.float32) + bias
          for p in (p0_ref, p1_ref, p2_ref, p3_ref)]

    # One-pass batch statistics over all 4*Q rows.
    tot = jnp.sum(ys[0], axis=0, keepdims=True)
    tot_sq = jnp.sum(ys[0] * ys[0], axis=0, keepdims=True)
    for y in ys[1:]:
        tot = tot + jnp.sum(y, axis=0, keepdims=True)
        tot_sq = tot_sq + jnp.sum(y * y, axis=0, keepdims=True)
    inv_m = 1.0 / (4 * ys[0].shape[0])
    mean = tot * inv_m
    var = jnp.maximum(tot_sq * inv_m - mean * mean, 0.0)
    scale = gamma_ref[...] * lax.rsqrt(var + EPS)
    shift = beta_ref[...] - mean * scale

    # Running-max epilogue over the 4 corners.
    pooled = jnp.maximum(ys[0] * scale + shift, 0.0)
    for y in ys[1:]:
        pooled = jnp.maximum(pooled, jnp.maximum(y * scale + shift, 0.0))

    # De-padded store: only the C2 real channels reach HBM, so the flatten -> fc1
    # path carries no zero lanes (narrow masked store on ~6 KB is negligible).
    o_ref[...] = pooled[:, :o_ref.shape[1]].astype(o_ref.dtype)


def mlp_head_kernel(x_ref, w1_ref, b1_ref, mask_ref, w2_ref, b2_ref, o_ref):
    """fc1 + ReLU + dropout (pre-scaled mask) + fc2, fused in one call.
    fc1 weight is de-padded: (7*7*32, 128) bf16."""
    h = jnp.dot(x_ref[...], w1_ref[...], preferred_element_type=jnp.float32)
    h = jnp.maximum(h + b1_ref[...], 0.0)
    h = h * mask_ref[...]                                   # mask already * 1/keep_prob
    out = jnp.dot(h.astype(w2_ref.dtype), w2_ref[...],
                  preferred_element_type=jnp.float32) + b2_ref[...]
    o_ref[...] = out


# ---------------- JAX glue (im2col / layout; all cheap XLA ops) ----------------

def _corner_blocks(x_nhwc):
    """im2col patches for a 5x5 / pad-2 conv, grouped corner-major so the fused
    2x2 maxpool is an elementwise max of 4 row blocks.  Returns a list of 4 blocks,
    each (N*H/2*W/2, K*K*C), column order (ky, kx, c); block c = 2*dy + dx."""
    N, H, W, C = x_nhwc.shape
    pad = K // 2
    xp = jnp.pad(x_nhwc, ((0, 0), (pad, pad), (pad, pad), (0, 0)))
    taps = [xp[:, ky:ky + H, kx:kx + W, :] for ky in range(K) for kx in range(K)]
    p = jnp.stack(taps, axis=3).reshape(N, H, W, K * K * C)
    return [p[:, dy::2, dx::2, :].reshape(-1, K * K * C)
            for dy in range(2) for dx in range(2)]


@jax.jit
def convnet_forward(prep, x_nchw, dropout_mask):
    N = x_nchw.shape[0]
    x = jnp.transpose(x_nchw, (0, 2, 3, 1))                       # NHWC f32

    # ---- layer1: conv(1->16, k5, p2) + BN + ReLU + maxpool(2,2), fused ----
    blocks1 = _corner_blocks(x)                                   # 4 x (N*14*14, 25)
    p1 = jnp.concatenate(blocks1, axis=0)                         # (4*Q1, 25)
    p1 = jnp.pad(p1, ((0, 0), (0, KD1 - p1.shape[1]))).astype(jnp.bfloat16)
    q1 = blocks1[0].shape[0]
    y1 = _call(conv1_fused_kernel, 5,
               jax.ShapeDtypeStruct((q1, C_PAD), jnp.bfloat16))(
        p1, prep['w1'], prep['b1'], prep['gamma1'], prep['beta1'])  # (392, 128) bf16

    # ---- layer2: conv(16->32, k5, p2) + BN + ReLU + maxpool(2,2), fused ----
    H1, W1 = x.shape[1] // 2, x.shape[2] // 2
    x2 = y1[:, :C1].reshape(N, H1, W1, C1)                        # (N,14,14,16) bf16
    blocks2 = [b.astype(jnp.bfloat16) for b in _corner_blocks(x2)]  # 4 x (98, 400)
    q2 = blocks2[0].shape[0]
    y2 = _call(conv2_fused_kernel, 8,
               jax.ShapeDtypeStruct((q2, C2), jnp.bfloat16))(
        *blocks2, prep['w2'], prep['b2'], prep['gamma2'], prep['beta2'])  # (98, 32) bf16

    # flatten: rows are (n, ho, wo), lanes are the 32 real channels; the (c,h,w)
    # permutation is folded into fc1's weight, so this is a tiny row-major reshape.
    flat = y2.reshape(N, (q2 // N) * C2)                          # (N, 1568) bf16

    out = _call(mlp_head_kernel, 6,
                jax.ShapeDtypeStruct((N, NUM_CLASSES), jnp.float32))(
        flat, prep['fc1_w'], prep['fc1_b'], dropout_mask,
        prep['fc2_w'], prep['fc2_b'])
    return out


def prepare_params(params):
    """One-time repack of torch-layout parameters into kernel-ready layouts:
    (ky,kx,cin)-ordered, lane-padded (Cout->128) bf16 conv weights; de-padded
    (1568,128) fc1 weight with the NCHW flatten permutation folded in."""
    def conv_w(w, k_pad):
        cout, cin, k, _ = w.shape
        w2d = jnp.transpose(w, (2, 3, 1, 0)).reshape(k * k * cin, cout)
        w2d = jnp.pad(w2d, ((0, k_pad - k * k * cin), (0, C_PAD - cout)))
        return w2d.astype(jnp.bfloat16)

    def chan_vec(v):
        return jnp.pad(v, (0, C_PAD - v.shape[0])).reshape(1, C_PAD).astype(jnp.float32)

    # fc1 weight: torch (128, C2*7*7) with inputs ordered (c, h, w); our head input
    # is ordered (h, w, c) over the REAL C2 channels -> permute once, no zero lanes.
    fc1 = params['fc1_w'].reshape(HIDDEN, C2, POOL_OUT, POOL_OUT)
    fc1 = jnp.transpose(fc1, (2, 3, 1, 0))                        # (7, 7, C2, 128)
    fc1 = fc1.reshape(POOL_OUT * POOL_OUT * C2, HIDDEN).astype(jnp.bfloat16)

    return {
        'w1': conv_w(params['w1'], KD1), 'b1': chan_vec(params['b1']),
        'gamma1': chan_vec(params['gamma1']), 'beta1': chan_vec(params['beta1']),
        'w2': conv_w(params['w2'], KD2), 'b2': chan_vec(params['b2']),
        'gamma2': chan_vec(params['gamma2']), 'beta2': chan_vec(params['beta2']),
        'fc1_w': fc1,
        'fc1_b': params['fc1_b'].reshape(1, HIDDEN).astype(jnp.float32),
        'fc2_w': params['fc2_w'].T.astype(jnp.bfloat16),
        'fc2_b': params['fc2_b'].reshape(1, NUM_CLASSES).astype(jnp.float32),
    }


if __name__ == "__main__":
    key = jax.random.PRNGKey(0)
    keys = jax.random.split(key, 8)

    # fc1 expects 7*7*32, which implies 28x28 spatial input (MNIST-like), batch=2, 1 channel.
    N, Cin, H, W = 2, 1, 28, 28
    x = jax.random.normal(keys[0], (N, Cin, H, W), jnp.float32)

    # Parameters in PyTorch layouts; prepare_params() repacks them once.
    params = {
        'w1': 0.1 * jax.random.normal(keys[1], (C1, Cin, K, K), jnp.float32),
        'b1': jnp.zeros((C1,), jnp.float32),
        'gamma1': jnp.ones((C1,), jnp.float32),
        'beta1': jnp.zeros((C1,), jnp.float32),
        'w2': 0.1 * jax.random.normal(keys[2], (C2, C1, K, K), jnp.float32),
        'b2': jnp.zeros((C2,), jnp.float32),
        'gamma2': jnp.ones((C2,), jnp.float32),
        'beta2': jnp.zeros((C2,), jnp.float32),
        'fc1_w': 0.05 * jax.random.normal(keys[3], (HIDDEN, POOL_OUT * POOL_OUT * C2),
                                          jnp.float32),
        'fc1_b': jnp.zeros((HIDDEN,), jnp.float32),
        'fc2_w': 0.05 * jax.random.normal(keys[4], (NUM_CLASSES, HIDDEN), jnp.float32),
        'fc2_b': jnp.zeros((NUM_CLASSES,), jnp.float32),
    }
    prep = prepare_params(params)

    # Module is in training mode: BN uses batch statistics, dropout is active.
    # The reference's *custom* Dropout keeps elements where randn(shape) < keep_prob
    # and divides by keep_prob; we mirror exactly that (threshold 0.5, scale 2.0),
    # folding the 1/keep_prob scale into the mask.
    # TODO(synk): torch's RNG stream cannot be bit-reproduced in JAX; only the
    # (randn < keep_prob)/keep_prob masking semantics are mirrored.
    noise = jax.random.normal(keys[5], (N, HIDDEN), jnp.float32)
    dropout_mask = (noise < KEEP_PROB).astype(jnp.float32) * (1.0 / KEEP_PROB)

    out = convnet_forward(prep, x, dropout_mask)
    jax.block_until_ready(out)
    assert out.shape == (N, NUM_CLASSES) and out.dtype == jnp.float32
    print("KERNEL_OK")
</pallas_src>

<mosaic_0001>
module attributes {stable_mosaic.version = 11 : i64} {
  func.func @conv1_fused_kernel(%arg0: memref<1568x32xbf16, #tpu.memory_space<vmem>>, %arg1: memref<32x128xbf16, #tpu.memory_space<vmem>>, %arg2: memref<1x128xf32, #tpu.memory_space<vmem>>, %arg3: memref<1x128xf32, #tpu.memory_space<vmem>>, %arg4: memref<1x128xf32, #tpu.memory_space<vmem>>, %arg5: memref<392x128xbf16, #tpu.memory_space<vmem>>) attributes {dimension_semantics = [], scalar_prefetch = 0 : i64, scratch_operands = 0 : i64, tpu.core_type = #tpu.core_type<tc>} {
    %c0 = arith.constant 0 : index
    %c0_0 = arith.constant 0 : index
    %0 = vector.load %arg0[%c0, %c0_0] : memref<1568x32xbf16, #tpu.memory_space<vmem>>, vector<1568x32xbf16>
    %c0_1 = arith.constant 0 : index
    %c0_2 = arith.constant 0 : index
    %1 = vector.load %arg1[%c0_1, %c0_2] : memref<32x128xbf16, #tpu.memory_space<vmem>>, vector<32x128xbf16>
    %cst = arith.constant dense<0.000000e+00> : vector<1568x128xf32>
    %2 = tpu.matmul %0, %1, %cst {dimension_numbers = #tpu.dot_dimension_numbers<[1], [0], [0], [1], [0, 0, 1, 1], [], []>} : vector<1568x32xbf16>, vector<32x128xbf16>, vector<1568x128xf32> -> vector<1568x128xf32>
    %c0_3 = arith.constant 0 : index
    %c0_4 = arith.constant 0 : index
    %3 = vector.load %arg2[%c0_3, %c0_4] : memref<1x128xf32, #tpu.memory_space<vmem>>, vector<1x128xf32>
    %4 = vector.broadcast %3 : vector<1x128xf32> to vector<1568x128xf32>
    %5 = arith.addf %2, %4 : vector<1568x128xf32>
    %cst_5 = arith.constant dense<0.000000e+00> : vector<128xf32>
    %6 = vector.multi_reduction <add>, %5, %cst_5 [0] : vector<1568x128xf32> to vector<128xf32>
    %7 = vector.shape_cast %6 : vector<128xf32> to vector<1x128xf32>
    %cst_6 = arith.constant 6.37755089E-4 : f32
    %8 = vector.broadcast %cst_6 : f32 to vector<1x128xf32>
    %9 = arith.mulf %7, %8 : vector<1x128xf32>
    %10 = arith.mulf %5, %5 : vector<1568x128xf32>
    %cst_7 = arith.constant dense<0.000000e+00> : vector<128xf32>
    %11 = vector.multi_reduction <add>, %10, %cst_7 [0] : vector<1568x128xf32> to vector<128xf32>
    %12 = vector.shape_cast %11 : vector<128xf32> to vector<1x128xf32>
    %cst_8 = arith.constant 6.37755089E-4 : f32
    %13 = vector.broadcast %cst_8 : f32 to vector<1x128xf32>
    %14 = arith.mulf %12, %13 : vector<1x128xf32>
    %15 = arith.mulf %9, %9 : vector<1x128xf32>
    %16 = arith.subf %14, %15 : vector<1x128xf32>
    %cst_9 = arith.constant 0.000000e+00 : f32
    %17 = vector.broadcast %cst_9 : f32 to vector<1x128xf32>
    %18 = arith.maximumf %16, %17 : vector<1x128xf32>
    %c0_10 = arith.constant 0 : index
    %c0_11 = arith.constant 0 : index
    %19 = vector.load %arg3[%c0_10, %c0_11] : memref<1x128xf32, #tpu.memory_space<vmem>>, vector<1x128xf32>
    %cst_12 = arith.constant 9.99999974E-6 : f32
    %20 = vector.broadcast %cst_12 : f32 to vector<1x128xf32>
    %21 = arith.addf %18, %20 : vector<1x128xf32>
    %22 = math.rsqrt %21 : vector<1x128xf32>
    %23 = arith.mulf %19, %22 : vector<1x128xf32>
    %c0_13 = arith.constant 0 : index
    %c0_14 = arith.constant 0 : index
    %24 = vector.load %arg4[%c0_13, %c0_14] : memref<1x128xf32, #tpu.memory_space<vmem>>, vector<1x128xf32>
    %25 = arith.mulf %9, %23 : vector<1x128xf32>
    %26 = arith.subf %24, %25 : vector<1x128xf32>
    %27 = vector.extract_strided_slice %5 {offsets = [0, 0], sizes = [392, 128], strides = [1, 1]} : vector<1568x128xf32> to vector<392x128xf32>
    %28 = vector.broadcast %23 : vector<1x128xf32> to vector<392x128xf32>
    %29 = arith.mulf %27, %28 : vector<392x128xf32>
    %30 = vector.broadcast %26 : vector<1x128xf32> to vector<392x128xf32>
    %31 = arith.addf %29, %30 : vector<392x128xf32>
    %cst_15 = arith.constant 0.000000e+00 : f32
    %32 = vector.broadcast %cst_15 : f32 to vector<392x128xf32>
    %33 = arith.maximumf %31, %32 : vector<392x128xf32>
    %34 = vector.extract_strided_slice %5 {offsets = [392, 0], sizes = [392, 128], strides = [1, 1]} : vector<1568x128xf32> to vector<392x128xf32>
    %35 = vector.broadcast %23 : vector<1x128xf32> to vector<392x128xf32>
    %36 = arith.mulf %34, %35 : vector<392x128xf32>
    %37 = vector.broadcast %26 : vector<1x128xf32> to vector<392x128xf32>
    %38 = arith.addf %36, %37 : vector<392x128xf32>
    %cst_16 = arith.constant 0.000000e+00 : f32
    %39 = vector.broadcast %cst_16 : f32 to vector<392x128xf32>
    %40 = arith.maximumf %38, %39 : vector<392x128xf32>
    %41 = arith.maximumf %33, %40 : vector<392x128xf32>
    %42 = vector.extract_strided_slice %5 {offsets = [784, 0], sizes = [392, 128], strides = [1, 1]} : vector<1568x128xf32> to vector<392x128xf32>
    %43 = vector.broadcast %23 : vector<1x128xf32> to vector<392x128xf32>
    %44 = arith.mulf %42, %43 : vector<392x128xf32>
    %45 = vector.broadcast %26 : vector<1x128xf32> to vector<392x128xf32>
    %46 = arith.addf %44, %45 : vector<392x128xf32>
    %cst_17 = arith.constant 0.000000e+00 : f32
    %47 = vector.broadcast %cst_17 : f32 to vector<392x128xf32>
    %48 = arith.maximumf %46, %47 : vector<392x128xf32>
    %49 = arith.maximumf %41, %48 : vector<392x128xf32>
    %50 = vector.extract_strided_slice %5 {offsets = [1176, 0], sizes = [392, 128], strides = [1, 1]} : vector<1568x128xf32> to vector<392x128xf32>
    %51 = vector.broadcast %23 : vector<1x128xf32> to vector<392x128xf32>
    %52 = arith.mulf %50, %51 : vector<392x128xf32>
    %53 = vector.broadcast %26 : vector<1x128xf32> to vector<392x128xf32>
    %54 = arith.addf %52, %53 : vector<392x128xf32>
    %cst_18 = arith.constant 0.000000e+00 : f32
    %55 = vector.broadcast %cst_18 : f32 to vector<392x128xf32>
    %56 = arith.maximumf %54, %55 : vector<392x128xf32>
    %57 = arith.maximumf %49, %56 : vector<392x128xf32>
    %58 = arith.truncf %57 : vector<392x128xf32> to vector<392x128xbf16>
    %c0_19 = arith.constant 0 : index
    %c0_20 = arith.constant 0 : index
    %59 = vector.load %arg5[%c0_19, %c0_20] : memref<392x128xbf16, #tpu.memory_space<vmem>>, vector<392x128xbf16>
    tpu.vector_store %arg5[%c0_19, %c0_20], %58 {strides = array<i32>} : memref<392x128xbf16, #tpu.memory_space<vmem>>, vector<392x128xbf16>,
    return
  }
}

module attributes {stable_mosaic.version = 11 : i64} {
  func.func @conv2_fused_kernel(%arg0: memref<98x400xbf16, #tpu.memory_space<vmem>>, %arg1: memref<98x400xbf16, #tpu.memory_space<vmem>>, %arg2: memref<98x400xbf16, #tpu.memory_space<vmem>>, %arg3: memref<98x400xbf16, #tpu.memory_space<vmem>>, %arg4: memref<400x128xbf16, #tpu.memory_space<vmem>>, %arg5: memref<1x128xf32, #tpu.memory_space<vmem>>, %arg6: memref<1x128xf32, #tpu.memory_space<vmem>>, %arg7: memref<1x128xf32, #tpu.memory_space<vmem>>, %arg8: memref<98x32xbf16, #tpu.memory_space<vmem>>) attributes {dimension_semantics = [], scalar_prefetch = 0 : i64, scratch_operands = 0 : i64, tpu.core_type = #tpu.core_type<tc>} {
    %c0 = arith.constant 0 : index
    %c0_0 = arith.constant 0 : index
    %0 = vector.load %arg4[%c0, %c0_0] : memref<400x128xbf16, #tpu.memory_space<vmem>>, vector<400x128xbf16>
    %c0_1 = arith.constant 0 : index
    %c0_2 = arith.constant 0 : index
    %1 = vector.load %arg5[%c0_1, %c0_2] : memref<1x128xf32, #tpu.memory_space<vmem>>, vector<1x128xf32>
    %c0_3 = arith.constant 0 : index
    %c0_4 = arith.constant 0 : index
    %2 = vector.load %arg0[%c0_3, %c0_4] : memref<98x400xbf16, #tpu.memory_space<vmem>>, vector<98x400xbf16>
    %cst = arith.constant dense<0.000000e+00> : vector<98x128xf32>
    %3 = tpu.matmul %2, %0, %cst {dimension_numbers = #tpu.dot_dimension_numbers<[1], [0], [0], [1], [0, 0, 1, 1], [], []>} : vector<98x400xbf16>, vector<400x128xbf16>, vector<98x128xf32> -> vector<98x128xf32>
    %4 = vector.broadcast %1 : vector<1x128xf32> to vector<98x128xf32>
    %5 = arith.addf %3, %4 : vector<98x128xf32>
    %c0_5 = arith.constant 0 : index
    %c0_6 = arith.constant 0 : index
    %6 = vector.load %arg1[%c0_5, %c0_6] : memref<98x400xbf16, #tpu.memory_space<vmem>>, vector<98x400xbf16>
    %cst_7 = arith.constant dense<0.000000e+00> : vector<98x128xf32>
    %7 = tpu.matmul %6, %0, %cst_7 {dimension_numbers = #tpu.dot_dimension_numbers<[1], [0], [0], [1], [0, 0, 1, 1], [], []>} : vector<98x400xbf16>, vector<400x128xbf16>, vector<98x128xf32> -> vector<98x128xf32>
    %8 = vector.broadcast %1 : vector<1x128xf32> to vector<98x128xf32>
    %9 = arith.addf %7, %8 : vector<98x128xf32>
    %c0_8 = arith.constant 0 : index
    %c0_9 = arith.constant 0 : index
    %10 = vector.load %arg2[%c0_8, %c0_9] : memref<98x400xbf16, #tpu.memory_space<vmem>>, vector<98x400xbf16>
    %cst_10 = arith.constant dense<0.000000e+00> : vector<98x128xf32>
    %11 = tpu.matmul %10, %0, %cst_10 {dimension_numbers = #tpu.dot_dimension_numbers<[1], [0], [0], [1], [0, 0, 1, 1], [], []>} : vector<98x400xbf16>, vector<400x128xbf16>, vector<98x128xf32> -> vector<98x128xf32>
    %12 = vector.broadcast %1 : vector<1x128xf32> to vector<98x128xf32>
    %13 = arith.addf %11, %12 : vector<98x128xf32>
    %c0_11 = arith.constant 0 : index
    %c0_12 = arith.constant 0 : index
    %14 = vector.load %arg3[%c0_11, %c0_12] : memref<98x400xbf16, #tpu.memory_space<vmem>>, vector<98x400xbf16>
    %cst_13 = arith.constant dense<0.000000e+00> : vector<98x128xf32>
    %15 = tpu.matmul %14, %0, %cst_13 {dimension_numbers = #tpu.dot_dimension_numbers<[1], [0], [0], [1], [0, 0, 1, 1], [], []>} : vector<98x400xbf16>, vector<400x128xbf16>, vector<98x128xf32> -> vector<98x128xf32>
    %16 = vector.broadcast %1 : vector<1x128xf32> to vector<98x128xf32>
    %17 = arith.addf %15, %16 : vector<98x128xf32>
    %cst_14 = arith.constant dense<0.000000e+00> : vector<128xf32>
    %18 = vector.multi_reduction <add>, %5, %cst_14 [0] : vector<98x128xf32> to vector<128xf32>
    %19 = vector.shape_cast %18 : vector<128xf32> to vector<1x128xf32>
    %20 = arith.mulf %5, %5 : vector<98x128xf32>
    %cst_15 = arith.constant dense<0.000000e+00> : vector<128xf32>
    %21 = vector.multi_reduction <add>, %20, %cst_15 [0] : vector<98x128xf32> to vector<128xf32>
    %22 = vector.shape_cast %21 : vector<128xf32> to vector<1x128xf32>
    %cst_16 = arith.constant dense<0.000000e+00> : vector<128xf32>
    %23 = vector.multi_reduction <add>, %9, %cst_16 [0] : vector<98x128xf32> to vector<128xf32>
    %24 = vector.shape_cast %23 : vector<128xf32> to vector<1x128xf32>
    %25 = arith.addf %19, %24 : vector<1x128xf32>
    %26 = arith.mulf %9, %9 : vector<98x128xf32>
    %cst_17 = arith.constant dense<0.000000e+00> : vector<128xf32>
    %27 = vector.multi_reduction <add>, %26, %cst_17 [0] : vector<98x128xf32> to vector<128xf32>
    %28 = vector.shape_cast %27 : vector<128xf32> to vector<1x128xf32>
    %29 = arith.addf %22, %28 : vector<1x128xf32>
    %cst_18 = arith.constant dense<0.000000e+00> : vector<128xf32>
    %30 = vector.multi_reduction <add>, %13, %cst_18 [0] : vector<98x128xf32> to vector<128xf32>
    %31 = vector.shape_cast %30 : vector<128xf32> to vector<1x128xf32>
    %32 = arith.addf %25, %31 : vector<1x128xf32>
    %33 = arith.mulf %13, %13 : vector<98x128xf32>
    %cst_19 = arith.constant dense<0.000000e+00> : vector<128xf32>
    %34 = vector.multi_reduction <add>, %33, %cst_19 [0] : vector<98x128xf32> to vector<128xf32>
    %35 = vector.shape_cast %34 : vector<128xf32> to vector<1x128xf32>
    %36 = arith.addf %29, %35 : vector<1x128xf32>
    %cst_20 = arith.constant dense<0.000000e+00> : vector<128xf32>
    %37 = vector.multi_reduction <add>, %17, %cst_20 [0] : vector<98x128xf32> to vector<128xf32>
    %38 = vector.shape_cast %37 : vector<128xf32> to vector<1x128xf32>
    %39 = arith.addf %32, %38 : vector<1x128xf32>
    %40 = arith.mulf %17, %17 : vector<98x128xf32>
    %cst_21 = arith.constant dense<0.000000e+00> : vector<128xf32>
    %41 = vector.multi_reduction <add>, %40, %cst_21 [0] : vector<98x128xf32> to vector<128xf32>
    %42 = vector.shape_cast %41 : vector<128xf32> to vector<1x128xf32>
    %43 = arith.addf %36, %42 : vector<1x128xf32>
    %cst_22 = arith.constant 0.00255102036 : f32
    %44 = vector.broadcast %cst_22 : f32 to vector<1x128xf32>
    %45 = arith.mulf %39, %44 : vector<1x128xf32>
    %cst_23 = arith.constant 0.00255102036 : f32
    %46 = vector.broadcast %cst_23 : f32 to vector<1x128xf32>
    %47 = arith.mulf %43, %46 : vector<1x128xf32>
    %48 = arith.mulf %45, %45 : vector<1x128xf32>
    %49 = arith.subf %47, %48 : vector<1x128xf32>
    %cst_24 = arith.constant 0.000000e+00 : f32
    %50 = vector.broadcast %cst_24 : f32 to vector<1x128xf32>
    %51 = arith.maximumf %49, %50 : vector<1x128xf32>
    %c0_25 = arith.constant 0 : index
    %c0_26 = arith.constant 0 : index
    %52 = vector.load %arg6[%c0_25, %c0_26] : memref<1x128xf32, #tpu.memory_space<vmem>>, vector<1x128xf32>
    %cst_27 = arith.constant 9.99999974E-6 : f32
    %53 = vector.broadcast %cst_27 : f32 to vector<1x128xf32>
    %54 = arith.addf %51, %53 : vector<1x128xf32>
    %55 = math.rsqrt %54 : vector<1x128xf32>
    %56 = arith.mulf %52, %55 : vector<1x128xf32>
    %c0_28 = arith.constant 0 : index
    %c0_29 = arith.constant 0 : index
    %57 = vector.load %arg7[%c0_28, %c0_29] : memref<1x128xf32, #tpu.memory_space<vmem>>, vector<1x128xf32>
    %58 = arith.mulf %45, %56 : vector<1x128xf32>
    %59 = arith.subf %57, %58 : vector<1x128xf32>
    %60 = vector.broadcast %56 : vector<1x128xf32> to vector<98x128xf32>
    %61 = arith.mulf %5, %60 : vector<98x128xf32>
    %62 = vector.broadcast %59 : vector<1x128xf32> to vector<98x128xf32>
    %63 = arith.addf %61, %62 : vector<98x128xf32>
    %cst_30 = arith.constant 0.000000e+00 : f32
    %64 = vector.broadcast %cst_30 : f32 to vector<98x128xf32>
    %65 = arith.maximumf %63, %64 : vector<98x128xf32>
    %66 = vector.broadcast %56 : vector<1x128xf32> to vector<98x128xf32>
    %67 = arith.mulf %9, %66 : vector<98x128xf32>
    %68 = vector.broadcast %59 : vector<1x128xf32> to vector<98x128xf32>
    %69 = arith.addf %67, %68 : vector<98x128xf32>
    %cst_31 = arith.constant 0.000000e+00 : f32
    %70 = vector.broadcast %cst_31 : f32 to vector<98x128xf32>
    %71 = arith.maximumf %69, %70 : vector<98x128xf32>
    %72 = arith.maximumf %65, %71 : vector<98x128xf32>
    %73 = vector.broadcast %56 : vector<1x128xf32> to vector<98x128xf32>
    %74 = arith.mulf %13, %73 : vector<98x128xf32>
    %75 = vector.broadcast %59 : vector<1x128xf32> to vector<98x128xf32>
    %76 = arith.addf %74, %75 : vector<98x128xf32>
    %cst_32 = arith.constant 0.000000e+00 : f32
    %77 = vector.broadcast %cst_32 : f32 to vector<98x128xf32>
    %78 = arith.maximumf %76, %77 : vector<98x128xf32>
    %79 = arith.maximumf %72, %78 : vector<98x128xf32>
    %80 = vector.broadcast %56 : vector<1x128xf32> to vector<98x128xf32>
    %81 = arith.mulf %17, %80 : vector<98x128xf32>
    %82 = vector.broadcast %59 : vector<1x128xf32> to vector<98x128xf32>
    %83 = arith.addf %81, %82 : vector<98x128xf32>
    %cst_33 = arith.constant 0.000000e+00 : f32
    %84 = vector.broadcast %cst_33 : f32 to vector<98x128xf32>
    %85 = arith.maximumf %83, %84 : vector<98x128xf32>
    %86 = arith.maximumf %79, %85 : vector<98x128xf32>
    %87 = vector.extract_strided_slice %86 {offsets = [0, 0], sizes = [98, 32], strides = [1, 1]} : vector<98x128xf32> to vector<98x32xf32>
    %88 = arith.truncf %87 : vector<98x32xf32> to vector<98x32xbf16>
    %c0_34 = arith.constant 0 : index
    %c0_35 = arith.constant 0 : index
    %89 = vector.load %arg8[%c0_34, %c0_35] : memref<98x32xbf16, #tpu.memory_space<vmem>>, vector<98x32xbf16>
    tpu.vector_store %arg8[%c0_34, %c0_35], %88 {strides = array<i32>} : memref<98x32xbf16, #tpu.memory_space<vmem>>, vector<98x32xbf16>,
    return
  }
}

module attributes {stable_mosaic.version = 11 : i64} {
  func.func @mlp_head_kernel(%arg0: memref<2x1568xbf16, #tpu.memory_space<vmem>>, %arg1: memref<1568x128xbf16, #tpu.memory_space<vmem>>, %arg2: memref<1x128xf32, #tpu.memory_space<vmem>>, %arg3: memref<2x128xf32, #tpu.memory_space<vmem>>, %arg4: memref<128x10xbf16, #tpu.memory_space<vmem>>, %arg5: memref<1x10xf32, #tpu.memory_space<vmem>>, %arg6: memref<2x10xf32, #tpu.memory_space<vmem>>) attributes {dimension_semantics = [], scalar_prefetch = 0 : i64, scratch_operands = 0 : i64, tpu.core_type = #tpu.core_type<tc>} {
    %c0 = arith.constant 0 : index
    %c0_0 = arith.constant 0 : index
    %0 = vector.load %arg0[%c0, %c0_0] : memref<2x1568xbf16, #tpu.memory_space<vmem>>, vector<2x1568xbf16>
    %c0_1 = arith.constant 0 : index
    %c0_2 = arith.constant 0 : index
    %1 = vector.load %arg1[%c0_1, %c0_2] : memref<1568x128xbf16, #tpu.memory_space<vmem>>, vector<1568x128xbf16>
    %cst = arith.constant dense<0.000000e+00> : vector<2x128xf32>
    %2 = tpu.matmul %0, %1, %cst {dimension_numbers = #tpu.dot_dimension_numbers<[1], [0], [0], [1], [0, 0, 1, 1], [], []>} : vector<2x1568xbf16>, vector<1568x128xbf16>, vector<2x128xf32> -> vector<2x128xf32>
    %c0_3 = arith.constant 0 : index
    %c0_4 = arith.constant 0 : index
    %3 = vector.load %arg2[%c0_3, %c0_4] : memref<1x128xf32, #tpu.memory_space<vmem>>, vector<1x128xf32>
    %4 = vector.broadcast %3 : vector<1x128xf32> to vector<2x128xf32>
    %5 = arith.addf %2, %4 : vector<2x128xf32>
    %cst_5 = arith.constant 0.000000e+00 : f32
    %6 = vector.broadcast %cst_5 : f32 to vector<2x128xf32>
    %7 = arith.maximumf %5, %6 : vector<2x128xf32>
    %c0_6 = arith.constant 0 : index
    %c0_7 = arith.constant 0 : index
    %8 = vector.load %arg3[%c0_6, %c0_7] : memref<2x128xf32, #tpu.memory_space<vmem>>, vector<2x128xf32>
    %9 = arith.mulf %7, %8 : vector<2x128xf32>
    %10 = arith.truncf %9 : vector<2x128xf32> to vector<2x128xbf16>
    %c0_8 = arith.constant 0 : index
    %c0_9 = arith.constant 0 : index
    %11 = vector.load %arg4[%c0_8, %c0_9] : memref<128x10xbf16, #tpu.memory_space<vmem>>, vector<128x10xbf16>
    %cst_10 = arith.constant dense<0.000000e+00> : vector<2x10xf32>
    %12 = tpu.matmul %10, %11, %cst_10 {dimension_numbers = #tpu.dot_dimension_numbers<[1], [0], [0], [1], [0, 0, 1, 1], [], []>} : vector<2x128xbf16>, vector<128x10xbf16>, vector<2x10xf32> -> vector<2x10xf32>
    %c0_11 = arith.constant 0 : index
    %c0_12 = arith.constant 0 : index
    %13 = vector.load %arg5[%c0_11, %c0_12] : memref<1x10xf32, #tpu.memory_space<vmem>>, vector<1x10xf32>
    %14 = vector.broadcast %13 : vector<1x10xf32> to vector<2x10xf32>
    %15 = arith.addf %12, %14 : vector<2x10xf32>
    %c0_13 = arith.constant 0 : index
    %c0_14 = arith.constant 0 : index
    %16 = vector.load %arg6[%c0_13, %c0_14] : memref<2x10xf32, #tpu.memory_space<vmem>>, vector<2x10xf32>
    tpu.vector_store %arg6[%c0_13, %c0_14], %15 {strides = array<i32>} : memref<2x10xf32, #tpu.memory_space<vmem>>, vector<2x10xf32>,
    return
  }
}

</mosaic_0001>

<bundles_post_ra>
// kernel: convnet_forward.3
= control target key start
LH: loop header
LB: loop body
LE: loop exit
PB: predicated region body
PF: predicated region fallthrough
CT: control target
= control target key end

     0   :  { %vm730_vm0 = vcmask 261120   ;;  %s7866_s1 = inlined_call_operand.vmem [shape: bf16[32,128], index: 1, kind: input, shape index: {}]   ;;  %s7867_s0 = inlined_call_operand.vmem [shape: bf16[1568,32], index: 0, kind: input, shape index: {}]   ;;  %s7868_s2 = inlined_call_operand.vmem [shape: f32[1,128], index: 2, kind: input, shape index: {}]   ;;  %s7869_s3 = inlined_call_operand.vmem [shape: f32[1,128], index: 3, kind: input, shape index: {}]   ;;  %s7870_s4 = inlined_call_operand.vmem [shape: f32[1,128], index: 4, kind: input, shape index: {}]   ;;  %s7871_s5 = inlined_call_operand.vmem [shape: bf16[392,128], index: 5, kind: output, shape index: {}]  }
   0x1   :  { %v4193_v0 = vld [vmem:[%s7866_s1] sm:$0xff]   ;;  %v4194_v1 = vld [vmem:[%s7866_s1 + $0x8] sm:$0xff]   ;;  %v4197_v4 = vld [vmem:[%s7867_s0 + $0x10] sm:$0xff]  }
   0x2   :  { %3989 = vmatprep.subr.bf16.mxu0 %v4193_v0  ;;  %v4195_v2 = vld [vmem:[%s7867_s0] sm:$0xff]   ;;  %4189 = vmatprep.subr.bf16.mxu1 %v4193_v0  ;;  %v4196_v3 = vld [vmem:[%s7867_s0 + $0x8] sm:$0xff]   ;;  %v4198_v5 = vld [vmem:[%s7867_s0 + $0x18] sm:$0xff]  }
   0x3   :  { %3990 = vmatpush3.bf16.msra.mxu0 %v4193_v0  ;;  %4191 = vmatpush3.bf16.msra.mxu1 %v4193_v0  ;;  %v4199_v6 = vld [vmem:[%s7867_s0 + $0x20] sm:$0xff]   ;;  %v4200_v7 = vld [vmem:[%s7867_s0 + $0x28] sm:$0xff]   ;;  %v4201_v8 = vld [vmem:[%s7867_s0 + $0x30] sm:$0xff]  }
   0x4   :  { %3991 = vmatprep.subr.bf16.mxu0 %v4194_v1  ;;  %3993 = vmatprep.mubr.msk.bf16.mxu0 %vm730_vm0, %v4195_v2  ;;  %v4202_v9 = vld [vmem:[%s7867_s0 + $0x38] sm:$0xff]   ;;  %v4203_v10 = vld [vmem:[%s7867_s0 + $0x40] sm:$0xff]   ;;  %v4204_v11 = vld [vmem:[%s7867_s0 + $0x48] sm:$0xff]  }
   0x5   :  { %4190 = vmatprep.subr.bf16.mxu1 %v4194_v1  ;;  %v4205_v12 = vld [vmem:[%s7867_s0 + $0x50] sm:$0xff]   ;;  %v4206_v13 = vld [vmem:[%s7867_s0 + $0x58] sm:$0xff]   ;;  %v4207_v14 = vld [vmem:[%s7867_s0 + $0x60] sm:$0xff]  }
   0x6   :  { %v4208_v15 = vld [vmem:[%s7867_s0 + $0x68] sm:$0xff]   ;;  %v4209_v16 = vld [vmem:[%s7867_s0 + $0x70] sm:$0xff]   ;;  %v4210_v17 = vld [vmem:[%s7867_s0 + $0x78] sm:$0xff]  }
   0x7   :  { %3992 = vmatpush3.bf16.msra.mxu0 %v4194_v1  ;;  %4192 = vmatpush3.bf16.msra.mxu1 %v4194_v1  ;;  %v4211_v18 = vld [vmem:[%s7867_s0 + $0x80] sm:$0xff]   ;;  %v4212_v19 = vld [vmem:[%s7867_s0 + $0x88] sm:$0xff]   ;;  %v4213_v20 = vld [vmem:[%s7867_s0 + $0x90] sm:$0xff]  }
   0x8   :  { %v4245_v21 = vld [vmem:[%s7867_s0 + $0x190] sm:$0xff]   ;;  %v4246_v22 = vld [vmem:[%s7867_s0 + $0x198] sm:$0xff]   ;;  %v4247_v23 = vld [vmem:[%s7867_s0 + $0x1a0] sm:$0xff]  }
   0x9   :  { %v4214_v24 = vld [vmem:[%s7867_s0 + $0x98] sm:$0xff]   ;;  %4093 = vmatprep.mubr.msk.bf16.mxu1 %vm730_vm0, %v4245_v21  ;;  %v4215_v25 = vld [vmem:[%s7867_s0 + $0xa0] sm:$0xff]   ;;  %v4248_v26 = vld [vmem:[%s7867_s0 + $0x1a8] sm:$0xff]  }
   0xa   :  { %3994 = vmatmul.mubr.msk.bf16.vlgmr.msra.gmra.mrb[0].mxu0 %vm730_vm0, %v4196_v3  ;;  %4094 = vmatmul.mubr.msk.bf16.vlgmr.msra.gmra.mrb[0].mxu1 %vm730_vm0, %v4246_v22  ;;  %v4216_v27 = vld [vmem:[%s7867_s0 + $0xa8] sm:$0xff]   ;;  %v4217_v28 = vld [vmem:[%s7867_s0 + $0xb0] sm:$0xff]   ;;  %v4250_v30 = vld [vmem:[%s7867_s0 + $0x1b8] sm:$0xff]  }
   0xb   :  { %3997 = vmatprep.mubr.msk.bf16.mxu0 %vm730_vm0, %v4197_v4  ;;  %4097 = vmatprep.mubr.msk.bf16.mxu1 %vm730_vm0, %v4247_v23  ;;  %v4249_v29 = vld [vmem:[%s7867_s0 + $0x1b0] sm:$0xff]   ;;  %v4218_v31 = vld [vmem:[%s7867_s0 + $0xb8] sm:$0xff]   ;;  %v4219_v32 = vld [vmem:[%s7867_s0 + $0xc0] sm:$0xff]  }
   0xc   :  { %v4251_v33 = vld [vmem:[%s7867_s0 + $0x1c0] sm:$0xff]   ;;  %v4252_v34 = vld [vmem:[%s7867_s0 + $0x1c8] sm:$0xff]   ;;  %v4221_v36 = vld [vmem:[%s7867_s0 + $0xd0] sm:$0xff]  }
   0xd   :  { %v4220_v35 = vld [vmem:[%s7867_s0 + $0xc8] sm:$0xff]   ;;  %v4253_v37 = vld [vmem:[%s7867_s0 + $0x1d0] sm:$0xff]   ;;  %v4254_v38 = vld [vmem:[%s7867_s0 + $0x1d8] sm:$0xff]  }
   0xe   :  { %v4222_v39 = vld [vmem:[%s7867_s0 + $0xd8] sm:$0xff]   ;;  %v4223_v40 = vld [vmem:[%s7867_s0 + $0xe0] sm:$0xff]   ;;  %v4256_v42 = vld [vmem:[%s7867_s0 + $0x1e8] sm:$0xff]  }
   0xf   :  { %v4255_v41 = vld [vmem:[%s7867_s0 + $0x1e0] sm:$0xff]   ;;  %v4224_v43 = vld [vmem:[%s7867_s0 + $0xe8] sm:$0xff]   ;;  %v4225_v44 = vld [vmem:[%s7867_s0 + $0xf0] sm:$0xff]  }
  0x10   :  { %v4257_v45 = vld [vmem:[%s7867_s0 + $0x1f0] sm:$0xff]   ;;  %v4258_v46 = vld [vmem:[%s7867_s0 + $0x1f8] sm:$0xff]   ;;  %v4227_v48 = vld [vmem:[%s7867_s0 + $0x100] sm:$0xff]  }
  0x11   :  { %v4226_v47 = vld [vmem:[%s7867_s0 + $0xf8] sm:$0xff]   ;;  %v4259_v49 = vld [vmem:[%s7867_s0 + $0x200] sm:$0xff]   ;;  %v4260_v50 = vld [vmem:[%s7867_s0 + $0x208] sm:$0xff]  }
  0x12   :  { %3998 = vmatmul.mubr.msk.bf16.gmra.mrb[4].mxu0 %vm730_vm0, %v4198_v5  ;;  %4098 = vmatmul.mubr.msk.bf16.gmra.mrb[4].mxu1 %vm730_vm0, %v4248_v26  ;;  %v4228_v51 = vld [vmem:[%s7867_s0 + $0x108] sm:$0xff]   ;;  %v4229_v52 = vld [vmem:[%s7867_s0 + $0x110] sm:$0xff]   ;;  %v4262_v54 = vld [vmem:[%s7867_s0 + $0x218] sm:$0xff]  }
  0x13   :  { %4001 = vmatprep.mubr.msk.bf16.mxu0 %vm730_vm0, %v4199_v6  ;;  %4101 = vmatprep.mubr.msk.bf16.mxu1 %vm730_vm0, %v4249_v29  ;;  %v4261_v53 = vld [vmem:[%s7867_s0 + $0x210] sm:$0xff]   ;;  %v4230_v55 = vld [vmem:[%s7867_s0 + $0x118] sm:$0xff]   ;;  %v4231_v56 = vld [vmem:[%s7867_s0 + $0x120] sm:$0xff]  }
  0x14   :  { %v4263_v57 = vld [vmem:[%s7867_s0 + $0x220] sm:$0xff]   ;;  %v4264_v58 = vld [vmem:[%s7867_s0 + $0x228] sm:$0xff]   ;;  %v4233_v60 = vld [vmem:[%s7867_s0 + $0x130] sm:$0xff]  }
  0x15   :  { %v4232_v59 = vld [vmem:[%s7867_s0 + $0x128] sm:$0xff]   ;;  %v4265_v61 = vld [vmem:[%s7867_s0 + $0x230] sm:$0xff]   ;;  %v4266_v62 = vld [vmem:[%s7867_s0 + $0x238] sm:$0xff]  }
  0x16   :  { %v4234_v63 = vld [vmem:[%s7867_s0 + $0x138] sm:$0xff]   ;;  %v4235_v0 = vld [vmem:[%s7867_s0 + $0x140] sm:$0xff]   ;;  %v4268_v2 = vld [vmem:[%s7867_s0 + $0x248] sm:$0xff]  }
  0x17   :  { %v4267_v1 = vld [vmem:[%s7867_s0 + $0x240] sm:$0xff]   ;;  %v4236_v3 = vld [vmem:[%s7867_s0 + $0x148] sm:$0xff]   ;;  %v4237_v4 = vld [vmem:[%s7867_s0 + $0x150] sm:$0xff]  }
  0x18   :  { %v4269_v5 = vld [vmem:[%s7867_s0 + $0x250] sm:$0xff]   ;;  %v4270_v6 = vld [vmem:[%s7867_s0 + $0x258] sm:$0xff]   ;;  %v4279_v22 = vld [vmem:[%s7867_s0 + $0x2a0] sm:$0xff]  }
  0x19   :  { %v4278_v21 = vld [vmem:[%s7867_s0 + $0x298] sm:$0xff]   ;;  %v4280_v23 = vld [vmem:[%s7867_s0 + $0x2a8] sm:$0xff]  }
  0x1a   :  { %4002 = vmatmul.mubr.msk.bf16.gmra.mrb[8].mxu0 %vm730_vm0, %v4200_v7  ;;  %4102 = vmatmul.mubr.msk.bf16.gmra.mrb[8].mxu1 %vm730_vm0, %v4250_v30  ;;  %v4238_v7 = vld [vmem:[%s7867_s0 + $0x158] sm:$0xff]  }
  0x1b   :  { %4005 = vmatprep.mubr.msk.bf16.mxu0 %vm730_vm0, %v4201_v8  ;;  %4105 = vmatprep.mubr.msk.bf16.mxu1 %vm730_vm0, %v4251_v33  ;;  %v4239_v8 = vld [vmem:[%s7867_s0 + $0x160] sm:$0xff]  }
  0x22   :  { %4006 = vmatmul.mubr.msk.bf16.gmra.mrb[12].mxu0 %vm730_vm0, %v4202_v9  ;;  %4106 = vmatmul.mubr.msk.bf16.gmra.mrb[12].mxu1 %vm730_vm0, %v4252_v34  ;;  %v4271_v9 = vld [vmem:[%s7867_s0 + $0x260] sm:$0xff]  }
  0x23   :  { %4009 = vmatprep.mubr.msk.bf16.mxu0 %vm730_vm0, %v4203_v10  ;;  %4109 = vmatprep.mubr.msk.bf16.mxu1 %vm730_vm0, %v4253_v37  ;;  %v4272_v10 = vld [vmem:[%s7867_s0 + $0x268] sm:$0xff]  }
  0x2a   :  { %4010 = vmatmul.mubr.msk.bf16.gmra.mrb[16].mxu0 %vm730_vm0, %v4204_v11  ;;  %4110 = vmatmul.mubr.msk.bf16.gmra.mrb[16].mxu1 %vm730_vm0, %v4254_v38  ;;  %v4240_v11 = vld [vmem:[%s7867_s0 + $0x168] sm:$0xff]   ;;  %v4283_v38 = vld [vmem:[%s7867_s0 + $0x2c0] sm:$0xff]  }
  0x2b   :  { %4013 = vmatprep.mubr.msk.bf16.mxu0 %vm730_vm0, %v4205_v12  ;;  %4113 = vmatprep.mubr.msk.bf16.mxu1 %vm730_vm0, %v4255_v41  ;;  %v4241_v12 = vld [vmem:[%s7867_s0 + $0x170] sm:$0xff]  }
  0x32   :  { %4014 = vmatmul.mubr.msk.bf16.gmra.mrb[20].mxu0 %vm730_vm0, %v4206_v13  ;;  %4114 = vmatmul.mubr.msk.bf16.gmra.mrb[20].mxu1 %vm730_vm0, %v4256_v42  ;;  %v4273_v13 = vld [vmem:[%s7867_s0 + $0x270] sm:$0xff]  }
  0x33   :  { %4017 = vmatprep.mubr.msk.bf16.mxu0 %vm730_vm0, %v4207_v14  ;;  %4117 = vmatprep.mubr.msk.bf16.mxu1 %vm730_vm0, %v4257_v45  ;;  %v4274_v14 = vld [vmem:[%s7867_s0 + $0x278] sm:$0xff]  }
  0x3a   :  { %4018 = vmatmul.mubr.msk.bf16.gmra.mrb[24].mxu0 %vm730_vm0, %v4208_v15  ;;  %4118 = vmatmul.mubr.msk.bf16.gmra.mrb[24].mxu1 %vm730_vm0, %v4258_v46  ;;  %v4242_v15 = vld [vmem:[%s7867_s0 + $0x178] sm:$0xff]  }
  0x3b   :  { %4021 = vmatprep.mubr.msk.bf16.mxu0 %vm730_vm0, %v4209_v16  ;;  %4121 = vmatprep.mubr.msk.bf16.mxu1 %vm730_vm0, %v4259_v49  ;;  %v4243_v16 = vld [vmem:[%s7867_s0 + $0x180] sm:$0xff]  }
  0x42   :  { %4022 = vmatmul.mubr.msk.bf16.gmra.mrb[28].mxu0 %vm730_vm0, %v4210_v17  ;;  %4122 = vmatmul.mubr.msk.bf16.gmra.mrb[28].mxu1 %vm730_vm0, %v4260_v50  ;;  %v4275_v17 = vld [vmem:[%s7867_s0 + $0x280] sm:$0xff]  }
  0x43   :  { %4025 = vmatprep.mubr.msk.bf16.mxu0 %vm730_vm0, %v4211_v18  ;;  %4125 = vmatprep.mubr.msk.bf16.mxu1 %vm730_vm0, %v4261_v53  ;;  %v4276_v18 = vld [vmem:[%s7867_s0 + $0x288] sm:$0xff]  }
  0x4a   :  { %4026 = vmatmul.mubr.msk.bf16.gmra.mrb[32].mxu0 %vm730_vm0, %v4212_v19  ;;  %4126 = vmatmul.mubr.msk.bf16.gmra.mrb[32].mxu1 %vm730_vm0, %v4262_v54  ;;  %v4244_v19 = vld [vmem:[%s7867_s0 + $0x188] sm:$0xff]  }
  0x4b   :  { %4029 = vmatprep.mubr.msk.bf16.mxu0 %vm730_vm0, %v4213_v20  ;;  %4129 = vmatprep.mubr.msk.bf16.mxu1 %vm730_vm0, %v4263_v57  ;;  %v4277_v20 = vld [vmem:[%s7867_s0 + $0x290] sm:$0xff]  }
  0x52   :  { %4030 = vmatmul.mubr.msk.bf16.gmra.mrb[36].mxu0 %vm730_vm0, %v4214_v24  ;;  %4130 = vmatmul.mubr.msk.bf16.gmra.mrb[36].mxu1 %vm730_vm0, %v4264_v58  ;;  %v4679_v24 = vld [vmem:[%s7868_s2] ss:$0 sm:$0xff] }
  0x53   :  { %4033 = vmatprep.mubr.msk.bf16.mxu0 %vm730_vm0, %v4215_v25  ;;  %4133 = vmatprep.mubr.msk.bf16.mxu1 %vm730_vm0, %v4265_v61  ;;  %v4281_v25 = vld [vmem:[%s7867_s0 + $0x2b0] sm:$0xff]  }
  0x5a   :  { %4034 = vmatmul.mubr.msk.bf16.gmra.mrb[40].mxu0 %vm730_vm0, %v4216_v27  ;;  %4134 = vmatmul.mubr.msk.bf16.gmra.mrb[40].mxu1 %vm730_vm0, %v4266_v62  ;;  %v4282_v27 = vld [vmem:[%s7867_s0 + $0x2b8] sm:$0xff]  }
  0x5b   :  { %4037 = vmatprep.mubr.msk.bf16.mxu0 %vm730_vm0, %v4217_v28  ;;  %4137 = vmatprep.mubr.msk.bf16.mxu1 %vm730_vm0, %v4267_v1  ;;  %v4286_v1 = vld [vmem:[%s7867_s0 + $0x2d8] sm:$0xff]  }
  0x62   :  { %4038 = vmatmul.mubr.msk.bf16.gmra.mrb[44].mxu0 %vm730_vm0, %v4218_v31  ;;  %4138 = vmatmul.mubr.msk.bf16.gmra.mrb[44].mxu1 %vm730_vm0, %v4268_v2 }
  0x63   :  { %4041 = vmatprep.mubr.msk.bf16.mxu0 %vm730_vm0, %v4219_v32  ;;  %4141 = vmatprep.mubr.msk.bf16.mxu1 %vm730_vm0, %v4269_v5 }
  0x6a   :  { %4042 = vmatmul.mubr.msk.bf16.gmra.mrb[48].mxu0 %vm730_vm0, %v4220_v35  ;;  %4142 = vmatmul.mubr.msk.bf16.gmra.mrb[48].mxu1 %vm730_vm0, %v4270_v6 }
  0x6b   :  { %4045 = vmatprep.mubr.msk.bf16.mxu0 %vm730_vm0, %v4221_v36  ;;  %4145 = vmatprep.mubr.msk.bf16.mxu1 %vm730_vm0, %v4271_v9 }
  0x72   :  { %4046 = vmatmul.mubr.msk.bf16.gmra.mrb[52].mxu0 %vm730_vm0, %v4222_v39  ;;  %4146 = vmatmul.mubr.msk.bf16.gmra.mrb[52].mxu1 %vm730_vm0, %v4272_v10 }
  0x73   :  { %4049 = vmatprep.mubr.msk.bf16.mxu0 %vm730_vm0, %v4223_v40  ;;  %4149 = vmatprep.mubr.msk.bf16.mxu1 %vm730_vm0, %v4273_v13 }
  0x7a   :  { %4050 = vmatmul.mubr.msk.bf16.gmra.mrb[56].mxu0 %vm730_vm0, %v4224_v43  ;;  %4150 = vmatmul.mubr.msk.bf16.gmra.mrb[56].mxu1 %vm730_vm0, %v4274_v14  ;;  %v4284_v43 = vld [vmem:[%s7867_s0 + $0x2c8] sm:$0xff]  }
  0x7b   :  { %4053 = vmatprep.mubr.msk.bf16.mxu0 %vm730_vm0, %v4225_v44  ;;  %4153 = vmatprep.mubr.msk.bf16.mxu1 %vm730_vm0, %v4275_v17 }
  0x82   :  { %4054 = vmatmul.mubr.msk.bf16.gmra.mrb[60].mxu0 %vm730_vm0, %v4226_v47  ;;  %4154 = vmatmul.mubr.msk.bf16.gmra.mrb[60].mxu1 %vm730_vm0, %v4276_v18  ;;  %v4287_v18 = vld [vmem:[%s7867_s0 + $0x2e0] sm:$0xff]  }
  0x83   :  { %4057 = vmatprep.mubr.msk.bf16.mxu0 %vm730_vm0, %v4227_v48  ;;  %4157 = vmatprep.mubr.msk.bf16.mxu1 %vm730_vm0, %v4277_v20 }
  0x8a   :  { %4058 = vmatmul.mubr.msk.bf16.gmra.mrb[64].mxu0 %vm730_vm0, %v4228_v51  ;;  %4158 = vmatmul.mubr.msk.bf16.gmra.mrb[64].mxu1 %vm730_vm0, %v4278_v21 }
  0x8b   :  { %4061 = vmatprep.mubr.msk.bf16.mxu0 %vm730_vm0, %v4229_v52  ;;  %4161 = vmatprep.mubr.msk.bf16.mxu1 %vm730_vm0, %v4279_v22 }
  0x92   :  { %4062 = vmatmul.mubr.msk.bf16.gmra.mrb[68].mxu0 %vm730_vm0, %v4230_v55  ;;  %4162 = vmatmul.mubr.msk.bf16.gmra.mrb[68].mxu1 %vm730_vm0, %v4280_v23  ;;  %v4288_v23 = vld [vmem:[%s7867_s0 + $0x2e8] sm:$0xff]  }
  0x93   :  { %4065 = vmatprep.mubr.msk.bf16.mxu0 %vm730_vm0, %v4231_v56  ;;  %4165 = vmatprep.mubr.msk.bf16.mxu1 %vm730_vm0, %v4281_v25 }
  0x9a   :  { %4066 = vmatmul.mubr.msk.bf16.gmra.mrb[72].mxu0 %vm730_vm0, %v4232_v59  ;;  %4166 = vmatmul.mubr.msk.bf16.gmra.mrb[72].mxu1 %vm730_vm0, %v4282_v27 }
  0x9b   :  { %4069 = vmatprep.mubr.msk.bf16.mxu0 %vm730_vm0, %v4233_v60  ;;  %4169 = vmatprep.mubr.msk.bf16.mxu1 %vm730_vm0, %v4283_v38  ;;  %v4285_v60 = vld [vmem:[%s7867_s0 + $0x2d0] sm:$0xff]  }
  0xa2   :  { %4070 = vmatmul.mubr.msk.bf16.gmra.mrb[76].mxu0 %vm730_vm0, %v4234_v63  ;;  %4170 = vmatmul.mubr.msk.bf16.gmra.mrb[76].mxu1 %vm730_vm0, %v4284_v43 }
  0xa3   :  { %4073 = vmatprep.mubr.msk.bf16.mxu0 %vm730_vm0, %v4235_v0  ;;  %4173 = vmatprep.mubr.msk.bf16.mxu1 %vm730_vm0, %v4285_v60 }
  0xaa   :  { %4074 = vmatmul.mubr.msk.bf16.gmra.mrb[80].mxu0 %vm730_vm0, %v4236_v3  ;;  %4174 = vmatmul.mubr.msk.bf16.gmra.mrb[80].mxu1 %vm730_vm0, %v4286_v1 }
  0xab   :  { %4077 = vmatprep.mubr.msk.bf16.mxu0 %vm730_vm0, %v4237_v4  ;;  %4177 = vmatprep.mubr.msk.bf16.mxu1 %vm730_vm0, %v4287_v18 }
  0xb2   :  { %4078 = vmatmul.mubr.msk.bf16.gmra.mrb[84].mxu0 %vm730_vm0, %v4238_v7  ;;  %4178 = vmatmul.mubr.msk.bf16.gmra.mrb[84].mxu1 %vm730_vm0, %v4288_v23 }
  0xb3   :  { %4081 = vmatprep.mubr.msk.bf16.mxu0 %vm730_vm0, %v4239_v8 }
  0xba   :  { %4082 = vmatmul.mubr.msk.bf16.gmra.mrb[88].mxu0 %vm730_vm0, %v4240_v11 }
  0xbb   :  { %4085 = vmatprep.mubr.msk.bf16.mxu0 %vm730_vm0, %v4241_v12 }
  0xc2   :  { %4086 = vmatmul.mubr.msk.bf16.gmra.mrb[92].mxu0 %vm730_vm0, %v4242_v15 }
  0xc3   :  { %4089 = vmatprep.mubr.msk.bf16.mxu0 %vm730_vm0, %v4243_v16 }
  0xca   :  { %4090 = vmatmul.mubr.msk.bf16.gmra.mrb[96].mxu0 %vm730_vm0, %v4244_v19 }
  0xdd   :  { %v3995_v26 = vpop.f32.mrb[0].mxu0 }
  0xde   :  { %v1059_v28 = vpop.f32.mrb[1].mxu0  ;;  %v4693_v32 = vadd.f32 %v3995_v26, %v4679_v24 }
  0xdf   :  { %v4689_v29 = vadd.f32 %v4679_v24, %v1059_v28  ;;  %v3996_v30 = vpop.f32.mrb[2].mxu0 }
  0xe0   :  { %v1062_v31 = vpop.f32.mrb[3].mxu0  ;;  %8120 = vst [vmem:[#allocation3_spill] sm:$0xff] %v4693_v32  ;;  %v4701_v35 = vadd.f32 %v3996_v30, %v4679_v24  ;;  %v2046_v39 = vmul.f32 %v4693_v32, %v4693_v32 }
  0xe1   :  { %8119 = vst [vmem:[#allocation2_spill] sm:$0xff] %v4689_v29  ;;  %v4696_v33 = vadd.f32 %v4679_v24, %v1062_v31  ;;  %v2044_v34 = vmul.f32 %v4689_v29, %v4689_v29 }
  0xe2   :  { %8122 = vst [vmem:[#allocation5_spill] sm:$0xff] %v4701_v35  ;;  %v2047_v45 = vmul.f32 %v4701_v35, %v4701_v35 }
  0xe3   :  { %8121 = vst [vmem:[#allocation4_spill] sm:$0xff] %v4696_v33  ;;  %v1842_v36 = vadd.f32 %v4696_v33, %v4689_v29  ;;  %v2045_v37 = vmul.f32 %v4696_v33, %v4696_v33 }
  0xe5   :  { %v1843_v40 = vadd.f32 %v1842_v36, %v4693_v32  ;;  %v2240_v41 = vadd.f32 %v2045_v37, %v2044_v34  ;;  %v3999_v42 = vpop.f32.mrb[4].mxu0 }
  0xe6   :  { %v1075_v44 = vpop.f32.mrb[5].mxu0  ;;  %v4725_v50 = vadd.f32 %v3999_v42, %v4679_v24 }
  0xe7   :  { %v1844_v46 = vadd.f32 %v1843_v40, %v4701_v35  ;;  %v2241_v47 = vadd.f32 %v2240_v41, %v2046_v39  ;;  %v4721_v48 = vadd.f32 %v4679_v24, %v1075_v44  ;;  %v4000_v49 = vpop.f32.mrb[6].mxu0 }
  0xe8   :  { %8124 = vst [vmem:[#allocation7_spill] sm:$0xff] %v4725_v50  ;;  %v1078_v51 = vpop.f32.mrb[7].mxu0  ;;  %v4734_v57 = vadd.f32 %v4000_v49, %v4679_v24  ;;  %v2050_v61 = vmul.f32 %v4725_v50, %v4725_v50 }
  0xe9   :  { %8123 = vst [vmem:[#allocation6_spill] sm:$0xff] %v4721_v48  ;;  %v2242_v52 = vadd.f32 %v2241_v47, %v2047_v45  ;;  %v1845_v53 = vadd.f32 %v1844_v46, %v4721_v48  ;;  %v2048_v54 = vmul.f32 %v4721_v48, %v4721_v48  ;;  %v4731_v55 = vadd.f32 %v4679_v24, %v1078_v51  ;;  %v4289_v45 = vld [vmem:[%s7867_s0 + $0x2f0] sm:$0xff]  }
  0xea   :  { %8126 = vst [vmem:[#allocation9_spill] sm:$0xff] %v4734_v57  ;;  %v2051_v3 = vmul.f32 %v4734_v57, %v4734_v57  ;;  %4181 = vmatprep.mubr.msk.bf16.mxu1 %vm730_vm0, %v4289_v45 }
  0xeb   :  { %8125 = vst [vmem:[#allocation8_spill] sm:$0xff] %v4731_v55  ;;  %v2243_v56 = vadd.f32 %v2242_v52, %v2048_v54  ;;  %v1846_v58 = vadd.f32 %v1845_v53, %v4731_v55  ;;  %v2049_v59 = vmul.f32 %v4731_v55, %v4731_v55  ;;  %v4290_v52 = vld [vmem:[%s7867_s0 + $0x2f8] sm:$0xff]  }
  0xec   :  { %4182 = vmatmul.mubr.msk.bf16.gmra.mrb[88].mxu1 %vm730_vm0, %v4290_v52 }
  0xed   :  { %v1847_v62 = vadd.f32 %v1846_v58, %v4725_v50  ;;  %v2244_v63 = vadd.f32 %v2243_v56, %v2049_v59  ;;  %v4003_v0 = vpop.f32.mrb[8].mxu0 }
  0xee   :  { %v1091_v2 = vpop.f32.mrb[9].mxu0  ;;  %v4757_v8 = vadd.f32 %v4003_v0, %v4679_v24 }
  0xef   :  { %v1848_v4 = vadd.f32 %v1847_v62, %v4734_v57  ;;  %v2245_v5 = vadd.f32 %v2244_v63, %v2050_v61  ;;  %v4753_v6 = vadd.f32 %v4679_v24, %v1091_v2  ;;  %v4004_v7 = vpop.f32.mrb[10].mxu0 }
  0xf0   :  { %8128 = vst [vmem:[#allocation11_spill] sm:$0xff] %v4757_v8  ;;  %v1094_v9 = vpop.f32.mrb[11].mxu0  ;;  %v4766_v15 = vadd.f32 %v4004_v7, %v4679_v24  ;;  %v2054_v19 = vmul.f32 %v4757_v8, %v4757_v8 }
  0xf1   :  { %8127 = vst [vmem:[#allocation10_spill] sm:$0xff] %v4753_v6  ;;  %v2246_v10 = vadd.f32 %v2245_v5, %v2051_v3  ;;  %v1849_v11 = vadd.f32 %v1848_v4, %v4753_v6  ;;  %v2052_v12 = vmul.f32 %v4753_v6, %v4753_v6  ;;  %v4763_v13 = vadd.f32 %v4679_v24, %v1094_v9  ;;  %v4291_v9 = vld [vmem:[%s7867_s0 + $0x300] sm:$0xff]  }
  0xf2   :  { %8130 = vst [vmem:[#allocation13_spill] sm:$0xff] %v4766_v15  ;;  %v2055_v26 = vmul.f32 %v4766_v15, %v4766_v15  ;;  %4185 = vmatprep.mubr.msk.bf16.mxu1 %vm730_vm0, %v4291_v9 }
  0xf3   :  { %8129 = vst [vmem:[#allocation12_spill] sm:$0xff] %v4763_v13  ;;  %v2247_v14 = vadd.f32 %v2246_v10, %v2052_v12  ;;  %v1850_v16 = vadd.f32 %v1849_v11, %v4763_v13  ;;  %v2053_v17 = vmul.f32 %v4763_v13, %v4763_v13 }
  0xf5   :  { %v1851_v20 = vadd.f32 %v1850_v16, %v4757_v8  ;;  %v2248_v21 = vadd.f32 %v2247_v14, %v2053_v17  ;;  %v4007_v22 = vpop.f32.mrb[12].mxu0  ;;  %v4292_v16 = vld [vmem:[%s7867_s0 + $0x308] sm:$0xff]  }
  0xf6   :  { %v1107_v25 = vpop.f32.mrb[13].mxu0  ;;  %v4789_v34 = vadd.f32 %v4007_v22, %v4679_v24  ;;  %4186 = vmatmul.mubr.msk.bf16.gmra.mrb[92].mxu1 %vm730_vm0, %v4292_v16 }
  0xf7   :  { %v1852_v27 = vadd.f32 %v1851_v20, %v4766_v15  ;;  %v2249_v28 = vadd.f32 %v2248_v21, %v2054_v19  ;;  %v4785_v30 = vadd.f32 %v4679_v24, %v1107_v25  ;;  %v4008_v31 = vpop.f32.mrb[14].mxu0 }
  0xf8   :  { %8132 = vst [vmem:[#allocation15_spill] sm:$0xff] %v4789_v34  ;;  %v1110_v36 = vpop.f32.mrb[15].mxu0  ;;  %v4798_v42 = vadd.f32 %v4008_v31, %v4679_v24  ;;  %v2058_v46 = vmul.f32 %v4789_v34, %v4789_v34 }
  0xf9   :  { %8131 = vst [vmem:[#allocation14_spill] sm:$0xff] %v4785_v30  ;;  %v2250_v37 = vadd.f32 %v2249_v28, %v2055_v26  ;;  %v1853_v38 = vadd.f32 %v1852_v27, %v4785_v30  ;;  %v2056_v39 = vmul.f32 %v4785_v30, %v4785_v30  ;;  %v4795_v40 = vadd.f32 %v4679_v24, %v1110_v36 }
  0xfa   :  { %8134 = vst [vmem:[#allocation17_spill] sm:$0xff] %v4798_v42  ;;  %v2059_v54 = vmul.f32 %v4798_v42, %v4798_v42 }
  0xfb   :  { %8133 = vst [vmem:[#allocation16_spill] sm:$0xff] %v4795_v40  ;;  %v2251_v41 = vadd.f32 %v2250_v37, %v2056_v39  ;;  %v1854_v43 = vadd.f32 %v1853_v38, %v4795_v40  ;;  %v2057_v44 = vmul.f32 %v4795_v40, %v4795_v40 }
  0xfd   :  { %v1855_v47 = vadd.f32 %v1854_v43, %v4789_v34  ;;  %v2252_v49 = vadd.f32 %v2251_v41, %v2057_v44  ;;  %v4011_v51 = vpop.f32.mrb[16].mxu0 }
  0xfe   :  { %v1123_v53 = vpop.f32.mrb[17].mxu0  ;;  %v4821_v61 = vadd.f32 %v4011_v51, %v4679_v24 }
  0xff   :  { %v1856_v56 = vadd.f32 %v1855_v47, %v4798_v42  ;;  %v2253_v58 = vadd.f32 %v2252_v49, %v2058_v46  ;;  %v4817_v59 = vadd.f32 %v4679_v24, %v1123_v53  ;;  %v4012_v60 = vpop.f32.mrb[18].mxu0 }
 0x100   :  { %8136 = vst [vmem:[#allocation19_spill] sm:$0xff] %v4821_v61  ;;  %v1126_v62 = vpop.f32.mrb[19].mxu0  ;;  %v4830_v4 = vadd.f32 %v4012_v60, %v4679_v24  ;;  %v2062_v10 = vmul.f32 %v4821_v61, %v4821_v61 }
 0x101   :  { %8135 = vst [vmem:[#allocation18_spill] sm:$0xff] %v4817_v59  ;;  %v2254_v63 = vadd.f32 %v2253_v58, %v2059_v54  ;;  %v1857_v0 = vadd.f32 %v1856_v56, %v4817_v59  ;;  %v2060_v1 = vmul.f32 %v4817_v59, %v4817_v59  ;;  %v4827_v2 = vadd.f32 %v4679_v24, %v1126_v62 }
 0x102   :  { %8138 = vst [vmem:[#allocation21_spill] sm:$0xff] %v4830_v4  ;;  %v2063_v18 = vmul.f32 %v4830_v4, %v4830_v4 }
 0x103   :  { %8137 = vst [vmem:[#allocation20_spill] sm:$0xff] %v4827_v2  ;;  %v2255_v3 = vadd.f32 %v2254_v63, %v2060_v1  ;;  %v1858_v5 = vadd.f32 %v1857_v0, %v4827_v2  ;;  %v2061_v7 = vmul.f32 %v4827_v2, %v4827_v2 }
 0x105   :  { %v1859_v11 = vadd.f32 %v1858_v5, %v4821_v61  ;;  %v2256_v12 = vadd.f32 %v2255_v3, %v2061_v7  ;;  %v4015_v14 = vpop.f32.mrb[20].mxu0 }
 0x106   :  { %v1139_v17 = vpop.f32.mrb[21].mxu0  ;;  %v4853_v23 = vadd.f32 %v4015_v14, %v4679_v24 }
 0x107   :  { %v1860_v19 = vadd.f32 %v1859_v11, %v4830_v4  ;;  %v2257_v20 = vadd.f32 %v2256_v12, %v2062_v10  ;;  %v4849_v21 = vadd.f32 %v4679_v24, %v1139_v17  ;;  %v4016_v22 = vpop.f32.mrb[22].mxu0 }
 0x108   :  { %8140 = vst [vmem:[#allocation23_spill] sm:$0xff] %v4853_v23  ;;  %v1142_v25 = vpop.f32.mrb[23].mxu0  ;;  %v4862_v37 = vadd.f32 %v4016_v22, %v4679_v24  ;;  %v2066_v41 = vmul.f32 %v4853_v23, %v4853_v23 }
 0x109   :  { %8139 = vst [vmem:[#allocation22_spill] sm:$0xff] %v4849_v21  ;;  %v2258_v26 = vadd.f32 %v2257_v20, %v2063_v18  ;;  %v1861_v27 = vadd.f32 %v1860_v19, %v4849_v21  ;;  %v2064_v28 = vmul.f32 %v4849_v21, %v4849_v21  ;;  %v4859_v31 = vadd.f32 %v4679_v24, %v1142_v25 }
 0x10a   :  { %8142 = vst [vmem:[#allocation25_spill] sm:$0xff] %v4862_v37  ;;  %v2067_v47 = vmul.f32 %v4862_v37, %v4862_v37 }
 0x10b   :  { %8141 = vst [vmem:[#allocation24_spill] sm:$0xff] %v4859_v31  ;;  %v2259_v36 = vadd.f32 %v2258_v26, %v2064_v28  ;;  %v1862_v38 = vadd.f32 %v1861_v27, %v4859_v31  ;;  %v2065_v39 = vmul.f32 %v4859_v31, %v4859_v31 }
 0x10d   :  { %v1863_v43 = vadd.f32 %v1862_v38, %v4853_v23  ;;  %v2260_v44 = vadd.f32 %v2259_v36, %v2065_v39  ;;  %v4019_v45 = vpop.f32.mrb[24].mxu0 }
 0x10e   :  { %v1155_v46 = vpop.f32.mrb[25].mxu0  ;;  %v4877_v54 = vadd.f32 %v4019_v45, %v4679_v24 }
 0x10f   :  { %v1864_v49 = vadd.f32 %v1863_v43, %v4862_v37  ;;  %v2261_v51 = vadd.f32 %v2260_v44, %v2066_v41  ;;  %v4874_v52 = vadd.f32 %v4679_v24, %v1155_v46  ;;  %v4020_v53 = vpop.f32.mrb[26].mxu0 }
 0x110   :  { %8144 = vst [vmem:[#allocation27_spill] sm:$0xff] %v4877_v54  ;;  %v1158_v56 = vpop.f32.mrb[27].mxu0  ;;  %v4886_v1 = vadd.f32 %v4020_v53, %v4679_v24  ;;  %v2070_v7 = vmul.f32 %v4877_v54, %v4877_v54 }
 0x111   :  { %8143 = vst [vmem:[#allocation26_spill] sm:$0xff] %v4874_v52  ;;  %v2262_v58 = vadd.f32 %v2261_v51, %v2067_v47  ;;  %v1865_v60 = vadd.f32 %v1864_v49, %v4874_v52  ;;  %v2068_v62 = vmul.f32 %v4874_v52, %v4874_v52  ;;  %v4883_v63 = vadd.f32 %v4679_v24, %v1158_v56 }
 0x112   :  { %8146 = vst [vmem:[#allocation29_spill] sm:$0xff] %v4886_v1  ;;  %v2071_v14 = vmul.f32 %v4886_v1, %v4886_v1 }
 0x113   :  { %8145 = vst [vmem:[#allocation28_spill] sm:$0xff] %v4883_v63  ;;  %v2263_v0 = vadd.f32 %v2262_v58, %v2068_v62  ;;  %v1866_v3 = vadd.f32 %v1865_v60, %v4883_v63  ;;  %v2069_v5 = vmul.f32 %v4883_v63, %v4883_v63 }
 0x115   :  { %v1867_v9 = vadd.f32 %v1866_v3, %v4877_v54  ;;  %v2264_v10 = vadd.f32 %v2263_v0, %v2069_v5  ;;  %v4023_v11 = vpop.f32.mrb[28].mxu0 }
 0x116   :  { %v1171_v12 = vpop.f32.mrb[29].mxu0  ;;  %v4901_v20 = vadd.f32 %v4023_v11, %v4679_v24 }
 0x117   :  { %v1868_v16 = vadd.f32 %v1867_v9, %v4886_v1  ;;  %v2265_v17 = vadd.f32 %v2264_v10, %v2070_v7  ;;  %v4898_v18 = vadd.f32 %v4679_v24, %v1171_v12  ;;  %v4024_v19 = vpop.f32.mrb[30].mxu0  ;;  %v4933_v9 = vpop.f32.mrb[0].mxu1 }
 0x118   :  { %8148 = vst [vmem:[#allocation31_spill] sm:$0xff] %v4901_v20  ;;  %v1174_v22 = vpop.f32.mrb[31].mxu0  ;;  %v4910_v38 = vadd.f32 %v4024_v19, %v4679_v24  ;;  %v2074_v43 = vmul.f32 %v4901_v20, %v4901_v20 }
 0x119   :  { %8147 = vst [vmem:[#allocation30_spill] sm:$0xff] %v4898_v18  ;;  %v2266_v25 = vadd.f32 %v2265_v17, %v2071_v14  ;;  %v1869_v26 = vadd.f32 %v1868_v16, %v4898_v18  ;;  %v2072_v27 = vmul.f32 %v4898_v18, %v4898_v18  ;;  %v4907_v28 = vadd.f32 %v4679_v24, %v1174_v22  ;;  %v4941_v16 = vpop.f32.mrb[1].mxu1 }
 0x11a   :  { %8150 = vst [vmem:[#allocation33_spill] sm:$0xff] %v4910_v38  ;;  %v2075_v49 = vmul.f32 %v4910_v38, %v4910_v38  ;;  %v4943_v17 = vpop.f32.mrb[2].mxu1 }
 0x11b   :  { %8149 = vst [vmem:[#allocation32_spill] sm:$0xff] %v4907_v28  ;;  %v2267_v36 = vadd.f32 %v2266_v25, %v2072_v27  ;;  %v1870_v39 = vadd.f32 %v1869_v26, %v4907_v28  ;;  %v2073_v41 = vmul.f32 %v4907_v28, %v4907_v28  ;;  %v4948_v27 = vpop.f32.mrb[3].mxu1 }
 0x11d   :  { %v1871_v44 = vadd.f32 %v1870_v39, %v4901_v20  ;;  %v2268_v45 = vadd.f32 %v2267_v36, %v2073_v41  ;;  %v4027_v46 = vpop.f32.mrb[32].mxu0 }
 0x11e   :  { %v1187_v47 = vpop.f32.mrb[33].mxu0  ;;  %v4925_v60 = vadd.f32 %v4027_v46, %v4679_v24 }
 0x11f   :  { %v1872_v51 = vadd.f32 %v1871_v44, %v4910_v38  ;;  %v2269_v53 = vadd.f32 %v2268_v45, %v2074_v43  ;;  %v4922_v56 = vadd.f32 %v4679_v24, %v1187_v47  ;;  %v4028_v58 = vpop.f32.mrb[34].mxu0 }
 0x120   :  { %8152 = vst [vmem:[#allocation35_spill] sm:$0xff] %v4925_v60  ;;  %v1190_v62 = vpop.f32.mrb[35].mxu0  ;;  %v4936_v11 = vadd.f32 %v4028_v58, %v4679_v24  ;;  %v2078_v19 = vmul.f32 %v4925_v60, %v4925_v60 }
 0x121   :  { %8151 = vst [vmem:[#allocation34_spill] sm:$0xff] %v4922_v56  ;;  %v2270_v0 = vadd.f32 %v2269_v53, %v2075_v49  ;;  %v1873_v3 = vadd.f32 %v1872_v51, %v4922_v56  ;;  %v2076_v5 = vmul.f32 %v4922_v56, %v4922_v56  ;;  %v4931_v7 = vadd.f32 %v4679_v24, %v1190_v62  ;;  %v4965_v62 = vpop.f32.mrb[4].mxu1 }
 0x122   :  { %8154 = vst [vmem:[#allocation37_spill] sm:$0xff] %v4936_v11  ;;  %v2079_v39 = vmul.f32 %v4936_v11, %v4936_v11 }
 0x123   :  { %8153 = vst [vmem:[#allocation36_spill] sm:$0xff] %v4931_v7  ;;  %v2271_v10 = vadd.f32 %v2270_v0, %v2076_v5  ;;  %v1874_v12 = vadd.f32 %v1873_v3, %v4931_v7  ;;  %v2077_v14 = vmul.f32 %v4931_v7, %v4931_v7 }
 0x125   :  { %v1875_v22 = vadd.f32 %v1874_v12, %v4925_v60  ;;  %v2272_v25 = vadd.f32 %v2271_v10, %v2077_v14  ;;  %v4031_v26 = vpop.f32.mrb[36].mxu0  ;;  %v4973_v12 = vpop.f32.mrb[5].mxu1 }
 0x126   :  { %v1203_v36 = vpop.f32.mrb[37].mxu0  ;;  %v4957_v46 = vadd.f32 %v4031_v26, %v4679_v24  ;;  %v4975_v14 = vpop.f32.mrb[6].mxu1 }
 0x127   :  { %v1876_v41 = vadd.f32 %v1875_v22, %v4936_v11  ;;  %v2273_v43 = vadd.f32 %v2272_v25, %v2078_v19  ;;  %v4954_v44 = vadd.f32 %v4679_v24, %v1203_v36  ;;  %v4032_v45 = vpop.f32.mrb[38].mxu0  ;;  %v4980_v36 = vpop.f32.mrb[7].mxu1 }
 0x128   :  { %8156 = vst [vmem:[#allocation39_spill] sm:$0xff] %v4957_v46  ;;  %v1206_v47 = vpop.f32.mrb[39].mxu0  ;;  %v4968_v3 = vadd.f32 %v4032_v45, %v4679_v24  ;;  %v2082_v19 = vmul.f32 %v4957_v46, %v4957_v46 }
 0x129   :  { %8155 = vst [vmem:[#allocation38_spill] sm:$0xff] %v4954_v44  ;;  %v2274_v49 = vadd.f32 %v2273_v43, %v2079_v39  ;;  %v1877_v51 = vadd.f32 %v1876_v41, %v4954_v44  ;;  %v2080_v53 = vmul.f32 %v4954_v44, %v4954_v44  ;;  %v4963_v58 = vadd.f32 %v4679_v24, %v1206_v47 }
 0x12a   :  { %8158 = vst [vmem:[#allocation41_spill] sm:$0xff] %v4968_v3  ;;  %v2083_v41 = vmul.f32 %v4968_v3, %v4968_v3 }
 0x12b   :  { %8157 = vst [vmem:[#allocation40_spill] sm:$0xff] %v4963_v58  ;;  %v2275_v0 = vadd.f32 %v2274_v49, %v2080_v53  ;;  %v1878_v5 = vadd.f32 %v1877_v51, %v4963_v58  ;;  %v2081_v10 = vmul.f32 %v4963_v58, %v4963_v58  ;;  %v4997_v58 = vpop.f32.mrb[8].mxu1 }
 0x12d   :  { %v1879_v22 = vadd.f32 %v1878_v5, %v4957_v46  ;;  %v2276_v25 = vadd.f32 %v2275_v0, %v2081_v10  ;;  %v4035_v26 = vpop.f32.mrb[40].mxu0 }
 0x12e   :  { %v1219_v39 = vpop.f32.mrb[41].mxu0  ;;  %v4989_v51 = vadd.f32 %v4035_v26, %v4679_v24 }
 0x12f   :  { %v1880_v43 = vadd.f32 %v1879_v22, %v4968_v3  ;;  %v2277_v45 = vadd.f32 %v2276_v25, %v2082_v19  ;;  %v4986_v47 = vadd.f32 %v4679_v24, %v1219_v39  ;;  %v4036_v49 = vpop.f32.mrb[42].mxu0  ;;  %v5005_v39 = vpop.f32.mrb[9].mxu1 }
 0x130   :  { %8160 = vst [vmem:[#allocation43_spill] sm:$0xff] %v4989_v51  ;;  %v1222_v53 = vpop.f32.mrb[43].mxu0  ;;  %v5000_v22 = vadd.f32 %v4036_v49, %v4679_v24 }
 0x131   :  { %8159 = vst [vmem:[#allocation42_spill] sm:$0xff] %v4986_v47  ;;  %v2278_v5 = vadd.f32 %v2277_v45, %v2083_v41  ;;  %v1881_v0 = vadd.f32 %v1880_v43, %v4986_v47  ;;  %v2084_v10 = vmul.f32 %v4986_v47, %v4986_v47  ;;  %v4995_v46 = vadd.f32 %v4679_v24, %v1222_v53  ;;  %v5007_v41 = vpop.f32.mrb[10].mxu1 }
 0x132   :  { %8162 = vst [vmem:[#allocation45_spill] sm:$0xff] %v5000_v22  ;;  %v2086_v43 = vmul.f32 %v4989_v51, %v4989_v51 }
 0x133   :  { %8161 = vst [vmem:[#allocation44_spill] sm:$0xff] %v4995_v46  ;;  %v2279_v19 = vadd.f32 %v2278_v5, %v2084_v10  ;;  %v1882_v25 = vadd.f32 %v1881_v0, %v4995_v46  ;;  %v2085_v26 = vmul.f32 %v4995_v46, %v4995_v46  ;;  %v5012_v5 = vpop.f32.mrb[11].mxu1  ;;  %v2087_v0 = vmul.f32 %v5000_v22, %v5000_v22 }
 0x134   :  { %v5029_v7 = vpop.f32.mrb[12].mxu1 }
 0x135   :  { %v1883_v45 = vadd.f32 %v1882_v25, %v4989_v51  ;;  %v2280_v53 = vadd.f32 %v2279_v19, %v2085_v26  ;;  %v4039_v47 = vpop.f32.mrb[44].mxu0 }
 0x136   :  { %v1235_v49 = vpop.f32.mrb[45].mxu0  ;;  %v5021_v11 = vadd.f32 %v4039_v47, %v4679_v24 }
 0x137   :  { %v1884_v10 = vadd.f32 %v1883_v45, %v5000_v22  ;;  %v2281_v46 = vadd.f32 %v2280_v53, %v2086_v43  ;;  %v5018_v3 = vadd.f32 %v4679_v24, %v1235_v49  ;;  %v4040_v44 = vpop.f32.mrb[46].mxu0 }
 0x138   :  { %8164 = vst [vmem:[#allocation47_spill] sm:$0xff] %v5021_v11  ;;  %v1238_v60 = vpop.f32.mrb[47].mxu0  ;;  %v5032_v45 = vadd.f32 %v4040_v44, %v4679_v24 }
 0x139   :  { %8163 = vst [vmem:[#allocation46_spill] sm:$0xff] %v5018_v3  ;;  %v2282_v25 = vadd.f32 %v2281_v46, %v2087_v0  ;;  %v1885_v19 = vadd.f32 %v1884_v10, %v5018_v3  ;;  %v2088_v26 = vmul.f32 %v5018_v3, %v5018_v3  ;;  %v5027_v51 = vadd.f32 %v4679_v24, %v1238_v60  ;;  %v5037_v46 = vpop.f32.mrb[13].mxu1 }
 0x13a   :  { %8166 = vst [vmem:[#allocation49_spill] sm:$0xff] %v5032_v45  ;;  %v5039_v49 = vpop.f32.mrb[14].mxu1  ;;  %v2090_v0 = vmul.f32 %v5021_v11, %v5021_v11 }
 0x13b   :  { %8165 = vst [vmem:[#allocation48_spill] sm:$0xff] %v5027_v51  ;;  %v2283_v43 = vadd.f32 %v2282_v25, %v2088_v26  ;;  %v1886_v53 = vadd.f32 %v1885_v19, %v5027_v51  ;;  %v2089_v47 = vmul.f32 %v5027_v51, %v5027_v51  ;;  %v5044_v25 = vpop.f32.mrb[15].mxu1  ;;  %v2091_v19 = vmul.f32 %v5032_v45, %v5032_v45 }
 0x13c   :  { %v5061_v28 = vpop.f32.mrb[16].mxu1 }
 0x13d   :  { %v1887_v60 = vadd.f32 %v1886_v53, %v5021_v11  ;;  %v2284_v10 = vadd.f32 %v2283_v43, %v2089_v47  ;;  %v4043_v3 = vpop.f32.mrb[48].mxu0 }
 0x13e   :  { %v1251_v44 = vpop.f32.mrb[49].mxu0  ;;  %v5053_v38 = vadd.f32 %v4043_v3, %v4679_v24 }
 0x13f   :  { %v1888_v26 = vadd.f32 %v1887_v60, %v5032_v45  ;;  %v2285_v51 = vadd.f32 %v2284_v10, %v2090_v0  ;;  %v5050_v22 = vadd.f32 %v4679_v24, %v1251_v44  ;;  %v4044_v56 = vpop.f32.mrb[50].mxu0 }
 0x140   :  { %8168 = vst [vmem:[#allocation51_spill] sm:$0xff] %v5053_v38  ;;  %v1254_v20 = vpop.f32.mrb[51].mxu0  ;;  %v5064_v60 = vadd.f32 %v4044_v56, %v4679_v24 }
 0x141   :  { %8167 = vst [vmem:[#allocation50_spill] sm:$0xff] %v5050_v22  ;;  %v2286_v53 = vadd.f32 %v2285_v51, %v2091_v19  ;;  %v1889_v43 = vadd.f32 %v1888_v26, %v5050_v22  ;;  %v2092_v47 = vmul.f32 %v5050_v22, %v5050_v22  ;;  %v5059_v11 = vadd.f32 %v4679_v24, %v1254_v20  ;;  %v5069_v51 = vpop.f32.mrb[17].mxu1 }
 0x142   :  { %8170 = vst [vmem:[#allocation53_spill] sm:$0xff] %v5064_v60  ;;  %v5071_v44 = vpop.f32.mrb[18].mxu1  ;;  %v2094_v19 = vmul.f32 %v5053_v38, %v5053_v38 }
 0x143   :  { %8169 = vst [vmem:[#allocation52_spill] sm:$0xff] %v5059_v11  ;;  %v2287_v0 = vadd.f32 %v2286_v53, %v2092_v47  ;;  %v1890_v10 = vadd.f32 %v1889_v43, %v5059_v11  ;;  %v2093_v3 = vmul.f32 %v5059_v11, %v5059_v11  ;;  %v5076_v53 = vpop.f32.mrb[19].mxu1  ;;  %v2095_v43 = vmul.f32 %v5064_v60, %v5064_v60 }
 0x144   :  { %v5093_v63 = vpop.f32.mrb[20].mxu1 }
 0x145   :  { %v1891_v20 = vadd.f32 %v1890_v10, %v5053_v38  ;;  %v2288_v26 = vadd.f32 %v2287_v0, %v2093_v3  ;;  %v4047_v22 = vpop.f32.mrb[52].mxu0 }
 0x146   :  { %v1267_v56 = vpop.f32.mrb[53].mxu0  ;;  %v5085_v1 = vadd.f32 %v4047_v22, %v4679_v24 }
 0x147   :  { %v1892_v47 = vadd.f32 %v1891_v20, %v5064_v60  ;;  %v2289_v11 = vadd.f32 %v2288_v26, %v2094_v19  ;;  %v5082_v45 = vadd.f32 %v4679_v24, %v1267_v56  ;;  %v4048_v18 = vpop.f32.mrb[54].mxu0 }
 0x148   :  { %8172 = vst [vmem:[#allocation55_spill] sm:$0xff] %v5085_v1  ;;  %v1270_v54 = vpop.f32.mrb[55].mxu0  ;;  %v5096_v20 = vadd.f32 %v4048_v18, %v4679_v24 }
 0x149   :  { %8171 = vst [vmem:[#allocation54_spill] sm:$0xff] %v5082_v45  ;;  %v2290_v10 = vadd.f32 %v2289_v11, %v2095_v43  ;;  %v1893_v0 = vadd.f32 %v1892_v47, %v5082_v45  ;;  %v2096_v3 = vmul.f32 %v5082_v45, %v5082_v45  ;;  %v5091_v38 = vadd.f32 %v4679_v24, %v1270_v54  ;;  %v5101_v11 = vpop.f32.mrb[21].mxu1 }
 0x14a   :  { %8174 = vst [vmem:[#allocation57_spill] sm:$0xff] %v5096_v20  ;;  %v5103_v56 = vpop.f32.mrb[22].mxu1  ;;  %v2098_v43 = vmul.f32 %v5085_v1, %v5085_v1 }
 0x14b   :  { %8173 = vst [vmem:[#allocation56_spill] sm:$0xff] %v5091_v38  ;;  %v2291_v19 = vadd.f32 %v2290_v10, %v2096_v3  ;;  %v1894_v26 = vadd.f32 %v1893_v0, %v5091_v38  ;;  %v2097_v22 = vmul.f32 %v5091_v38, %v5091_v38  ;;  %v5108_v10 = vpop.f32.mrb[23].mxu1  ;;  %v2099_v0 = vmul.f32 %v5096_v20, %v5096_v20 }
 0x14c   :  { %v5125_v31 = vpop.f32.mrb[24].mxu1 }
 0x14d   :  { %v1895_v54 = vadd.f32 %v1894_v26, %v5085_v1  ;;  %v2292_v47 = vadd.f32 %v2291_v19, %v2097_v22  ;;  %v4051_v45 = vpop.f32.mrb[56].mxu0 }
 0x14e   :  { %v1283_v18 = vpop.f32.mrb[57].mxu0  ;;  %v5117_v37 = vadd.f32 %v4051_v45, %v4679_v24 }
 0x14f   :  { %v1896_v3 = vadd.f32 %v1895_v54, %v5096_v20  ;;  %v2293_v38 = vadd.f32 %v2292_v47, %v2098_v43  ;;  %v5114_v60 = vadd.f32 %v4679_v24, %v1283_v18  ;;  %v4052_v52 = vpop.f32.mrb[58].mxu0 }
 0x150   :  { %8176 = vst [vmem:[#allocation59_spill] sm:$0xff] %v5117_v37  ;;  %v1286_v23 = vpop.f32.mrb[59].mxu0  ;;  %v5128_v54 = vadd.f32 %v4052_v52, %v4679_v24 }
 0x151   :  { %8175 = vst [vmem:[#allocation58_spill] sm:$0xff] %v5114_v60  ;;  %v2294_v26 = vadd.f32 %v2293_v38, %v2099_v0  ;;  %v1897_v19 = vadd.f32 %v1896_v3, %v5114_v60  ;;  %v2100_v22 = vmul.f32 %v5114_v60, %v5114_v60  ;;  %v5123_v1 = vadd.f32 %v4679_v24, %v1286_v23  ;;  %v5133_v38 = vpop.f32.mrb[25].mxu1 }
 0x152   :  { %8178 = vst [vmem:[#allocation61_spill] sm:$0xff] %v5128_v54  ;;  %v5135_v18 = vpop.f32.mrb[26].mxu1  ;;  %v2102_v0 = vmul.f32 %v5117_v37, %v5117_v37 }
 0x153   :  { %8177 = vst [vmem:[#allocation60_spill] sm:$0xff] %v5123_v1  ;;  %v2295_v43 = vadd.f32 %v2294_v26, %v2100_v22  ;;  %v1898_v47 = vadd.f32 %v1897_v19, %v5123_v1  ;;  %v2101_v45 = vmul.f32 %v5123_v1, %v5123_v1  ;;  %v5140_v26 = vpop.f32.mrb[27].mxu1  ;;  %v2103_v19 = vmul.f32 %v5128_v54, %v5128_v54 }
 0x154   :  { %v5157_v2 = vpop.f32.mrb[28].mxu1 }
 0x155   :  { %v1899_v23 = vadd.f32 %v1898_v47, %v5117_v37  ;;  %v2296_v3 = vadd.f32 %v2295_v43, %v2101_v45  ;;  %v4055_v60 = vpop.f32.mrb[60].mxu0 }
 0x156   :  { %v1299_v52 = vpop.f32.mrb[61].mxu0  ;;  %v5149_v4 = vadd.f32 %v4055_v60, %v4679_v24 }
 0x157   :  { %v1900_v22 = vadd.f32 %v1899_v23, %v5128_v54  ;;  %v2297_v1 = vadd.f32 %v2296_v3, %v2102_v0  ;;  %v5146_v20 = vadd.f32 %v4679_v24, %v1299_v52  ;;  %v4056_v21 = vpop.f32.mrb[62].mxu0 }
 0x158   :  { %8180 = vst [vmem:[#allocation63_spill] sm:$0xff] %v5149_v4  ;;  %v1302_v61 = vpop.f32.mrb[63].mxu0  ;;  %v5160_v23 = vadd.f32 %v4056_v21, %v4679_v24 }
 0x159   :  { %8179 = vst [vmem:[#allocation62_spill] sm:$0xff] %v5146_v20  ;;  %v2298_v47 = vadd.f32 %v2297_v1, %v2103_v19  ;;  %v1901_v43 = vadd.f32 %v1900_v22, %v5146_v20  ;;  %v2104_v45 = vmul.f32 %v5146_v20, %v5146_v20  ;;  %v5155_v37 = vadd.f32 %v4679_v24, %v1302_v61  ;;  %v5165_v1 = vpop.f32.mrb[29].mxu1 }
 0x15a   :  { %8182 = vst [vmem:[#allocation65_spill] sm:$0xff] %v5160_v23  ;;  %v5167_v52 = vpop.f32.mrb[30].mxu1  ;;  %v2106_v19 = vmul.f32 %v5149_v4, %v5149_v4 }
 0x15b   :  { %8181 = vst [vmem:[#allocation64_spill] sm:$0xff] %v5155_v37  ;;  %v2299_v0 = vadd.f32 %v2298_v47, %v2104_v45  ;;  %v1902_v3 = vadd.f32 %v1901_v43, %v5155_v37  ;;  %v2105_v60 = vmul.f32 %v5155_v37, %v5155_v37  ;;  %v5172_v47 = vpop.f32.mrb[31].mxu1  ;;  %v2107_v43 = vmul.f32 %v5160_v23, %v5160_v23 }
 0x15c   :  { %v5189_v40 = vpop.f32.mrb[32].mxu1 }
 0x15d   :  { %v1903_v61 = vadd.f32 %v1902_v3, %v5149_v4  ;;  %v2300_v22 = vadd.f32 %v2299_v0, %v2105_v60  ;;  %v4059_v20 = vpop.f32.mrb[64].mxu0 }
 0x15e   :  { %v1315_v21 = vpop.f32.mrb[65].mxu0  ;;  %v5181_v42 = vadd.f32 %v4059_v20, %v4679_v24 }
 0x15f   :  { %v1904_v45 = vadd.f32 %v1903_v61, %v5160_v23  ;;  %v2301_v37 = vadd.f32 %v2300_v22, %v2106_v19  ;;  %v5178_v54 = vadd.f32 %v4679_v24, %v1315_v21  ;;  %v4060_v59 = vpop.f32.mrb[66].mxu0 }
 0x160   :  { %8184 = vst [vmem:[#allocation67_spill] sm:$0xff] %v5181_v42  ;;  %v1318_v34 = vpop.f32.mrb[67].mxu0  ;;  %v5192_v61 = vadd.f32 %v4060_v59, %v4679_v24 }
 0x161   :  { %8183 = vst [vmem:[#allocation66_spill] sm:$0xff] %v5178_v54  ;;  %v2302_v3 = vadd.f32 %v2301_v37, %v2107_v43  ;;  %v1905_v0 = vadd.f32 %v1904_v45, %v5178_v54  ;;  %v2108_v60 = vmul.f32 %v5178_v54, %v5178_v54  ;;  %v5187_v4 = vadd.f32 %v4679_v24, %v1318_v34  ;;  %v5197_v37 = vpop.f32.mrb[33].mxu1 }
 0x162   :  { %8186 = vst [vmem:[#allocation69_spill] sm:$0xff] %v5192_v61  ;;  %v5199_v21 = vpop.f32.mrb[34].mxu1  ;;  %v2110_v43 = vmul.f32 %v5181_v42, %v5181_v42 }
 0x163   :  { %8185 = vst [vmem:[#allocation68_spill] sm:$0xff] %v5187_v4  ;;  %v2303_v19 = vadd.f32 %v2302_v3, %v2108_v60  ;;  %v1906_v22 = vadd.f32 %v1905_v0, %v5187_v4  ;;  %v2109_v20 = vmul.f32 %v5187_v4, %v5187_v4  ;;  %v5204_v3 = vpop.f32.mrb[35].mxu1  ;;  %v2111_v0 = vmul.f32 %v5192_v61, %v5192_v61 }
 0x164   :  { %v5221_v13 = vpop.f32.mrb[36].mxu1 }
 0x165   :  { %v1907_v34 = vadd.f32 %v1906_v22, %v5181_v42  ;;  %v2304_v45 = vadd.f32 %v2303_v19, %v2109_v20  ;;  %v4063_v54 = vpop.f32.mrb[68].mxu0 }
 0x166   :  { %v1331_v59 = vpop.f32.mrb[69].mxu0  ;;  %v5213_v15 = vadd.f32 %v4063_v54, %v4679_v24 }
 0x167   :  { %v1908_v60 = vadd.f32 %v1907_v34, %v5192_v61  ;;  %v2305_v4 = vadd.f32 %v2304_v45, %v2110_v43  ;;  %v5210_v23 = vadd.f32 %v4679_v24, %v1331_v59  ;;  %v4064_v30 = vpop.f32.mrb[70].mxu0 }
 0x168   :  { %8188 = vst [vmem:[#allocation71_spill] sm:$0xff] %v5213_v15  ;;  %v1334_v8 = vpop.f32.mrb[71].mxu0  ;;  %v5224_v34 = vadd.f32 %v4064_v30, %v4679_v24 }
 0x169   :  { %8187 = vst [vmem:[#allocation70_spill] sm:$0xff] %v5210_v23  ;;  %v2306_v22 = vadd.f32 %v2305_v4, %v2111_v0  ;;  %v1909_v19 = vadd.f32 %v1908_v60, %v5210_v23  ;;  %v2112_v20 = vmul.f32 %v5210_v23, %v5210_v23  ;;  %v5219_v42 = vadd.f32 %v4679_v24, %v1334_v8  ;;  %v5229_v4 = vpop.f32.mrb[37].mxu1 }
 0x16a   :  { %8190 = vst [vmem:[#allocation73_spill] sm:$0xff] %v5224_v34  ;;  %v5231_v59 = vpop.f32.mrb[38].mxu1  ;;  %v2114_v0 = vmul.f32 %v5213_v15, %v5213_v15 }
 0x16b   :  { %8189 = vst [vmem:[#allocation72_spill] sm:$0xff] %v5219_v42  ;;  %v2307_v43 = vadd.f32 %v2306_v22, %v2112_v20  ;;  %v1910_v45 = vadd.f32 %v1909_v19, %v5219_v42  ;;  %v2113_v54 = vmul.f32 %v5219_v42, %v5219_v42  ;;  %v5236_v22 = vpop.f32.mrb[39].mxu1  ;;  %v2115_v19 = vmul.f32 %v5224_v34, %v5224_v34 }
 0x16c   :  { %v5253_v55 = vpop.f32.mrb[40].mxu1 }
 0x16d   :  { %v1911_v8 = vadd.f32 %v1910_v45, %v5213_v15  ;;  %v2308_v60 = vadd.f32 %v2307_v43, %v2113_v54  ;;  %v4067_v23 = vpop.f32.mrb[72].mxu0 }
 0x16e   :  { %v1347_v30 = vpop.f32.mrb[73].mxu0  ;;  %v5245_v57 = vadd.f32 %v4067_v23, %v4679_v24 }
 0x16f   :  { %v1912_v20 = vadd.f32 %v1911_v8, %v5224_v34  ;;  %v2309_v42 = vadd.f32 %v2308_v60, %v2114_v0  ;;  %v5242_v61 = vadd.f32 %v4679_v24, %v1347_v30  ;;  %v4068_v6 = vpop.f32.mrb[74].mxu0 }
 0x170   :  { %8192 = vst [vmem:[#allocation75_spill] sm:$0xff] %v5245_v57  ;;  %v1350_v50 = vpop.f32.mrb[75].mxu0  ;;  %v5256_v8 = vadd.f32 %v4068_v6, %v4679_v24 }
 0x171   :  { %8191 = vst [vmem:[#allocation74_spill] sm:$0xff] %v5242_v61  ;;  %v2310_v45 = vadd.f32 %v2309_v42, %v2115_v19  ;;  %v1913_v43 = vadd.f32 %v1912_v20, %v5242_v61  ;;  %v2116_v54 = vmul.f32 %v5242_v61, %v5242_v61  ;;  %v5251_v15 = vadd.f32 %v4679_v24, %v1350_v50  ;;  %v5261_v42 = vpop.f32.mrb[41].mxu1 }
 0x172   :  { %8194 = vst [vmem:[#allocation77_spill] sm:$0xff] %v5256_v8  ;;  %v5263_v30 = vpop.f32.mrb[42].mxu1  ;;  %v2118_v19 = vmul.f32 %v5245_v57, %v5245_v57 }
 0x173   :  { %8193 = vst [vmem:[#allocation76_spill] sm:$0xff] %v5251_v15  ;;  %v2311_v0 = vadd.f32 %v2310_v45, %v2116_v54  ;;  %v1914_v60 = vadd.f32 %v1913_v43, %v5251_v15  ;;  %v2117_v23 = vmul.f32 %v5251_v15, %v5251_v15  ;;  %v5268_v45 = vpop.f32.mrb[43].mxu1  ;;  %v2119_v43 = vmul.f32 %v5256_v8, %v5256_v8 }
 0x174   :  { %v5285_v33 = vpop.f32.mrb[44].mxu1 }
 0x175   :  { %v1915_v50 = vadd.f32 %v1914_v60, %v5245_v57  ;;  %v2312_v20 = vadd.f32 %v2311_v0, %v2117_v23  ;;  %v4071_v61 = vpop.f32.mrb[76].mxu0  ;;  %8198 = vst [vmem:[#allocation81_spill] sm:$0xff] %v5285_v33 }
 0x176   :  { %v1363_v6 = vpop.f32.mrb[77].mxu0  ;;  %v5277_v35 = vadd.f32 %v4071_v61, %v4679_v24 }
 0x177   :  { %v1916_v54 = vadd.f32 %v1915_v50, %v5256_v8  ;;  %v2313_v15 = vadd.f32 %v2312_v20, %v2118_v19  ;;  %v5274_v34 = vadd.f32 %v4679_v24, %v1363_v6  ;;  %v4072_v48 = vpop.f32.mrb[78].mxu0 }
 0x178   :  { %8196 = vst [vmem:[#allocation79_spill] sm:$0xff] %v5277_v35  ;;  %v1366_v32 = vpop.f32.mrb[79].mxu0  ;;  %v5288_v50 = vadd.f32 %v4072_v48, %v4679_v24 }
 0x179   :  { %8195 = vst [vmem:[#allocation78_spill] sm:$0xff] %v5274_v34  ;;  %v2314_v60 = vadd.f32 %v2313_v15, %v2119_v43  ;;  %v1917_v0 = vadd.f32 %v1916_v54, %v5274_v34  ;;  %v2120_v23 = vmul.f32 %v5274_v34, %v5274_v34  ;;  %v5283_v57 = vadd.f32 %v4679_v24, %v1366_v32  ;;  %v5293_v15 = vpop.f32.mrb[45].mxu1 }
 0x17a   :  { %8199 = vst [vmem:[#allocation82_spill] sm:$0xff] %v5288_v50  ;;  %v5295_v6 = vpop.f32.mrb[46].mxu1  ;;  %v2122_v43 = vmul.f32 %v5277_v35, %v5277_v35 }
 0x17b   :  { %8197 = vst [vmem:[#allocation80_spill] sm:$0xff] %v5283_v57  ;;  %v2315_v19 = vadd.f32 %v2314_v60, %v2120_v23  ;;  %v1918_v20 = vadd.f32 %v1917_v0, %v5283_v57  ;;  %v2121_v61 = vmul.f32 %v5283_v57, %v5283_v57  ;;  %8200 = vst [vmem:[#allocation83_spill] sm:$0xff] %v5295_v6  ;;  %v5300_v60 = vpop.f32.mrb[47].mxu1 }
 0x17c   :  { %8201 = vst [vmem:[#allocation84_spill] sm:$0xff] %v5300_v60  ;;  %v2123_v0 = vmul.f32 %v5288_v50, %v5288_v50  ;;  %v5317_v60 = vpop.f32.mrb[48].mxu1 }
 0x17d   :  { %v1919_v32 = vadd.f32 %v1918_v20, %v5277_v35  ;;  %v2316_v54 = vadd.f32 %v2315_v19, %v2121_v61  ;;  %v4075_v34 = vpop.f32.mrb[80].mxu0  ;;  %8205 = vst [vmem:[#allocation88_spill] sm:$0xff] %v5317_v60 }
 0x17e   :  { %v1379_v48 = vpop.f32.mrb[81].mxu0  ;;  %v5309_v6 = vadd.f32 %v4075_v34, %v4679_v24 }
 0x17f   :  { %v1920_v23 = vadd.f32 %v1919_v32, %v5288_v50  ;;  %v2317_v57 = vadd.f32 %v2316_v54, %v2122_v43  ;;  %v5306_v8 = vadd.f32 %v4679_v24, %v1379_v48  ;;  %v4076_v29 = vpop.f32.mrb[82].mxu0 }
 0x180   :  { %8203 = vst [vmem:[#allocation86_spill] sm:$0xff] %v5309_v6  ;;  %v1382_v33 = vpop.f32.mrb[83].mxu0  ;;  %v5320_v32 = vadd.f32 %v4076_v29, %v4679_v24 }
 0x181   :  { %8202 = vst [vmem:[#allocation85_spill] sm:$0xff] %v5306_v8  ;;  %v2318_v20 = vadd.f32 %v2317_v57, %v2123_v0  ;;  %v1921_v19 = vadd.f32 %v1920_v23, %v5306_v8  ;;  %v2124_v61 = vmul.f32 %v5306_v8, %v5306_v8  ;;  %v5315_v35 = vadd.f32 %v4679_v24, %v1382_v33  ;;  %v5325_v57 = vpop.f32.mrb[49].mxu1 }
 0x182   :  { %8206 = vst [vmem:[#allocation89_spill] sm:$0xff] %v5320_v32  ;;  %8207 = vst [vmem:[#allocation90_spill] sm:$0xff] %v5325_v57  ;;  %v5327_v48 = vpop.f32.mrb[50].mxu1  ;;  %v2126_v0 = vmul.f32 %v5309_v6, %v5309_v6 }
 0x183   :  { %8204 = vst [vmem:[#allocation87_spill] sm:$0xff] %v5315_v35  ;;  %v2319_v43 = vadd.f32 %v2318_v20, %v2124_v61  ;;  %v1922_v54 = vadd.f32 %v1921_v19, %v5315_v35  ;;  %v2125_v34 = vmul.f32 %v5315_v35, %v5315_v35  ;;  %8208 = vst [vmem:[#allocation91_spill] sm:$0xff] %v5327_v48  ;;  %v5332_v20 = vpop.f32.mrb[51].mxu1 }
 0x184   :  { %8209 = vst [vmem:[#allocation92_spill] sm:$0xff] %v5332_v20  ;;  %v2127_v19 = vmul.f32 %v5320_v32, %v5320_v32  ;;  %v5349_v20 = vpop.f32.mrb[52].mxu1 }
 0x185   :  { %v1923_v33 = vadd.f32 %v1922_v54, %v5309_v6  ;;  %v2320_v23 = vadd.f32 %v2319_v43, %v2125_v34  ;;  %v4079_v8 = vpop.f32.mrb[84].mxu0  ;;  %8213 = vst [vmem:[#allocation96_spill] sm:$0xff] %v5349_v20 }
 0x186   :  { %v1395_v29 = vpop.f32.mrb[85].mxu0  ;;  %v5341_v60 = vadd.f32 %v4079_v8, %v4679_v24 }
 0x187   :  { %v1924_v61 = vadd.f32 %v1923_v33, %v5320_v32  ;;  %v2321_v35 = vadd.f32 %v2320_v23, %v2126_v0  ;;  %v5338_v50 = vadd.f32 %v4679_v24, %v1395_v29  ;;  %v4080_v48 = vpop.f32.mrb[86].mxu0 }
 0x188   :  { %8211 = vst [vmem:[#allocation94_spill] sm:$0xff] %v5341_v60  ;;  %v1398_v57 = vpop.f32.mrb[87].mxu0  ;;  %v5352_v33 = vadd.f32 %v4080_v48, %v4679_v24 }
 0x189   :  { %8210 = vst [vmem:[#allocation93_spill] sm:$0xff] %v5338_v50  ;;  %v2322_v54 = vadd.f32 %v2321_v35, %v2127_v19  ;;  %v1925_v43 = vadd.f32 %v1924_v61, %v5338_v50  ;;  %v2128_v34 = vmul.f32 %v5338_v50, %v5338_v50  ;;  %v5347_v6 = vadd.f32 %v4679_v24, %v1398_v57  ;;  %v5357_v35 = vpop.f32.mrb[53].mxu1 }
 0x18a   :  { %8214 = vst [vmem:[#allocation97_spill] sm:$0xff] %v5352_v33  ;;  %8215 = vst [vmem:[#allocation98_spill] sm:$0xff] %v5357_v35  ;;  %v5359_v29 = vpop.f32.mrb[54].mxu1  ;;  %v2130_v19 = vmul.f32 %v5341_v60, %v5341_v60  ;;  %v2131_v48 = vmul.f32 %v5352_v33, %v5352_v33 }
 0x18b   :  { %8212 = vst [vmem:[#allocation95_spill] sm:$0xff] %v5347_v6  ;;  %v2323_v0 = vadd.f32 %v2322_v54, %v2128_v34  ;;  %v1926_v23 = vadd.f32 %v1925_v43, %v5347_v6  ;;  %v2129_v8 = vmul.f32 %v5347_v6, %v5347_v6  ;;  %8216 = vst [vmem:[#allocation99_spill] sm:$0xff] %v5359_v29  ;;  %v5364_v54 = vpop.f32.mrb[55].mxu1  ;;  %v5372_v6 = vld [vmem:[%s7868_s2] ss:$0 sm:$0xff] }
 0x18c   :  { %8217 = vst [vmem:[#allocation100_spill] sm:$0xff] %v5364_v54 }
 0x18d   :  { %v1927_v57 = vadd.f32 %v1926_v23, %v5341_v60  ;;  %v2324_v61 = vadd.f32 %v2323_v0, %v2129_v8  ;;  %v4083_v50 = vpop.f32.mrb[88].mxu0 }
 0x18e   :  { %v1411_v24 = vpop.f32.mrb[89].mxu0  ;;  %v5378_v0 = vadd.f32 %v5372_v6, %v4083_v50 }
 0x18f   :  { %v1928_v43 = vadd.f32 %v1927_v57, %v5352_v33  ;;  %v2325_v34 = vadd.f32 %v2324_v61, %v2130_v19  ;;  %v5375_v32 = vadd.f32 %v5372_v6, %v1411_v24  ;;  %v4084_v23 = vpop.f32.mrb[90].mxu0  ;;  %v5386_v61 = vpop.f32.mrb[56].mxu1 }
 0x190   :  { %8219 = vst [vmem:[#allocation102_spill] sm:$0xff] %v5378_v0  ;;  %v1414_v8 = vpop.f32.mrb[91].mxu0  ;;  %8221 = vst [vmem:[#allocation104_spill] sm:$0xff] %v5386_v61  ;;  %v5389_v24 = vadd.f32 %v5372_v6, %v4084_v23 }
 0x191   :  { %8218 = vst [vmem:[#allocation101_spill] sm:$0xff] %v5375_v32  ;;  %v2326_v60 = vadd.f32 %v2325_v34, %v2131_v48  ;;  %v1929_v29 = vadd.f32 %v1928_v43, %v5375_v32  ;;  %v2132_v57 = vmul.f32 %v5375_v32, %v5375_v32  ;;  %v5384_v19 = vadd.f32 %v5372_v6, %v1414_v8  ;;  %v5394_v48 = vpop.f32.mrb[57].mxu1 }
 0x192   :  { %8222 = vst [vmem:[#allocation105_spill] sm:$0xff] %v5389_v24  ;;  %8223 = vst [vmem:[#allocation106_spill] sm:$0xff] %v5394_v48  ;;  %v5396_v43 = vpop.f32.mrb[58].mxu1  ;;  %v2134_v34 = vmul.f32 %v5378_v0, %v5378_v0 }
 0x193   :  { %8220 = vst [vmem:[#allocation103_spill] sm:$0xff] %v5384_v19  ;;  %v2327_v33 = vadd.f32 %v2326_v60, %v2132_v57  ;;  %v1930_v20 = vadd.f32 %v1929_v29, %v5384_v19  ;;  %v2133_v50 = vmul.f32 %v5384_v19, %v5384_v19  ;;  %8224 = vst [vmem:[#allocation107_spill] sm:$0xff] %v5396_v43  ;;  %v5401_v60 = vpop.f32.mrb[59].mxu1 }
 0x194   :  { %8225 = vst [vmem:[#allocation108_spill] sm:$0xff] %v5401_v60  ;;  %v2135_v29 = vmul.f32 %v5389_v24, %v5389_v24  ;;  %v5418_v60 = vpop.f32.mrb[60].mxu1 }
 0x195   :  { %v1931_v8 = vadd.f32 %v1930_v20, %v5378_v0  ;;  %v2328_v32 = vadd.f32 %v2327_v33, %v2133_v50  ;;  %v4087_v61 = vpop.f32.mrb[92].mxu0  ;;  %8229 = vst [vmem:[#allocation112_spill] sm:$0xff] %v5418_v60 }
 0x196   :  { %v1427_v23 = vpop.f32.mrb[93].mxu0  ;;  %v5410_v54 = vadd.f32 %v5372_v6, %v4087_v61 }
 0x197   :  { %v1932_v57 = vadd.f32 %v1931_v8, %v5389_v24  ;;  %v2329_v19 = vadd.f32 %v2328_v32, %v2134_v34  ;;  %v5407_v48 = vadd.f32 %v5372_v6, %v1427_v23  ;;  %v4088_v43 = vpop.f32.mrb[94].mxu0 }
 0x198   :  { %8227 = vst [vmem:[#allocation110_spill] sm:$0xff] %v5410_v54  ;;  %v1430_v35 = vpop.f32.mrb[95].mxu0  ;;  %v5421_v34 = vadd.f32 %v5372_v6, %v4088_v43 }
 0x199   :  { %8226 = vst [vmem:[#allocation109_spill] sm:$0xff] %v5407_v48  ;;  %v2330_v20 = vadd.f32 %v2329_v19, %v2135_v29  ;;  %v1933_v33 = vadd.f32 %v1932_v57, %v5407_v48  ;;  %v2136_v50 = vmul.f32 %v5407_v48, %v5407_v48  ;;  %v5416_v0 = vadd.f32 %v5372_v6, %v1430_v35  ;;  %v5426_v19 = vpop.f32.mrb[61].mxu1 }
 0x19a   :  { %8230 = vst [vmem:[#allocation113_spill] sm:$0xff] %v5421_v34  ;;  %8231 = vst [vmem:[#allocation114_spill] sm:$0xff] %v5426_v19  ;;  %v5428_v23 = vpop.f32.mrb[62].mxu1  ;;  %v2138_v29 = vmul.f32 %v5410_v54, %v5410_v54 }
 0x19b   :  { %8228 = vst [vmem:[#allocation111_spill] sm:$0xff] %v5416_v0  ;;  %v2331_v32 = vadd.f32 %v2330_v20, %v2136_v50  ;;  %v1934_v8 = vadd.f32 %v1933_v33, %v5416_v0  ;;  %v2137_v61 = vmul.f32 %v5416_v0, %v5416_v0  ;;  %8232 = vst [vmem:[#allocation115_spill] sm:$0xff] %v5428_v23  ;;  %v5433_v20 = vpop.f32.mrb[63].mxu1 }
 0x19c   :  { %v2139_v33 = vmul.f32 %v5421_v34, %v5421_v34 }
 0x19d   :  { %v1935_v35 = vadd.f32 %v1934_v8, %v5410_v54  ;;  %v2332_v57 = vadd.f32 %v2331_v32, %v2137_v61  ;;  %v4091_v48 = vpop.f32.mrb[96].mxu0 }
 0x19e   :  { %v1443_v43 = vpop.f32.mrb[97].mxu0  ;;  %v5442_v60 = vadd.f32 %v5372_v6, %v4091_v48 }
 0x19f   :  { %v1936_v50 = vadd.f32 %v1935_v35, %v5421_v34  ;;  %v2333_v0 = vadd.f32 %v2332_v57, %v2138_v29  ;;  %v5439_v24 = vadd.f32 %v5372_v6, %v1443_v43  ;;  %v4092_v23 = vpop.f32.mrb[98].mxu0  ;;  %v5452_v29 = vadd.f32 %v5372_v6, %v4941_v16  ;;  %v5454_v35 = vpop.f32.mrb[64].mxu1 }
 0x1a0   :  { %8234 = vst [vmem:[#allocation117_spill] sm:$0xff] %v5442_v60  ;;  %v1446_v19 = vpop.f32.mrb[99].mxu0  ;;  %v5457_v48 = vadd.f32 %v5372_v6, %v4092_v23  ;;  %v5473_v23 = vadd.f32 %v5372_v6, %v4948_v27  ;;  %v5487_v27 = vadd.f32 %v5372_v6, %v4943_v17 }
 0x1a1   :  { %8233 = vst [vmem:[#allocation116_spill] sm:$0xff] %v5439_v24  ;;  %v2334_v8 = vadd.f32 %v2333_v0, %v2139_v33  ;;  %v1937_v32 = vadd.f32 %v1936_v50, %v5439_v24  ;;  %v2140_v61 = vmul.f32 %v5439_v24, %v5439_v24  ;;  %v5448_v54 = vadd.f32 %v5372_v6, %v1446_v19  ;;  %v5462_v33 = vpop.f32.mrb[65].mxu1 }
 0x1a2   :  { %8236 = vst [vmem:[#allocation119_spill] sm:$0xff] %v5452_v29  ;;  %8237 = vst [vmem:[#allocation120_spill] sm:$0xff] %v5457_v48  ;;  %v5464_v50 = vpop.f32.mrb[66].mxu1  ;;  %v2142_v19 = vmul.f32 %v5442_v60, %v5442_v60 }
 0x1a3   :  { %8235 = vst [vmem:[#allocation118_spill] sm:$0xff] %v5448_v54  ;;  %v2335_v57 = vadd.f32 %v2334_v8, %v2140_v61  ;;  %v1938_v0 = vadd.f32 %v1937_v32, %v5448_v54  ;;  %v2141_v43 = vmul.f32 %v5448_v54, %v5448_v54  ;;  %8238 = vst [vmem:[#allocation121_spill] sm:$0xff] %v5464_v50  ;;  %v5469_v34 = vpop.f32.mrb[67].mxu1 }
 0x1a4   :  { %8239 = vst [vmem:[#allocation122_spill] sm:$0xff] %v5473_v23  ;;  %v2143_v8 = vmul.f32 %v5457_v48, %v5457_v48  ;;  %v2144_v54 = vmul.f32 %v5452_v29, %v5452_v29  ;;  %8241 = vst [vmem:[#allocation124_spill] sm:$0xff] %v5487_v27 }
 0x1a5   :  { %v1939_v16 = vadd.f32 %v1938_v0, %v5442_v60  ;;  %v2336_v24 = vadd.f32 %v2335_v57, %v2141_v43  ;;  %v5482_v0 = vadd.f32 %v5372_v6, %v4933_v9  ;;  %v5489_v43 = vpop.f32.mrb[68].mxu1 }
 0x1a6   :  { %v5498_v9 = vpop.f32.mrb[69].mxu1 }
 0x1a7   :  { %v1940_v32 = vadd.f32 %v1939_v16, %v5457_v48  ;;  %v2337_v61 = vadd.f32 %v2336_v24, %v2142_v19  ;;  %8240 = vst [vmem:[#allocation123_spill] sm:$0xff] %v5482_v0  ;;  %v2145_v24 = vmul.f32 %v5473_v23, %v5473_v23  ;;  %v5496_v19 = vadd.f32 %v5372_v6, %v4973_v12 }
 0x1a8   :  { %v2146_v17 = vmul.f32 %v5482_v0, %v5482_v0 }
 0x1a9   :  { %v2338_v50 = vadd.f32 %v2337_v61, %v2143_v8  ;;  %v1941_v57 = vadd.f32 %v1940_v32, %v5452_v29  ;;  %8242 = vst [vmem:[#allocation125_spill] sm:$0xff] %v5496_v19  ;;  %v5500_v8 = vpop.f32.mrb[70].mxu1  ;;  %v2148_v12 = vmul.f32 %v5496_v19, %v5496_v19  ;;  %v5514_v29 = vadd.f32 %v5372_v6, %v4980_v36 }
 0x1ab   :  { %v2339_v60 = vadd.f32 %v2338_v50, %v2144_v54  ;;  %v1942_v16 = vadd.f32 %v1941_v57, %v5473_v23  ;;  %v5505_v54 = vpop.f32.mrb[71].mxu1  ;;  %v2147_v50 = vmul.f32 %v5487_v27, %v5487_v27  ;;  %8243 = vst [vmem:[#allocation126_spill] sm:$0xff] %v5514_v29  ;;  %v2149_v36 = vmul.f32 %v5514_v29, %v5514_v29 }
 0x1ad   :  { %v1943_v32 = vadd.f32 %v1942_v16, %v5482_v0  ;;  %v2340_v61 = vadd.f32 %v2339_v60, %v2145_v24  ;;  %v5518_v16 = vadd.f32 %v5372_v6, %v4965_v62  ;;  %v5523_v24 = vadd.f32 %v5372_v6, %v4975_v14 }
 0x1af   :  { %v1944_v57 = vadd.f32 %v1943_v32, %v5487_v27  ;;  %v2341_v23 = vadd.f32 %v2340_v61, %v2146_v17  ;;  %8244 = vst [vmem:[#allocation127_spill] sm:$0xff] %v5518_v16  ;;  %8245 = vst [vmem:[#allocation128_spill] sm:$0xff] %v5523_v24  ;;  %v5525_v32 = vpop.f32.mrb[72].mxu1  ;;  %v2150_v14 = vmul.f32 %v5518_v16, %v5518_v16 }
 0x1b0   :  { %v5534_v62 = vpop.f32.mrb[73].mxu1  ;;  %v5550_v27 = vadd.f32 %v5372_v6, %v5012_v5 }
 0x1b1   :  { %v2342_v48 = vadd.f32 %v2341_v23, %v2147_v50  ;;  %v1945_v60 = vadd.f32 %v1944_v57, %v5496_v19  ;;  %v5532_v23 = vadd.f32 %v5372_v6, %v5005_v39  ;;  %v5536_v50 = vpop.f32.mrb[74].mxu1 }
 0x1b2   :  { %8247 = vst [vmem:[#allocation130_spill] sm:$0xff] %v5550_v27  ;;  %v2153_v5 = vmul.f32 %v5550_v27, %v5550_v27 }
 0x1b3   :  { %v2343_v17 = vadd.f32 %v2342_v48, %v2148_v12  ;;  %v1946_v61 = vadd.f32 %v1945_v60, %v5514_v29  ;;  %8246 = vst [vmem:[#allocation129_spill] sm:$0xff] %v5532_v23  ;;  %v5541_v48 = vpop.f32.mrb[75].mxu1  ;;  %v2151_v12 = vmul.f32 %v5523_v24, %v5523_v24  ;;  %v2152_v39 = vmul.f32 %v5532_v23, %v5532_v23 }
 0x1b5   :  { %v1947_v57 = vadd.f32 %v1946_v61, %v5518_v16  ;;  %v2344_v19 = vadd.f32 %v2343_v17, %v2149_v36  ;;  %v5554_v61 = vadd.f32 %v5372_v6, %v4997_v58  ;;  %v5559_v36 = vadd.f32 %v5372_v6, %v5007_v41 }
 0x1b7   :  { %v1948_v60 = vadd.f32 %v1947_v57, %v5523_v24  ;;  %v2345_v29 = vadd.f32 %v2344_v19, %v2150_v14  ;;  %8248 = vst [vmem:[#allocation131_spill] sm:$0xff] %v5554_v61  ;;  %8249 = vst [vmem:[#allocation132_spill] sm:$0xff] %v5559_v36  ;;  %v5561_v57 = vpop.f32.mrb[76].mxu1  ;;  %v2154_v41 = vmul.f32 %v5554_v61, %v5554_v61 }
 0x1b8   :  { %v5570_v58 = vpop.f32.mrb[77].mxu1  ;;  %v5586_v24 = vadd.f32 %v5372_v6, %v5044_v25 }
 0x1b9   :  { %v2346_v0 = vadd.f32 %v2345_v29, %v2151_v12  ;;  %v1949_v17 = vadd.f32 %v1948_v60, %v5532_v23  ;;  %v5568_v29 = vadd.f32 %v5372_v6, %v5037_v46  ;;  %v5572_v12 = vpop.f32.mrb[78].mxu1 }
 0x1ba   :  { %8251 = vst [vmem:[#allocation134_spill] sm:$0xff] %v5586_v24  ;;  %v2157_v25 = vmul.f32 %v5586_v24, %v5586_v24 }
 0x1bb   :  { %v2347_v19 = vadd.f32 %v2346_v0, %v2152_v39  ;;  %v1950_v14 = vadd.f32 %v1949_v17, %v5550_v27  ;;  %8250 = vst [vmem:[#allocation133_spill] sm:$0xff] %v5568_v29  ;;  %v5577_v0 = vpop.f32.mrb[79].mxu1  ;;  %v2155_v39 = vmul.f32 %v5559_v36, %v5559_v36  ;;  %v2156_v46 = vmul.f32 %v5568_v29, %v5568_v29 }
 0x1bd   :  { %v1951_v60 = vadd.f32 %v1950_v14, %v5554_v61  ;;  %v2348_v23 = vadd.f32 %v2347_v19, %v2153_v5  ;;  %v5590_v14 = vadd.f32 %v5372_v6, %v5029_v7  ;;  %v5595_v5 = vadd.f32 %v5372_v6, %v5039_v49 }
 0x1bf   :  { %v1952_v17 = vadd.f32 %v1951_v60, %v5559_v36  ;;  %v2349_v27 = vadd.f32 %v2348_v23, %v2154_v41  ;;  %8252 = vst [vmem:[#allocation135_spill] sm:$0xff] %v5590_v14  ;;  %8253 = vst [vmem:[#allocation136_spill] sm:$0xff] %v5595_v5  ;;  %v5597_v60 = vpop.f32.mrb[80].mxu1  ;;  %v2158_v49 = vmul.f32 %v5590_v14, %v5590_v14 }
 0x1c0   :  { %v5606_v7 = vpop.f32.mrb[81].mxu1  ;;  %v5622_v36 = vadd.f32 %v5372_v6, %v5076_v53 }
 0x1c1   :  { %v2350_v16 = vadd.f32 %v2349_v27, %v2155_v39  ;;  %v1953_v19 = vadd.f32 %v1952_v17, %v5568_v29  ;;  %v5604_v27 = vadd.f32 %v5372_v6, %v5069_v51  ;;  %v5608_v39 = vpop.f32.mrb[82].mxu1 }
 0x1c2   :  { %8255 = vst [vmem:[#allocation138_spill] sm:$0xff] %v5622_v36  ;;  %v2161_v53 = vmul.f32 %v5622_v36, %v5622_v36 }
 0x1c3   :  { %v2351_v23 = vadd.f32 %v2350_v16, %v2156_v46  ;;  %v1954_v41 = vadd.f32 %v1953_v19, %v5586_v24  ;;  %8254 = vst [vmem:[#allocation137_spill] sm:$0xff] %v5604_v27  ;;  %v5613_v16 = vpop.f32.mrb[83].mxu1  ;;  %v2159_v46 = vmul.f32 %v5595_v5, %v5595_v5  ;;  %v2160_v51 = vmul.f32 %v5604_v27, %v5604_v27 }
 0x1c5   :  { %v1955_v17 = vadd.f32 %v1954_v41, %v5590_v14  ;;  %v2352_v29 = vadd.f32 %v2351_v23, %v2157_v25  ;;  %v5626_v41 = vadd.f32 %v5372_v6, %v5061_v28  ;;  %v5631_v25 = vadd.f32 %v5372_v6, %v5071_v44 }
 0x1c7   :  { %v1956_v19 = vadd.f32 %v1955_v17, %v5595_v5  ;;  %v2353_v24 = vadd.f32 %v2352_v29, %v2158_v49  ;;  %8256 = vst [vmem:[#allocation139_spill] sm:$0xff] %v5626_v41  ;;  %8257 = vst [vmem:[#allocation140_spill] sm:$0xff] %v5631_v25  ;;  %v5633_v17 = vpop.f32.mrb[84].mxu1  ;;  %v2162_v44 = vmul.f32 %v5626_v41, %v5626_v41 }
 0x1c8   :  { %v5642_v28 = vpop.f32.mrb[85].mxu1  ;;  %v5658_v5 = vadd.f32 %v5372_v6, %v5108_v10 }
 0x1c9   :  { %v2354_v61 = vadd.f32 %v2353_v24, %v2159_v46  ;;  %v1957_v23 = vadd.f32 %v1956_v19, %v5604_v27  ;;  %v5640_v24 = vadd.f32 %v5372_v6, %v5101_v11  ;;  %v5644_v46 = vpop.f32.mrb[86].mxu1 }
 0x1ca   :  { %8259 = vst [vmem:[#allocation142_spill] sm:$0xff] %v5658_v5  ;;  %v2165_v10 = vmul.f32 %v5658_v5, %v5658_v5 }
 0x1cb   :  { %v2355_v29 = vadd.f32 %v2354_v61, %v2160_v51  ;;  %v1958_v49 = vadd.f32 %v1957_v23, %v5622_v36  ;;  %8258 = vst [vmem:[#allocation141_spill] sm:$0xff] %v5640_v24  ;;  %v5649_v61 = vpop.f32.mrb[87].mxu1  ;;  %v2163_v51 = vmul.f32 %v5631_v25, %v5631_v25  ;;  %v2164_v11 = vmul.f32 %v5640_v24, %v5640_v24 }
 0x1cd   :  { %v1959_v19 = vadd.f32 %v1958_v49, %v5626_v41  ;;  %v2356_v27 = vadd.f32 %v2355_v29, %v2161_v53  ;;  %v5662_v49 = vadd.f32 %v5372_v6, %v5093_v63  ;;  %v5667_v53 = vadd.f32 %v5372_v6, %v5103_v56 }
 0x1cf   :  { %v1960_v23 = vadd.f32 %v1959_v19, %v5631_v25  ;;  %v2357_v36 = vadd.f32 %v2356_v27, %v2162_v44  ;;  %8260 = vst [vmem:[#allocation143_spill] sm:$0xff] %v5662_v49  ;;  %8261 = vst [vmem:[#allocation144_spill] sm:$0xff] %v5667_v53  ;;  %v5669_v19 = vpop.f32.mrb[88].mxu1  ;;  %v2166_v56 = vmul.f32 %v5662_v49, %v5662_v49 }
 0x1d0   :  { %v5678_v63 = vpop.f32.mrb[89].mxu1  ;;  %v5694_v25 = vadd.f32 %v5372_v6, %v5140_v26 }
 0x1d1   :  { %v2358_v14 = vadd.f32 %v2357_v36, %v2163_v51  ;;  %v1961_v29 = vadd.f32 %v1960_v23, %v5640_v24  ;;  %v5676_v36 = vadd.f32 %v5372_v6, %v5133_v38  ;;  %v5680_v51 = vpop.f32.mrb[90].mxu1 }
 0x1d2   :  { %8263 = vst [vmem:[#allocation146_spill] sm:$0xff] %v5694_v25  ;;  %v2169_v26 = vmul.f32 %v5694_v25, %v5694_v25 }
 0x1d3   :  { %v2359_v27 = vadd.f32 %v2358_v14, %v2164_v11  ;;  %v1962_v44 = vadd.f32 %v1961_v29, %v5658_v5  ;;  %8262 = vst [vmem:[#allocation145_spill] sm:$0xff] %v5676_v36  ;;  %v5685_v14 = vpop.f32.mrb[91].mxu1  ;;  %v2167_v11 = vmul.f32 %v5667_v53, %v5667_v53  ;;  %v2168_v38 = vmul.f32 %v5676_v36, %v5676_v36 }
 0x1d5   :  { %v1963_v23 = vadd.f32 %v1962_v44, %v5662_v49  ;;  %v2360_v24 = vadd.f32 %v2359_v27, %v2165_v10  ;;  %v5698_v44 = vadd.f32 %v5372_v6, %v5125_v31  ;;  %v5703_v10 = vadd.f32 %v5372_v6, %v5135_v18 }
 0x1d7   :  { %v1964_v29 = vadd.f32 %v1963_v23, %v5667_v53  ;;  %v2361_v5 = vadd.f32 %v2360_v24, %v2166_v56  ;;  %8264 = vst [vmem:[#allocation147_spill] sm:$0xff] %v5698_v44  ;;  %8265 = vst [vmem:[#allocation148_spill] sm:$0xff] %v5703_v10  ;;  %v5705_v23 = vpop.f32.mrb[92].mxu1  ;;  %v2170_v18 = vmul.f32 %v5698_v44, %v5698_v44 }
 0x1d8   :  { %v5714_v31 = vpop.f32.mrb[93].mxu1  ;;  %v5730_v53 = vadd.f32 %v5372_v6, %v5172_v47  ;;  %v5746_v47 = vadd.f32 %v5372_v6, %v5197_v37 }
 0x1d9   :  { %v2362_v41 = vadd.f32 %v2361_v5, %v2167_v11  ;;  %v1965_v27 = vadd.f32 %v1964_v29, %v5676_v36  ;;  %v5712_v5 = vadd.f32 %v5372_v6, %v5165_v1  ;;  %v5716_v11 = vpop.f32.mrb[94].mxu1 }
 0x1da   :  { %8267 = vst [vmem:[#allocation150_spill] sm:$0xff] %v5730_v53  ;;  %8270 = vst [vmem:[#allocation153_spill] sm:$0xff] %v5746_v47 }
 0x1db   :  { %v2363_v24 = vadd.f32 %v2362_v41, %v2168_v38  ;;  %v1966_v56 = vadd.f32 %v1965_v27, %v5694_v25  ;;  %8266 = vst [vmem:[#allocation149_spill] sm:$0xff] %v5712_v5  ;;  %v5721_v41 = vpop.f32.mrb[95].mxu1  ;;  %v2171_v38 = vmul.f32 %v5703_v10, %v5703_v10  ;;  %v2172_v1 = vmul.f32 %v5712_v5, %v5712_v5 }
 0x1dd   :  { %v1967_v29 = vadd.f32 %v1966_v56, %v5698_v44  ;;  %v2364_v36 = vadd.f32 %v2363_v24, %v2169_v26  ;;  %v5734_v56 = vadd.f32 %v5372_v6, %v5157_v2  ;;  %v5739_v26 = vadd.f32 %v5372_v6, %v5167_v52 }
 0x1df   :  { %v1968_v27 = vadd.f32 %v1967_v29, %v5703_v10  ;;  %v2365_v25 = vadd.f32 %v2364_v36, %v2170_v18  ;;  %8268 = vst [vmem:[#allocation151_spill] sm:$0xff] %v5734_v56  ;;  %8269 = vst [vmem:[#allocation152_spill] sm:$0xff] %v5739_v26  ;;  %v2173_v18 = vmul.f32 %v5730_v53, %v5730_v53  ;;  %v8409_v10 = vld [vmem:[#allocation56_spill] sm:$0xff] }
 0x1e0   :  { %v2174_v2 = vmul.f32 %v5734_v56, %v5734_v56  ;;  %v2175_v52 = vmul.f32 %v5739_v26, %v5739_v26 }
 0x1e1   :  { %v2366_v49 = vadd.f32 %v2365_v25, %v2171_v38  ;;  %v1969_v24 = vadd.f32 %v1968_v27, %v5712_v5 }
 0x1e3   :  { %v2367_v29 = vadd.f32 %v2366_v49, %v2172_v1  ;;  %v1970_v36 = vadd.f32 %v1969_v24, %v5730_v53  ;;  %v2176_v1 = vmul.f32 %v5746_v47, %v5746_v47  ;;  %v5758_v24 = vadd.f32 %v5372_v6, %v5204_v3 }
 0x1e4   :  { %v5762_v53 = vadd.f32 %v5372_v6, %v5189_v40  ;;  %v5774_v3 = vadd.f32 %v5372_v6, %v5229_v4  ;;  %v5790_v4 = vadd.f32 %v5372_v6, %v5221_v13 }
 0x1e5   :  { %v1971_v25 = vadd.f32 %v1970_v36, %v5734_v56  ;;  %v2368_v38 = vadd.f32 %v2367_v29, %v2173_v18  ;;  %8271 = vst [vmem:[#allocation154_spill] sm:$0xff] %v5758_v24  ;;  %v5767_v36 = vadd.f32 %v5372_v6, %v5199_v21  ;;  %v8405_v56 = vld [vmem:[#allocation51_spill] sm:$0xff] }
 0x1e6   :  { %8272 = vst [vmem:[#allocation155_spill] sm:$0xff] %v5762_v53  ;;  %8274 = vst [vmem:[#allocation157_spill] sm:$0xff] %v5774_v3  ;;  %v2178_v40 = vmul.f32 %v5762_v53, %v5762_v53  ;;  %v2182_v13 = vmul.f32 %v5790_v4, %v5790_v4 }
 0x1e7   :  { %v1972_v49 = vadd.f32 %v1971_v25, %v5739_v26  ;;  %v2369_v27 = vadd.f32 %v2368_v38, %v2174_v2  ;;  %8273 = vst [vmem:[#allocation156_spill] sm:$0xff] %v5767_v36  ;;  %v2177_v25 = vmul.f32 %v5758_v24, %v5758_v24  ;;  %v2179_v21 = vmul.f32 %v5767_v36, %v5767_v36 }
 0x1e8   :  { %8276 = vst [vmem:[#allocation159_spill] sm:$0xff] %v5790_v4 }
 0x1e9   :  { %v2370_v37 = vadd.f32 %v2369_v27, %v2175_v52  ;;  %v1973_v29 = vadd.f32 %v1972_v49, %v5746_v47  ;;  %v8402_v47 = vld [vmem:[#allocation50_spill] sm:$0xff] }
 0x1eb   :  { %v2371_v18 = vadd.f32 %v2370_v37, %v2176_v1  ;;  %v1974_v2 = vadd.f32 %v1973_v29, %v5758_v24  ;;  %v2180_v1 = vmul.f32 %v5774_v3, %v5774_v3  ;;  %v5786_v37 = vadd.f32 %v5372_v6, %v5236_v22  ;;  %v8401_v24 = vld [vmem:[#allocation49_spill] sm:$0xff] }
 0x1ec   :  { %v5802_v22 = vadd.f32 %v5372_v6, %v5261_v42  ;;  %v5818_v42 = vadd.f32 %v5372_v6, %v5253_v55 }
 0x1ed   :  { %v1975_v38 = vadd.f32 %v1974_v2, %v5762_v53  ;;  %v2372_v52 = vadd.f32 %v2371_v18, %v2177_v25  ;;  %8275 = vst [vmem:[#allocation158_spill] sm:$0xff] %v5786_v37  ;;  %v5795_v2 = vadd.f32 %v5372_v6, %v5231_v59  ;;  %v8400_v53 = vld [vmem:[#allocation47_spill] sm:$0xff] }
 0x1ee   :  { %8278 = vst [vmem:[#allocation161_spill] sm:$0xff] %v5802_v22  ;;  %8280 = vst [vmem:[#allocation163_spill] sm:$0xff] %v5818_v42  ;;  %v2186_v55 = vmul.f32 %v5818_v42, %v5818_v42 }
 0x1ef   :  { %v2373_v49 = vadd.f32 %v2372_v52, %v2178_v40  ;;  %v1976_v27 = vadd.f32 %v1975_v38, %v5767_v36  ;;  %8277 = vst [vmem:[#allocation160_spill] sm:$0xff] %v5795_v2  ;;  %v2181_v38 = vmul.f32 %v5786_v37, %v5786_v37  ;;  %v2183_v59 = vmul.f32 %v5795_v2, %v5795_v2  ;;  %v8399_v36 = vld [vmem:[#allocation48_spill] sm:$0xff] }
 0x1f1   :  { %v1977_v29 = vadd.f32 %v1976_v27, %v5774_v3  ;;  %v2374_v18 = vadd.f32 %v2373_v49, %v2179_v21  ;;  %v8398_v3 = vld [vmem:[#allocation46_spill] sm:$0xff] }
 0x1f3   :  { %v2375_v25 = vadd.f32 %v2374_v18, %v2180_v1  ;;  %v1978_v40 = vadd.f32 %v1977_v29, %v5786_v37  ;;  %v2184_v1 = vmul.f32 %v5802_v22, %v5802_v22  ;;  %v5814_v29 = vadd.f32 %v5372_v6, %v5268_v45  ;;  %v8397_v37 = vld [vmem:[#allocation45_spill] sm:$0xff] }
 0x1f4   :  { %v5830_v45 = vadd.f32 %v5372_v6, %v5293_v15  ;;  %v8285_v15 = vld [vmem:[#allocation81_spill] sm:$0xff] }
 0x1f5   :  { %v1979_v52 = vadd.f32 %v1978_v40, %v5790_v4  ;;  %v2376_v21 = vadd.f32 %v2375_v25, %v2181_v38  ;;  %8279 = vst [vmem:[#allocation162_spill] sm:$0xff] %v5814_v29  ;;  %v5823_v40 = vadd.f32 %v5372_v6, %v5263_v30  ;;  %v8396_v4 = vld [vmem:[#allocation43_spill] sm:$0xff] }
 0x1f6   :  { %8282 = vst [vmem:[#allocation165_spill] sm:$0xff] %v5830_v45 }
 0x1f7   :  { %v2377_v49 = vadd.f32 %v2376_v21, %v2182_v13  ;;  %v1980_v27 = vadd.f32 %v1979_v52, %v5795_v2  ;;  %8281 = vst [vmem:[#allocation164_spill] sm:$0xff] %v5823_v40  ;;  %v2185_v52 = vmul.f32 %v5814_v29, %v5814_v29  ;;  %v2187_v30 = vmul.f32 %v5823_v40, %v5823_v40  ;;  %v8395_v2 = vld [vmem:[#allocation44_spill] sm:$0xff] }
 0x1f9   :  { %v1981_v18 = vadd.f32 %v1980_v27, %v5802_v22  ;;  %v2378_v25 = vadd.f32 %v2377_v49, %v2183_v59  ;;  %v8394_v22 = vld [vmem:[#allocation42_spill] sm:$0xff] }
 0x1fb   :  { %v2379_v38 = vadd.f32 %v2378_v25, %v2184_v1  ;;  %v1982_v13 = vadd.f32 %v1981_v18, %v5814_v29  ;;  %v2188_v1 = vmul.f32 %v5830_v45, %v5830_v45  ;;  %v8283_v18 = vld [vmem:[#allocation84_spill] sm:$0xff]  ;;  %v5846_v29 = vadd.f32 %v5372_v6, %v8285_v15 }
 0x1fc   :  { %v5842_v25 = vadd.f32 %v5372_v6, %v8283_v18 }
 0x1fd   :  { %v1983_v21 = vadd.f32 %v1982_v13, %v5818_v42  ;;  %v2380_v59 = vadd.f32 %v2379_v38, %v2185_v52  ;;  %8286 = vst [vmem:[#allocation81_spill] sm:$0xff] %v5846_v29  ;;  %v8287_v52 = vld [vmem:[#allocation83_spill] sm:$0xff]  ;;  %v2190_v15 = vmul.f32 %v5846_v29, %v5846_v29 }
 0x1fe   :  { %8284 = vst [vmem:[#allocation84_spill] sm:$0xff] %v5842_v25  ;;  %v5851_v42 = vadd.f32 %v5372_v6, %v8287_v52 }
 0x1ff   :  { %v2381_v49 = vadd.f32 %v2380_v59, %v2186_v55  ;;  %v1984_v27 = vadd.f32 %v1983_v21, %v5823_v40  ;;  %v2189_v59 = vmul.f32 %v5842_v25, %v5842_v25  ;;  %v8289_v40 = vld [vmem:[#allocation90_spill] sm:$0xff] }
 0x200   :  { %8288 = vst [vmem:[#allocation83_spill] sm:$0xff] %v5851_v42  ;;  %v5858_v18 = vadd.f32 %v5372_v6, %v8289_v40  ;;  %v8293_v40 = vld [vmem:[#allocation88_spill] sm:$0xff] }
 0x201   :  { %v1985_v13 = vadd.f32 %v1984_v27, %v5830_v45  ;;  %v2382_v38 = vadd.f32 %v2381_v49, %v2187_v30  ;;  %v2191_v49 = vmul.f32 %v5851_v42, %v5851_v42  ;;  %v5874_v45 = vadd.f32 %v5372_v6, %v8293_v40 }
 0x202   :  { %8290 = vst [vmem:[#allocation90_spill] sm:$0xff] %v5858_v18 }
 0x203   :  { %v2383_v55 = vadd.f32 %v2382_v38, %v2188_v1  ;;  %v1986_v21 = vadd.f32 %v1985_v13, %v5842_v25  ;;  %v2192_v13 = vmul.f32 %v5858_v18, %v5858_v18  ;;  %v8291_v38 = vld [vmem:[#allocation92_spill] sm:$0xff]  ;;  %8294 = vst [vmem:[#allocation88_spill] sm:$0xff] %v5874_v45  ;;  %v2194_v40 = vmul.f32 %v5874_v45, %v5874_v45 }
 0x204   :  { %v5870_v25 = vadd.f32 %v5372_v6, %v8291_v38 }
 0x205   :  { %v1987_v27 = vadd.f32 %v1986_v21, %v5846_v29  ;;  %v2384_v30 = vadd.f32 %v2383_v55, %v2189_v59  ;;  %v8295_v59 = vld [vmem:[#allocation91_spill] sm:$0xff] }
 0x206   :  { %8292 = vst [vmem:[#allocation92_spill] sm:$0xff] %v5870_v25  ;;  %v5879_v29 = vadd.f32 %v5372_v6, %v8295_v59 }
 0x207   :  { %v2385_v52 = vadd.f32 %v2384_v30, %v2190_v15  ;;  %v1988_v1 = vadd.f32 %v1987_v27, %v5851_v42  ;;  %v2193_v30 = vmul.f32 %v5870_v25, %v5870_v25  ;;  %v8297_v42 = vld [vmem:[#allocation98_spill] sm:$0xff] }
 0x208   :  { %8296 = vst [vmem:[#allocation91_spill] sm:$0xff] %v5879_v29  ;;  %v5886_v38 = vadd.f32 %v5372_v6, %v8297_v42  ;;  %v8301_v42 = vld [vmem:[#allocation96_spill] sm:$0xff] }
 0x209   :  { %v1989_v21 = vadd.f32 %v1988_v1, %v5858_v18  ;;  %v2386_v55 = vadd.f32 %v2385_v52, %v2191_v49  ;;  %v2195_v52 = vmul.f32 %v5879_v29, %v5879_v29  ;;  %v5902_v18 = vadd.f32 %v5372_v6, %v8301_v42 }
 0x20a   :  { %8298 = vst [vmem:[#allocation98_spill] sm:$0xff] %v5886_v38 }
 0x20b   :  { %v2387_v15 = vadd.f32 %v2386_v55, %v2192_v13  ;;  %v1990_v27 = vadd.f32 %v1989_v21, %v5870_v25  ;;  %v2196_v21 = vmul.f32 %v5886_v38, %v5886_v38  ;;  %v8299_v55 = vld [vmem:[#allocation100_spill] sm:$0xff]  ;;  %8302 = vst [vmem:[#allocation96_spill] sm:$0xff] %v5902_v18  ;;  %v2198_v42 = vmul.f32 %v5902_v18, %v5902_v18 }
 0x20c   :  { %v5898_v25 = vadd.f32 %v5372_v6, %v8299_v55 }
 0x20d   :  { %v1991_v1 = vadd.f32 %v1990_v27, %v5874_v45  ;;  %v2388_v49 = vadd.f32 %v2387_v15, %v2193_v30  ;;  %v8303_v30 = vld [vmem:[#allocation99_spill] sm:$0xff] }
 0x20e   :  { %8300 = vst [vmem:[#allocation100_spill] sm:$0xff] %v5898_v25  ;;  %v5907_v45 = vadd.f32 %v5372_v6, %v8303_v30 }
 0x20f   :  { %v2389_v59 = vadd.f32 %v2388_v49, %v2194_v40  ;;  %v1992_v13 = vadd.f32 %v1991_v1, %v5879_v29  ;;  %v2197_v49 = vmul.f32 %v5898_v25, %v5898_v25  ;;  %v8305_v29 = vld [vmem:[#allocation106_spill] sm:$0xff] }
 0x210   :  { %8304 = vst [vmem:[#allocation99_spill] sm:$0xff] %v5907_v45  ;;  %v5914_v55 = vadd.f32 %v5372_v6, %v8305_v29  ;;  %v8309_v29 = vld [vmem:[#allocation104_spill] sm:$0xff] }
 0x211   :  { %v1993_v27 = vadd.f32 %v1992_v13, %v5886_v38  ;;  %v2390_v15 = vadd.f32 %v2389_v59, %v2195_v52  ;;  %v2199_v59 = vmul.f32 %v5907_v45, %v5907_v45  ;;  %v5930_v38 = vadd.f32 %v5372_v6, %v8309_v29 }
 0x212   :  { %8306 = vst [vmem:[#allocation106_spill] sm:$0xff] %v5914_v55 }
 0x213   :  { %v2391_v40 = vadd.f32 %v2390_v15, %v2196_v21  ;;  %v1994_v1 = vadd.f32 %v1993_v27, %v5898_v25  ;;  %v2200_v27 = vmul.f32 %v5914_v55, %v5914_v55  ;;  %v8307_v15 = vld [vmem:[#allocation108_spill] sm:$0xff]  ;;  %8310 = vst [vmem:[#allocation104_spill] sm:$0xff] %v5930_v38  ;;  %v2202_v29 = vmul.f32 %v5930_v38, %v5930_v38 }
 0x214   :  { %v5926_v25 = vadd.f32 %v5372_v6, %v8307_v15 }
 0x215   :  { %v1995_v13 = vadd.f32 %v1994_v1, %v5902_v18  ;;  %v2392_v52 = vadd.f32 %v2391_v40, %v2197_v49  ;;  %v8311_v49 = vld [vmem:[#allocation107_spill] sm:$0xff] }
 0x216   :  { %8308 = vst [vmem:[#allocation108_spill] sm:$0xff] %v5926_v25  ;;  %v5935_v18 = vadd.f32 %v5372_v6, %v8311_v49 }
 0x217   :  { %v2393_v30 = vadd.f32 %v2392_v52, %v2198_v42  ;;  %v1996_v21 = vadd.f32 %v1995_v13, %v5907_v45  ;;  %v2201_v52 = vmul.f32 %v5926_v25, %v5926_v25  ;;  %v8313_v45 = vld [vmem:[#allocation114_spill] sm:$0xff] }
 0x218   :  { %8312 = vst [vmem:[#allocation107_spill] sm:$0xff] %v5935_v18  ;;  %v5942_v15 = vadd.f32 %v5372_v6, %v8313_v45  ;;  %v8316_v45 = vld [vmem:[#allocation112_spill] sm:$0xff] }
 0x219   :  { %v1997_v1 = vadd.f32 %v1996_v21, %v5914_v55  ;;  %v2394_v40 = vadd.f32 %v2393_v30, %v2199_v59  ;;  %v2203_v30 = vmul.f32 %v5935_v18, %v5935_v18  ;;  %v8393_v55 = vld [vmem:[#allocation41_spill] sm:$0xff] }
 0x21a   :  { %8314 = vst [vmem:[#allocation114_spill] sm:$0xff] %v5942_v15 }
 0x21b   :  { %v2395_v42 = vadd.f32 %v2394_v40, %v2200_v27  ;;  %v1998_v13 = vadd.f32 %v1997_v1, %v5926_v25  ;;  %v2204_v1 = vmul.f32 %v5942_v15, %v5942_v15  ;;  %v5954_v40 = vadd.f32 %v5372_v6, %v5433_v20 }
 0x21c   :  { %v5958_v25 = vadd.f32 %v5372_v6, %v8316_v45  ;;  %v5970_v20 = vadd.f32 %v5372_v6, %v5462_v33  ;;  %v5986_v33 = vadd.f32 %v5372_v6, %v5454_v35 }
 0x21d   :  { %v1999_v21 = vadd.f32 %v1998_v13, %v5930_v38  ;;  %v2396_v59 = vadd.f32 %v2395_v42, %v2201_v52  ;;  %8315 = vst [vmem:[#allocation166_spill] sm:$0xff] %v5954_v40  ;;  %v8318_v52 = vld [vmem:[#allocation115_spill] sm:$0xff] }
 0x21e   :  { %8317 = vst [vmem:[#allocation112_spill] sm:$0xff] %v5958_v25  ;;  %v5963_v38 = vadd.f32 %v5372_v6, %v8318_v52  ;;  %8320 = vst [vmem:[#allocation167_spill] sm:$0xff] %v5970_v20  ;;  %v2206_v45 = vmul.f32 %v5958_v25, %v5958_v25  ;;  %v2210_v35 = vmul.f32 %v5986_v33, %v5986_v33 }
 0x21f   :  { %v2397_v49 = vadd.f32 %v2396_v59, %v2202_v29  ;;  %v2000_v27 = vadd.f32 %v1999_v21, %v5935_v18  ;;  %v2205_v59 = vmul.f32 %v5954_v40, %v5954_v40  ;;  %8322 = vst [vmem:[#allocation169_spill] sm:$0xff] %v5986_v33  ;;  %v8392_v18 = vld [vmem:[#allocation39_spill] sm:$0xff] }
 0x220   :  { %8319 = vst [vmem:[#allocation115_spill] sm:$0xff] %v5963_v38 }
 0x221   :  { %v2001_v13 = vadd.f32 %v2000_v27, %v5942_v15  ;;  %v2398_v42 = vadd.f32 %v2397_v49, %v2203_v30  ;;  %v2207_v49 = vmul.f32 %v5963_v38, %v5963_v38  ;;  %v8391_v15 = vld [vmem:[#allocation40_spill] sm:$0xff] }
 0x223   :  { %v2399_v29 = vadd.f32 %v2398_v42, %v2204_v1  ;;  %v2002_v21 = vadd.f32 %v2001_v13, %v5954_v40  ;;  %v2208_v13 = vmul.f32 %v5970_v20, %v5970_v20  ;;  %v5982_v42 = vadd.f32 %v5372_v6, %v5469_v34  ;;  %v8390_v40 = vld [vmem:[#allocation38_spill] sm:$0xff] }
 0x224   :  { %v5998_v34 = vadd.f32 %v5372_v6, %v5498_v9  ;;  %v6014_v9 = vadd.f32 %v5372_v6, %v5489_v43 }
 0x225   :  { %v2003_v27 = vadd.f32 %v2002_v21, %v5958_v25  ;;  %v2400_v30 = vadd.f32 %v2399_v29, %v2205_v59  ;;  %8321 = vst [vmem:[#allocation168_spill] sm:$0xff] %v5982_v42  ;;  %v8323_v59 = vld [vmem:[#allocation121_spill] sm:$0xff] }
 0x226   :  { %v5991_v25 = vadd.f32 %v5372_v6, %v8323_v59  ;;  %8325 = vst [vmem:[#allocation170_spill] sm:$0xff] %v5998_v34  ;;  %8327 = vst [vmem:[#allocation172_spill] sm:$0xff] %v6014_v9  ;;  %v2214_v43 = vmul.f32 %v6014_v9, %v6014_v9 }
 0x227   :  { %v2401_v52 = vadd.f32 %v2400_v30, %v2206_v45  ;;  %v2004_v1 = vadd.f32 %v2003_v27, %v5963_v38  ;;  %v2209_v30 = vmul.f32 %v5982_v42, %v5982_v42  ;;  %v8389_v38 = vld [vmem:[#allocation37_spill] sm:$0xff] }
 0x228   :  { %8324 = vst [vmem:[#allocation121_spill] sm:$0xff] %v5991_v25 }
 0x229   :  { %v2005_v21 = vadd.f32 %v2004_v1, %v5970_v20  ;;  %v2402_v29 = vadd.f32 %v2401_v52, %v2207_v49  ;;  %v2211_v52 = vmul.f32 %v5991_v25, %v5991_v25  ;;  %v8388_v20 = vld [vmem:[#allocation35_spill] sm:$0xff] }
 0x22b   :  { %v2403_v45 = vadd.f32 %v2402_v29, %v2208_v13  ;;  %v2006_v27 = vadd.f32 %v2005_v21, %v5982_v42  ;;  %v2212_v21 = vmul.f32 %v5998_v34, %v5998_v34  ;;  %v6010_v29 = vadd.f32 %v5372_v6, %v5505_v54  ;;  %v8387_v42 = vld [vmem:[#allocation36_spill] sm:$0xff] }
 0x22c   :  { %v6026_v54 = vadd.f32 %v5372_v6, %v5534_v62  ;;  %v6042_v62 = vadd.f32 %v5372_v6, %v5525_v32 }
 0x22d   :  { %v2007_v1 = vadd.f32 %v2006_v27, %v5986_v33  ;;  %v2404_v49 = vadd.f32 %v2403_v45, %v2209_v30  ;;  %8326 = vst [vmem:[#allocation171_spill] sm:$0xff] %v6010_v29  ;;  %v6019_v30 = vadd.f32 %v5372_v6, %v5500_v8  ;;  %v8386_v33 = vld [vmem:[#allocation34_spill] sm:$0xff] }
 0x22e   :  { %8329 = vst [vmem:[#allocation174_spill] sm:$0xff] %v6026_v54  ;;  %8331 = vst [vmem:[#allocation176_spill] sm:$0xff] %v6042_v62  ;;  %v2218_v32 = vmul.f32 %v6042_v62, %v6042_v62 }
 0x22f   :  { %v2405_v59 = vadd.f32 %v2404_v49, %v2210_v35  ;;  %v2008_v13 = vadd.f32 %v2007_v1, %v5991_v25  ;;  %8328 = vst [vmem:[#allocation173_spill] sm:$0xff] %v6019_v30  ;;  %v2213_v49 = vmul.f32 %v6010_v29, %v6010_v29  ;;  %v2215_v8 = vmul.f32 %v6019_v30, %v6019_v30  ;;  %v8385_v25 = vld [vmem:[#allocation33_spill] sm:$0xff] }
 0x231   :  { %v2009_v27 = vadd.f32 %v2008_v13, %v5998_v34  ;;  %v2406_v45 = vadd.f32 %v2405_v59, %v2211_v52  ;;  %v8384_v34 = vld [vmem:[#allocation31_spill] sm:$0xff] }
 0x233   :  { %v2407_v35 = vadd.f32 %v2406_v45, %v2212_v21  ;;  %v2010_v1 = vadd.f32 %v2009_v27, %v6010_v29  ;;  %v2216_v27 = vmul.f32 %v6026_v54, %v6026_v54  ;;  %v6038_v45 = vadd.f32 %v5372_v6, %v5541_v48  ;;  %v8383_v29 = vld [vmem:[#allocation32_spill] sm:$0xff] }
 0x234   :  { %v6054_v48 = vadd.f32 %v5372_v6, %v5570_v58  ;;  %v6070_v58 = vadd.f32 %v5372_v6, %v5561_v57 }
 0x235   :  { %v2011_v13 = vadd.f32 %v2010_v1, %v6014_v9  ;;  %v2408_v52 = vadd.f32 %v2407_v35, %v2213_v49  ;;  %8330 = vst [vmem:[#allocation175_spill] sm:$0xff] %v6038_v45  ;;  %v6047_v49 = vadd.f32 %v5372_v6, %v5536_v50  ;;  %v8382_v9 = vld [vmem:[#allocation30_spill] sm:$0xff] }
 0x236   :  { %8333 = vst [vmem:[#allocation178_spill] sm:$0xff] %v6054_v48  ;;  %8335 = vst [vmem:[#allocation180_spill] sm:$0xff] %v6070_v58  ;;  %v2222_v57 = vmul.f32 %v6070_v58, %v6070_v58 }
 0x237   :  { %v2409_v59 = vadd.f32 %v2408_v52, %v2214_v43  ;;  %v2012_v21 = vadd.f32 %v2011_v13, %v6019_v30  ;;  %8332 = vst [vmem:[#allocation177_spill] sm:$0xff] %v6047_v49  ;;  %v2217_v52 = vmul.f32 %v6038_v45, %v6038_v45  ;;  %v2219_v50 = vmul.f32 %v6047_v49, %v6047_v49  ;;  %v8381_v30 = vld [vmem:[#allocation29_spill] sm:$0xff] }
 0x239   :  { %v2013_v1 = vadd.f32 %v2012_v21, %v6026_v54  ;;  %v2410_v35 = vadd.f32 %v2409_v59, %v2215_v8  ;;  %v8380_v54 = vld [vmem:[#allocation27_spill] sm:$0xff] }
 0x23b   :  { %v2411_v43 = vadd.f32 %v2410_v35, %v2216_v27  ;;  %v2014_v13 = vadd.f32 %v2013_v1, %v6038_v45  ;;  %v2220_v1 = vmul.f32 %v6054_v48, %v6054_v48  ;;  %v6066_v35 = vadd.f32 %v5372_v6, %v5577_v0  ;;  %v8379_v45 = vld [vmem:[#allocation28_spill] sm:$0xff] }
 0x23c   :  { %v6082_v0 = vadd.f32 %v5372_v6, %v5606_v7  ;;  %v6098_v7 = vadd.f32 %v5372_v6, %v5597_v60 }
 0x23d   :  { %v2015_v21 = vadd.f32 %v2014_v13, %v6042_v62  ;;  %v2412_v8 = vadd.f32 %v2411_v43, %v2217_v52  ;;  %8334 = vst [vmem:[#allocation179_spill] sm:$0xff] %v6066_v35  ;;  %v6075_v52 = vadd.f32 %v5372_v6, %v5572_v12  ;;  %v8378_v62 = vld [vmem:[#allocation26_spill] sm:$0xff] }
 0x23e   :  { %8337 = vst [vmem:[#allocation182_spill] sm:$0xff] %v6082_v0  ;;  %8339 = vst [vmem:[#allocation184_spill] sm:$0xff] %v6098_v7  ;;  %v2226_v60 = vmul.f32 %v6098_v7, %v6098_v7 }
 0x23f   :  { %v2413_v59 = vadd.f32 %v2412_v8, %v2218_v32  ;;  %v2016_v27 = vadd.f32 %v2015_v21, %v6047_v49  ;;  %8336 = vst [vmem:[#allocation181_spill] sm:$0xff] %v6075_v52  ;;  %v2221_v8 = vmul.f32 %v6066_v35, %v6066_v35  ;;  %v2223_v12 = vmul.f32 %v6075_v52, %v6075_v52  ;;  %v8377_v49 = vld [vmem:[#allocation25_spill] sm:$0xff] }
 0x241   :  { %v2017_v13 = vadd.f32 %v2016_v27, %v6054_v48  ;;  %v2414_v43 = vadd.f32 %v2413_v59, %v2219_v50  ;;  %v8376_v48 = vld [vmem:[#allocation23_spill] sm:$0xff] }
 0x243   :  { %v2415_v32 = vadd.f32 %v2414_v43, %v2220_v1  ;;  %v2018_v21 = vadd.f32 %v2017_v13, %v6066_v35  ;;  %v2224_v13 = vmul.f32 %v6082_v0, %v6082_v0  ;;  %v6094_v43 = vadd.f32 %v5372_v6, %v5613_v16  ;;  %v8375_v35 = vld [vmem:[#allocation24_spill] sm:$0xff] }
 0x244   :  { %v6110_v16 = vadd.f32 %v5372_v6, %v5642_v28  ;;  %v6126_v28 = vadd.f32 %v5372_v6, %v5633_v17 }
 0x245   :  { %v2019_v27 = vadd.f32 %v2018_v21, %v6070_v58  ;;  %v2416_v50 = vadd.f32 %v2415_v32, %v2221_v8  ;;  %8338 = vst [vmem:[#allocation183_spill] sm:$0xff] %v6094_v43  ;;  %v6103_v8 = vadd.f32 %v5372_v6, %v5608_v39  ;;  %v8374_v58 = vld [vmem:[#allocation22_spill] sm:$0xff] }
 0x246   :  { %8341 = vst [vmem:[#allocation186_spill] sm:$0xff] %v6110_v16  ;;  %8343 = vst [vmem:[#allocation188_spill] sm:$0xff] %v6126_v28  ;;  %v2230_v17 = vmul.f32 %v6126_v28, %v6126_v28 }
 0x247   :  { %v2417_v59 = vadd.f32 %v2416_v50, %v2222_v57  ;;  %v2020_v1 = vadd.f32 %v2019_v27, %v6075_v52  ;;  %8340 = vst [vmem:[#allocation185_spill] sm:$0xff] %v6103_v8  ;;  %v2225_v50 = vmul.f32 %v6094_v43, %v6094_v43  ;;  %v2227_v39 = vmul.f32 %v6103_v8, %v6103_v8  ;;  %v8373_v52 = vld [vmem:[#allocation21_spill] sm:$0xff] }
 0x249   :  { %v2021_v21 = vadd.f32 %v2020_v1, %v6082_v0  ;;  %v2418_v32 = vadd.f32 %v2417_v59, %v2223_v12  ;;  %v8372_v0 = vld [vmem:[#allocation19_spill] sm:$0xff] }
 0x24b   :  { %v2419_v57 = vadd.f32 %v2418_v32, %v2224_v13  ;;  %v2022_v27 = vadd.f32 %v2021_v21, %v6094_v43  ;;  %v2228_v21 = vmul.f32 %v6110_v16, %v6110_v16  ;;  %v6122_v32 = vadd.f32 %v5372_v6, %v5649_v61  ;;  %v8371_v43 = vld [vmem:[#allocation20_spill] sm:$0xff] }
 0x24c   :  { %v6138_v61 = vadd.f32 %v5372_v6, %v5678_v63  ;;  %v6154_v63 = vadd.f32 %v5372_v6, %v5669_v19 }
 0x24d   :  { %v2023_v1 = vadd.f32 %v2022_v27, %v6098_v7  ;;  %v2420_v12 = vadd.f32 %v2419_v57, %v2225_v50  ;;  %8342 = vst [vmem:[#allocation187_spill] sm:$0xff] %v6122_v32  ;;  %v6131_v50 = vadd.f32 %v5372_v6, %v5644_v46  ;;  %v8370_v7 = vld [vmem:[#allocation18_spill] sm:$0xff] }
 0x24e   :  { %8345 = vst [vmem:[#allocation190_spill] sm:$0xff] %v6138_v61  ;;  %8347 = vst [vmem:[#allocation192_spill] sm:$0xff] %v6154_v63  ;;  %v2234_v19 = vmul.f32 %v6154_v63, %v6154_v63 }
 0x24f   :  { %v2421_v59 = vadd.f32 %v2420_v12, %v2226_v60  ;;  %v2024_v13 = vadd.f32 %v2023_v1, %v6103_v8  ;;  %8344 = vst [vmem:[#allocation189_spill] sm:$0xff] %v6131_v50  ;;  %v2229_v12 = vmul.f32 %v6122_v32, %v6122_v32  ;;  %v2231_v46 = vmul.f32 %v6131_v50, %v6131_v50  ;;  %v8369_v8 = vld [vmem:[#allocation17_spill] sm:$0xff] }
 0x251   :  { %v2025_v27 = vadd.f32 %v2024_v13, %v6110_v16  ;;  %v2422_v57 = vadd.f32 %v2421_v59, %v2227_v39 }
 0x253   :  { %v2423_v60 = vadd.f32 %v2422_v57, %v2228_v21  ;;  %v2026_v1 = vadd.f32 %v2025_v27, %v6122_v32  ;;  %v2232_v27 = vmul.f32 %v6138_v61, %v6138_v61  ;;  %v6150_v57 = vadd.f32 %v5372_v6, %v5685_v14 }
 0x254   :  { %v6166_v14 = vadd.f32 %v5372_v6, %v5714_v31  ;;  %v6182_v31 = vadd.f32 %v5372_v6, %v5705_v23 }
 0x255   :  { %v2027_v13 = vadd.f32 %v2026_v1, %v6126_v28  ;;  %v2424_v39 = vadd.f32 %v2423_v60, %v2229_v12  ;;  %8346 = vst [vmem:[#allocation191_spill] sm:$0xff] %v6150_v57  ;;  %v6159_v12 = vadd.f32 %v5372_v6, %v5680_v51 }
 0x256   :  { %8349 = vst [vmem:[#allocation194_spill] sm:$0xff] %v6166_v14  ;;  %8351 = vst [vmem:[#allocation196_spill] sm:$0xff] %v6182_v31 }
 0x257   :  { %v2425_v59 = vadd.f32 %v2424_v39, %v2230_v17  ;;  %v2028_v21 = vadd.f32 %v2027_v13, %v6131_v50  ;;  %8348 = vst [vmem:[#allocation193_spill] sm:$0xff] %v6159_v12  ;;  %v2233_v39 = vmul.f32 %v6150_v57, %v6150_v57  ;;  %v2235_v51 = vmul.f32 %v6159_v12, %v6159_v12 }
 0x259   :  { %v2029_v1 = vadd.f32 %v2028_v21, %v6138_v61  ;;  %v2426_v60 = vadd.f32 %v2425_v59, %v2231_v46 }
 0x25b   :  { %v2427_v17 = vadd.f32 %v2426_v60, %v2232_v27  ;;  %v2030_v13 = vadd.f32 %v2029_v1, %v6150_v57  ;;  %v2236_v1 = vmul.f32 %v6166_v14, %v6166_v14  ;;  %v6178_v60 = vadd.f32 %v5372_v6, %v5721_v41 }
 0x25c   :  { %v2238_v41 = vmul.f32 %v6182_v31, %v6182_v31 }
 0x25d   :  { %v2031_v21 = vadd.f32 %v2030_v13, %v6154_v63  ;;  %v2428_v46 = vadd.f32 %v2427_v17, %v2233_v39  ;;  %8350 = vst [vmem:[#allocation195_spill] sm:$0xff] %v6178_v60 }
 0x25f   :  { %v2429_v59 = vadd.f32 %v2428_v46, %v2234_v19  ;;  %v2032_v27 = vadd.f32 %v2031_v21, %v6159_v12  ;;  %v6187_v19 = vadd.f32 %v5372_v6, %v5716_v11  ;;  %v2237_v46 = vmul.f32 %v6178_v60, %v6178_v60 }
 0x261   :  { %v2033_v13 = vadd.f32 %v2032_v27, %v6166_v14  ;;  %v2430_v17 = vadd.f32 %v2429_v59, %v2235_v51  ;;  %8352 = vst [vmem:[#allocation197_spill] sm:$0xff] %v6187_v19  ;;  %v2239_v27 = vmul.f32 %v6187_v19, %v6187_v19 }
 0x263   :  { %v2431_v39 = vadd.f32 %v2430_v17, %v2236_v1  ;;  %v2034_v21 = vadd.f32 %v2033_v13, %v6178_v60 }
 0x265   :  { %v2035_v12 = vadd.f32 %v2034_v21, %v6182_v31  ;;  %v2432_v23 = vadd.f32 %v2431_v39, %v2237_v46 }
 0x267   :  { %v2036_v51 = vadd.f32 %v2035_v12, %v6187_v19  ;;  %v2433_v59 = vadd.f32 %v2432_v23, %v2238_v41  ;;  %v2453_v41 = vlaneseq  ;;  %v8368_v19 = vld [vmem:[#allocation15_spill] sm:$0xff] }
 0x269   :  { %v2037_v1 = vrot.slane %v2036_v51, 4  ;;  %v2434_v6 = vadd.f32 %v2433_v59, %v2239_v27  ;;  %v2454_v23 = vshrl.u32 %v2453_v41, 7  ;;  %v2445_v27 = vld [vmem:[%s7869_s3] sm:$0x1]  ;;  %v8361_v41 = vld [vmem:[#allocation9_spill] sm:$0xff] }
 0x26b   :  { %v2038_v11 = vadd.f32 %v2037_v1, %v2036_v51  ;;  %v2435_v17 = vrot.slane %v2434_v6, 4  ;;  %v2455_v51 = vsub.s32 0, %v2454_v23 }
 0x26d   :  { %v2039_v13 = vrot.slane %v2038_v11, 2  ;;  %v2436_v14 = vadd.f32 %v2435_v17, %v2434_v6  ;;  %v8357_v6 = vld [vmem:[#allocation5_spill] sm:$0xff]  ;;  %v8358_v17 = vld [vmem:[#allocation6_spill] sm:$0xff] }
 0x26f   :  { %v2040_v63 = vadd.f32 %v2039_v13, %v2038_v11  ;;  %v2437_v60 = vrot.slane %v2436_v14, 2 }
 0x271   :  { %v2041_v57 = vrot.slane %v2040_v63, 1  ;;  %v2438_v61 = vadd.f32 %v2437_v60, %v2436_v14  ;;  %v8356_v60 = vld [vmem:[#allocation3_spill] sm:$0xff] }
 0x273   :  { %v2042_v50 = vadd.f32 %v2041_v57, %v2040_v63  ;;  %v2439_v28 = vrot.slane %v2438_v61, 1  ;;  %v8355_v63 = vld [vmem:[#allocation4_spill] sm:$0xff] }
 0x275   :  { %v2043_v21 = vmul.f32 0.0006377551, %v2042_v50  ;;  %v2440_v39 = vadd.f32 %v2439_v28, %v2438_v61  ;;  %v2449_v50 = vld [vmem:[%s7870_s4] sm:$0x1] }
 0x277   :  { %v2441_v46 = vmul.f32 0.0006377551, %v2440_v39  ;;  %v2442_v31 = vmul.f32 %v2043_v21, %v2043_v21  ;;  %v8359_v39 = vld [vmem:[#allocation8_spill] sm:$0xff] }
 0x279   :  { %v2443_v32 = vsub.f32 %v2441_v46, %v2442_v31  ;;  %v8360_v46 = vld [vmem:[#allocation7_spill] sm:$0xff] }
 0x27b   :  { %v2444_v16 = vmax.f32 %v2443_v32, 0.0  ;;  %v8354_v32 = vld [vmem:[#allocation2_spill] sm:$0xff] }
 0x27d   :  { %v2446_v12 = vadd.f32 1e-05, %v2444_v16 }
 0x27f   :  { %4293 = vrsqrt.f32 %v2446_v12 }
 0x289   :  { %v4294_v59 = vpop.eup %4293 }
 0x28a   :  { %v2448_v1 = vmul.f32 %v4294_v59, %v2445_v27  ;;  %v8362_v27 = vld [vmem:[#allocation10_spill] sm:$0xff] }
 0x28c   :  { %v2450_v28 = vmul.f32 %v2448_v1, %v2043_v21  ;;  %v6204_v61 = vrot.slane %v2448_v1, %v2455_v51  ;;  %v8363_v1 = vld [vmem:[#allocation12_spill] sm:$0xff] }
 0x28e   :  { %8353 = vst [vmem:[#allocation198_spill] sm:$0xff] %v6204_v61  ;;  %v2451_v57 = vsub.f32 %v2449_v50, %v2450_v28  ;;  %v2458_v16 = vmul.f32 %v6204_v61, %v8354_v32  ;;  %v2459_v14 = vmul.f32 %v6204_v61, %v8355_v63  ;;  %v2460_v31 = vmul.f32 %v6204_v61, %v8356_v60  ;;  %v8364_v28 = vld [vmem:[#allocation11_spill] sm:$0xff]  ;;  %v8365_v63 = vld [vmem:[#allocation13_spill] sm:$0xff] }
 0x28f   :  { %v2461_v11 = vmul.f32 %v6204_v61, %v8357_v6  ;;  %v2462_v13 = vmul.f32 %v6204_v61, %v8358_v17  ;;  %v2463_v21 = vmul.f32 %v6204_v61, %v8359_v39  ;;  %v2464_v12 = vmul.f32 %v6204_v61, %v8360_v46  ;;  %v8366_v6 = vld [vmem:[#allocation14_spill] sm:$0xff]  ;;  %v8367_v39 = vld [vmem:[#allocation16_spill] sm:$0xff] }
 0x290   :  { %v2465_v23 = vmul.f32 %v6204_v61, %v8361_v41  ;;  %v2466_v59 = vmul.f32 %v6204_v61, %v8362_v27  ;;  %v2467_v50 = vmul.f32 %v6204_v61, %v8363_v1  ;;  %v2468_v32 = vmul.f32 %v6204_v61, %v8364_v28 }
 0x291   :  { %v2469_v60 = vmul.f32 %v6204_v61, %v8365_v63  ;;  %v2470_v17 = vmul.f32 %v6204_v61, %v8366_v6  ;;  %v2471_v46 = vmul.f32 %v6204_v61, %v8367_v39  ;;  %v2472_v41 = vmul.f32 %v6204_v61, %v8368_v19 }
 0x292   :  { %v2473_v27 = vmul.f32 %v6204_v61, %v8369_v8  ;;  %v2474_v1 = vmul.f32 %v6204_v61, %v8370_v7  ;;  %v2475_v28 = vmul.f32 %v6204_v61, %v8371_v43  ;;  %v2476_v63 = vmul.f32 %v6204_v61, %v8372_v0 }
 0x293   :  { %v2477_v6 = vmul.f32 %v6204_v61, %v8373_v52  ;;  %v2478_v39 = vmul.f32 %v6204_v61, %v8374_v58  ;;  %v2479_v19 = vmul.f32 %v6204_v61, %v8375_v35  ;;  %v2480_v8 = vmul.f32 %v6204_v61, %v8376_v48 }
 0x294   :  { %v2481_v7 = vmul.f32 %v6204_v61, %v8377_v49  ;;  %v2482_v43 = vmul.f32 %v6204_v61, %v8378_v62  ;;  %v2483_v0 = vmul.f32 %v6204_v61, %v8379_v45  ;;  %v2484_v52 = vmul.f32 %v6204_v61, %v8380_v54 }
 0x295   :  { %v2485_v58 = vmul.f32 %v6204_v61, %v8381_v30  ;;  %v2486_v35 = vmul.f32 %v6204_v61, %v8382_v9  ;;  %v2487_v48 = vmul.f32 %v6204_v61, %v8383_v29  ;;  %v2488_v49 = vmul.f32 %v6204_v61, %v8384_v34 }
 0x296   :  { %v2489_v62 = vmul.f32 %v6204_v61, %v8385_v25  ;;  %v2490_v45 = vmul.f32 %v6204_v61, %v8386_v33  ;;  %v2491_v54 = vmul.f32 %v6204_v61, %v8387_v42  ;;  %v2492_v30 = vmul.f32 %v6204_v61, %v8388_v20 }
 0x297   :  { %v2493_v9 = vmul.f32 %v6204_v61, %v8389_v38  ;;  %v2494_v29 = vmul.f32 %v6204_v61, %v8390_v40  ;;  %v2495_v34 = vmul.f32 %v6204_v61, %v8391_v15  ;;  %v2496_v25 = vmul.f32 %v6204_v61, %v8392_v18 }
 0x298   :  { %v2497_v33 = vmul.f32 %v6204_v61, %v8393_v55  ;;  %v2498_v42 = vmul.f32 %v6204_v61, %v8394_v22  ;;  %v2499_v20 = vmul.f32 %v6204_v61, %v8395_v2  ;;  %v2500_v38 = vmul.f32 %v6204_v61, %v8396_v4  ;;  %v8404_v4 = vld [vmem:[#allocation52_spill] sm:$0xff] }
 0x299   :  { %v2501_v40 = vmul.f32 %v6204_v61, %v8397_v37  ;;  %v2502_v15 = vmul.f32 %v6204_v61, %v8398_v3  ;;  %v2503_v18 = vmul.f32 %v6204_v61, %v8399_v36  ;;  %v2504_v55 = vmul.f32 %v6204_v61, %v8400_v53  ;;  %v8406_v36 = vld [vmem:[#allocation53_spill] sm:$0xff]  ;;  %v8407_v53 = vld [vmem:[#allocation54_spill] sm:$0xff] }
 0x29a   :  { %v2505_v22 = vmul.f32 %v6204_v61, %v8401_v24  ;;  %v2506_v2 = vmul.f32 %v6204_v61, %v8402_v47  ;;  %v6304_v26 = vrot.slane %v2451_v57, %v2455_v51  ;;  %v6308_v37 = vmul.f32 %v6204_v61, %v8404_v4 }
 0x29b   :  { %v6312_v3 = vmul.f32 %v6204_v61, %v8405_v56  ;;  %v6316_v5 = vmul.f32 %v6204_v61, %v8406_v36  ;;  %v6320_v24 = vmul.f32 %v6204_v61, %v8407_v53  ;;  %v6324_v47 = vmul.f32 %v6204_v61, %v8409_v10 }
 0x29c   :  { %8403 = vst [vmem:[#allocation2_spill] sm:$0xff] %v6304_v26  ;;  %v6327_v51 = vadd.f32 %v6304_v26, %v2458_v16  ;;  %v6330_v57 = vadd.f32 %v6304_v26, %v2459_v14  ;;  %v6333_v56 = vadd.f32 %v6304_v26, %v2460_v31  ;;  %v6336_v4 = vadd.f32 %v6304_v26, %v2461_v11 }
 0x29d   :  { %8408 = vst [vmem:[#allocation4_spill] sm:$0xff] %v6320_v24  ;;  %8410 = vst [vmem:[#allocation3_spill] sm:$0xff] %v6324_v47  ;;  %v6339_v36 = vadd.f32 %v6304_v26, %v2462_v13  ;;  %v6342_v53 = vadd.f32 %v6304_v26, %v2463_v21  ;;  %v6345_v10 = vadd.f32 %v6304_v26, %v2464_v12 }
 0x29e   :  { %v6348_v16 = vadd.f32 %v6304_v26, %v2465_v23  ;;  %v6351_v14 = vadd.f32 %v6304_v26, %v2466_v59  ;;  %v6354_v31 = vadd.f32 %v6304_v26, %v2467_v50  ;;  %v6357_v11 = vadd.f32 %v6304_v26, %v2468_v32 }
 0x29f   :  { %8411 = vst [vmem:[#allocation5_spill] sm:$0xff] %v6339_v36  ;;  %8412 = vst [vmem:[#allocation6_spill] sm:$0xff] %v6342_v53  ;;  %v6360_v13 = vadd.f32 %v6304_v26, %v2469_v60  ;;  %v6363_v21 = vadd.f32 %v6304_v26, %v2470_v17  ;;  %v6366_v12 = vadd.f32 %v6304_v26, %v2471_v46 }
 0x2a0   :  { %8413 = vst [vmem:[#allocation8_spill] sm:$0xff] %v6345_v10  ;;  %8414 = vst [vmem:[#allocation7_spill] sm:$0xff] %v6348_v16  ;;  %v6369_v23 = vadd.f32 %v6304_v26, %v2472_v41  ;;  %v6372_v59 = vadd.f32 %v6304_v26, %v2473_v27  ;;  %v6375_v50 = vadd.f32 %v6304_v26, %v2474_v1 }
 0x2a1   :  { %8415 = vst [vmem:[#allocation9_spill] sm:$0xff] %v6351_v14  ;;  %8416 = vst [vmem:[#allocation10_spill] sm:$0xff] %v6354_v31  ;;  %v6378_v32 = vadd.f32 %v6304_v26, %v2475_v28  ;;  %v6381_v60 = vadd.f32 %v6304_v26, %v2476_v63  ;;  %v6384_v17 = vadd.f32 %v6304_v26, %v2477_v6  ;;  %v8498_v31 = vld [vmem:[#allocation116_spill] sm:$0xff]  ;;  %v8499_v14 = vld [vmem:[#allocation118_spill] sm:$0xff] }
 0x2a2   :  { %8417 = vst [vmem:[#allocation12_spill] sm:$0xff] %v6357_v11  ;;  %8418 = vst [vmem:[#allocation11_spill] sm:$0xff] %v6360_v13  ;;  %v6387_v46 = vadd.f32 %v6304_v26, %v2478_v39  ;;  %v6390_v41 = vadd.f32 %v6304_v26, %v2479_v19  ;;  %v6393_v27 = vadd.f32 %v6304_v26, %v2480_v8  ;;  %v8496_v13 = vld [vmem:[#allocation110_spill] sm:$0xff]  ;;  %v8497_v11 = vld [vmem:[#allocation113_spill] sm:$0xff] }
 0x2a3   :  { %8419 = vst [vmem:[#allocation13_spill] sm:$0xff] %v6363_v21  ;;  %8420 = vst [vmem:[#allocation14_spill] sm:$0xff] %v6366_v12  ;;  %v6396_v1 = vadd.f32 %v6304_v26, %v2481_v7  ;;  %v6399_v28 = vadd.f32 %v6304_v26, %v2482_v43  ;;  %v6402_v63 = vadd.f32 %v6304_v26, %v2483_v0  ;;  %v8494_v12 = vld [vmem:[#allocation109_spill] sm:$0xff]  ;;  %v8495_v21 = vld [vmem:[#allocation111_spill] sm:$0xff] }
 0x2a4   :  { %8421 = vst [vmem:[#allocation16_spill] sm:$0xff] %v6369_v23  ;;  %8422 = vst [vmem:[#allocation15_spill] sm:$0xff] %v6372_v59  ;;  %v6405_v6 = vadd.f32 %v6304_v26, %v2484_v52  ;;  %v6408_v39 = vadd.f32 %v6304_v26, %v2485_v58  ;;  %v6411_v19 = vadd.f32 %v6304_v26, %v2486_v35  ;;  %v8492_v59 = vld [vmem:[#allocation102_spill] sm:$0xff]  ;;  %v8493_v23 = vld [vmem:[#allocation105_spill] sm:$0xff] }
 0x2a5   :  { %8423 = vst [vmem:[#allocation17_spill] sm:$0xff] %v6375_v50  ;;  %8424 = vst [vmem:[#allocation18_spill] sm:$0xff] %v6378_v32  ;;  %v6414_v8 = vadd.f32 %v6304_v26, %v2487_v48  ;;  %v6417_v7 = vadd.f32 %v6304_v26, %v2488_v49  ;;  %v6420_v43 = vadd.f32 %v6304_v26, %v2489_v62  ;;  %v8490_v32 = vld [vmem:[#allocation101_spill] sm:$0xff]  ;;  %v8491_v50 = vld [vmem:[#allocation103_spill] sm:$0xff] }
 0x2a6   :  { %8425 = vst [vmem:[#allocation20_spill] sm:$0xff] %v6381_v60  ;;  %8426 = vst [vmem:[#allocation19_spill] sm:$0xff] %v6384_v17  ;;  %v6423_v0 = vadd.f32 %v6304_v26, %v2490_v45  ;;  %v6426_v52 = vadd.f32 %v6304_v26, %v2491_v54  ;;  %v6429_v58 = vadd.f32 %v6304_v26, %v2492_v30  ;;  %v8488_v17 = vld [vmem:[#allocation94_spill] sm:$0xff]  ;;  %v8489_v60 = vld [vmem:[#allocation97_spill] sm:$0xff] }
 0x2a7   :  { %8427 = vst [vmem:[#allocation21_spill] sm:$0xff] %v6387_v46  ;;  %8428 = vst [vmem:[#allocation22_spill] sm:$0xff] %v6390_v41  ;;  %v6432_v35 = vadd.f32 %v6304_v26, %v2493_v9  ;;  %v6435_v48 = vadd.f32 %v6304_v26, %v2494_v29  ;;  %v6438_v49 = vadd.f32 %v6304_v26, %v2495_v34  ;;  %v8486_v41 = vld [vmem:[#allocation93_spill] sm:$0xff]  ;;  %v8487_v46 = vld [vmem:[#allocation95_spill] sm:$0xff] }
 0x2a8   :  { %8429 = vst [vmem:[#allocation24_spill] sm:$0xff] %v6393_v27  ;;  %8430 = vst [vmem:[#allocation23_spill] sm:$0xff] %v6396_v1  ;;  %v6441_v62 = vadd.f32 %v6304_v26, %v2496_v25  ;;  %v6444_v45 = vadd.f32 %v6304_v26, %v2497_v33  ;;  %v6447_v54 = vadd.f32 %v6304_v26, %v2498_v42  ;;  %v8484_v1 = vld [vmem:[#allocation86_spill] sm:$0xff]  ;;  %v8485_v27 = vld [vmem:[#allocation89_spill] sm:$0xff] }
 0x2a9   :  { %8431 = vst [vmem:[#allocation25_spill] sm:$0xff] %v6399_v28  ;;  %8432 = vst [vmem:[#allocation26_spill] sm:$0xff] %v6402_v63  ;;  %v6450_v30 = vadd.f32 %v6304_v26, %v2499_v20  ;;  %v6453_v9 = vadd.f32 %v6304_v26, %v2500_v38  ;;  %v6456_v29 = vadd.f32 %v6304_v26, %v2501_v40  ;;  %v8457_v38 = vld [vmem:[#allocation57_spill] sm:$0xff]  ;;  %v8483_v28 = vld [vmem:[#allocation87_spill] sm:$0xff] }
 0x2aa   :  { %8433 = vst [vmem:[#allocation28_spill] sm:$0xff] %v6405_v6  ;;  %8434 = vst [vmem:[#allocation27_spill] sm:$0xff] %v6408_v39  ;;  %v6459_v34 = vadd.f32 %v6304_v26, %v2502_v15  ;;  %v6462_v25 = vadd.f32 %v6304_v26, %v2503_v18  ;;  %v6465_v33 = vadd.f32 %v6304_v26, %v2504_v55  ;;  %v8459_v15 = vld [vmem:[#allocation60_spill] sm:$0xff]  ;;  %v8461_v55 = vld [vmem:[#allocation61_spill] sm:$0xff] }
 0x2ab   :  { %8435 = vst [vmem:[#allocation29_spill] sm:$0xff] %v6411_v19  ;;  %8436 = vst [vmem:[#allocation30_spill] sm:$0xff] %v6414_v8  ;;  %v6468_v42 = vadd.f32 %v6304_v26, %v2505_v22  ;;  %v6471_v20 = vadd.f32 %v6304_v26, %v2506_v2  ;;  %v2617_v40 = vmul.f32 %v6204_v61, %v8457_v38  ;;  %v8478_v8 = vld [vmem:[#allocation78_spill] sm:$0xff]  ;;  %v8479_v19 = vld [vmem:[#allocation80_spill] sm:$0xff] }
 0x2ac   :  { %8437 = vst [vmem:[#allocation32_spill] sm:$0xff] %v6417_v7  ;;  %8438 = vst [vmem:[#allocation31_spill] sm:$0xff] %v6420_v43  ;;  %v2619_v18 = vmul.f32 %v6204_v61, %v8459_v15  ;;  %v2621_v22 = vmul.f32 %v6204_v61, %v8461_v55  ;;  %v8476_v43 = vld [vmem:[#allocation75_spill] sm:$0xff]  ;;  %v8477_v7 = vld [vmem:[#allocation77_spill] sm:$0xff] }
 0x2ad   :  { %8439 = vst [vmem:[#allocation33_spill] sm:$0xff] %v6423_v0  ;;  %8440 = vst [vmem:[#allocation34_spill] sm:$0xff] %v6426_v52  ;;  %v8474_v52 = vld [vmem:[#allocation74_spill] sm:$0xff]  ;;  %v8475_v0 = vld [vmem:[#allocation76_spill] sm:$0xff] }
 0x2ae   :  { %8441 = vst [vmem:[#allocation36_spill] sm:$0xff] %v6429_v58  ;;  %8442 = vst [vmem:[#allocation35_spill] sm:$0xff] %v6432_v35  ;;  %v8472_v35 = vld [vmem:[#allocation71_spill] sm:$0xff]  ;;  %v8473_v58 = vld [vmem:[#allocation73_spill] sm:$0xff] }
 0x2af   :  { %8443 = vst [vmem:[#allocation37_spill] sm:$0xff] %v6435_v48  ;;  %8444 = vst [vmem:[#allocation38_spill] sm:$0xff] %v6438_v49  ;;  %v8470_v49 = vld [vmem:[#allocation70_spill] sm:$0xff]  ;;  %v8471_v48 = vld [vmem:[#allocation72_spill] sm:$0xff] }
 0x2b0   :  { %8445 = vst [vmem:[#allocation40_spill] sm:$0xff] %v6441_v62  ;;  %8446 = vst [vmem:[#allocation39_spill] sm:$0xff] %v6444_v45  ;;  %v8456_v62 = vld [vmem:[#allocation55_spill] sm:$0xff]  ;;  %v8469_v45 = vld [vmem:[#allocation69_spill] sm:$0xff] }
 0x2b1   :  { %8447 = vst [vmem:[#allocation41_spill] sm:$0xff] %v6447_v54  ;;  %8448 = vst [vmem:[#allocation42_spill] sm:$0xff] %v6450_v30  ;;  %v2616_v2 = vmul.f32 %v6204_v61, %v8456_v62  ;;  %v8458_v30 = vld [vmem:[#allocation58_spill] sm:$0xff]  ;;  %v8468_v54 = vld [vmem:[#allocation67_spill] sm:$0xff] }
 0x2b2   :  { %8449 = vst [vmem:[#allocation44_spill] sm:$0xff] %v6453_v9  ;;  %8450 = vst [vmem:[#allocation43_spill] sm:$0xff] %v6456_v29  ;;  %v2618_v44 = vmul.f32 %v6204_v61, %v8458_v30  ;;  %v8466_v29 = vld [vmem:[#allocation66_spill] sm:$0xff]  ;;  %v8467_v9 = vld [vmem:[#allocation68_spill] sm:$0xff]  ;;  %v2628_v55 = vmul.f32 %v6204_v61, %v8468_v54  ;;  %v2635_v54 = vmul.f32 %v6204_v61, %v8475_v0 }
 0x2b3   :  { %8451 = vst [vmem:[#allocation45_spill] sm:$0xff] %v6459_v34  ;;  %8452 = vst [vmem:[#allocation46_spill] sm:$0xff] %v6462_v25  ;;  %v8460_v34 = vld [vmem:[#allocation59_spill] sm:$0xff]  ;;  %v8465_v25 = vld [vmem:[#allocation65_spill] sm:$0xff]  ;;  %v2626_v15 = vmul.f32 %v6204_v61, %v8466_v29  ;;  %v2633_v29 = vmul.f32 %v6204_v61, %v8473_v58 }
 0x2b4   :  { %8453 = vst [vmem:[#allocation48_spill] sm:$0xff] %v6465_v33  ;;  %8454 = vst [vmem:[#allocation47_spill] sm:$0xff] %v6468_v42  ;;  %v2620_v47 = vmul.f32 %v6204_v61, %v8460_v34  ;;  %v8462_v42 = vld [vmem:[#allocation62_spill] sm:$0xff]  ;;  %v8464_v33 = vld [vmem:[#allocation63_spill] sm:$0xff]  ;;  %v2625_v30 = vmul.f32 %v6204_v61, %v8465_v25  ;;  %v2627_v34 = vmul.f32 %v6204_v61, %v8467_v9 }
 0x2b5   :  { %8455 = vst [vmem:[#allocation49_spill] sm:$0xff] %v6471_v20  ;;  %v2622_v24 = vmul.f32 %v6204_v61, %v8462_v42  ;;  %v8463_v20 = vld [vmem:[#allocation64_spill] sm:$0xff]  ;;  %v2624_v38 = vmul.f32 %v6204_v61, %v8464_v33  ;;  %v2629_v42 = vmul.f32 %v6204_v61, %v8469_v45  ;;  %v2631_v33 = vmul.f32 %v6204_v61, %v8471_v48  ;;  %v8480_v39 = vld [vmem:[#allocation79_spill] sm:$0xff]  ;;  %v8481_v6 = vld [vmem:[#allocation82_spill] sm:$0xff] }
 0x2b6   :  { %v2623_v62 = vmul.f32 %v6204_v61, %v8463_v20  ;;  %v2630_v20 = vmul.f32 %v6204_v61, %v8470_v49  ;;  %v2632_v25 = vmul.f32 %v6204_v61, %v8472_v35  ;;  %v2634_v9 = vmul.f32 %v6204_v61, %v8474_v52  ;;  %v8482_v63 = vld [vmem:[#allocation85_spill] sm:$0xff] }
 0x2b7   :  { %v2636_v45 = vmul.f32 %v6204_v61, %v8476_v43  ;;  %v2637_v49 = vmul.f32 %v6204_v61, %v8477_v7  ;;  %v2638_v48 = vmul.f32 %v6204_v61, %v8478_v8  ;;  %v2639_v35 = vmul.f32 %v6204_v61, %v8479_v19 }
 0x2b8   :  { %v2640_v58 = vmul.f32 %v6204_v61, %v8480_v39  ;;  %v2641_v52 = vmul.f32 %v6204_v61, %v8481_v6  ;;  %v2642_v0 = vmul.f32 %v6204_v61, %v8482_v63  ;;  %v2643_v43 = vmul.f32 %v6204_v61, %v8483_v28 }
 0x2b9   :  { %v2644_v7 = vmul.f32 %v6204_v61, %v8484_v1  ;;  %v2645_v8 = vmul.f32 %v6204_v61, %v8485_v27  ;;  %v2646_v19 = vmul.f32 %v6204_v61, %v8486_v41  ;;  %v2647_v39 = vmul.f32 %v6204_v61, %v8487_v46 }
 0x2ba   :  { %v2648_v6 = vmul.f32 %v6204_v61, %v8488_v17  ;;  %v2649_v63 = vmul.f32 %v6204_v61, %v8489_v60  ;;  %v2650_v28 = vmul.f32 %v6204_v61, %v8490_v32  ;;  %v2651_v1 = vmul.f32 %v6204_v61, %v8491_v50 }
 0x2bb   :  { %v2652_v27 = vmul.f32 %v6204_v61, %v8492_v59  ;;  %v2653_v41 = vmul.f32 %v6204_v61, %v8493_v23  ;;  %v2654_v46 = vmul.f32 %v6204_v61, %v8494_v12  ;;  %v2655_v17 = vmul.f32 %v6204_v61, %v8495_v21 }
 0x2bc   :  { %v2656_v60 = vmul.f32 %v6204_v61, %v8496_v13  ;;  %v2657_v32 = vmul.f32 %v6204_v61, %v8497_v11  ;;  %v2658_v50 = vmul.f32 %v6204_v61, %v8498_v31  ;;  %v2659_v59 = vmul.f32 %v6204_v61, %v8499_v14  ;;  %v8500_v11 = vld [vmem:[#allocation4_spill] sm:$0xff]  ;;  %v8501_v31 = vld [vmem:[#allocation3_spill] sm:$0xff] }
 0x2bd   :  { %v6612_v23 = vadd.f32 %v6308_v37, %v6304_v26  ;;  %v6616_v12 = vadd.f32 %v6312_v3, %v6304_v26  ;;  %v6620_v13 = vadd.f32 %v6316_v5, %v6304_v26  ;;  %v6624_v21 = vadd.f32 %v8500_v11, %v6304_v26 }
 0x2be   :  { %v6628_v16 = vadd.f32 %v8501_v31, %v6304_v26  ;;  %v6631_v14 = vadd.f32 %v2616_v2, %v6304_v26  ;;  %v6634_v37 = vadd.f32 %v2617_v40, %v6304_v26  ;;  %v6637_v3 = vadd.f32 %v2618_v44, %v6304_v26 }
 0x2bf   :  { %v6640_v5 = vadd.f32 %v2619_v18, %v6304_v26  ;;  %v6643_v61 = vadd.f32 %v2620_v47, %v6304_v26  ;;  %v6646_v11 = vadd.f32 %v2621_v22, %v6304_v26  ;;  %v6649_v31 = vadd.f32 %v2622_v24, %v6304_v26 }
 0x2c0   :  { %v6652_v2 = vadd.f32 %v2623_v62, %v6304_v26  ;;  %v6655_v40 = vadd.f32 %v2624_v38, %v6304_v26  ;;  %v6658_v44 = vadd.f32 %v2625_v30, %v6304_v26  ;;  %v6661_v18 = vadd.f32 %v2626_v15, %v6304_v26 }
 0x2c1   :  { %v6664_v47 = vadd.f32 %v2627_v34, %v6304_v26  ;;  %v6667_v22 = vadd.f32 %v2628_v55, %v6304_v26  ;;  %v6670_v24 = vadd.f32 %v2629_v42, %v6304_v26  ;;  %v6673_v62 = vadd.f32 %v2630_v20, %v6304_v26 }
 0x2c2   :  { %v6676_v38 = vadd.f32 %v2631_v33, %v6304_v26  ;;  %v6679_v30 = vadd.f32 %v2632_v25, %v6304_v26  ;;  %v6682_v15 = vadd.f32 %v2633_v29, %v6304_v26  ;;  %v6685_v34 = vadd.f32 %v2634_v9, %v6304_v26 }
 0x2c3   :  { %v6688_v55 = vadd.f32 %v2635_v54, %v6304_v26  ;;  %v6691_v42 = vadd.f32 %v2636_v45, %v6304_v26  ;;  %v6694_v20 = vadd.f32 %v2637_v49, %v6304_v26  ;;  %v6697_v33 = vadd.f32 %v2638_v48, %v6304_v26 }
 0x2c4   :  { %v6700_v25 = vadd.f32 %v2639_v35, %v6304_v26  ;;  %v6703_v29 = vadd.f32 %v2640_v58, %v6304_v26  ;;  %v6706_v9 = vadd.f32 %v2641_v52, %v6304_v26  ;;  %v6709_v54 = vadd.f32 %v2642_v0, %v6304_v26 }
 0x2c5   :  { %v6712_v45 = vadd.f32 %v2643_v43, %v6304_v26  ;;  %v6715_v49 = vadd.f32 %v2644_v7, %v6304_v26  ;;  %v6718_v48 = vadd.f32 %v2645_v8, %v6304_v26  ;;  %v6721_v35 = vadd.f32 %v2646_v19, %v6304_v26 }
 0x2c6   :  { %v6724_v58 = vadd.f32 %v2647_v39, %v6304_v26  ;;  %v6727_v52 = vadd.f32 %v2648_v6, %v6304_v26  ;;  %v6730_v0 = vadd.f32 %v2649_v63, %v6304_v26  ;;  %v6733_v43 = vadd.f32 %v2650_v28, %v6304_v26 }
 0x2c7   :  { %v6736_v7 = vadd.f32 %v2651_v1, %v6304_v26  ;;  %v6739_v8 = vadd.f32 %v2652_v27, %v6304_v26  ;;  %v6742_v19 = vadd.f32 %v2653_v41, %v6304_v26  ;;  %v6745_v39 = vadd.f32 %v2654_v46, %v6304_v26 }
 0x2c8   :  { %v6748_v6 = vadd.f32 %v2655_v17, %v6304_v26  ;;  %v6751_v63 = vadd.f32 %v2656_v60, %v6304_v26  ;;  %v6754_v28 = vadd.f32 %v2657_v32, %v6304_v26  ;;  %v6757_v1 = vadd.f32 %v2658_v50, %v6304_v26 }
 0x2c9   :  { %v6760_v27 = vadd.f32 %v2659_v59, %v6304_v26  ;;  %v2709_v41 = vmax.f32 %v6612_v23, 0.0  ;;  %v2710_v46 = vmax.f32 %v6616_v12, 0.0  ;;  %v2711_v10 = vmax.f32 %v6620_v13, 0.0 }
 0x2ca   :  { %v2712_v17 = vmax.f32 %v6624_v21, 0.0  ;;  %v2713_v60 = vmax.f32 %v6628_v16, 0.0  ;;  %v2714_v53 = vmax.f32 %v6631_v14, 0.0  ;;  %v2715_v32 = vmax.f32 %v6634_v37, 0.0 }
 0x2cb   :  { %v2716_v50 = vmax.f32 %v6637_v3, 0.0  ;;  %v2717_v36 = vmax.f32 %v6640_v5, 0.0  ;;  %v2718_v59 = vmax.f32 %v6643_v61, 0.0  ;;  %v2719_v23 = vmax.f32 %v6646_v11, 0.0 }
 0x2cc   :  { %v2720_v12 = vmax.f32 %v6649_v31, 0.0  ;;  %v2721_v13 = vmax.f32 %v6652_v2, 0.0  ;;  %v2722_v21 = vmax.f32 %v6655_v40, 0.0  ;;  %v2723_v16 = vmax.f32 %v6658_v44, 0.0 }
 0x2cd   :  { %v2724_v14 = vmax.f32 %v6661_v18, 0.0  ;;  %v2725_v37 = vmax.f32 %v6664_v47, 0.0  ;;  %v2726_v3 = vmax.f32 %v6667_v22, 0.0  ;;  %v2727_v5 = vmax.f32 %v6670_v24, 0.0 }
 0x2ce   :  { %v2728_v61 = vmax.f32 %v6673_v62, 0.0  ;;  %v2729_v11 = vmax.f32 %v6676_v38, 0.0  ;;  %v2730_v31 = vmax.f32 %v6679_v30, 0.0  ;;  %v2731_v2 = vmax.f32 %v6682_v15, 0.0 }
 0x2cf   :  { %v2732_v40 = vmax.f32 %v6685_v34, 0.0  ;;  %v2733_v44 = vmax.f32 %v6688_v55, 0.0  ;;  %v2734_v18 = vmax.f32 %v6691_v42, 0.0  ;;  %v2735_v47 = vmax.f32 %v6694_v20, 0.0 }
 0x2d0   :  { %v2736_v22 = vmax.f32 %v6697_v33, 0.0  ;;  %v2737_v24 = vmax.f32 %v6700_v25, 0.0  ;;  %v2738_v62 = vmax.f32 %v6703_v29, 0.0  ;;  %v2739_v38 = vmax.f32 %v6706_v9, 0.0 }
 0x2d1   :  { %v2740_v30 = vmax.f32 %v6709_v54, 0.0  ;;  %v2741_v15 = vmax.f32 %v6712_v45, 0.0  ;;  %v2742_v34 = vmax.f32 %v6715_v49, 0.0  ;;  %v2743_v55 = vmax.f32 %v6718_v48, 0.0 }
 0x2d2   :  { %v2744_v42 = vmax.f32 %v6721_v35, 0.0  ;;  %v2745_v20 = vmax.f32 %v6724_v58, 0.0  ;;  %v2746_v33 = vmax.f32 %v6727_v52, 0.0  ;;  %v2747_v25 = vmax.f32 %v6730_v0, 0.0 }
 0x2d3   :  { %v2748_v29 = vmax.f32 %v6733_v43, 0.0  ;;  %v2749_v9 = vmax.f32 %v6736_v7, 0.0  ;;  %v2750_v54 = vmax.f32 %v6739_v8, 0.0  ;;  %v2751_v45 = vmax.f32 %v6742_v19, 0.0 }
 0x2d4   :  { %v2752_v49 = vmax.f32 %v6745_v39, 0.0  ;;  %v2753_v48 = vmax.f32 %v6748_v6, 0.0  ;;  %v2754_v35 = vmax.f32 %v6751_v63, 0.0  ;;  %v2755_v58 = vmax.f32 %v6754_v28, 0.0  ;;  %v8507_v28 = vld [vmem:[#allocation5_spill] sm:$0xff] }
 0x2d5   :  { %v2756_v52 = vmax.f32 %v6757_v1, 0.0  ;;  %v2757_v0 = vmax.f32 %v6760_v27, 0.0  ;;  %v8502_v43 = vmax.f32 %v6327_v51, 0.0  ;;  %v8504_v7 = vmax.f32 %v6330_v57, 0.0  ;;  %v8509_v51 = vld [vmem:[#allocation6_spill] sm:$0xff] }
 0x2d6   :  { %v8505_v19 = vmax.f32 %v6333_v56, 0.0  ;;  %v8506_v6 = vmax.f32 %v6336_v4, 0.0  ;;  %v8508_v1 = vmax.f32 %v8507_v28, 0.0 }
 0x2d7   :  { %v6813_v26 = vmax.f32 %v8502_v43, %v2709_v41  ;;  %v6817_v8 = vmax.f32 %v8504_v7, %v2710_v46  ;;  %v8510_v41 = vmax.f32 %v8509_v51, 0.0  ;;  %v8515_v7 = vld [vmem:[#allocation7_spill] sm:$0xff] }
 0x2d8   :  { %v6821_v39 = vmax.f32 %v8505_v19, %v2711_v10  ;;  %v6825_v63 = vmax.f32 %v8506_v6, %v2712_v17  ;;  %v6829_v27 = vmax.f32 %v8508_v1, %v2713_v60  ;;  %v8516_v56 = vmax.f32 %v8515_v7, 0.0  ;;  %v8518_v19 = vld [vmem:[#allocation9_spill] sm:$0xff]  ;;  %v8521_v6 = vld [vmem:[#allocation10_spill] sm:$0xff]  ;;  %v8524_v1 = vld [vmem:[#allocation12_spill] sm:$0xff] }
 0x2d9   :  { %8503 = vst [vmem:[#allocation50_spill] sm:$0xff] %v6813_v26  ;;  %v6833_v43 = vmax.f32 %v8510_v41, %v2714_v53  ;;  %v8512_v26 = vld [vmem:[#allocation8_spill] sm:$0xff]  ;;  %v8519_v4 = vmax.f32 %v8518_v19, 0.0  ;;  %v8522_v28 = vmax.f32 %v8521_v6, 0.0  ;;  %v8525_v51 = vmax.f32 %v8524_v1, 0.0  ;;  %v8527_v41 = vld [vmem:[#allocation11_spill] sm:$0xff] }
 0x2da   :  { %v8513_v57 = vmax.f32 %v8512_v26, 0.0  ;;  %v6841_v10 = vmax.f32 %v8516_v56, %v2716_v50  ;;  %v8528_v26 = vmax.f32 %v8527_v41, 0.0  ;;  %v8533_v56 = vld [vmem:[#allocation14_spill] sm:$0xff] }
 0x2db   :  { %8511 = vst [vmem:[#allocation52_spill] sm:$0xff] %v6833_v43  ;;  %v6845_v17 = vmax.f32 %v8519_v4, %v2717_v36  ;;  %v6849_v60 = vmax.f32 %v8522_v28, %v2718_v59  ;;  %v6853_v53 = vmax.f32 %v8525_v51, %v2719_v23  ;;  %v8534_v19 = vmax.f32 %v8533_v56, 0.0  ;;  %v8536_v4 = vld [vmem:[#allocation16_spill] sm:$0xff]  ;;  %v8539_v28 = vld [vmem:[#allocation15_spill] sm:$0xff]  ;;  %v8542_v51 = vld [vmem:[#allocation17_spill] sm:$0xff] }
 0x2dc   :  { %v6837_v46 = vmax.f32 %v8513_v57, %v2715_v32  ;;  %8517 = vst [vmem:[#allocation53_spill] sm:$0xff] %v6841_v10  ;;  %v6857_v32 = vmax.f32 %v8528_v26, %v2720_v12  ;;  %v8530_v57 = vld [vmem:[#allocation13_spill] sm:$0xff]  ;;  %v8537_v6 = vmax.f32 %v8536_v4, 0.0  ;;  %v8540_v1 = vmax.f32 %v8539_v28, 0.0  ;;  %v8545_v26 = vld [vmem:[#allocation18_spill] sm:$0xff] }
 0x2dd   :  { %8520 = vst [vmem:[#allocation54_spill] sm:$0xff] %v6845_v17  ;;  %8523 = vst [vmem:[#allocation56_spill] sm:$0xff] %v6849_v60  ;;  %v8531_v7 = vmax.f32 %v8530_v57, 0.0  ;;  %v6865_v36 = vmax.f32 %v8534_v19, %v2722_v21  ;;  %v8543_v41 = vmax.f32 %v8542_v51, 0.0  ;;  %v8546_v57 = vmax.f32 %v8545_v26, 0.0  ;;  %v8551_v19 = vld [vmem:[#allocation19_spill] sm:$0xff] }
 0x2de   :  { %8514 = vst [vmem:[#allocation51_spill] sm:$0xff] %v6837_v46  ;;  %8526 = vst [vmem:[#allocation55_spill] sm:$0xff] %v6853_v53  ;;  %v6869_v59 = vmax.f32 %v8537_v6, %v2723_v16  ;;  %v6873_v23 = vmax.f32 %v8540_v1, %v2724_v14  ;;  %v8552_v4 = vmax.f32 %v8551_v19, 0.0  ;;  %v8554_v6 = vld [vmem:[#allocation21_spill] sm:$0xff]  ;;  %v8557_v1 = vld [vmem:[#allocation22_spill] sm:$0xff] }
 0x2df   :  { %8529 = vst [vmem:[#allocation57_spill] sm:$0xff] %v6857_v32  ;;  %v6861_v50 = vmax.f32 %v8531_v7, %v2721_v13  ;;  %8535 = vst [vmem:[#allocation60_spill] sm:$0xff] %v6865_v36  ;;  %v6877_v12 = vmax.f32 %v8543_v41, %v2725_v37  ;;  %v6881_v13 = vmax.f32 %v8546_v57, %v2726_v3  ;;  %v8548_v7 = vld [vmem:[#allocation20_spill] sm:$0xff]  ;;  %v8555_v28 = vmax.f32 %v8554_v6, 0.0  ;;  %v8563_v57 = vld [vmem:[#allocation23_spill] sm:$0xff] }
 0x2e0   :  { %8538 = vst [vmem:[#allocation59_spill] sm:$0xff] %v6869_v59  ;;  %8541 = vst [vmem:[#allocation61_spill] sm:$0xff] %v6873_v23  ;;  %v8549_v56 = vmax.f32 %v8548_v7, 0.0  ;;  %v6889_v16 = vmax.f32 %v8552_v4, %v2728_v61  ;;  %v8558_v51 = vmax.f32 %v8557_v1, 0.0  ;;  %v8560_v41 = vld [vmem:[#allocation24_spill] sm:$0xff]  ;;  %v8564_v7 = vmax.f32 %v8563_v57, 0.0 }
 0x2e1   :  { %8532 = vst [vmem:[#allocation58_spill] sm:$0xff] %v6861_v50  ;;  %8544 = vst [vmem:[#allocation62_spill] sm:$0xff] %v6877_v12  ;;  %v6893_v14 = vmax.f32 %v8555_v28, %v2729_v11  ;;  %v8561_v26 = vmax.f32 %v8560_v41, 0.0  ;;  %v8569_v4 = vld [vmem:[#allocation26_spill] sm:$0xff]  ;;  %v8572_v28 = vld [vmem:[#allocation28_spill] sm:$0xff] }
 0x2e2   :  { %8547 = vst [vmem:[#allocation64_spill] sm:$0xff] %v6881_v13  ;;  %v6885_v21 = vmax.f32 %v8549_v56, %v2727_v5  ;;  %8553 = vst [vmem:[#allocation65_spill] sm:$0xff] %v6889_v16  ;;  %v6897_v37 = vmax.f32 %v8558_v51, %v2730_v31  ;;  %v6905_v5 = vmax.f32 %v8564_v7, %v2732_v40  ;;  %v8566_v56 = vld [vmem:[#allocation25_spill] sm:$0xff]  ;;  %v8570_v6 = vmax.f32 %v8569_v4, 0.0  ;;  %v8575_v51 = vld [vmem:[#allocation27_spill] sm:$0xff] }
 0x2e3   :  { %8556 = vst [vmem:[#allocation66_spill] sm:$0xff] %v6893_v14  ;;  %v6901_v3 = vmax.f32 %v8561_v26, %v2731_v2  ;;  %v8567_v19 = vmax.f32 %v8566_v56, 0.0  ;;  %v8573_v1 = vmax.f32 %v8572_v28, 0.0  ;;  %v8576_v41 = vmax.f32 %v8575_v51, 0.0  ;;  %v8578_v26 = vld [vmem:[#allocation29_spill] sm:$0xff]  ;;  %v8581_v7 = vld [vmem:[#allocation30_spill] sm:$0xff] }
 0x2e4   :  { %8550 = vst [vmem:[#allocation63_spill] sm:$0xff] %v6885_v21  ;;  %8559 = vst [vmem:[#allocation68_spill] sm:$0xff] %v6897_v37  ;;  %v6913_v11 = vmax.f32 %v8570_v6, %v2734_v18  ;;  %v8579_v57 = vmax.f32 %v8578_v26, 0.0  ;;  %v8582_v56 = vmax.f32 %v8581_v7, 0.0  ;;  %v8587_v6 = vld [vmem:[#allocation31_spill] sm:$0xff]  ;;  %v8677_v37 = vld [vmem:[#allocation154_spill] sm:$0xff] }
 0x2e5   :  { %8562 = vst [vmem:[#allocation67_spill] sm:$0xff] %v6901_v3  ;;  %8565 = vst [vmem:[#allocation69_spill] sm:$0xff] %v6905_v5  ;;  %v6909_v61 = vmax.f32 %v8567_v19, %v2733_v44  ;;  %v6917_v31 = vmax.f32 %v8573_v1, %v2735_v47  ;;  %v6921_v2 = vmax.f32 %v8576_v41, %v2736_v22  ;;  %v8584_v19 = vld [vmem:[#allocation32_spill] sm:$0xff]  ;;  %v8588_v28 = vmax.f32 %v8587_v6, 0.0  ;;  %v8590_v1 = vld [vmem:[#allocation33_spill] sm:$0xff] }
 0x2e6   :  { %8571 = vst [vmem:[#allocation72_spill] sm:$0xff] %v6913_v11  ;;  %v6925_v40 = vmax.f32 %v8579_v57, %v2737_v24  ;;  %v6929_v44 = vmax.f32 %v8582_v56, %v2738_v62  ;;  %v8585_v4 = vmax.f32 %v8584_v19, 0.0  ;;  %v8591_v51 = vmax.f32 %v8590_v1, 0.0  ;;  %v8593_v41 = vld [vmem:[#allocation34_spill] sm:$0xff]  ;;  %v8596_v57 = vld [vmem:[#allocation36_spill] sm:$0xff]  ;;  %v8599_v56 = vld [vmem:[#allocation35_spill] sm:$0xff] }
 0x2e7   :  { %8568 = vst [vmem:[#allocation70_spill] sm:$0xff] %v6909_v61  ;;  %8574 = vst [vmem:[#allocation71_spill] sm:$0xff] %v6917_v31  ;;  %v6937_v47 = vmax.f32 %v8588_v28, %v2740_v30  ;;  %v8594_v26 = vmax.f32 %v8593_v41, 0.0  ;;  %v8597_v7 = vmax.f32 %v8596_v57, 0.0  ;;  %v8600_v19 = vmax.f32 %v8599_v56, 0.0  ;;  %v8605_v28 = vld [vmem:[#allocation38_spill] sm:$0xff] }
 0x2e8   :  { %8577 = vst [vmem:[#allocation73_spill] sm:$0xff] %v6921_v2  ;;  %8580 = vst [vmem:[#allocation74_spill] sm:$0xff] %v6925_v40  ;;  %v6933_v18 = vmax.f32 %v8585_v4, %v2739_v38  ;;  %v6941_v22 = vmax.f32 %v8591_v51, %v2741_v15  ;;  %v8602_v4 = vld [vmem:[#allocation37_spill] sm:$0xff]  ;;  %v8606_v1 = vmax.f32 %v8605_v28, 0.0  ;;  %v8608_v51 = vld [vmem:[#allocation40_spill] sm:$0xff] }
 0x2e9   :  { %8583 = vst [vmem:[#allocation76_spill] sm:$0xff] %v6929_v44  ;;  %8589 = vst [vmem:[#allocation77_spill] sm:$0xff] %v6937_v47  ;;  %v6945_v24 = vmax.f32 %v8594_v26, %v2742_v34  ;;  %v6949_v62 = vmax.f32 %v8597_v7, %v2743_v55  ;;  %v6953_v38 = vmax.f32 %v8600_v19, %v2744_v42  ;;  %v8603_v6 = vmax.f32 %v8602_v4, 0.0  ;;  %v8611_v26 = vld [vmem:[#allocation39_spill] sm:$0xff]  ;;  %v8614_v7 = vld [vmem:[#allocation41_spill] sm:$0xff] }
 0x2ea   :  { %8586 = vst [vmem:[#allocation75_spill] sm:$0xff] %v6933_v18  ;;  %8592 = vst [vmem:[#allocation78_spill] sm:$0xff] %v6941_v22  ;;  %v6961_v15 = vmax.f32 %v8606_v1, %v2746_v33  ;;  %v8609_v41 = vmax.f32 %v8608_v51, 0.0  ;;  %v8612_v57 = vmax.f32 %v8611_v26, 0.0  ;;  %v8615_v56 = vmax.f32 %v8614_v7, 0.0  ;;  %v8617_v19 = vld [vmem:[#allocation42_spill] sm:$0xff] }
 0x2eb   :  { %8595 = vst [vmem:[#allocation80_spill] sm:$0xff] %v6945_v24  ;;  %8598 = vst [vmem:[#allocation79_spill] sm:$0xff] %v6949_v62  ;;  %v6957_v30 = vmax.f32 %v8603_v6, %v2745_v20  ;;  %v8618_v4 = vmax.f32 %v8617_v19, 0.0  ;;  %v8620_v6 = vld [vmem:[#allocation44_spill] sm:$0xff]  ;;  %v8623_v1 = vld [vmem:[#allocation43_spill] sm:$0xff] }
 0x2ec   :  { %8601 = vst [vmem:[#allocation82_spill] sm:$0xff] %v6953_v38  ;;  %8607 = vst [vmem:[#allocation87_spill] sm:$0xff] %v6961_v15  ;;  %v6965_v34 = vmax.f32 %v8609_v41, %v2747_v25  ;;  %v6969_v55 = vmax.f32 %v8612_v57, %v2748_v29  ;;  %v6973_v42 = vmax.f32 %v8615_v56, %v2749_v9  ;;  %v8621_v28 = vmax.f32 %v8620_v6, 0.0  ;;  %v8626_v41 = vld [vmem:[#allocation45_spill] sm:$0xff]  ;;  %v8629_v57 = vld [vmem:[#allocation46_spill] sm:$0xff] }
 0x2ed   :  { %8604 = vst [vmem:[#allocation85_spill] sm:$0xff] %v6957_v30  ;;  %v6977_v20 = vmax.f32 %v8618_v4, %v2750_v54  ;;  %v8624_v51 = vmax.f32 %v8623_v1, 0.0  ;;  %v8627_v26 = vmax.f32 %v8626_v41, 0.0  ;;  %v8630_v7 = vmax.f32 %v8629_v57, 0.0  ;;  %v8632_v56 = vld [vmem:[#allocation48_spill] sm:$0xff]  ;;  %v8635_v4 = vld [vmem:[#allocation47_spill] sm:$0xff] }
 0x2ee   :  { %8610 = vst [vmem:[#allocation86_spill] sm:$0xff] %v6965_v34  ;;  %8613 = vst [vmem:[#allocation89_spill] sm:$0xff] %v6969_v55  ;;  %v6981_v33 = vmax.f32 %v8621_v28, %v2751_v45  ;;  %v8633_v19 = vmax.f32 %v8632_v56, 0.0  ;;  %v8636_v6 = vmax.f32 %v8635_v4, 0.0  ;;  %v8638_v28 = vld [vmem:[#allocation49_spill] sm:$0xff]  ;;  %v8642_v41 = vld [vmem:[#allocation198_spill] sm:$0xff] }
 0x2ef   :  { %8616 = vst [vmem:[#allocation93_spill] sm:$0xff] %v6973_v42  ;;  %8619 = vst [vmem:[#allocation95_spill] sm:$0xff] %v6977_v20  ;;  %v6985_v25 = vmax.f32 %v8624_v51, %v2752_v49  ;;  %v6989_v29 = vmax.f32 %v8627_v26, %v2753_v48  ;;  %v6993_v9 = vmax.f32 %v8630_v7, %v2754_v35  ;;  %v8639_v1 = vmax.f32 %v8638_v28, 0.0  ;;  %v8641_v51 = vld [vmem:[#allocation117_spill] sm:$0xff]  ;;  %v8643_v26 = vld [vmem:[#allocation120_spill] sm:$0xff] }
 0x2f0   :  { %8622 = vst [vmem:[#allocation94_spill] sm:$0xff] %v6981_v33  ;;  %v6997_v54 = vmax.f32 %v8633_v19, %v2755_v58  ;;  %v7001_v45 = vmax.f32 %v8636_v6, %v2756_v52  ;;  %v2807_v48 = vmul.f32 %v8642_v41, %v8641_v51  ;;  %v2808_v57 = vmul.f32 %v8642_v41, %v8643_v26  ;;  %v8644_v35 = vld [vmem:[#allocation119_spill] sm:$0xff]  ;;  %v8645_v56 = vld [vmem:[#allocation122_spill] sm:$0xff]  ;;  %v8647_v4 = vld [vmem:[#allocation124_spill] sm:$0xff] }
 0x2f1   :  { %8625 = vst [vmem:[#allocation97_spill] sm:$0xff] %v6985_v25  ;;  %8628 = vst [vmem:[#allocation101_spill] sm:$0xff] %v6989_v29  ;;  %v7005_v49 = vmax.f32 %v8639_v1, %v2757_v0  ;;  %v2809_v7 = vmul.f32 %v8642_v41, %v8644_v35  ;;  %v2810_v58 = vmul.f32 %v8642_v41, %v8645_v56  ;;  %v8646_v19 = vld [vmem:[#allocation123_spill] sm:$0xff]  ;;  %v8648_v0 = vld [vmem:[#allocation125_spill] sm:$0xff] }
 0x2f2   :  { %8631 = vst [vmem:[#allocation103_spill] sm:$0xff] %v6993_v9  ;;  %8634 = vst [vmem:[#allocation102_spill] sm:$0xff] %v6997_v54  ;;  %v2811_v52 = vmul.f32 %v8642_v41, %v8646_v19  ;;  %v2812_v6 = vmul.f32 %v8642_v41, %v8647_v4  ;;  %v2813_v28 = vmul.f32 %v8642_v41, %v8648_v0  ;;  %v8649_v1 = vld [vmem:[#allocation126_spill] sm:$0xff]  ;;  %v8652_v54 = vld [vmem:[#allocation129_spill] sm:$0xff] }
 0x2f3   :  { %8637 = vst [vmem:[#allocation105_spill] sm:$0xff] %v7001_v45  ;;  %8640 = vst [vmem:[#allocation109_spill] sm:$0xff] %v7005_v49  ;;  %v2814_v51 = vmul.f32 %v8642_v41, %v8649_v1  ;;  %v8650_v49 = vld [vmem:[#allocation127_spill] sm:$0xff]  ;;  %v8651_v45 = vld [vmem:[#allocation128_spill] sm:$0xff]  ;;  %v2817_v56 = vmul.f32 %v8642_v41, %v8652_v54 }
 0x2f4   :  { %v2815_v26 = vmul.f32 %v8642_v41, %v8650_v49  ;;  %v2816_v35 = vmul.f32 %v8642_v41, %v8651_v45  ;;  %v8653_v9 = vld [vmem:[#allocation130_spill] sm:$0xff]  ;;  %v8654_v29 = vld [vmem:[#allocation131_spill] sm:$0xff]  ;;  %v8655_v25 = vld [vmem:[#allocation132_spill] sm:$0xff] }
 0x2f5   :  { %v2818_v19 = vmul.f32 %v8642_v41, %v8653_v9  ;;  %v2819_v4 = vmul.f32 %v8642_v41, %v8654_v29  ;;  %v2820_v0 = vmul.f32 %v8642_v41, %v8655_v25  ;;  %v8656_v33 = vld [vmem:[#allocation133_spill] sm:$0xff]  ;;  %v8657_v20 = vld [vmem:[#allocation134_spill] sm:$0xff]  ;;  %v8658_v42 = vld [vmem:[#allocation135_spill] sm:$0xff] }
 0x2f6   :  { %v2821_v1 = vmul.f32 %v8642_v41, %v8656_v33  ;;  %v2822_v49 = vmul.f32 %v8642_v41, %v8657_v20  ;;  %v2823_v45 = vmul.f32 %v8642_v41, %v8658_v42  ;;  %v8659_v55 = vld [vmem:[#allocation136_spill] sm:$0xff]  ;;  %v8660_v34 = vld [vmem:[#allocation137_spill] sm:$0xff]  ;;  %v8661_v15 = vld [vmem:[#allocation138_spill] sm:$0xff] }
 0x2f7   :  { %v2824_v54 = vmul.f32 %v8642_v41, %v8659_v55  ;;  %v2825_v9 = vmul.f32 %v8642_v41, %v8660_v34  ;;  %v2826_v29 = vmul.f32 %v8642_v41, %v8661_v15  ;;  %v8662_v30 = vld [vmem:[#allocation139_spill] sm:$0xff]  ;;  %v8663_v38 = vld [vmem:[#allocation140_spill] sm:$0xff]  ;;  %v8664_v62 = vld [vmem:[#allocation141_spill] sm:$0xff] }
 0x2f8   :  { %v2827_v25 = vmul.f32 %v8642_v41, %v8662_v30  ;;  %v2828_v33 = vmul.f32 %v8642_v41, %v8663_v38  ;;  %v2829_v20 = vmul.f32 %v8642_v41, %v8664_v62  ;;  %v8665_v24 = vld [vmem:[#allocation142_spill] sm:$0xff]  ;;  %v8666_v22 = vld [vmem:[#allocation143_spill] sm:$0xff]  ;;  %v8667_v47 = vld [vmem:[#allocation144_spill] sm:$0xff] }
 0x2f9   :  { %v2830_v42 = vmul.f32 %v8642_v41, %v8665_v24  ;;  %v2831_v55 = vmul.f32 %v8642_v41, %v8666_v22  ;;  %v2832_v34 = vmul.f32 %v8642_v41, %v8667_v47  ;;  %v8668_v18 = vld [vmem:[#allocation145_spill] sm:$0xff]  ;;  %v8669_v44 = vld [vmem:[#allocation146_spill] sm:$0xff]  ;;  %v8670_v40 = vld [vmem:[#allocation147_spill] sm:$0xff] }
 0x2fa   :  { %v2833_v15 = vmul.f32 %v8642_v41, %v8668_v18  ;;  %v2834_v30 = vmul.f32 %v8642_v41, %v8669_v44  ;;  %v2835_v38 = vmul.f32 %v8642_v41, %v8670_v40  ;;  %v8671_v2 = vld [vmem:[#allocation148_spill] sm:$0xff]  ;;  %v8672_v31 = vld [vmem:[#allocation149_spill] sm:$0xff]  ;;  %v8673_v11 = vld [vmem:[#allocation150_spill] sm:$0xff]  ;;  %v2842_v40 = vmul.f32 %v8642_v41, %v8677_v37 }
 0x2fb   :  { %v2836_v62 = vmul.f32 %v8642_v41, %v8671_v2  ;;  %v2837_v24 = vmul.f32 %v8642_v41, %v8672_v31  ;;  %v2838_v22 = vmul.f32 %v8642_v41, %v8673_v11  ;;  %v8674_v61 = vld [vmem:[#allocation151_spill] sm:$0xff]  ;;  %v8675_v5 = vld [vmem:[#allocation152_spill] sm:$0xff]  ;;  %v8676_v3 = vld [vmem:[#allocation153_spill] sm:$0xff] }
 0x2fc   :  { %v2839_v47 = vmul.f32 %v8642_v41, %v8674_v61  ;;  %v2840_v18 = vmul.f32 %v8642_v41, %v8675_v5  ;;  %v2841_v44 = vmul.f32 %v8642_v41, %v8676_v3  ;;  %v8678_v14 = vld [vmem:[#allocation155_spill] sm:$0xff]  ;;  %v8679_v16 = vld [vmem:[#allocation156_spill] sm:$0xff]  ;;  %v8680_v21 = vld [vmem:[#allocation157_spill] sm:$0xff] }
 0x2fd   :  { %v2843_v2 = vmul.f32 %v8642_v41, %v8678_v14  ;;  %v2844_v31 = vmul.f32 %v8642_v41, %v8679_v16  ;;  %v2845_v11 = vmul.f32 %v8642_v41, %v8680_v21  ;;  %v8681_v13 = vld [vmem:[#allocation158_spill] sm:$0xff]  ;;  %v8682_v12 = vld [vmem:[#allocation159_spill] sm:$0xff]  ;;  %v8683_v23 = vld [vmem:[#allocation160_spill] sm:$0xff] }
 0x2fe   :  { %v2846_v61 = vmul.f32 %v8642_v41, %v8681_v13  ;;  %v2847_v5 = vmul.f32 %v8642_v41, %v8682_v12  ;;  %v2848_v3 = vmul.f32 %v8642_v41, %v8683_v23  ;;  %v8684_v59 = vld [vmem:[#allocation161_spill] sm:$0xff]  ;;  %v8685_v36 = vld [vmem:[#allocation162_spill] sm:$0xff]  ;;  %v8686_v50 = vld [vmem:[#allocation163_spill] sm:$0xff] }
 0x2ff   :  { %v2849_v37 = vmul.f32 %v8642_v41, %v8684_v59  ;;  %v2850_v14 = vmul.f32 %v8642_v41, %v8685_v36  ;;  %v2851_v16 = vmul.f32 %v8642_v41, %v8686_v50  ;;  %v8687_v32 = vld [vmem:[#allocation164_spill] sm:$0xff]  ;;  %v8688_v53 = vld [vmem:[#allocation165_spill] sm:$0xff]  ;;  %v8691_v10 = vld [vmem:[#allocation2_spill] sm:$0xff] }
 0x300   :  { %v2852_v21 = vmul.f32 %v8642_v41, %v8687_v32  ;;  %v2853_v13 = vmul.f32 %v8642_v41, %v8688_v53  ;;  %v8689_v60 = vld [vmem:[#allocation84_spill] sm:$0xff]  ;;  %v8690_v17 = vld [vmem:[#allocation81_spill] sm:$0xff]  ;;  %v7106_v59 = vadd.f32 %v2807_v48, %v8691_v10  ;;  %v7109_v36 = vadd.f32 %v2808_v57, %v8691_v10 }
 0x301   :  { %v2854_v12 = vmul.f32 %v8642_v41, %v8689_v60  ;;  %v2855_v23 = vmul.f32 %v8642_v41, %v8690_v17  ;;  %v7112_v50 = vadd.f32 %v2809_v7, %v8691_v10  ;;  %v7115_v32 = vadd.f32 %v2810_v58, %v8691_v10 }
 0x302   :  { %v7118_v53 = vadd.f32 %v2811_v52, %v8691_v10  ;;  %v7121_v60 = vadd.f32 %v2812_v6, %v8691_v10  ;;  %v7124_v17 = vadd.f32 %v2813_v28, %v8691_v10  ;;  %v7127_v48 = vadd.f32 %v2814_v51, %v8691_v10 }
 0x303   :  { %v7130_v57 = vadd.f32 %v2815_v26, %v8691_v10  ;;  %v7133_v7 = vadd.f32 %v2816_v35, %v8691_v10  ;;  %v7136_v58 = vadd.f32 %v2817_v56, %v8691_v10  ;;  %v7139_v52 = vadd.f32 %v2818_v19, %v8691_v10 }
 0x304   :  { %v7142_v6 = vadd.f32 %v2819_v4, %v8691_v10  ;;  %v7145_v28 = vadd.f32 %v2820_v0, %v8691_v10  ;;  %v7148_v51 = vadd.f32 %v2821_v1, %v8691_v10  ;;  %v7151_v26 = vadd.f32 %v2822_v49, %v8691_v10 }
 0x305   :  { %v7154_v35 = vadd.f32 %v2823_v45, %v8691_v10  ;;  %v7157_v56 = vadd.f32 %v2824_v54, %v8691_v10  ;;  %v7160_v19 = vadd.f32 %v2825_v9, %v8691_v10  ;;  %v7163_v4 = vadd.f32 %v2826_v29, %v8691_v10 }
 0x306   :  { %v7166_v0 = vadd.f32 %v2827_v25, %v8691_v10  ;;  %v7169_v1 = vadd.f32 %v2828_v33, %v8691_v10  ;;  %v7172_v49 = vadd.f32 %v2829_v20, %v8691_v10  ;;  %v7175_v45 = vadd.f32 %v2830_v42, %v8691_v10 }
 0x307   :  { %v7178_v54 = vadd.f32 %v2831_v55, %v8691_v10  ;;  %v7181_v9 = vadd.f32 %v2832_v34, %v8691_v10  ;;  %v7184_v29 = vadd.f32 %v2833_v15, %v8691_v10  ;;  %v7187_v25 = vadd.f32 %v2834_v30, %v8691_v10 }
 0x308   :  { %v7190_v33 = vadd.f32 %v2835_v38, %v8691_v10  ;;  %v7193_v20 = vadd.f32 %v2836_v62, %v8691_v10  ;;  %v7196_v42 = vadd.f32 %v2837_v24, %v8691_v10  ;;  %v7199_v55 = vadd.f32 %v2838_v22, %v8691_v10 }
 0x309   :  { %v7202_v34 = vadd.f32 %v2839_v47, %v8691_v10  ;;  %v7205_v15 = vadd.f32 %v2840_v18, %v8691_v10  ;;  %v7208_v30 = vadd.f32 %v2841_v44, %v8691_v10  ;;  %v7211_v38 = vadd.f32 %v2842_v40, %v8691_v10 }
 0x30a   :  { %v7214_v62 = vadd.f32 %v2843_v2, %v8691_v10  ;;  %v7217_v24 = vadd.f32 %v2844_v31, %v8691_v10  ;;  %v7220_v22 = vadd.f32 %v2845_v11, %v8691_v10  ;;  %v7223_v47 = vadd.f32 %v2846_v61, %v8691_v10 }
 0x30b   :  { %v7226_v18 = vadd.f32 %v2847_v5, %v8691_v10  ;;  %v7229_v44 = vadd.f32 %v2848_v3, %v8691_v10  ;;  %v7232_v40 = vadd.f32 %v2849_v37, %v8691_v10  ;;  %v7235_v2 = vadd.f32 %v2850_v14, %v8691_v10 }
 0x30c   :  { %v7238_v31 = vadd.f32 %v2851_v16, %v8691_v10  ;;  %v7241_v11 = vadd.f32 %v2852_v21, %v8691_v10  ;;  %v7244_v61 = vadd.f32 %v2853_v13, %v8691_v10  ;;  %v7247_v5 = vadd.f32 %v2854_v12, %v8691_v10 }
 0x30d   :  { %v7250_v3 = vadd.f32 %v2855_v23, %v8691_v10  ;;  %v2905_v37 = vmax.f32 %v7106_v59, 0.0  ;;  %v2906_v14 = vmax.f32 %v7109_v36, 0.0  ;;  %v2907_v41 = vmax.f32 %v7112_v50, 0.0  ;;  %v8692_v10 = vld [vmem:[#allocation50_spill] sm:$0xff] }
 0x30e   :  { %v2908_v16 = vmax.f32 %v7115_v32, 0.0  ;;  %v2909_v21 = vmax.f32 %v7118_v53, 0.0  ;;  %v2910_v46 = vmax.f32 %v7121_v60, 0.0  ;;  %v2911_v13 = vmax.f32 %v7124_v17, 0.0 }
 0x30f   :  { %v2912_v12 = vmax.f32 %v7127_v48, 0.0  ;;  %v2913_v43 = vmax.f32 %v7130_v57, 0.0  ;;  %v2914_v23 = vmax.f32 %v7133_v7, 0.0  ;;  %v2915_v59 = vmax.f32 %v7136_v58, 0.0 }
 0x310   :  { %v2916_v36 = vmax.f32 %v7139_v52, 0.0  ;;  %v2917_v50 = vmax.f32 %v7142_v6, 0.0  ;;  %v2918_v32 = vmax.f32 %v7145_v28, 0.0  ;;  %v2919_v53 = vmax.f32 %v7148_v51, 0.0 }
 0x311   :  { %v2920_v60 = vmax.f32 %v7151_v26, 0.0  ;;  %v2921_v17 = vmax.f32 %v7154_v35, 0.0  ;;  %v2922_v48 = vmax.f32 %v7157_v56, 0.0  ;;  %v2923_v57 = vmax.f32 %v7160_v19, 0.0 }
 0x312   :  { %v2924_v7 = vmax.f32 %v7163_v4, 0.0  ;;  %v2925_v58 = vmax.f32 %v7166_v0, 0.0  ;;  %v2926_v52 = vmax.f32 %v7169_v1, 0.0  ;;  %v2927_v6 = vmax.f32 %v7172_v49, 0.0 }
 0x313   :  { %v2928_v28 = vmax.f32 %v7175_v45, 0.0  ;;  %v2929_v51 = vmax.f32 %v7178_v54, 0.0  ;;  %v2930_v26 = vmax.f32 %v7181_v9, 0.0  ;;  %v2931_v35 = vmax.f32 %v7184_v29, 0.0 }
 0x314   :  { %v2932_v56 = vmax.f32 %v7187_v25, 0.0  ;;  %v2933_v19 = vmax.f32 %v7190_v33, 0.0  ;;  %v2934_v4 = vmax.f32 %v7193_v20, 0.0  ;;  %v2935_v0 = vmax.f32 %v7196_v42, 0.0 }
 0x315   :  { %v2936_v1 = vmax.f32 %v7199_v55, 0.0  ;;  %v2937_v49 = vmax.f32 %v7202_v34, 0.0  ;;  %v2938_v45 = vmax.f32 %v7205_v15, 0.0  ;;  %v2939_v54 = vmax.f32 %v7208_v30, 0.0 }
 0x316   :  { %v2940_v9 = vmax.f32 %v7211_v38, 0.0  ;;  %v2941_v29 = vmax.f32 %v7214_v62, 0.0  ;;  %v2942_v25 = vmax.f32 %v7217_v24, 0.0  ;;  %v2943_v33 = vmax.f32 %v7220_v22, 0.0 }
 0x317   :  { %v2944_v20 = vmax.f32 %v7223_v47, 0.0  ;;  %v2945_v42 = vmax.f32 %v7226_v18, 0.0  ;;  %v2946_v55 = vmax.f32 %v7229_v44, 0.0  ;;  %v2947_v34 = vmax.f32 %v7232_v40, 0.0 }
 0x318   :  { %v2948_v15 = vmax.f32 %v7235_v2, 0.0  ;;  %v2949_v30 = vmax.f32 %v7238_v31, 0.0  ;;  %v2950_v38 = vmax.f32 %v7241_v11, 0.0  ;;  %v2951_v62 = vmax.f32 %v7244_v61, 0.0  ;;  %v8694_v31 = vld [vmem:[#allocation52_spill] sm:$0xff]  ;;  %v8696_v61 = vld [vmem:[#allocation51_spill] sm:$0xff] }
 0x319   :  { %v2952_v24 = vmax.f32 %v7247_v5, 0.0  ;;  %v2953_v22 = vmax.f32 %v7250_v3, 0.0  ;;  %v7302_v47 = vmax.f32 %v8692_v10, %v2905_v37  ;;  %v7305_v18 = vmax.f32 %v6817_v8, %v2906_v14  ;;  %v8698_v10 = vld [vmem:[#allocation53_spill] sm:$0xff]  ;;  %v8700_v8 = vld [vmem:[#allocation54_spill] sm:$0xff] }
 0x31a   :  { %v7308_v44 = vmax.f32 %v6821_v39, %v2907_v41  ;;  %v7311_v40 = vmax.f32 %v6825_v63, %v2908_v16  ;;  %v7314_v2 = vmax.f32 %v6829_v27, %v2909_v21  ;;  %v7317_v11 = vmax.f32 %v8694_v31, %v2910_v46  ;;  %v8702_v39 = vld [vmem:[#allocation56_spill] sm:$0xff]  ;;  %v8704_v63 = vld [vmem:[#allocation55_spill] sm:$0xff]  ;;  %v8706_v27 = vld [vmem:[#allocation57_spill] sm:$0xff] }
 0x31b   :  { %v7320_v5 = vmax.f32 %v8696_v61, %v2911_v13  ;;  %v7323_v3 = vmax.f32 %v8698_v10, %v2912_v12  ;;  %v7326_v37 = vmax.f32 %v8700_v8, %v2913_v43  ;;  %v7329_v41 = vmax.f32 %v8702_v39, %v2914_v23  ;;  %v8708_v46 = vld [vmem:[#allocation58_spill] sm:$0xff]  ;;  %v8710_v13 = vld [vmem:[#allocation60_spill] sm:$0xff]  ;;  %v8712_v12 = vld [vmem:[#allocation59_spill] sm:$0xff] }
 0x31c   :  { %8693 = vst [vmem:[#allocation111_spill] sm:$0xff] %v7314_v2  ;;  %8695 = vst [vmem:[#allocation110_spill] sm:$0xff] %v7317_v11  ;;  %v7332_v14 = vmax.f32 %v8704_v63, %v2915_v59  ;;  %v7335_v16 = vmax.f32 %v8706_v27, %v2916_v36  ;;  %v7338_v21 = vmax.f32 %v8708_v46, %v2917_v50  ;;  %v8714_v43 = vld [vmem:[#allocation61_spill] sm:$0xff]  ;;  %v8716_v23 = vld [vmem:[#allocation62_spill] sm:$0xff] }
 0x31d   :  { %8697 = vst [vmem:[#allocation113_spill] sm:$0xff] %v7320_v5  ;;  %8699 = vst [vmem:[#allocation116_spill] sm:$0xff] %v7323_v3  ;;  %v7341_v31 = vmax.f32 %v8710_v13, %v2918_v32  ;;  %v7344_v61 = vmax.f32 %v8712_v12, %v2919_v53  ;;  %v7347_v10 = vmax.f32 %v8714_v43, %v2920_v60  ;;  %v8718_v59 = vld [vmem:[#allocation64_spill] sm:$0xff]  ;;  %v8720_v36 = vld [vmem:[#allocation63_spill] sm:$0xff] }
 0x31e   :  { %8701 = vst [vmem:[#allocation118_spill] sm:$0xff] %v7326_v37  ;;  %8703 = vst [vmem:[#allocation4_spill] sm:$0xff] %v7329_v41  ;;  %v7350_v8 = vmax.f32 %v8716_v23, %v2921_v17  ;;  %v7353_v39 = vmax.f32 %v8718_v59, %v2922_v48  ;;  %v7356_v63 = vmax.f32 %v8720_v36, %v2923_v57  ;;  %v8722_v50 = vld [vmem:[#allocation65_spill] sm:$0xff]  ;;  %v8724_v32 = vld [vmem:[#allocation66_spill] sm:$0xff] }
 0x31f   :  { %8705 = vst [vmem:[#allocation3_spill] sm:$0xff] %v7332_v14  ;;  %8707 = vst [vmem:[#allocation5_spill] sm:$0xff] %v7335_v16  ;;  %v7359_v27 = vmax.f32 %v8722_v50, %v2924_v7  ;;  %v7362_v46 = vmax.f32 %v8724_v32, %v2925_v58  ;;  %v8726_v53 = vld [vmem:[#allocation68_spill] sm:$0xff]  ;;  %v8728_v60 = vld [vmem:[#allocation67_spill] sm:$0xff] }
 0x320   :  { %8709 = vst [vmem:[#allocation6_spill] sm:$0xff] %v7338_v21  ;;  %8711 = vst [vmem:[#allocation8_spill] sm:$0xff] %v7341_v31  ;;  %v7365_v13 = vmax.f32 %v8726_v53, %v2926_v52  ;;  %v7368_v12 = vmax.f32 %v8728_v60, %v2927_v6  ;;  %v8730_v17 = vld [vmem:[#allocation69_spill] sm:$0xff]  ;;  %v8732_v48 = vld [vmem:[#allocation70_spill] sm:$0xff] }
 0x321   :  { %8713 = vst [vmem:[#allocation7_spill] sm:$0xff] %v7344_v61  ;;  %8715 = vst [vmem:[#allocation9_spill] sm:$0xff] %v7347_v10  ;;  %v7371_v43 = vmax.f32 %v8730_v17, %v2928_v28  ;;  %v7374_v23 = vmax.f32 %v8732_v48, %v2929_v51  ;;  %v8734_v57 = vld [vmem:[#allocation72_spill] sm:$0xff]  ;;  %v8736_v7 = vld [vmem:[#allocation71_spill] sm:$0xff] }
 0x322   :  { %8717 = vst [vmem:[#allocation10_spill] sm:$0xff] %v7350_v8  ;;  %8719 = vst [vmem:[#allocation12_spill] sm:$0xff] %v7353_v39  ;;  %v7377_v59 = vmax.f32 %v8734_v57, %v2930_v26  ;;  %v7380_v36 = vmax.f32 %v8736_v7, %v2931_v35  ;;  %v8738_v58 = vld [vmem:[#allocation73_spill] sm:$0xff]  ;;  %v8740_v52 = vld [vmem:[#allocation74_spill] sm:$0xff] }
 0x323   :  { %8721 = vst [vmem:[#allocation11_spill] sm:$0xff] %v7356_v63  ;;  %8723 = vst [vmem:[#allocation13_spill] sm:$0xff] %v7359_v27  ;;  %v7383_v50 = vmax.f32 %v8738_v58, %v2932_v56  ;;  %v7386_v32 = vmax.f32 %v8740_v52, %v2933_v19  ;;  %v8742_v6 = vld [vmem:[#allocation76_spill] sm:$0xff]  ;;  %v8744_v28 = vld [vmem:[#allocation75_spill] sm:$0xff] }
 0x324   :  { %8725 = vst [vmem:[#allocation14_spill] sm:$0xff] %v7362_v46  ;;  %8727 = vst [vmem:[#allocation16_spill] sm:$0xff] %v7365_v13  ;;  %v7389_v53 = vmax.f32 %v8742_v6, %v2934_v4  ;;  %v7392_v60 = vmax.f32 %v8744_v28, %v2935_v0  ;;  %v8746_v51 = vld [vmem:[#allocation77_spill] sm:$0xff]  ;;  %v8748_v26 = vld [vmem:[#allocation78_spill] sm:$0xff] }
 0x325   :  { %8729 = vst [vmem:[#allocation15_spill] sm:$0xff] %v7368_v12  ;;  %8731 = vst [vmem:[#allocation17_spill] sm:$0xff] %v7371_v43  ;;  %v7395_v17 = vmax.f32 %v8746_v51, %v2936_v1  ;;  %v7398_v48 = vmax.f32 %v8748_v26, %v2937_v49  ;;  %v8750_v35 = vld [vmem:[#allocation80_spill] sm:$0xff]  ;;  %v8752_v56 = vld [vmem:[#allocation79_spill] sm:$0xff] }
 0x326   :  { %8733 = vst [vmem:[#allocation18_spill] sm:$0xff] %v7374_v23  ;;  %8735 = vst [vmem:[#allocation20_spill] sm:$0xff] %v7377_v59  ;;  %v7401_v57 = vmax.f32 %v8750_v35, %v2938_v45  ;;  %v7404_v7 = vmax.f32 %v8752_v56, %v2939_v54  ;;  %v8754_v19 = vld [vmem:[#allocation82_spill] sm:$0xff]  ;;  %v8756_v4 = vld [vmem:[#allocation85_spill] sm:$0xff] }
 0x327   :  { %8737 = vst [vmem:[#allocation19_spill] sm:$0xff] %v7380_v36  ;;  %8739 = vst [vmem:[#allocation21_spill] sm:$0xff] %v7383_v50  ;;  %v7407_v58 = vmax.f32 %v8754_v19, %v2940_v9  ;;  %v7410_v52 = vmax.f32 %v8756_v4, %v2941_v29  ;;  %v8758_v0 = vld [vmem:[#allocation87_spill] sm:$0xff]  ;;  %v8760_v1 = vld [vmem:[#allocation86_spill] sm:$0xff] }
 0x328   :  { %8741 = vst [vmem:[#allocation22_spill] sm:$0xff] %v7386_v32  ;;  %8743 = vst [vmem:[#allocation24_spill] sm:$0xff] %v7389_v53  ;;  %v7413_v6 = vmax.f32 %v8758_v0, %v2942_v25  ;;  %v7416_v28 = vmax.f32 %v8760_v1, %v2943_v33  ;;  %v8762_v49 = vld [vmem:[#allocation89_spill] sm:$0xff]  ;;  %v8766_v54 = vld [vmem:[#allocation95_spill] sm:$0xff] }
 0x329   :  { %8745 = vst [vmem:[#allocation23_spill] sm:$0xff] %v7392_v60  ;;  %8747 = vst [vmem:[#allocation25_spill] sm:$0xff] %v7395_v17  ;;  %v7419_v51 = vmax.f32 %v8762_v49, %v2944_v20  ;;  %v8764_v45 = vld [vmem:[#allocation93_spill] sm:$0xff]  ;;  %v7425_v35 = vmax.f32 %v8766_v54, %v2946_v55  ;;  %v8768_v9 = vld [vmem:[#allocation94_spill] sm:$0xff] }
 0x32a   :  { %8749 = vst [vmem:[#allocation26_spill] sm:$0xff] %v7398_v48  ;;  %8751 = vst [vmem:[#allocation28_spill] sm:$0xff] %v7401_v57  ;;  %v7422_v26 = vmax.f32 %v8764_v45, %v2945_v42  ;;  %v7428_v56 = vmax.f32 %v8768_v9, %v2947_v34  ;;  %v8770_v29 = vld [vmem:[#allocation97_spill] sm:$0xff]  ;;  %v8774_v33 = vld [vmem:[#allocation103_spill] sm:$0xff] }
 0x32b   :  { %8753 = vst [vmem:[#allocation27_spill] sm:$0xff] %v7404_v7  ;;  %8755 = vst [vmem:[#allocation29_spill] sm:$0xff] %v7407_v58  ;;  %v7431_v19 = vmax.f32 %v8770_v29, %v2948_v15  ;;  %v8772_v25 = vld [vmem:[#allocation101_spill] sm:$0xff]  ;;  %v7437_v0 = vmax.f32 %v8774_v33, %v2950_v38  ;;  %v8776_v20 = vld [vmem:[#allocation102_spill] sm:$0xff] }
 0x32c   :  { %8757 = vst [vmem:[#allocation30_spill] sm:$0xff] %v7410_v52  ;;  %8759 = vst [vmem:[#allocation32_spill] sm:$0xff] %v7413_v6  ;;  %v7434_v4 = vmax.f32 %v8772_v25, %v2949_v30  ;;  %v7440_v1 = vmax.f32 %v8776_v20, %v2951_v62  ;;  %v8778_v42 = vld [vmem:[#allocation105_spill] sm:$0xff]  ;;  %v8782_v34 = vld [vmem:[#allocation83_spill] sm:$0xff] }
 0x32d   :  { %8761 = vst [vmem:[#allocation31_spill] sm:$0xff] %v7416_v28  ;;  %8763 = vst [vmem:[#allocation33_spill] sm:$0xff] %v7419_v51  ;;  %v7443_v49 = vmax.f32 %v8778_v42, %v2952_v24  ;;  %v8780_v55 = vld [vmem:[#allocation109_spill] sm:$0xff]  ;;  %v8783_v54 = vld [vmem:[#allocation198_spill] sm:$0xff] }
 0x32e   :  { %8765 = vst [vmem:[#allocation34_spill] sm:$0xff] %v7422_v26  ;;  %8767 = vst [vmem:[#allocation36_spill] sm:$0xff] %v7425_v35  ;;  %v7446_v45 = vmax.f32 %v8780_v55, %v2953_v22  ;;  %v3003_v9 = vmul.f32 %v8783_v54, %v8782_v34  ;;  %v8784_v15 = vld [vmem:[#allocation90_spill] sm:$0xff]  ;;  %v8785_v30 = vld [vmem:[#allocation92_spill] sm:$0xff] }
 0x32f   :  { %8769 = vst [vmem:[#allocation35_spill] sm:$0xff] %v7428_v56  ;;  %8771 = vst [vmem:[#allocation37_spill] sm:$0xff] %v7431_v19  ;;  %v3004_v29 = vmul.f32 %v8783_v54, %v8784_v15  ;;  %v3005_v25 = vmul.f32 %v8783_v54, %v8785_v30  ;;  %v8786_v38 = vld [vmem:[#allocation88_spill] sm:$0xff]  ;;  %v8787_v62 = vld [vmem:[#allocation91_spill] sm:$0xff] }
 0x330   :  { %8773 = vst [vmem:[#allocation38_spill] sm:$0xff] %v7434_v4  ;;  %8775 = vst [vmem:[#allocation40_spill] sm:$0xff] %v7437_v0  ;;  %v3006_v33 = vmul.f32 %v8783_v54, %v8786_v38  ;;  %v3007_v20 = vmul.f32 %v8783_v54, %v8787_v62  ;;  %v8788_v24 = vld [vmem:[#allocation98_spill] sm:$0xff]  ;;  %v8789_v22 = vld [vmem:[#allocation100_spill] sm:$0xff] }
 0x331   :  { %8777 = vst [vmem:[#allocation39_spill] sm:$0xff] %v7440_v1  ;;  %8779 = vst [vmem:[#allocation41_spill] sm:$0xff] %v7443_v49  ;;  %v3008_v42 = vmul.f32 %v8783_v54, %v8788_v24  ;;  %v3009_v55 = vmul.f32 %v8783_v54, %v8789_v22  ;;  %v8791_v49 = vld [vmem:[#allocation99_spill] sm:$0xff]  ;;  %v8792_v1 = vld [vmem:[#allocation106_spill] sm:$0xff] }
 0x332   :  { %8781 = vst [vmem:[#allocation42_spill] sm:$0xff] %v7446_v45  ;;  %v8790_v45 = vld [vmem:[#allocation96_spill] sm:$0xff]  ;;  %v3011_v15 = vmul.f32 %v8783_v54, %v8791_v49  ;;  %v3012_v30 = vmul.f32 %v8783_v54, %v8792_v1  ;;  %v8795_v19 = vld [vmem:[#allocation107_spill] sm:$0xff]  ;;  %v8796_v56 = vld [vmem:[#allocation114_spill] sm:$0xff] }
 0x333   :  { %v3010_v34 = vmul.f32 %v8783_v54, %v8790_v45  ;;  %v8793_v0 = vld [vmem:[#allocation108_spill] sm:$0xff]  ;;  %v3015_v24 = vmul.f32 %v8783_v54, %v8795_v19  ;;  %v3016_v22 = vmul.f32 %v8783_v54, %v8796_v56  ;;  %v8797_v35 = vld [vmem:[#allocation166_spill] sm:$0xff]  ;;  %v8799_v51 = vld [vmem:[#allocation115_spill] sm:$0xff] }
 0x334   :  { %v3013_v38 = vmul.f32 %v8783_v54, %v8793_v0  ;;  %v8794_v4 = vld [vmem:[#allocation104_spill] sm:$0xff]  ;;  %v3017_v45 = vmul.f32 %v8783_v54, %v8797_v35  ;;  %v3019_v1 = vmul.f32 %v8783_v54, %v8799_v51  ;;  %v8800_v28 = vld [vmem:[#allocation167_spill] sm:$0xff]  ;;  %v8802_v52 = vld [vmem:[#allocation169_spill] sm:$0xff] }
 0x335   :  { %v3014_v62 = vmul.f32 %v8783_v54, %v8794_v4  ;;  %v8798_v26 = vld [vmem:[#allocation112_spill] sm:$0xff]  ;;  %v3020_v0 = vmul.f32 %v8783_v54, %v8800_v28  ;;  %v3022_v19 = vmul.f32 %v8783_v54, %v8802_v52  ;;  %v8803_v58 = vld [vmem:[#allocation121_spill] sm:$0xff]  ;;  %v8804_v7 = vld [vmem:[#allocation170_spill] sm:$0xff] }
 0x336   :  { %v3018_v49 = vmul.f32 %v8783_v54, %v8798_v26  ;;  %v8801_v6 = vld [vmem:[#allocation168_spill] sm:$0xff]  ;;  %v3023_v56 = vmul.f32 %v8783_v54, %v8803_v58  ;;  %v3024_v35 = vmul.f32 %v8783_v54, %v8804_v7  ;;  %v8805_v57 = vld [vmem:[#allocation171_spill] sm:$0xff]  ;;  %v8807_v17 = vld [vmem:[#allocation173_spill] sm:$0xff] }
 0x337   :  { %v3021_v4 = vmul.f32 %v8783_v54, %v8801_v6  ;;  %v3025_v26 = vmul.f32 %v8783_v54, %v8805_v57  ;;  %v8806_v48 = vld [vmem:[#allocation172_spill] sm:$0xff]  ;;  %v3027_v28 = vmul.f32 %v8783_v54, %v8807_v17  ;;  %v8808_v60 = vld [vmem:[#allocation174_spill] sm:$0xff]  ;;  %v8809_v53 = vld [vmem:[#allocation175_spill] sm:$0xff] }
 0x338   :  { %v3026_v51 = vmul.f32 %v8783_v54, %v8806_v48  ;;  %v3028_v6 = vmul.f32 %v8783_v54, %v8808_v60  ;;  %v3029_v52 = vmul.f32 %v8783_v54, %v8809_v53  ;;  %v8810_v32 = vld [vmem:[#allocation176_spill] sm:$0xff]  ;;  %v8811_v50 = vld [vmem:[#allocation177_spill] sm:$0xff]  ;;  %v8812_v36 = vld [vmem:[#allocation178_spill] sm:$0xff] }
 0x339   :  { %v3030_v58 = vmul.f32 %v8783_v54, %v8810_v32  ;;  %v3031_v7 = vmul.f32 %v8783_v54, %v8811_v50  ;;  %v3032_v57 = vmul.f32 %v8783_v54, %v8812_v36  ;;  %v8813_v59 = vld [vmem:[#allocation179_spill] sm:$0xff]  ;;  %v8814_v23 = vld [vmem:[#allocation180_spill] sm:$0xff]  ;;  %v8815_v43 = vld [vmem:[#allocation181_spill] sm:$0xff] }
 0x33a   :  { %v3033_v48 = vmul.f32 %v8783_v54, %v8813_v59  ;;  %v3034_v17 = vmul.f32 %v8783_v54, %v8814_v23  ;;  %v3035_v60 = vmul.f32 %v8783_v54, %v8815_v43  ;;  %v8816_v12 = vld [vmem:[#allocation182_spill] sm:$0xff]  ;;  %v8817_v13 = vld [vmem:[#allocation183_spill] sm:$0xff]  ;;  %v8818_v46 = vld [vmem:[#allocation184_spill] sm:$0xff] }
 0x33b   :  { %v3036_v53 = vmul.f32 %v8783_v54, %v8816_v12  ;;  %v3037_v32 = vmul.f32 %v8783_v54, %v8817_v13  ;;  %v3038_v50 = vmul.f32 %v8783_v54, %v8818_v46  ;;  %v8819_v27 = vld [vmem:[#allocation185_spill] sm:$0xff]  ;;  %v8820_v63 = vld [vmem:[#allocation186_spill] sm:$0xff]  ;;  %v8821_v39 = vld [vmem:[#allocation187_spill] sm:$0xff] }
 0x33c   :  { %v3039_v36 = vmul.f32 %v8783_v54, %v8819_v27  ;;  %v3040_v59 = vmul.f32 %v8783_v54, %v8820_v63  ;;  %v3041_v23 = vmul.f32 %v8783_v54, %v8821_v39  ;;  %v8822_v8 = vld [vmem:[#allocation188_spill] sm:$0xff]  ;;  %v8823_v10 = vld [vmem:[#allocation189_spill] sm:$0xff]  ;;  %v8824_v61 = vld [vmem:[#allocation190_spill] sm:$0xff] }
 0x33d   :  { %v3042_v43 = vmul.f32 %v8783_v54, %v8822_v8  ;;  %v3043_v12 = vmul.f32 %v8783_v54, %v8823_v10  ;;  %v3044_v13 = vmul.f32 %v8783_v54, %v8824_v61  ;;  %v8825_v31 = vld [vmem:[#allocation191_spill] sm:$0xff]  ;;  %v8826_v21 = vld [vmem:[#allocation192_spill] sm:$0xff]  ;;  %v8827_v16 = vld [vmem:[#allocation193_spill] sm:$0xff] }
 0x33e   :  { %v3045_v46 = vmul.f32 %v8783_v54, %v8825_v31  ;;  %v3046_v27 = vmul.f32 %v8783_v54, %v8826_v21  ;;  %v3047_v63 = vmul.f32 %v8783_v54, %v8827_v16  ;;  %v8828_v14 = vld [vmem:[#allocation194_spill] sm:$0xff]  ;;  %v8829_v41 = vld [vmem:[#allocation195_spill] sm:$0xff]  ;;  %v8830_v37 = vld [vmem:[#allocation196_spill] sm:$0xff] }
 0x33f   :  { %v3048_v39 = vmul.f32 %v8783_v54, %v8828_v14  ;;  %v3049_v8 = vmul.f32 %v8783_v54, %v8829_v41  ;;  %v3050_v10 = vmul.f32 %v8783_v54, %v8830_v37  ;;  %v8831_v3 = vld [vmem:[#allocation197_spill] sm:$0xff]  ;;  %v8832_v5 = vld [vmem:[#allocation2_spill] sm:$0xff] }
 0x340   :  { %v3051_v61 = vmul.f32 %v8783_v54, %v8831_v3  ;;  %v7547_v31 = vadd.f32 %v3003_v9, %v8832_v5  ;;  %v7550_v21 = vadd.f32 %v3004_v29, %v8832_v5  ;;  %v7553_v16 = vadd.f32 %v3005_v25, %v8832_v5 }
 0x341   :  { %v7556_v14 = vadd.f32 %v3006_v33, %v8832_v5  ;;  %v7559_v41 = vadd.f32 %v3007_v20, %v8832_v5  ;;  %v7562_v37 = vadd.f32 %v3008_v42, %v8832_v5  ;;  %v7565_v3 = vadd.f32 %v3009_v55, %v8832_v5 }
 0x342   :  { %v7568_v54 = vadd.f32 %v3010_v34, %v8832_v5  ;;  %v7571_v9 = vadd.f32 %v3011_v15, %v8832_v5  ;;  %v7574_v29 = vadd.f32 %v3012_v30, %v8832_v5  ;;  %v7577_v25 = vadd.f32 %v3013_v38, %v8832_v5 }
 0x343   :  { %v7580_v33 = vadd.f32 %v3014_v62, %v8832_v5  ;;  %v7583_v20 = vadd.f32 %v3015_v24, %v8832_v5  ;;  %v7586_v42 = vadd.f32 %v3016_v22, %v8832_v5  ;;  %v7589_v55 = vadd.f32 %v3017_v45, %v8832_v5 }
 0x344   :  { %v7592_v34 = vadd.f32 %v3018_v49, %v8832_v5  ;;  %v7595_v15 = vadd.f32 %v3019_v1, %v8832_v5  ;;  %v7598_v30 = vadd.f32 %v3020_v0, %v8832_v5  ;;  %v7601_v38 = vadd.f32 %v3021_v4, %v8832_v5 }
 0x345   :  { %v7604_v62 = vadd.f32 %v3022_v19, %v8832_v5  ;;  %v7607_v24 = vadd.f32 %v3023_v56, %v8832_v5  ;;  %v7610_v22 = vadd.f32 %v3024_v35, %v8832_v5  ;;  %v7613_v45 = vadd.f32 %v3025_v26, %v8832_v5 }
 0x346   :  { %v7616_v49 = vadd.f32 %v3026_v51, %v8832_v5  ;;  %v7619_v1 = vadd.f32 %v3027_v28, %v8832_v5  ;;  %v7622_v0 = vadd.f32 %v3028_v6, %v8832_v5  ;;  %v7625_v4 = vadd.f32 %v3029_v52, %v8832_v5 }
 0x347   :  { %v7628_v19 = vadd.f32 %v3030_v58, %v8832_v5  ;;  %v7631_v56 = vadd.f32 %v3031_v7, %v8832_v5  ;;  %v7634_v35 = vadd.f32 %v3032_v57, %v8832_v5  ;;  %v7637_v26 = vadd.f32 %v3033_v48, %v8832_v5 }
 0x348   :  { %v7640_v51 = vadd.f32 %v3034_v17, %v8832_v5  ;;  %v7643_v28 = vadd.f32 %v3035_v60, %v8832_v5  ;;  %v7646_v6 = vadd.f32 %v3036_v53, %v8832_v5  ;;  %v7649_v52 = vadd.f32 %v3037_v32, %v8832_v5 }
 0x349   :  { %v7652_v58 = vadd.f32 %v3038_v50, %v8832_v5  ;;  %v7655_v7 = vadd.f32 %v3039_v36, %v8832_v5  ;;  %v7658_v57 = vadd.f32 %v3040_v59, %v8832_v5  ;;  %v7661_v48 = vadd.f32 %v3041_v23, %v8832_v5 }
 0x34a   :  { %v7664_v17 = vadd.f32 %v3042_v43, %v8832_v5  ;;  %v7667_v60 = vadd.f32 %v3043_v12, %v8832_v5  ;;  %v7670_v53 = vadd.f32 %v3044_v13, %v8832_v5  ;;  %v7673_v32 = vadd.f32 %v3045_v46, %v8832_v5 }
 0x34b   :  { %v7676_v50 = vadd.f32 %v3046_v27, %v8832_v5  ;;  %v7679_v36 = vadd.f32 %v3047_v63, %v8832_v5  ;;  %v7682_v59 = vadd.f32 %v3048_v39, %v8832_v5  ;;  %v7685_v23 = vadd.f32 %v3049_v8, %v8832_v5 }
 0x34c   :  { %v7688_v43 = vadd.f32 %v3050_v10, %v8832_v5  ;;  %v7691_v12 = vadd.f32 %v3051_v61, %v8832_v5  ;;  %v3101_v13 = vmax.f32 %v7547_v31, 0.0  ;;  %v3102_v46 = vmax.f32 %v7550_v21, 0.0 }
 0x34d   :  { %v3103_v27 = vmax.f32 %v7553_v16, 0.0  ;;  %v3104_v63 = vmax.f32 %v7556_v14, 0.0  ;;  %v3105_v39 = vmax.f32 %v7559_v41, 0.0  ;;  %v3106_v11 = vmax.f32 %v7562_v37, 0.0 }
 0x34e   :  { %v3107_v8 = vmax.f32 %v7565_v3, 0.0  ;;  %v3108_v10 = vmax.f32 %v7568_v54, 0.0  ;;  %v3109_v2 = vmax.f32 %v7571_v9, 0.0  ;;  %v3110_v5 = vmax.f32 %v7574_v29, 0.0 }
 0x34f   :  { %v3111_v61 = vmax.f32 %v7577_v25, 0.0  ;;  %v3112_v31 = vmax.f32 %v7580_v33, 0.0  ;;  %v3113_v21 = vmax.f32 %v7583_v20, 0.0  ;;  %v3114_v16 = vmax.f32 %v7586_v42, 0.0 }
 0x350   :  { %v3115_v14 = vmax.f32 %v7589_v55, 0.0  ;;  %v3116_v41 = vmax.f32 %v7592_v34, 0.0  ;;  %v3117_v37 = vmax.f32 %v7595_v15, 0.0  ;;  %v3118_v3 = vmax.f32 %v7598_v30, 0.0 }
 0x351   :  { %v3119_v54 = vmax.f32 %v7601_v38, 0.0  ;;  %v3120_v9 = vmax.f32 %v7604_v62, 0.0  ;;  %v3121_v29 = vmax.f32 %v7607_v24, 0.0  ;;  %v3122_v25 = vmax.f32 %v7610_v22, 0.0 }
 0x352   :  { %v3123_v33 = vmax.f32 %v7613_v45, 0.0  ;;  %v3124_v20 = vmax.f32 %v7616_v49, 0.0  ;;  %v3125_v42 = vmax.f32 %v7619_v1, 0.0  ;;  %v3126_v55 = vmax.f32 %v7622_v0, 0.0 }
 0x353   :  { %v3127_v34 = vmax.f32 %v7625_v4, 0.0  ;;  %v3128_v15 = vmax.f32 %v7628_v19, 0.0  ;;  %v3129_v30 = vmax.f32 %v7631_v56, 0.0  ;;  %v3130_v38 = vmax.f32 %v7634_v35, 0.0 }
 0x354   :  { %v3131_v62 = vmax.f32 %v7637_v26, 0.0  ;;  %v3132_v24 = vmax.f32 %v7640_v51, 0.0  ;;  %v3133_v22 = vmax.f32 %v7643_v28, 0.0  ;;  %v3134_v45 = vmax.f32 %v7646_v6, 0.0 }
 0x355   :  { %v3135_v49 = vmax.f32 %v7649_v52, 0.0  ;;  %v3136_v1 = vmax.f32 %v7652_v58, 0.0  ;;  %v3137_v0 = vmax.f32 %v7655_v7, 0.0  ;;  %v3138_v4 = vmax.f32 %v7658_v57, 0.0 }
 0x356   :  { %v3139_v19 = vmax.f32 %v7661_v48, 0.0  ;;  %v3140_v56 = vmax.f32 %v7664_v17, 0.0  ;;  %v3141_v35 = vmax.f32 %v7667_v60, 0.0  ;;  %v3142_v26 = vmax.f32 %v7670_v53, 0.0 }
 0x357   :  { %v3143_v51 = vmax.f32 %v7673_v32, 0.0  ;;  %v3144_v28 = vmax.f32 %v7676_v50, 0.0  ;;  %v3145_v6 = vmax.f32 %v7679_v36, 0.0  ;;  %v3146_v52 = vmax.f32 %v7682_v59, 0.0  ;;  %v8833_v32 = vld [vmem:[#allocation111_spill] sm:$0xff]  ;;  %v8834_v36 = vld [vmem:[#allocation110_spill] sm:$0xff] }
 0x358   :  { %v3147_v58 = vmax.f32 %v7685_v23, 0.0  ;;  %v3148_v7 = vmax.f32 %v7688_v43, 0.0  ;;  %v3149_v57 = vmax.f32 %v7691_v12, 0.0  ;;  %v3150_v48 = vmax.f32 %v7302_v47, %v3101_v13  ;;  %v8835_v23 = vld [vmem:[#allocation113_spill] sm:$0xff]  ;;  %v8836_v12 = vld [vmem:[#allocation116_spill] sm:$0xff]  ;;  %v8837_v47 = vld [vmem:[#allocation118_spill] sm:$0xff] }
 0x359   :  { %v3151_v17 = vmax.f32 %v7305_v18, %v3102_v46  ;;  %v3152_v60 = vmax.f32 %v7308_v44, %v3103_v27  ;;  %v3153_v53 = vmax.f32 %v7311_v40, %v3104_v63  ;;  %v3154_v50 = vmax.f32 %v8833_v32, %v3105_v39  ;;  %v8838_v46 = vld [vmem:[#allocation4_spill] sm:$0xff]  ;;  %v8839_v44 = vld [vmem:[#allocation3_spill] sm:$0xff]  ;;  %v8840_v63 = vld [vmem:[#allocation5_spill] sm:$0xff] }
 0x35a   :  { %v3155_v59 = vmax.f32 %v8834_v36, %v3106_v11  ;;  %v3156_v43 = vmax.f32 %v8835_v23, %v3107_v8  ;;  %v3157_v13 = vmax.f32 %v8836_v12, %v3108_v10  ;;  %v3158_v18 = vmax.f32 %v8837_v47, %v3109_v2  ;;  %v8841_v39 = vld [vmem:[#allocation6_spill] sm:$0xff]  ;;  %v8842_v36 = vld [vmem:[#allocation8_spill] sm:$0xff]  ;;  %v8843_v23 = vld [vmem:[#allocation7_spill] sm:$0xff] }
 0x35b   :  { %v3159_v27 = vmax.f32 %v8838_v46, %v3110_v5  ;;  %v3160_v40 = vmax.f32 %v8839_v44, %v3111_v61  ;;  %v3161_v32 = vmax.f32 %v8840_v63, %v3112_v31  ;;  %v3162_v11 = vmax.f32 %v8841_v39, %v3113_v21  ;;  %v8844_v12 = vld [vmem:[#allocation9_spill] sm:$0xff]  ;;  %v8845_v47 = vld [vmem:[#allocation10_spill] sm:$0xff]  ;;  %v8846_v46 = vld [vmem:[#allocation12_spill] sm:$0xff] }
 0x35c   :  { %v3163_v8 = vmax.f32 %v8842_v36, %v3114_v16  ;;  %v3164_v10 = vmax.f32 %v8843_v23, %v3115_v14  ;;  %v3165_v2 = vmax.f32 %v8844_v12, %v3116_v41  ;;  %v3166_v5 = vmax.f32 %v8845_v47, %v3117_v37  ;;  %v8847_v61 = vld [vmem:[#allocation11_spill] sm:$0xff]  ;;  %v8848_v63 = vld [vmem:[#allocation13_spill] sm:$0xff]  ;;  %v8849_v39 = vld [vmem:[#allocation14_spill] sm:$0xff] }
 0x35d   :  { %v3167_v44 = vmax.f32 %v8846_v46, %v3118_v3  ;;  %v3168_v31 = vmax.f32 %v8847_v61, %v3119_v54  ;;  %v3169_v21 = vmax.f32 %v8848_v63, %v3120_v9  ;;  %v3170_v16 = vmax.f32 %v8849_v39, %v3121_v29  ;;  %v8850_v36 = vld [vmem:[#allocation16_spill] sm:$0xff]  ;;  %v8851_v23 = vld [vmem:[#allocation15_spill] sm:$0xff]  ;;  %v8852_v41 = vld [vmem:[#allocation17_spill] sm:$0xff] }
 0x35e   :  { %v3171_v14 = vmax.f32 %v8850_v36, %v3122_v25  ;;  %v3172_v12 = vmax.f32 %v8851_v23, %v3123_v33  ;;  %v3173_v37 = vmax.f32 %v8852_v41, %v3124_v20  ;;  %v8853_v47 = vld [vmem:[#allocation18_spill] sm:$0xff]  ;;  %v8854_v46 = vld [vmem:[#allocation20_spill] sm:$0xff]  ;;  %v8855_v61 = vld [vmem:[#allocation19_spill] sm:$0xff] }
 0x35f   :  { %v3174_v3 = vmax.f32 %v8853_v47, %v3125_v42  ;;  %v3175_v54 = vmax.f32 %v8854_v46, %v3126_v55  ;;  %v3176_v9 = vmax.f32 %v8855_v61, %v3127_v34  ;;  %v8856_v63 = vld [vmem:[#allocation21_spill] sm:$0xff]  ;;  %v8857_v39 = vld [vmem:[#allocation22_spill] sm:$0xff]  ;;  %v8858_v36 = vld [vmem:[#allocation24_spill] sm:$0xff] }
 0x360   :  { %v3177_v29 = vmax.f32 %v8856_v63, %v3128_v15  ;;  %v3178_v25 = vmax.f32 %v8857_v39, %v3129_v30  ;;  %v3179_v23 = vmax.f32 %v8858_v36, %v3130_v38  ;;  %v8859_v33 = vld [vmem:[#allocation23_spill] sm:$0xff]  ;;  %v8860_v41 = vld [vmem:[#allocation25_spill] sm:$0xff]  ;;  %v8861_v47 = vld [vmem:[#allocation26_spill] sm:$0xff] }
 0x361   :  { %v3180_v20 = vmax.f32 %v8859_v33, %v3131_v62  ;;  %v3181_v42 = vmax.f32 %v8860_v41, %v3132_v24  ;;  %v3182_v46 = vmax.f32 %v8861_v47, %v3133_v22  ;;  %v8862_v55 = vld [vmem:[#allocation28_spill] sm:$0xff]  ;;  %v8863_v61 = vld [vmem:[#allocation27_spill] sm:$0xff]  ;;  %v8864_v63 = vld [vmem:[#allocation29_spill] sm:$0xff] }
 0x362   :  { %v3183_v34 = vmax.f32 %v8862_v55, %v3134_v45  ;;  %v3184_v15 = vmax.f32 %v8863_v61, %v3135_v49  ;;  %v3185_v30 = vmax.f32 %v8864_v63, %v3136_v1  ;;  %v8865_v39 = vld [vmem:[#allocation30_spill] sm:$0xff]  ;;  %v8866_v38 = vld [vmem:[#allocation32_spill] sm:$0xff]  ;;  %v8867_v62 = vld [vmem:[#allocation31_spill] sm:$0xff] }
 0x363   :  { %v3186_v36 = vmax.f32 %v8865_v39, %v3137_v0  ;;  %v3187_v33 = vmax.f32 %v8866_v38, %v3138_v4  ;;  %v3188_v24 = vmax.f32 %v8867_v62, %v3139_v19  ;;  %v8868_v41 = vld [vmem:[#allocation33_spill] sm:$0xff]  ;;  %v8869_v47 = vld [vmem:[#allocation34_spill] sm:$0xff]  ;;  %v8870_v55 = vld [vmem:[#allocation36_spill] sm:$0xff] }
 0x364   :  { %v3189_v22 = vmax.f32 %v8868_v41, %v3140_v56  ;;  %v3190_v45 = vmax.f32 %v8869_v47, %v3141_v35  ;;  %v3191_v49 = vmax.f32 %v8870_v55, %v3142_v26  ;;  %v8871_v61 = vld [vmem:[#allocation35_spill] sm:$0xff]  ;;  %v8872_v63 = vld [vmem:[#allocation37_spill] sm:$0xff]  ;;  %v8873_v39 = vld [vmem:[#allocation38_spill] sm:$0xff]  ;;  %v3749_v55 = vpack.c.bf16 %v3151_v17, %v3150_v48 }
 0x365   :  { %v3192_v1 = vmax.f32 %v8871_v61, %v3143_v51  ;;  %v3193_v0 = vmax.f32 %v8872_v63, %v3144_v28  ;;  %v3194_v4 = vmax.f32 %v8873_v39, %v3145_v6  ;;  %v8874_v38 = vld [vmem:[#allocation40_spill] sm:$0xff]  ;;  %v8875_v62 = vld [vmem:[#allocation39_spill] sm:$0xff]  ;;  %v8876_v56 = vld [vmem:[#allocation41_spill] sm:$0xff]  ;;  %v3754_v51 = vpack.c.bf16 %v3153_v53, %v3152_v60 }
 0x366   :  { %v3195_v19 = vmax.f32 %v8874_v38, %v3146_v52  ;;  %v3196_v41 = vmax.f32 %v8875_v62, %v3147_v58  ;;  %v3197_v35 = vmax.f32 %v8876_v56, %v3148_v7  ;;  %v8877_v47 = vld [vmem:[#allocation42_spill] sm:$0xff]  ;;  %v3759_v61 = vpack.c.bf16 %v3155_v59, %v3154_v50  ;;  %3750 = vst [vmem:[%s7871_s5] sm:$0xff] %v3749_v55  }
 0x367   :  { %v3198_v26 = vmax.f32 %v8877_v47, %v3149_v57  ;;  %v3764_v28 = vpack.c.bf16 %v3157_v13, %v3156_v43  ;;  %v3769_v63 = vpack.c.bf16 %v3159_v27, %v3158_v18  ;;  %v3774_v6 = vpack.c.bf16 %v3161_v32, %v3160_v40  ;;  %3866 = vst [vmem:[%s7871_s5 + $0x8] sm:$0xff] %v3754_v51  }
 0x368   :  { %v3779_v39 = vpack.c.bf16 %v3163_v8, %v3162_v11  ;;  %3867 = vst [vmem:[%s7871_s5 + $0x10] sm:$0xff] %v3759_v61   ;;  %v3784_v52 = vpack.c.bf16 %v3165_v2, %v3164_v10  ;;  %v3789_v58 = vpack.c.bf16 %v3167_v44, %v3166_v5  ;;  %v3794_v7 = vpack.c.bf16 %v3169_v21, %v3168_v31 }
 0x369   :  { %v3745_v38 = vpack.c.bf16 %v3198_v26, %v3198_v26  ;;  %3868 = vst [vmem:[%s7871_s5 + $0x18] sm:$0xff] %v3764_v28   ;;  %3869 = vst [vmem:[%s7871_s5 + $0x20] sm:$0xff] %v3769_v63   ;;  %v3799_v57 = vpack.c.bf16 %v3171_v14, %v3170_v16  ;;  %v3804_v48 = vpack.c.bf16 %v3173_v37, %v3172_v12 }
 0x36a   :  { %3870 = vst [vmem:[%s7871_s5 + $0x28] sm:$0xff] %v3774_v6   ;;  %3871 = vst [vmem:[%s7871_s5 + $0x30] sm:$0xff] %v3779_v39   ;;  %v3809_v17 = vpack.c.bf16 %v3175_v54, %v3174_v3  ;;  %v3814_v60 = vpack.c.bf16 %v3177_v29, %v3176_v9  ;;  %v3819_v53 = vpack.c.bf16 %v3179_v23, %v3178_v25 }
 0x36b   :  { %3872 = vst [vmem:[%s7871_s5 + $0x38] sm:$0xff] %v3784_v52   ;;  %3873 = vst [vmem:[%s7871_s5 + $0x40] sm:$0xff] %v3789_v58   ;;  %v3824_v50 = vpack.c.bf16 %v3181_v42, %v3180_v20  ;;  %v3829_v59 = vpack.c.bf16 %v3183_v34, %v3182_v46  ;;  %v3834_v43 = vpack.c.bf16 %v3185_v30, %v3184_v15 }
 0x36c   :  { %3874 = vst [vmem:[%s7871_s5 + $0x48] sm:$0xff] %v3794_v7   ;;  %3444 = vst [vmem:[%s7871_s5 + $0xc0] sm:$0xf] %v3745_v38  ;;  %v3839_v13 = vpack.c.bf16 %v3187_v33, %v3186_v36  ;;  %v3844_v18 = vpack.c.bf16 %v3189_v22, %v3188_v24  ;;  %v3849_v27 = vpack.c.bf16 %v3191_v49, %v3190_v45 }
 0x36d   :  { %3875 = vst [vmem:[%s7871_s5 + $0x50] sm:$0xff] %v3799_v57   ;;  %3876 = vst [vmem:[%s7871_s5 + $0x58] sm:$0xff] %v3804_v48   ;;  %v3854_v40 = vpack.c.bf16 %v3193_v0, %v3192_v1  ;;  %v3859_v32 = vpack.c.bf16 %v3195_v19, %v3194_v4  ;;  %v3864_v11 = vpack.c.bf16 %v3197_v35, %v3196_v41 }
 0x36e   :  { %3877 = vst [vmem:[%s7871_s5 + $0x60] sm:$0xff] %v3809_v17   ;;  %3878 = vst [vmem:[%s7871_s5 + $0x68] sm:$0xff] %v3814_v60  }
 0x36f   :  { %3879 = vst [vmem:[%s7871_s5 + $0x70] sm:$0xff] %v3819_v53   ;;  %3880 = vst [vmem:[%s7871_s5 + $0x78] sm:$0xff] %v3824_v50  }
 0x370   :  { %3881 = vst [vmem:[%s7871_s5 + $0x80] sm:$0xff] %v3829_v59   ;;  %3882 = vst [vmem:[%s7871_s5 + $0x88] sm:$0xff] %v3834_v43  }
 0x371   :  { %3883 = vst [vmem:[%s7871_s5 + $0x90] sm:$0xff] %v3839_v13   ;;  %3884 = vst [vmem:[%s7871_s5 + $0x98] sm:$0xff] %v3844_v18  }
 0x372   :  { %3885 = vst [vmem:[%s7871_s5 + $0xa0] sm:$0xff] %v3849_v27   ;;  %3886 = vst [vmem:[%s7871_s5 + $0xa8] sm:$0xff] %v3854_v40  }
 0x373   :  { %3887 = vst [vmem:[%s7871_s5 + $0xb0] sm:$0xff] %v3859_v32   ;;  %3888 = vst [vmem:[%s7871_s5 + $0xb8] sm:$0xff] %v3864_v11  }

// kernel: convnet_forward.5
= control target key start
LH: loop header
LB: loop body
LE: loop exit
PB: predicated region body
PF: predicated region fallthrough
CT: control target
= control target key end

     0   :  { %v236_v29 = vlaneseq  ;;  %v1752_v35 = vmov 1966171168   ;;  %s2154_s0 = inlined_call_operand.vmem [shape: bf16[2,1568], index: 0, kind: input, shape index: {}]   ;;  %s2155_s1 = inlined_call_operand.vmem [shape: bf16[1568,128], index: 1, kind: input, shape index: {}]   ;;  %s2156_s2 = inlined_call_operand.vmem [shape: f32[1,128], index: 2, kind: input, shape index: {}]   ;;  %s2157_s3 = inlined_call_operand.vmem [shape: f32[2,128], index: 3, kind: input, shape index: {}]   ;;  %s2158_s4 = inlined_call_operand.vmem [shape: bf16[128,10], index: 4, kind: input, shape index: {}]   ;;  %s2159_s5 = inlined_call_operand.vmem [shape: f32[1,10], index: 5, kind: input, shape index: {}]   ;;  %s2160_s6 = inlined_call_operand.hbm [shape: f32[2,10], index: 6, kind: output, shape index: {}]  }
   0x1   :  { %v1620_v0 = vld [vmem:[%s2155_s1 + $0x40] sm:$0xff]   ;;  %v1624_v4 = vld [vmem:[%s2155_s1 + $0x48] sm:$0xff]   ;;  %v1628_v8 = vld [vmem:[%s2155_s1 + $0x50] sm:$0xff]   ;;  %v234_v36 = vunpack.c.l.s4 %v1752_v35 }
   0x2   :  { %v1621_v1 = vld [vmem:[%s2155_s1] sm:$0xff]   ;;  %1444 = vmatprep.subr.bf16.mxu0 %v1620_v0  ;;  %v1625_v5 = vld [vmem:[%s2155_s1 + $0x8] sm:$0xff]   ;;  %v1629_v9 = vld [vmem:[%s2155_s1 + $0x10] sm:$0xff]   ;;  %v237_v33 = vshrl.u32 %v236_v29, 7 }
   0x3   :  { %v1622_v2 = vld [vmem:[%s2155_s1 + $0xc0] sm:$0xff]   ;;  %1445 = vmatpush3.bf16.msra.mxu0 %v1621_v1  ;;  %v1626_v6 = vld [vmem:[%s2155_s1 + $0xc8] sm:$0xff]   ;;  %v1630_v10 = vld [vmem:[%s2155_s1 + $0xd0] sm:$0xff]   ;;  %v235_v39 = vunpack.c.0.s8 %v234_v36 }
   0x4   :  { %v1623_v3 = vld [vmem:[%s2155_s1 + $0x80] sm:$0xff]   ;;  %1466 = vmatprep.subr.bf16.mxu1 %v1622_v2  ;;  %1446 = vmatprep.subr.bf16.mxu0 %v1624_v4  ;;  %v1627_v7 = vld [vmem:[%s2155_s1 + $0x88] sm:$0xff]   ;;  %v1631_v11 = vld [vmem:[%s2155_s1 + $0x90] sm:$0xff]  }
   0x5   :  { %1467 = vmatpush3.bf16.msra.mxu1 %v1623_v3  ;;  %v1632_v12 = vld [vmem:[%s2155_s1 + $0x58] sm:$0xff]   ;;  %v1636_v16 = vld [vmem:[%s2155_s1 + $0x60] sm:$0xff]   ;;  %v1640_v20 = vld [vmem:[%s2155_s1 + $0x68] sm:$0xff]   ;;  %v1896_v41 = vsub.s32 %v235_v39, %v237_v33 }
   0x6   :  { %1468 = vmatprep.subr.bf16.mxu1 %v1626_v6  ;;  %v1633_v13 = vld [vmem:[%s2155_s1 + $0x18] sm:$0xff]   ;;  %v1637_v17 = vld [vmem:[%s2155_s1 + $0x20] sm:$0xff]   ;;  %v1641_v21 = vld [vmem:[%s2155_s1 + $0x28] sm:$0xff]  }
   0x7   :  { %1447 = vmatpush3.bf16.msra.mxu0 %v1625_v5  ;;  %v1634_v14 = vld [vmem:[%s2155_s1 + $0xd8] sm:$0xff]   ;;  %v1638_v18 = vld [vmem:[%s2155_s1 + $0xe0] sm:$0xff]   ;;  %v1642_v22 = vld [vmem:[%s2155_s1 + $0xe8] sm:$0xff]  }
   0x8   :  { %1448 = vmatprep.subr.bf16.mxu0 %v1628_v8  ;;  %v1635_v15 = vld [vmem:[%s2155_s1 + $0x98] sm:$0xff]   ;;  %v1639_v19 = vld [vmem:[%s2155_s1 + $0xa0] sm:$0xff]   ;;  %v1643_v23 = vld [vmem:[%s2155_s1 + $0xa8] sm:$0xff]  }
   0x9   :  { %1469 = vmatpush3.bf16.msra.mxu1 %v1627_v7  ;;  %v1644_v24 = vld [vmem:[%s2155_s1 + $0x70] sm:$0xff]   ;;  %v1648_v28 = vld [vmem:[%s2155_s1 + $0x78] sm:$0xff]   ;;  %v1653_v34 = vld [vmem:[%s2155_s1 + $0x140] sm:$0xff]  }
   0xa   :  { %1470 = vmatprep.subr.bf16.mxu1 %v1630_v10  ;;  %v1645_v25 = vld [vmem:[%s2155_s1 + $0x30] sm:$0xff]   ;;  %v1649_v30 = vld [vmem:[%s2155_s1 + $0x38] sm:$0xff]   ;;  %v25_v37 = vld [vmem:[%s2154_s0] sm:$0xff] }
   0xb   :  { %1449 = vmatpush3.bf16.msra.mxu0 %v1629_v9  ;;  %v1646_v26 = vld [vmem:[%s2155_s1 + $0xf0] sm:$0xff]   ;;  %v1650_v31 = vld [vmem:[%s2155_s1 + $0xf8] sm:$0xff]   ;;  %v232_v38 = vcombine.high %v25_v37, %v25_v37  ;;  %v1655_v40 = vld [vmem:[%s2155_s1 + $0x1c0] sm:$0xff]   ;;  %v239_v42 = vrot.slane %v25_v37, %v1896_v41 }
   0xc   :  { %1450 = vmatprep.subr.bf16.mxu0 %v1632_v12  ;;  %v1647_v27 = vld [vmem:[%s2155_s1 + $0xb0] sm:$0xff]   ;;  %v1651_v32 = vld [vmem:[%s2155_s1 + $0xb8] sm:$0xff]   ;;  %v1654_v47 = vld [vmem:[%s2155_s1 + $0x100] sm:$0xff]  }
   0xd   :  { %1471 = vmatpush3.bf16.msra.mxu1 %v1631_v11  ;;  %v1900_v43 = vrot.slane %v232_v38, %v1896_v41  ;;  %v247_v44 = vcombine.high %v239_v42, %v239_v42  ;;  %v255_v45 = vrot.slane %v239_v42, %v1896_v41  ;;  %v1656_v49 = vld [vmem:[%s2155_s1 + $0x180] sm:$0xff]   ;;  %v1657_v52 = vld [vmem:[%s2155_s1 + $0x148] sm:$0xff]   ;;  %v1661_v58 = vld [vmem:[%s2155_s1 + $0x150] sm:$0xff]  }
   0xe   :  { %1472 = vmatprep.subr.bf16.mxu1 %v1634_v14  ;;  %v1658_v54 = vld [vmem:[%s2155_s1 + $0x108] sm:$0xff]   ;;  %v1662_v59 = vld [vmem:[%s2155_s1 + $0x110] sm:$0xff]   ;;  %v1665_v62 = vld [vmem:[%s2155_s1 + $0x158] sm:$0xff]  }
   0xf   :  { %1451 = vmatpush3.bf16.msra.mxu0 %v1633_v13  ;;  %v248_v46 = vcombine.high %v1900_v43, %v1900_v43  ;;  %v269_v48 = vrot.slane %v247_v44, %v1896_v41  ;;  %v277_v51 = vcombine.high %v255_v45, %v255_v45  ;;  %v1659_v55 = vld [vmem:[%s2155_s1 + $0x1c8] sm:$0xff]   ;;  %v1663_v60 = vld [vmem:[%s2155_s1 + $0x1d0] sm:$0xff]   ;;  %v1666_v63 = vld [vmem:[%s2155_s1 + $0x118] sm:$0xff]  }
  0x10   :  { %1452 = vmatprep.subr.bf16.mxu0 %v1636_v16  ;;  %v1660_v57 = vld [vmem:[%s2155_s1 + $0x188] sm:$0xff]   ;;  %v1664_v61 = vld [vmem:[%s2155_s1 + $0x190] sm:$0xff]   ;;  %v1667_v0 = vld [vmem:[%s2155_s1 + $0x1d8] sm:$0xff]  }
  0x11   :  { %1473 = vmatpush3.bf16.msra.mxu1 %v1635_v15  ;;  %v276_v50 = vrot.slane %v248_v46, %v1896_v41  ;;  %956 = vmatprep.mubr.bf16.mxu0 %v269_v48  ;;  %v279_v53 = vcombine.high %v269_v48, %v269_v48  ;;  %v1668_v1 = vld [vmem:[%s2155_s1 + $0x198] sm:$0xff]   ;;  %v1669_v2 = vld [vmem:[%s2155_s1 + $0x160] sm:$0xff]   ;;  %v1673_v6 = vld [vmem:[%s2155_s1 + $0x168] sm:$0xff]  }
  0x12   :  { %1474 = vmatprep.subr.bf16.mxu1 %v1638_v18  ;;  %v1670_v3 = vld [vmem:[%s2155_s1 + $0x120] sm:$0xff]   ;;  %v1674_v7 = vld [vmem:[%s2155_s1 + $0x128] sm:$0xff]   ;;  %v1677_v10 = vld [vmem:[%s2155_s1 + $0x170] sm:$0xff]   ;;  %v262_v18 = vrot.slane %v1900_v43, %v1896_v41 }
  0x13   :  { %1453 = vmatpush3.bf16.msra.mxu0 %v1637_v17  ;;  %v280_v56 = vcombine.high %v276_v50, %v276_v50  ;;  %996 = vmatprep.mubr.bf16.mxu1 %v279_v53  ;;  %v1671_v4 = vld [vmem:[%s2155_s1 + $0x1e0] sm:$0xff]   ;;  %v1675_v8 = vld [vmem:[%s2155_s1 + $0x1e8] sm:$0xff]   ;;  %v1678_v11 = vld [vmem:[%s2155_s1 + $0x130] sm:$0xff]  }
  0x14   :  { %1454 = vmatprep.subr.bf16.mxu0 %v1640_v20  ;;  %v1672_v5 = vld [vmem:[%s2155_s1 + $0x1a0] sm:$0xff]   ;;  %v1676_v9 = vld [vmem:[%s2155_s1 + $0x1a8] sm:$0xff]   ;;  %v1679_v12 = vld [vmem:[%s2155_s1 + $0x1f0] sm:$0xff]  }
  0x15   :  { %1475 = vmatpush3.bf16.msra.mxu1 %v1639_v19  ;;  %v1680_v13 = vld [vmem:[%s2155_s1 + $0x1b0] sm:$0xff]   ;;  %v1681_v14 = vld [vmem:[%s2155_s1 + $0x178] sm:$0xff]   ;;  %v1685_v19 = vld [vmem:[%s2155_s1 + $0x240] sm:$0xff]  }
  0x16   :  { %1476 = vmatprep.subr.bf16.mxu1 %v1642_v22  ;;  %v1682_v15 = vld [vmem:[%s2155_s1 + $0x138] sm:$0xff]   ;;  %v1686_v20 = vld [vmem:[%s2155_s1 + $0x200] sm:$0xff]   ;;  %v1694_v29 = vld [vmem:[%s2155_s1 + $0x210] sm:$0xff]  }
  0x17   :  { %1455 = vmatpush3.bf16.msra.mxu0 %v1641_v21  ;;  %v1683_v16 = vld [vmem:[%s2155_s1 + $0x1f8] sm:$0xff]   ;;  %v1687_v21 = vld [vmem:[%s2155_s1 + $0x2c0] sm:$0xff]   ;;  %v1706_v42 = vld [vmem:[%s2155_s1 + $0x228] sm:$0xff]  }
  0x18   :  { %1456 = vmatprep.subr.bf16.mxu0 %v1644_v24  ;;  %v1684_v17 = vld [vmem:[%s2155_s1 + $0x1b8] sm:$0xff]   ;;  %v1688_v22 = vld [vmem:[%s2155_s1 + $0x280] sm:$0xff]   ;;  %v1689_v24 = vld [vmem:[%s2155_s1 + $0x248] sm:$0xff]  }
  0x19   :  { %1477 = vmatpush3.bf16.msra.mxu1 %v1643_v23  ;;  %v278_v23 = vcombine.high %v262_v18, %v262_v18  ;;  %v1698_v33 = vld [vmem:[%s2155_s1 + $0x218] sm:$0xff]   ;;  %v1701_v36 = vld [vmem:[%s2155_s1 + $0x260] sm:$0xff]   ;;  %v1707_v43 = vld [vmem:[%s2155_s1 + $0x2e8] sm:$0xff]  }
  0x1a   :  { %1478 = vmatprep.subr.bf16.mxu1 %v1646_v26  ;;  %v1691_v26 = vld [vmem:[%s2155_s1 + $0x2c8] sm:$0xff]   ;;  %v1700_v35 = vld [vmem:[%s2155_s1 + $0x298] sm:$0xff]   ;;  %v1702_v37 = vld [vmem:[%s2155_s1 + $0x220] sm:$0xff]  }
  0x1b   :  { %1457 = vmatpush3.bf16.msra.mxu0 %v1645_v25  ;;  %v1690_v25 = vld [vmem:[%s2155_s1 + $0x208] sm:$0xff]   ;;  %v1703_v38 = vld [vmem:[%s2155_s1 + $0x2e0] sm:$0xff]   ;;  %v1711_v48 = vld [vmem:[%s2155_s1 + $0x2f0] sm:$0xff]  }
  0x1c   :  { %1458 = vmatprep.subr.bf16.mxu0 %v1648_v28  ;;  %v1693_v28 = vld [vmem:[%s2155_s1 + $0x250] sm:$0xff]   ;;  %v1704_v39 = vld [vmem:[%s2155_s1 + $0x2a0] sm:$0xff]   ;;  %v1708_v44 = vld [vmem:[%s2155_s1 + $0x2a8] sm:$0xff]  }
  0x1d   :  { %1479 = vmatpush3.bf16.msra.mxu1 %v1647_v27  ;;  %v1692_v27 = vld [vmem:[%s2155_s1 + $0x288] sm:$0xff]   ;;  %v1715_v53 = vld [vmem:[%s2155_s1 + $0x2f8] sm:$0xff]  }
  0x1e   :  { %1480 = vmatprep.subr.bf16.mxu1 %v1650_v31  ;;  %v1696_v31 = vld [vmem:[%s2155_s1 + $0x290] sm:$0xff]   ;;  %v26_v46 = vld [vmem:[%s2154_s0 + $0x8] sm:$0x1f] }
  0x1f   :  { %1459 = vmatpush3.bf16.msra.mxu0 %v1649_v30  ;;  %v1695_v30 = vld [vmem:[%s2155_s1 + $0x2d0] sm:$0xff]  }
  0x20   :  { %1488 = vmatprep.subr.bf16.mxu0 %v1653_v34  ;;  %v1699_v34 = vld [vmem:[%s2155_s1 + $0x2d8] sm:$0xff]  }
  0x21   :  { %1481 = vmatpush3.bf16.msra.mxu1 %v1651_v32  ;;  %v1697_v32 = vld [vmem:[%s2155_s1 + $0x258] sm:$0xff]  }
  0x22   :  { %1510 = vmatprep.subr.bf16.mxu1 %v1655_v40  ;;  %957 = vmatmul.mubr.bf16.vlgmr.msra.gmra.mrb[0].mxu0 %v255_v45  ;;  %v1705_v40 = vld [vmem:[%s2155_s1 + $0x268] sm:$0xff]   ;;  %v1709_v45 = vld [vmem:[%s2155_s1 + $0x270] sm:$0xff]  }
  0x23   :  { %1489 = vmatpush3.bf16.msra.mxu0 %v1654_v47  ;;  %1036 = vmatprep.mubr.bf16.mxu0 %v276_v50  ;;  %v1710_v47 = vld [vmem:[%s2155_s1 + $0x230] sm:$0xff]   ;;  %v1713_v50 = vld [vmem:[%s2155_s1 + $0x278] sm:$0xff]  }
  0x24   :  { %997 = vmatmul.mubr.bf16.vlgmr.msra.gmra.mrb[0].mxu1 %v277_v51  ;;  %1490 = vmatprep.subr.bf16.mxu0 %v1657_v52  ;;  %v1712_v51 = vld [vmem:[%s2155_s1 + $0x2b0] sm:$0xff]  }
  0x25   :  { %1511 = vmatpush3.bf16.msra.mxu1 %v1656_v49  ;;  %1076 = vmatprep.mubr.bf16.mxu1 %v280_v56  ;;  %v288_v49 = vrot.slane %v26_v46, %v1896_v41 }
  0x26   :  { %1512 = vmatprep.subr.bf16.mxu1 %v1659_v55 }
  0x27   :  { %1491 = vmatpush3.bf16.msra.mxu0 %v1658_v54  ;;  %v296_v52 = vcombine.high %v288_v49, %v288_v49  ;;  %v1714_v54 = vld [vmem:[%s2155_s1 + $0x238] sm:$0xff]  }
  0x28   :  { %1492 = vmatprep.subr.bf16.mxu0 %v1661_v58 }
  0x29   :  { %1513 = vmatpush3.bf16.msra.mxu1 %v1660_v57  ;;  %v317_v55 = vrot.slane %v296_v52, %v1896_v41  ;;  %v303_v57 = vrot.slane %v288_v49, %v1896_v41 }
  0x2a   :  { %1514 = vmatprep.subr.bf16.mxu1 %v1663_v60 }
  0x2b   :  { %1493 = vmatpush3.bf16.msra.mxu0 %v1662_v59  ;;  %v319_v56 = vcombine.high %v317_v55, %v317_v55 }
  0x2c   :  { %1494 = vmatprep.subr.bf16.mxu0 %v1665_v62 }
  0x2d   :  { %1515 = vmatpush3.bf16.msra.mxu1 %v1664_v61 }
  0x2e   :  { %1516 = vmatprep.subr.bf16.mxu1 %v1667_v0 }
  0x2f   :  { %1495 = vmatpush3.bf16.msra.mxu0 %v1666_v63 }
  0x30   :  { %1496 = vmatprep.subr.bf16.mxu0 %v1669_v2 }
  0x31   :  { %1517 = vmatpush3.bf16.msra.mxu1 %v1668_v1 }
  0x32   :  { %1518 = vmatprep.subr.bf16.mxu1 %v1671_v4 }
  0x33   :  { %1497 = vmatpush3.bf16.msra.mxu0 %v1670_v3 }
  0x34   :  { %1498 = vmatprep.subr.bf16.mxu0 %v1673_v6 }
  0x35   :  { %1519 = vmatpush3.bf16.msra.mxu1 %v1672_v5 }
  0x36   :  { %1520 = vmatprep.subr.bf16.mxu1 %v1675_v8 }
  0x37   :  { %1499 = vmatpush3.bf16.msra.mxu0 %v1674_v7 }
  0x38   :  { %1500 = vmatprep.subr.bf16.mxu0 %v1677_v10 }
  0x39   :  { %1521 = vmatpush3.bf16.msra.mxu1 %v1676_v9 }
  0x3a   :  { %1522 = vmatprep.subr.bf16.mxu1 %v1679_v12 }
  0x3b   :  { %1501 = vmatpush3.bf16.msra.mxu0 %v1678_v11 }
  0x3c   :  { %1502 = vmatprep.subr.bf16.mxu0 %v1681_v14 }
  0x3d   :  { %1523 = vmatpush3.bf16.msra.mxu1 %v1680_v13 }
  0x3e   :  { %1524 = vmatprep.subr.bf16.mxu1 %v1683_v16 }
  0x3f   :  { %1503 = vmatpush3.bf16.msra.mxu0 %v1682_v15 }
  0x40   :  { %1532 = vmatprep.subr.bf16.mxu0 %v1685_v19 }
  0x41   :  { %1525 = vmatpush3.bf16.msra.mxu1 %v1684_v17 }
  0x42   :  { %1037 = vmatmul.mubr.bf16.vlgmr.msra.gmra.mrb[4].mxu0 %v262_v18  ;;  %1554 = vmatprep.subr.bf16.mxu1 %v1687_v21 }
  0x43   :  { %1533 = vmatpush3.bf16.msra.mxu0 %v1686_v20  ;;  %1116 = vmatprep.mubr.bf16.mxu0 %v317_v55 }
  0x44   :  { %1077 = vmatmul.mubr.bf16.vlgmr.msra.gmra.mrb[4].mxu1 %v278_v23  ;;  %1534 = vmatprep.subr.bf16.mxu0 %v1689_v24 }
  0x45   :  { %1555 = vmatpush3.bf16.msra.mxu1 %v1688_v22 }
  0x46   :  { %1556 = vmatprep.subr.bf16.mxu1 %v1691_v26 }
  0x47   :  { %1535 = vmatpush3.bf16.msra.mxu0 %v1690_v25 }
  0x48   :  { %1536 = vmatprep.subr.bf16.mxu0 %v1693_v28 }
  0x49   :  { %1557 = vmatpush3.bf16.msra.mxu1 %v1692_v27 }
  0x4a   :  { %1558 = vmatprep.subr.bf16.mxu1 %v1695_v30 }
  0x4b   :  { %1537 = vmatpush3.bf16.msra.mxu0 %v1694_v29 }
  0x4c   :  { %1538 = vmatprep.subr.bf16.mxu0 %v1697_v32 }
  0x4d   :  { %1559 = vmatpush3.bf16.msra.mxu1 %v1696_v31 }
  0x4e   :  { %1560 = vmatprep.subr.bf16.mxu1 %v1699_v34 }
  0x4f   :  { %1539 = vmatpush3.bf16.msra.mxu0 %v1698_v33 }
  0x50   :  { %1540 = vmatprep.subr.bf16.mxu0 %v1701_v36 }
  0x51   :  { %1561 = vmatpush3.bf16.msra.mxu1 %v1700_v35 }
  0x52   :  { %1562 = vmatprep.subr.bf16.mxu1 %v1703_v38 }
  0x53   :  { %1541 = vmatpush3.bf16.msra.mxu0 %v1702_v37 }
  0x54   :  { %1542 = vmatprep.subr.bf16.mxu0 %v1705_v40 }
  0x55   :  { %1563 = vmatpush3.bf16.msra.mxu1 %v1704_v39 }
  0x56   :  { %1564 = vmatprep.subr.bf16.mxu1 %v1707_v43 }
  0x57   :  { %1543 = vmatpush3.bf16.msra.mxu0 %v1706_v42 }
  0x58   :  { %1544 = vmatprep.subr.bf16.mxu0 %v1709_v45 }
  0x59   :  { %1565 = vmatpush3.bf16.msra.mxu1 %v1708_v44 }
  0x5a   :  { %1566 = vmatprep.subr.bf16.mxu1 %v1711_v48 }
  0x5b   :  { %1545 = vmatpush3.bf16.msra.mxu0 %v1710_v47 }
  0x5c   :  { %1546 = vmatprep.subr.bf16.mxu0 %v1713_v50 }
  0x5d   :  { %11 = vsyncpa [#allocation3], 0  ;;  %1567 = vmatpush3.bf16.msra.mxu1 %v1712_v51  ;;  %v1716_v58 = vld [vmem:[%s2155_s1 + $0x2b8] sm:$0xff]   ;;  %1156 = vmatprep.mubr.bf16.mxu1 %v319_v56  ;;  %v281_v59 = vcombine.high %v26_v46, %v26_v46  ;;  %v1718_v60 = vld [vmem:[%s2155_s1 + $0x300] sm:$0xff]   ;;  %v1753_v61 = vmov 0.0   ;;  %v318_v62 = vcombine.high %v303_v57, %v303_v57  ;;  %vm1754_vm0 = vmmov 0  }
  0x5e   :  { %1568 = vmatprep.subr.bf16.mxu1 %v1715_v53  ;;  %v1719_v0 = vld [vmem:[%s2155_s1 + $0x308] sm:$0xff]   ;;  %vm920_vm1 = vcmask 261120   ;;  %v1720_v2 = vld [vmem:[%s2158_s4] sm:$0xff]   ;;  %v1722_v4 = vld [vmem:[%s2158_s4 + $0x10] sm:$0xff]   ;;  %s1755_s22 = smov [#allocation2]   ;;  %vm1319_vm2 = vcmask 74752  }
  0x5f   :  { %1547 = vmatpush3.bf16.msra.mxu0 %v1714_v54  ;;  %v295_v63 = vrot.slane %v281_v59, %v1896_v41  ;;  %v1721_v3 = vld [vmem:[%s2158_s4 + $0x8] sm:$0xff]   ;;  %v1724_v5 = vld [vmem:[%s2158_s4 + $0x20] sm:$0xff]   ;;  %v1726_v7 = vld [vmem:[%s2158_s4 + $0x30] sm:$0xff]   ;;  %s1327_s23 = sshll.u32 %s1755_s22, 4  ;;  %s1328_s23 = int_to_ptr.vmem [resolvable:$true] %s1327_s23 }
  0x60   :  { %1588 = vmatprep.subr.bf16.mxu0 %v1753_v61  ;;  %v1725_v6 = vld [vmem:[%s2158_s4 + $0x28] sm:$0xff]   ;;  %v1727_v8 = vld [vmem:[%s2158_s4 + $0x38] sm:$0xff]   ;;  %v1335_v10 = vld [vmem:[%s2156_s2] ss:$0 sm:$0xff]  ;;  %p1733_p1 = scmp.lt.s32.totalorder %s1328_s23, %s1328_s23 }
  0x61   :  { %1569 = vmatpush3.bf16.msra.mxu1 %v1716_v58  ;;  %v310_v1 = vrot.slane %v295_v63, %v1896_v41  ;;  %v1723_v41 = vld [vmem:[%s2158_s4 + $0x18] sm:$0xff]   ;;  %v1205_v50 = vld [vmem:[%s2157_s3] sm:$0x3]  ;;  %s1728_s3 = scalar_lea.vmem %s1328_s23, 32 }
  0x62   :  { %1117 = vmatmul.mubr.bf16.vlgmr.msra.gmra.mrb[8].mxu0 %v303_v57  ;;  %1596 = vmatprep.subr.bf16.mxu1 %v1753_v61  ;;  %v1435_v56 = vld [vmem:[%s2159_s5] ss:$0 sm:$0xff]  ;;  %p1729_p0 = scmp.ne.s32.totalorder %s1328_s23, %s1728_s3  ;;  %p1734_p2 = scmp.lt.s32.totalorder %s1728_s3, %s1728_s3 }
  0x63   :  { %1589 = vmatpush3.bf16.msra.mxu0 %v1718_v60  ;;  %1592 = vmatprep.mubr.msk.bf16.mxu0 %vm1754_vm0, %v1753_v61 }
  0x64   :  { %1157 = vmatmul.mubr.bf16.vlgmr.msra.gmra.mrb[8].mxu1 %v318_v62  ;;  %1590 = vmatprep.subr.bf16.mxu0 %v1753_v61  ;;  %p1735_p3 = por %p1734_p2, %p1733_p1 }
  0x65   :  { %1612 = vmatprep.mubr.msk.bf16.mxu1 %vm1754_vm0, %v1753_v61  ;;  %1597 = vmatpush3.bf16.msra.mxu1 %v1720_v2 }
  0x66   :  { %1598 = vmatprep.subr.bf16.mxu1 %v1753_v61  ;;  %p1736_p4 = pnand %p1735_p3, %p1729_p0 }
  0x67   :  { %1591 = vmatpush3.bf16.msra.mxu0 %v1719_v0 }
  0x69   :  { %1599 = vmatpush3.bf16.msra.mxu1 %v1721_v3 }
  0x6a   :  { %1593 = vmatmul.mubr.msk.bf16.vlgmr.msra.gmra.mrb[12].mxu0 %vm920_vm1, %v310_v1  ;;  %1600 = vmatprep.subr.bf16.mxu1 %v1753_v61 }
  0x6d   :  { %1601 = vmatpush3.bf16.msra.mxu1 %v1722_v4 }
  0x6e   :  { %1602 = vmatprep.subr.bf16.mxu1 %v1753_v61 }
  0x71   :  { %1603 = vmatpush3.bf16.msra.mxu1 %v1723_v41 }
  0x72   :  { %1604 = vmatprep.subr.bf16.mxu1 %v1753_v61 }
  0x75   :  { %1605 = vmatpush3.bf16.msra.mxu1 %v1724_v5 }
  0x76   :  { %1606 = vmatprep.subr.bf16.mxu1 %v1753_v61 }
  0x79   :  { %1607 = vmatpush3.bf16.msra.mxu1 %v1725_v6 }
  0x7a   :  { %1608 = vmatprep.subr.bf16.mxu1 %v1753_v61 }
  0x7d   :  { %1609 = vmatpush3.bf16.msra.mxu1 %v1726_v7 }
  0x7e   :  { %1610 = vmatprep.subr.bf16.mxu1 %v1753_v61 }
  0x81   :  { %1611 = vmatpush3.bf16.msra.mxu1 %v1727_v8 }
  0xf5   :  { %v1460_v9 = vpop.f32.mrb[0].mxu0 }
  0xf6   :  { %v1461_v11 = vpop.f32.mrb[1].mxu0 }
  0xf7   :  { %v1462_v12 = vadd.f32 %v1461_v11, %v1460_v9  ;;  %v1463_v13 = vpop.f32.mrb[2].mxu0  ;;  %v1482_v14 = vpop.f32.mrb[0].mxu1 }
  0xf8   :  { %v1464_v15 = vpop.f32.mrb[3].mxu0  ;;  %v1483_v16 = vpop.f32.mrb[1].mxu1 }
  0xf9   :  { %v959_v17 = vadd.f32 %v1462_v12, %v1335_v10  ;;  %v1484_v18 = vadd.f32 %v1483_v16, %v1482_v14  ;;  %v1485_v19 = vpop.f32.mrb[2].mxu1 }
  0xfa   :  { %v1486_v20 = vpop.f32.mrb[3].mxu1 }
  0xfb   :  { %v999_v21 = vadd.f32 %v1484_v18, %v959_v17 }
 0x115   :  { %v1504_v22 = vpop.f32.mrb[4].mxu0 }
 0x116   :  { %v1505_v23 = vpop.f32.mrb[5].mxu0 }
 0x117   :  { %v1506_v24 = vadd.f32 %v1505_v23, %v1504_v22  ;;  %v1507_v25 = vpop.f32.mrb[6].mxu0  ;;  %v1526_v26 = vpop.f32.mrb[4].mxu1 }
 0x118   :  { %v1508_v27 = vpop.f32.mrb[7].mxu0  ;;  %v1527_v28 = vpop.f32.mrb[5].mxu1 }
 0x119   :  { %v1039_v29 = vadd.f32 %v1506_v24, %v999_v21  ;;  %v1528_v30 = vadd.f32 %v1527_v28, %v1526_v26  ;;  %v1529_v31 = vpop.f32.mrb[6].mxu1 }
 0x11a   :  { %v1530_v32 = vpop.f32.mrb[7].mxu1 }
 0x11b   :  { %v1079_v33 = vadd.f32 %v1528_v30, %v1039_v29 }
 0x135   :  { %v1548_v34 = vpop.f32.mrb[8].mxu0 }
 0x136   :  { %v1549_v35 = vpop.f32.mrb[9].mxu0 }
 0x137   :  { %v1550_v36 = vadd.f32 %v1549_v35, %v1548_v34  ;;  %v1570_v37 = vpop.f32.mrb[8].mxu1  ;;  %v1551_v38 = vpop.f32.mrb[10].mxu0 }
 0x138   :  { %v1571_v39 = vpop.f32.mrb[9].mxu1  ;;  %v1552_v40 = vpop.f32.mrb[11].mxu0 }
 0x139   :  { %v1119_v42 = vadd.f32 %v1550_v36, %v1079_v33  ;;  %v1572_v43 = vadd.f32 %v1571_v39, %v1570_v37  ;;  %v1573_v44 = vpop.f32.mrb[10].mxu1 }
 0x13a   :  { %v1574_v45 = vpop.f32.mrb[11].mxu1 }
 0x13b   :  { %v1159_v46 = vadd.f32 %v1572_v43, %v1119_v42 }
 0x13d   :  { %v1198_v47 = vpop.f32.mrb[12].mxu0 }
 0x13e   :  { %v1199_v48 = vadd.f32 %v1198_v47, %v1159_v46  ;;  %v1594_v49 = vpop.f32.mrb[13].mxu0 }
 0x13f   :  { %v1201_v51 = vpop.f32.mrb[14].mxu0 }
 0x140   :  { %v1204_v52 = vmax.f32 %v1199_v48, 0.0  ;;  %v1595_v53 = vpop.f32.mrb[15].mxu0 }
 0x142   :  { %v1206_v54 = vmul.f32 %v1205_v50, %v1204_v52 }
 0x144   :  { %v1207_v55 = vpack.c.bf16 %v1206_v54, %v1206_v54 }
 0x146   :  { %1613 = vmatmul.mubr.bf16.vlgmr.msra.gmra.mrb[12].mxu1 %v1207_v55 }
 0x219   :  { %v1313_v57 = vpop.f32.mrb[12].mxu1 }
 0x21a   :  { %v1314_v58 = vadd.f32 %v1435_v56, %v1313_v57  ;;  %v1614_v59 = vpop.f32.mrb[13].mxu1 }
 0x21b   :  { %v1316_v60 = vpop.f32.mrb[14].mxu1 }
 0x21c   :  { %v1615_v61 = vpop.f32.mrb[15].mxu1  ;;  %1320 = vst.msk [vmem:[#allocation2] sm:$0x3] %vm1319_vm2, %v1314_v58 }
 0x21d   :  { %1739 = shalt.err (!%p1736_p4)
}
 0x21e   :  { %s1740_s5 = scalar_lea.hbm %s2160_s6, 32 }
 0x21f   :  { %p1741_p5 = scmp.ne.s32.totalorder %s2160_s6, %s1740_s5  ;;  %p1744_p6 = scmp.lt.u32.totalorder %s1740_s5, %s2160_s6 }
 0x221   :  { %p1746_p7 = pnand %p1744_p6, %p1741_p5 }
 0x223   :  { %1749 = shalt.err (!%p1746_p7)
}
 0x224   :  { %1330 = dma.vmem_to_hbm [thread:$0]  %s1328_s23, 32, %s2160_s6, [#allocation3]  }
 0x225   :  { %1750 = dma.done.wait [#allocation3], 32  }
 0x226   :  { %1751 = vsyncadd [#allocation3], 4294967264 }
 0x227   :  { %1334 = vsyncpa [#allocation3], 1 }

// kernel: convnet_forward.4
= control target key start
LH: loop header
LB: loop body
LE: loop exit
PB: predicated region body
PF: predicated region fallthrough
CT: control target
= control target key end

     0   :  { %v2753_v0 = vmov 0   ;;  %vm390_vm0 = vcmask 130048   ;;  %vm1649_vm1 = vcmask 1041408   ;;  %vm2121_vm2 = vcmask 257024   ;;  %s3959_s4 = inlined_call_operand.vmem [shape: bf16[400,128], index: 4, kind: input, shape index: {}]   ;;  %s3960_s0 = inlined_call_operand.vmem [shape: bf16[98,400], index: 0, kind: input, shape index: {}]   ;;  %s3961_s1 = inlined_call_operand.vmem [shape: bf16[98,400], index: 1, kind: input, shape index: {}]   ;;  %s3962_s2 = inlined_call_operand.vmem [shape: bf16[98,400], index: 2, kind: input, shape index: {}]   ;;  %s3963_s3 = inlined_call_operand.vmem [shape: bf16[98,400], index: 3, kind: input, shape index: {}]   ;;  %s3964_s5 = inlined_call_operand.vmem [shape: f32[1,128], index: 5, kind: input, shape index: {}]   ;;  %s3965_s6 = inlined_call_operand.vmem [shape: f32[1,128], index: 6, kind: input, shape index: {}]   ;;  %s3966_s7 = inlined_call_operand.vmem [shape: f32[1,128], index: 7, kind: input, shape index: {}]   ;;  %s3967_s8 = inlined_call_operand.vmem [shape: bf16[98,32], index: 8, kind: output, shape index: {}]  }
   0x1   :  { %500 = vmatprep.subr.bf16.mxu1 %v2753_v0  ;;  %v2803_v1 = vld [vmem:[%s3959_s4 + $0x40] sm:$0xff]   ;;  %v2820_v4 = vld [vmem:[%s3959_s4 + $0x48] sm:$0xff]   ;;  %v2838_v7 = vld [vmem:[%s3959_s4 + $0x50] sm:$0xff]   ;;  %vm2134_vm3 = vcmask 253952  }
   0x2   :  { %v2808_v2 = vld [vmem:[%s3959_s4 + $0x80] sm:$0xff]   ;;  %2332 = vmatprep.subr.bf16.mxu0 %v2803_v1  ;;  %v2827_v5 = vld [vmem:[%s3959_s4 + $0x88] sm:$0xff]   ;;  %v2844_v8 = vld [vmem:[%s3959_s4 + $0x90] sm:$0xff]  }
   0x3   :  { %v2814_v3 = vld [vmem:[%s3959_s4] sm:$0xff]   ;;  %501 = vmatpush1.bf16.msra.mxu1 %v2808_v2  ;;  %v2833_v6 = vld [vmem:[%s3959_s4 + $0x8] sm:$0xff]   ;;  %v2851_v9 = vld [vmem:[%s3959_s4 + $0x10] sm:$0xff]  }
   0x4   :  { %2333 = vmatpush3.bf16.msra.mxu0 %v2814_v3  ;;  %502 = vmatprep.subr.bf16.mxu1 %v2753_v0  ;;  %v2857_v10 = vld [vmem:[%s3959_s4 + $0x58] sm:$0xff]   ;;  %v2876_v13 = vld [vmem:[%s3959_s4 + $0x60] sm:$0xff]   ;;  %v2895_v16 = vld [vmem:[%s3959_s4 + $0x68] sm:$0xff]  }
   0x5   :  { %2334 = vmatprep.subr.bf16.mxu0 %v2820_v4  ;;  %v2863_v11 = vld [vmem:[%s3959_s4 + $0x98] sm:$0xff]   ;;  %v2882_v14 = vld [vmem:[%s3959_s4 + $0xa0] sm:$0xff]   ;;  %v2901_v17 = vld [vmem:[%s3959_s4 + $0xa8] sm:$0xff]  }
   0x6   :  { %v2870_v12 = vld [vmem:[%s3959_s4 + $0x18] sm:$0xff]   ;;  %v2889_v15 = vld [vmem:[%s3959_s4 + $0x20] sm:$0xff]   ;;  %v2908_v18 = vld [vmem:[%s3959_s4 + $0x28] sm:$0xff]  }
   0x7   :  { %503 = vmatpush1.bf16.msra.mxu1 %v2827_v5  ;;  %v2914_v19 = vld [vmem:[%s3959_s4 + $0x70] sm:$0xff]   ;;  %v2932_v22 = vld [vmem:[%s3959_s4 + $0x78] sm:$0xff]   ;;  %v2963_v28 = vld [vmem:[%s3959_s4 + $0xc0] sm:$0xff]  }
   0x8   :  { %2335 = vmatpush3.bf16.msra.mxu0 %v2833_v6  ;;  %504 = vmatprep.subr.bf16.mxu1 %v2753_v0  ;;  %v2919_v20 = vld [vmem:[%s3959_s4 + $0xb0] sm:$0xff]   ;;  %v2942_v24 = vld [vmem:[%s3959_s4 + $0xb8] sm:$0xff]   ;;  %v105_v48 = vld [vmem:[%s3960_s0 + $0xc0] sm:$0x11] }
   0x9   :  { %2336 = vmatprep.subr.bf16.mxu0 %v2838_v7  ;;  %v2925_v21 = vld [vmem:[%s3959_s4 + $0x30] sm:$0xff]   ;;  %v2595_v25 = vld [vmem:[%s3960_s0 + $0xc] ss:$16 sps:$4 sm:$0xff]   ;;  %v2593_v30 = vld [vmem:[%s3960_s0 + $0x8] ss:$16 sps:$4 sm:$0xff]   ;;  %v2166_v50 = vcombine.high %v105_v48, %v105_v48  ;;  %v2165_v55 = vcombine.low %v105_v48, %v105_v48 }
   0xa   :  { %v2591_v23 = vld [vmem:[%s3960_s0 + $0x4] ss:$16 sps:$4 sm:$0xff]   ;;  %v2952_v26 = vld [vmem:[%s3959_s4 + $0x38] sm:$0xff]   ;;  %2194 = vmatprep.mubr.msk.bf16.mxu1 %vm390_vm0, %v2595_v25  ;;  %v2589_v27 = vld [vmem:[%s3960_s0] ss:$16 sps:$4 sm:$0xff]  }
   0xb   :  { %505 = vmatpush1.bf16.msra.mxu1 %v2844_v8  ;;  %444 = vmatprep.mubr.bf16.mxu0 %v2591_v23  ;;  %v2596_v29 = vld [vmem:[%s3960_s0 + $0x24] ss:$16 sps:$4 sm:$0xff]   ;;  %v2599_v31 = vld [vmem:[%s3960_s0 + $0x2c] ss:$16 sps:$4 sm:$0xff]   ;;  %v2598_v32 = vld [vmem:[%s3960_s0 + $0x20] ss:$16 sps:$4 sm:$0xff]  }
   0xc   :  { %2337 = vmatpush3.bf16.msra.mxu0 %v2851_v9  ;;  %506 = vmatprep.subr.bf16.mxu1 %v2753_v0  ;;  %v2602_v33 = vld [vmem:[%s3960_s0 + $0x44] ss:$16 sps:$4 sm:$0xff]   ;;  %v2601_v34 = vld [vmem:[%s3960_s0 + $0x28] ss:$16 sps:$4 sm:$0xff]   ;;  %v2605_v35 = vld [vmem:[%s3960_s0 + $0x4c] ss:$16 sps:$4 sm:$0xff]  }
   0xd   :  { %2338 = vmatprep.subr.bf16.mxu0 %v2857_v10  ;;  %v2604_v36 = vld [vmem:[%s3960_s0 + $0x40] ss:$16 sps:$4 sm:$0xff]   ;;  %v2608_v37 = vld [vmem:[%s3960_s0 + $0x64] ss:$16 sps:$4 sm:$0xff]   ;;  %v2607_v38 = vld [vmem:[%s3960_s0 + $0x48] ss:$16 sps:$4 sm:$0xff]  }
   0xe   :  { %v2611_v39 = vld [vmem:[%s3960_s0 + $0x6c] ss:$16 sps:$4 sm:$0xff]   ;;  %v2610_v40 = vld [vmem:[%s3960_s0 + $0x60] ss:$16 sps:$4 sm:$0xff]   ;;  %v2614_v41 = vld [vmem:[%s3960_s0 + $0x84] ss:$16 sps:$4 sm:$0xff]  }
   0xf   :  { %507 = vmatpush1.bf16.msra.mxu1 %v2863_v11  ;;  %v2613_v42 = vld [vmem:[%s3960_s0 + $0x68] ss:$16 sps:$4 sm:$0xff]   ;;  %v2617_v43 = vld [vmem:[%s3960_s0 + $0x8c] ss:$16 sps:$4 sm:$0xff]   ;;  %v2616_v44 = vld [vmem:[%s3960_s0 + $0x80] ss:$16 sps:$4 sm:$0xff]  }
  0x10   :  { %2339 = vmatpush3.bf16.msra.mxu0 %v2870_v12  ;;  %508 = vmatprep.subr.bf16.mxu1 %v2753_v0  ;;  %v2620_v45 = vld [vmem:[%s3960_s0 + $0xa4] ss:$16 sps:$4 sm:$0xff]   ;;  %v2619_v46 = vld [vmem:[%s3960_s0 + $0x88] ss:$16 sps:$4 sm:$0xff]   ;;  %v2623_v47 = vld [vmem:[%s3960_s0 + $0xac] ss:$16 sps:$4 sm:$0xff]  }
  0x11   :  { %2340 = vmatprep.subr.bf16.mxu0 %v2876_v13  ;;  %v2622_v49 = vld [vmem:[%s3960_s0 + $0xa0] ss:$16 sps:$4 sm:$0xff]   ;;  %v106_v51 = vld [vmem:[%s3960_s0 + $0xc8] sm:$0x11]  ;;  %v2632_v54 = vld [vmem:[%s3961_s1 + $0x4] ss:$16 sps:$4 sm:$0xff]  }
  0x12   :  { %v2625_v52 = vld [vmem:[%s3960_s0 + $0xa8] ss:$16 sps:$4 sm:$0xff]   ;;  %v2168_v53 = vcombine.high %v106_v51, %v106_v51  ;;  %v2167_v56 = vcombine.low %v106_v51, %v106_v51  ;;  %v2635_v57 = vld [vmem:[%s3961_s1 + $0xc] ss:$16 sps:$4 sm:$0xff]   ;;  %v2630_v58 = vld [vmem:[%s3961_s1] ss:$16 sps:$4 sm:$0xff]  }
  0x13   :  { %509 = vmatpush1.bf16.msra.mxu1 %v2882_v14  ;;  %v2636_v59 = vld [vmem:[%s3961_s1 + $0x24] ss:$16 sps:$4 sm:$0xff]   ;;  %v2633_v60 = vld [vmem:[%s3961_s1 + $0x8] ss:$16 sps:$4 sm:$0xff]   ;;  %v2639_v61 = vld [vmem:[%s3961_s1 + $0x2c] ss:$16 sps:$4 sm:$0xff]  }
  0x14   :  { %2341 = vmatpush3.bf16.msra.mxu0 %v2889_v15  ;;  %510 = vmatprep.subr.bf16.mxu1 %v2753_v0  ;;  %v2638_v62 = vld [vmem:[%s3961_s1 + $0x20] ss:$16 sps:$4 sm:$0xff]   ;;  %v2642_v63 = vld [vmem:[%s3961_s1 + $0x44] ss:$16 sps:$4 sm:$0xff]   ;;  %v2641_v23 = vld [vmem:[%s3961_s1 + $0x28] ss:$16 sps:$4 sm:$0xff]  }
  0x15   :  { %2342 = vmatprep.subr.bf16.mxu0 %v2895_v16  ;;  %v2645_v25 = vld [vmem:[%s3961_s1 + $0x4c] ss:$16 sps:$4 sm:$0xff]   ;;  %v2673_v51 = vld [vmem:[%s3962_s2 + $0x8] ss:$16 sps:$4 sm:$0xff]  }
  0x16   :  { %v2675_v48 = vld [vmem:[%s3962_s2 + $0xc] ss:$16 sps:$4 sm:$0xff]  }
  0x17   :  { %511 = vmatpush1.bf16.msra.mxu1 %v2901_v17 }
  0x18   :  { %2343 = vmatpush3.bf16.msra.mxu0 %v2908_v18  ;;  %512 = vmatprep.subr.bf16.mxu1 %v2753_v0 }
  0x19   :  { %2344 = vmatprep.subr.bf16.mxu0 %v2914_v19 }
  0x1b   :  { %513 = vmatpush1.bf16.msra.mxu1 %v2919_v20 }
  0x1c   :  { %2345 = vmatpush3.bf16.msra.mxu0 %v2925_v21  ;;  %514 = vmatprep.subr.bf16.mxu1 %v2753_v0 }
  0x1d   :  { %2346 = vmatprep.subr.bf16.mxu0 %v2932_v22 }
  0x1f   :  { %515 = vmatpush1.bf16.msra.mxu1 %v2942_v24 }
  0x20   :  { %2347 = vmatpush3.bf16.msra.mxu0 %v2952_v26  ;;  %516 = vmatprep.subr.bf16.mxu1 %v2753_v0 }
  0x21   :  { %2390 = vmatprep.subr.bf16.mxu0 %v2803_v1 }
  0x23   :  { %445 = vmatmul.mubr.bf16.vlgmr.msra.gmra.mrb[0].mxu0 %v2589_v27  ;;  %517 = vmatpush1.bf16.msra.mxu1 %v2963_v28  ;;  %v2644_v27 = vld [vmem:[%s3961_s1 + $0x40] ss:$16 sps:$4 sm:$0xff]  }
  0x24   :  { %2391 = vmatpush3.bf16.msra.mxu0 %v2814_v3  ;;  %850 = vmatprep.subr.bf16.mxu1 %v2753_v0 }
  0x25   :  { %452 = vmatprep.mubr.bf16.mxu0 %v2596_v29  ;;  %2392 = vmatprep.subr.bf16.mxu0 %v2820_v4  ;;  %v2648_v29 = vld [vmem:[%s3961_s1 + $0x64] ss:$16 sps:$4 sm:$0xff]  }
  0x26   :  { %533 = vmatmul.mubr.bf16.vlgmr.msra.gmra.mrb[0].mxu1 %v2593_v30  ;;  %v2647_v30 = vld [vmem:[%s3961_s1 + $0x48] ss:$16 sps:$4 sm:$0xff]  }
  0x27   :  { %851 = vmatpush1.bf16.msra.mxu1 %v2808_v2  ;;  %2195 = vmatprep.mubr.msk.bf16.mxu1 %vm390_vm0, %v2599_v31  ;;  %v2651_v31 = vld [vmem:[%s3961_s1 + $0x6c] ss:$16 sps:$4 sm:$0xff]  }
  0x28   :  { %2393 = vmatpush3.bf16.msra.mxu0 %v2833_v6  ;;  %852 = vmatprep.subr.bf16.mxu1 %v2753_v0 }
  0x29   :  { %2394 = vmatprep.subr.bf16.mxu0 %v2838_v7 }
  0x2b   :  { %453 = vmatmul.mubr.bf16.gmra.mrb[4].mxu0 %v2598_v32  ;;  %853 = vmatpush1.bf16.msra.mxu1 %v2827_v5  ;;  %v2650_v32 = vld [vmem:[%s3961_s1 + $0x60] ss:$16 sps:$4 sm:$0xff]  }
  0x2c   :  { %460 = vmatprep.mubr.bf16.mxu0 %v2602_v33  ;;  %2395 = vmatpush3.bf16.msra.mxu0 %v2851_v9  ;;  %v2654_v33 = vld [vmem:[%s3961_s1 + $0x84] ss:$16 sps:$4 sm:$0xff]  }
  0x2d   :  { %854 = vmatprep.subr.bf16.mxu1 %v2753_v0  ;;  %2396 = vmatprep.subr.bf16.mxu0 %v2857_v10 }
  0x2e   :  { %541 = vmatmul.mubr.bf16.gmra.mrb[4].mxu1 %v2601_v34  ;;  %v2653_v34 = vld [vmem:[%s3961_s1 + $0x68] ss:$16 sps:$4 sm:$0xff]  }
  0x2f   :  { %2196 = vmatprep.mubr.msk.bf16.mxu1 %vm390_vm0, %v2605_v35  ;;  %855 = vmatpush1.bf16.msra.mxu1 %v2844_v8  ;;  %v2657_v35 = vld [vmem:[%s3961_s1 + $0x8c] ss:$16 sps:$4 sm:$0xff]  }
  0x30   :  { %2397 = vmatpush3.bf16.msra.mxu0 %v2870_v12  ;;  %856 = vmatprep.subr.bf16.mxu1 %v2753_v0 }
  0x31   :  { %2398 = vmatprep.subr.bf16.mxu0 %v2876_v13 }
  0x33   :  { %461 = vmatmul.mubr.bf16.gmra.mrb[8].mxu0 %v2604_v36  ;;  %857 = vmatpush1.bf16.msra.mxu1 %v2863_v11  ;;  %v2656_v36 = vld [vmem:[%s3961_s1 + $0x80] ss:$16 sps:$4 sm:$0xff]  }
  0x34   :  { %468 = vmatprep.mubr.bf16.mxu0 %v2608_v37  ;;  %2399 = vmatpush3.bf16.msra.mxu0 %v2889_v15  ;;  %v2660_v37 = vld [vmem:[%s3961_s1 + $0xa4] ss:$16 sps:$4 sm:$0xff]  }
  0x35   :  { %858 = vmatprep.subr.bf16.mxu1 %v2753_v0  ;;  %2400 = vmatprep.subr.bf16.mxu0 %v2895_v16 }
  0x36   :  { %549 = vmatmul.mubr.bf16.gmra.mrb[8].mxu1 %v2607_v38  ;;  %v2659_v38 = vld [vmem:[%s3961_s1 + $0x88] ss:$16 sps:$4 sm:$0xff]  }
  0x37   :  { %2197 = vmatprep.mubr.msk.bf16.mxu1 %vm390_vm0, %v2611_v39  ;;  %859 = vmatpush1.bf16.msra.mxu1 %v2882_v14  ;;  %v2663_v39 = vld [vmem:[%s3961_s1 + $0xac] ss:$16 sps:$4 sm:$0xff]  }
  0x38   :  { %2401 = vmatpush3.bf16.msra.mxu0 %v2908_v18  ;;  %860 = vmatprep.subr.bf16.mxu1 %v2753_v0 }
  0x39   :  { %2402 = vmatprep.subr.bf16.mxu0 %v2914_v19 }
  0x3b   :  { %469 = vmatmul.mubr.bf16.gmra.mrb[12].mxu0 %v2610_v40  ;;  %861 = vmatpush1.bf16.msra.mxu1 %v2901_v17  ;;  %v612_v40 = vld [vmem:[%s3961_s1 + $0xc0] sm:$0x11] }
  0x3c   :  { %476 = vmatprep.mubr.bf16.mxu0 %v2614_v41  ;;  %2403 = vmatpush3.bf16.msra.mxu0 %v2925_v21  ;;  %v2226_v41 = vcombine.high %v612_v40, %v612_v40 }
  0x3d   :  { %862 = vmatprep.subr.bf16.mxu1 %v2753_v0  ;;  %2404 = vmatprep.subr.bf16.mxu0 %v2932_v22 }
  0x3e   :  { %557 = vmatmul.mubr.bf16.gmra.mrb[12].mxu1 %v2613_v42  ;;  %v613_v42 = vld [vmem:[%s3961_s1 + $0xc8] sm:$0x11] }
  0x3f   :  { %2198 = vmatprep.mubr.msk.bf16.mxu1 %vm390_vm0, %v2617_v43  ;;  %863 = vmatpush1.bf16.msra.mxu1 %v2919_v20  ;;  %v2665_v43 = vld [vmem:[%s3961_s1 + $0xa8] ss:$16 sps:$4 sm:$0xff]  }
  0x40   :  { %864 = vmatprep.subr.bf16.mxu1 %v2753_v0  ;;  %2405 = vmatpush3.bf16.msra.mxu0 %v2952_v26 }
  0x41   :  { %2448 = vmatprep.subr.bf16.mxu0 %v2803_v1 }
  0x43   :  { %477 = vmatmul.mubr.bf16.gmra.mrb[16].mxu0 %v2616_v44  ;;  %865 = vmatpush1.bf16.msra.mxu1 %v2942_v24  ;;  %v2228_v44 = vcombine.high %v613_v42, %v613_v42 }
  0x44   :  { %484 = vmatprep.mubr.bf16.mxu0 %v2620_v45  ;;  %866 = vmatprep.subr.bf16.mxu1 %v2753_v0  ;;  %v2225_v45 = vcombine.low %v612_v40, %v612_v40  ;;  %v2745_v40 = vld [vmem:[%s3963_s3 + $0xa8] ss:$16 sps:$4 sm:$0xff]  }
  0x46   :  { %565 = vmatmul.mubr.bf16.gmra.mrb[16].mxu1 %v2619_v46  ;;  %v2672_v46 = vld [vmem:[%s3962_s2 + $0x4] ss:$16 sps:$4 sm:$0xff]  }
  0x47   :  { %2199 = vmatprep.mubr.msk.bf16.mxu1 %vm390_vm0, %v2623_v47  ;;  %867 = vmatpush1.bf16.msra.mxu1 %v2963_v28  ;;  %v2227_v47 = vcombine.low %v613_v42, %v613_v42 }
  0x48   :  { %1200 = vmatprep.subr.bf16.mxu1 %v2753_v0 }
  0x4b   :  { %485 = vmatmul.mubr.bf16.gmra.mrb[20].mxu0 %v2622_v49  ;;  %v2670_v49 = vld [vmem:[%s3962_s2] ss:$16 sps:$4 sm:$0xff]  }
  0x4c   :  { %492 = vmatprep.mubr.bf16.mxu0 %v2166_v50  ;;  %v2676_v50 = vld [vmem:[%s3962_s2 + $0x24] ss:$16 sps:$4 sm:$0xff]  }
  0x4e   :  { %573 = vmatmul.mubr.bf16.gmra.mrb[20].mxu1 %v2625_v52  ;;  %v2679_v52 = vld [vmem:[%s3962_s2 + $0x2c] ss:$16 sps:$4 sm:$0xff]  }
  0x4f   :  { %2200 = vmatprep.mubr.msk.bf16.mxu1 %vm390_vm0, %v2168_v53  ;;  %v2678_v53 = vld [vmem:[%s3962_s2 + $0x20] ss:$16 sps:$4 sm:$0xff]  }
  0x53   :  { %493 = vmatmul.mubr.bf16.gmra.mrb[24].mxu0 %v2165_v55  ;;  %v2716_v55 = vld [vmem:[%s3963_s3 + $0x24] ss:$16 sps:$4 sm:$0xff]  }
  0x54   :  { %794 = vmatprep.mubr.bf16.mxu0 %v2632_v54  ;;  %v2710_v54 = vld [vmem:[%s3963_s3] ss:$16 sps:$4 sm:$0xff]  }
  0x56   :  { %581 = vmatmul.mubr.bf16.gmra.mrb[24].mxu1 %v2167_v56  ;;  %v2713_v56 = vld [vmem:[%s3963_s3 + $0x8] ss:$16 sps:$4 sm:$0xff]  }
  0x57   :  { %2229 = vmatprep.mubr.msk.bf16.mxu1 %vm390_vm0, %v2635_v57  ;;  %v2719_v57 = vld [vmem:[%s3963_s3 + $0x2c] ss:$16 sps:$4 sm:$0xff]  }
  0x5b   :  { %795 = vmatmul.mubr.bf16.vlgmr.msra.gmra.mrb[28].mxu0 %v2630_v58  ;;  %v2718_v58 = vld [vmem:[%s3963_s3 + $0x20] ss:$16 sps:$4 sm:$0xff]  }
  0x5c   :  { %2449 = vmatpush3.bf16.msra.mxu0 %v2814_v3  ;;  %802 = vmatprep.mubr.bf16.mxu0 %v2636_v59  ;;  %v2722_v59 = vld [vmem:[%s3963_s3 + $0x44] ss:$16 sps:$4 sm:$0xff]  }
  0x5d   :  { %2450 = vmatprep.subr.bf16.mxu0 %v2820_v4 }
  0x5e   :  { %883 = vmatmul.mubr.bf16.vlgmr.msra.gmra.mrb[28].mxu1 %v2633_v60  ;;  %v2721_v60 = vld [vmem:[%s3963_s3 + $0x28] ss:$16 sps:$4 sm:$0xff]  }
  0x5f   :  { %1201 = vmatpush1.bf16.msra.mxu1 %v2808_v2  ;;  %2230 = vmatprep.mubr.msk.bf16.mxu1 %vm390_vm0, %v2639_v61  ;;  %v2725_v61 = vld [vmem:[%s3963_s3 + $0x4c] ss:$16 sps:$4 sm:$0xff]  }
  0x60   :  { %2451 = vmatpush3.bf16.msra.mxu0 %v2833_v6  ;;  %1202 = vmatprep.subr.bf16.mxu1 %v2753_v0 }
  0x61   :  { %2452 = vmatprep.subr.bf16.mxu0 %v2838_v7 }
  0x63   :  { %803 = vmatmul.mubr.bf16.gmra.mrb[32].mxu0 %v2638_v62  ;;  %1203 = vmatpush1.bf16.msra.mxu1 %v2827_v5  ;;  %v2724_v62 = vld [vmem:[%s3963_s3 + $0x40] ss:$16 sps:$4 sm:$0xff]  }
  0x64   :  { %810 = vmatprep.mubr.bf16.mxu0 %v2642_v63  ;;  %2453 = vmatpush3.bf16.msra.mxu0 %v2851_v9  ;;  %v2728_v63 = vld [vmem:[%s3963_s3 + $0x64] ss:$16 sps:$4 sm:$0xff]  }
  0x65   :  { %1204 = vmatprep.subr.bf16.mxu1 %v2753_v0  ;;  %2454 = vmatprep.subr.bf16.mxu0 %v2857_v10 }
  0x66   :  { %891 = vmatmul.mubr.bf16.gmra.mrb[32].mxu1 %v2641_v23  ;;  %v2727_v23 = vld [vmem:[%s3963_s3 + $0x48] ss:$16 sps:$4 sm:$0xff]  }
  0x67   :  { %2231 = vmatprep.mubr.msk.bf16.mxu1 %vm390_vm0, %v2645_v25  ;;  %1205 = vmatpush1.bf16.msra.mxu1 %v2844_v8  ;;  %v2731_v25 = vld [vmem:[%s3963_s3 + $0x6c] ss:$16 sps:$4 sm:$0xff]  }
  0x68   :  { %2455 = vmatpush3.bf16.msra.mxu0 %v2870_v12  ;;  %1206 = vmatprep.subr.bf16.mxu1 %v2753_v0 }
  0x69   :  { %2456 = vmatprep.subr.bf16.mxu0 %v2876_v13 }
  0x6b   :  { %811 = vmatmul.mubr.bf16.gmra.mrb[36].mxu0 %v2644_v27  ;;  %1207 = vmatpush1.bf16.msra.mxu1 %v2863_v11  ;;  %v2730_v27 = vld [vmem:[%s3963_s3 + $0x60] ss:$16 sps:$4 sm:$0xff]  }
  0x6c   :  { %818 = vmatprep.mubr.bf16.mxu0 %v2648_v29  ;;  %2457 = vmatpush3.bf16.msra.mxu0 %v2889_v15  ;;  %v2734_v29 = vld [vmem:[%s3963_s3 + $0x84] ss:$16 sps:$4 sm:$0xff]  }
  0x6d   :  { %1208 = vmatprep.subr.bf16.mxu1 %v2753_v0  ;;  %2458 = vmatprep.subr.bf16.mxu0 %v2895_v16 }
  0x6e   :  { %899 = vmatmul.mubr.bf16.gmra.mrb[36].mxu1 %v2647_v30  ;;  %v2733_v30 = vld [vmem:[%s3963_s3 + $0x68] ss:$16 sps:$4 sm:$0xff]  }
  0x6f   :  { %2232 = vmatprep.mubr.msk.bf16.mxu1 %vm390_vm0, %v2651_v31  ;;  %1209 = vmatpush1.bf16.msra.mxu1 %v2882_v14  ;;  %v2737_v31 = vld [vmem:[%s3963_s3 + $0x8c] ss:$16 sps:$4 sm:$0xff]  }
  0x70   :  { %2459 = vmatpush3.bf16.msra.mxu0 %v2908_v18  ;;  %1210 = vmatprep.subr.bf16.mxu1 %v2753_v0 }
  0x71   :  { %2460 = vmatprep.subr.bf16.mxu0 %v2914_v19 }
  0x73   :  { %819 = vmatmul.mubr.bf16.gmra.mrb[40].mxu0 %v2650_v32  ;;  %1211 = vmatpush1.bf16.msra.mxu1 %v2901_v17  ;;  %v2736_v32 = vld [vmem:[%s3963_s3 + $0x80] ss:$16 sps:$4 sm:$0xff]  }
  0x74   :  { %826 = vmatprep.mubr.bf16.mxu0 %v2654_v33  ;;  %2461 = vmatpush3.bf16.msra.mxu0 %v2925_v21  ;;  %v2740_v33 = vld [vmem:[%s3963_s3 + $0xa4] ss:$16 sps:$4 sm:$0xff]  }
  0x75   :  { %1212 = vmatprep.subr.bf16.mxu1 %v2753_v0  ;;  %2462 = vmatprep.subr.bf16.mxu0 %v2932_v22 }
  0x76   :  { %907 = vmatmul.mubr.bf16.gmra.mrb[40].mxu1 %v2653_v34  ;;  %v2739_v34 = vld [vmem:[%s3963_s3 + $0x88] ss:$16 sps:$4 sm:$0xff]  }
  0x77   :  { %2233 = vmatprep.mubr.msk.bf16.mxu1 %vm390_vm0, %v2657_v35  ;;  %1213 = vmatpush1.bf16.msra.mxu1 %v2919_v20  ;;  %v2743_v35 = vld [vmem:[%s3963_s3 + $0xac] ss:$16 sps:$4 sm:$0xff]  }
  0x78   :  { %1214 = vmatprep.subr.bf16.mxu1 %v2753_v0  ;;  %2463 = vmatpush3.bf16.msra.mxu0 %v2952_v26 }
  0x79   :  { %2506 = vmatprep.subr.bf16.mxu0 %v2803_v1  ;;  %v2662_v1 = vld [vmem:[%s3961_s1 + $0xa0] ss:$16 sps:$4 sm:$0xff]  }
  0x7b   :  { %827 = vmatmul.mubr.bf16.gmra.mrb[44].mxu0 %v2656_v36  ;;  %1215 = vmatpush1.bf16.msra.mxu1 %v2942_v24  ;;  %v1312_v36 = vld [vmem:[%s3963_s3 + $0xc0] sm:$0x11] }
  0x7c   :  { %834 = vmatprep.mubr.bf16.mxu0 %v2660_v37  ;;  %1216 = vmatprep.subr.bf16.mxu1 %v2753_v0  ;;  %v2742_v37 = vld [vmem:[%s3963_s3 + $0xa0] ss:$16 sps:$4 sm:$0xff]  }
  0x7e   :  { %915 = vmatmul.mubr.bf16.gmra.mrb[44].mxu1 %v2659_v38  ;;  %v2296_v38 = vcombine.high %v1312_v36, %v1312_v36 }
  0x7f   :  { %2234 = vmatprep.mubr.msk.bf16.mxu1 %vm390_vm0, %v2663_v39  ;;  %1217 = vmatpush1.bf16.msra.mxu1 %v2963_v28  ;;  %v1313_v39 = vld [vmem:[%s3963_s3 + $0xc8] sm:$0x11] }
  0x80   :  { %1550 = vmatprep.subr.bf16.mxu1 %v2753_v0 }
  0x83   :  { %835 = vmatmul.mubr.bf16.gmra.mrb[48].mxu0 %v2662_v1  ;;  %v2298_v1 = vcombine.high %v1313_v39, %v1313_v39 }
  0x84   :  { %842 = vmatprep.mubr.bf16.mxu0 %v2226_v41 }
  0x86   :  { %923 = vmatmul.mubr.bf16.gmra.mrb[48].mxu1 %v2665_v43  ;;  %v3402_v43 = vld [vmem:[%s3964_s5] ss:$0 sm:$0xff] }
  0x87   :  { %2235 = vmatprep.mubr.msk.bf16.mxu1 %vm390_vm0, %v2228_v44  ;;  %v2295_v44 = vcombine.low %v1312_v36, %v1312_v36 }
  0x8b   :  { %843 = vmatmul.mubr.bf16.gmra.mrb[52].mxu0 %v2225_v45 }
  0x8c   :  { %1144 = vmatprep.mubr.bf16.mxu0 %v2672_v46 }
  0x8e   :  { %931 = vmatmul.mubr.bf16.gmra.mrb[52].mxu1 %v2227_v47 }
  0x8f   :  { %2264 = vmatprep.mubr.msk.bf16.mxu1 %vm390_vm0, %v2675_v48 }
  0x93   :  { %1145 = vmatmul.mubr.bf16.vlgmr.msra.gmra.mrb[56].mxu0 %v2670_v49 }
  0x94   :  { %2507 = vmatpush3.bf16.msra.mxu0 %v2814_v3  ;;  %1152 = vmatprep.mubr.bf16.mxu0 %v2676_v50  ;;  %v2682_v3 = vld [vmem:[%s3962_s2 + $0x44] ss:$16 sps:$4 sm:$0xff]  }
  0x95   :  { %2508 = vmatprep.subr.bf16.mxu0 %v2820_v4  ;;  %v2685_v4 = vld [vmem:[%s3962_s2 + $0x4c] ss:$16 sps:$4 sm:$0xff]  }
  0x96   :  { %1233 = vmatmul.mubr.bf16.vlgmr.msra.gmra.mrb[56].mxu1 %v2673_v51 }
  0x97   :  { %1551 = vmatpush1.bf16.msra.mxu1 %v2808_v2  ;;  %2265 = vmatprep.mubr.msk.bf16.mxu1 %vm390_vm0, %v2679_v52  ;;  %v2681_v2 = vld [vmem:[%s3962_s2 + $0x28] ss:$16 sps:$4 sm:$0xff]   ;;  %v2297_v52 = vcombine.low %v1313_v39, %v1313_v39 }
  0x98   :  { %2509 = vmatpush3.bf16.msra.mxu0 %v2833_v6  ;;  %1552 = vmatprep.subr.bf16.mxu1 %v2753_v0  ;;  %v2684_v6 = vld [vmem:[%s3962_s2 + $0x40] ss:$16 sps:$4 sm:$0xff]  }
  0x99   :  { %2510 = vmatprep.subr.bf16.mxu0 %v2838_v7  ;;  %v2687_v7 = vld [vmem:[%s3962_s2 + $0x48] ss:$16 sps:$4 sm:$0xff]  }
  0x9b   :  { %1153 = vmatmul.mubr.bf16.gmra.mrb[60].mxu0 %v2678_v53  ;;  %1553 = vmatpush1.bf16.msra.mxu1 %v2827_v5  ;;  %v2688_v5 = vld [vmem:[%s3962_s2 + $0x64] ss:$16 sps:$4 sm:$0xff]  }
  0x9c   :  { %1160 = vmatprep.mubr.bf16.mxu0 %v2682_v3  ;;  %2511 = vmatpush3.bf16.msra.mxu0 %v2851_v9  ;;  %v2690_v9 = vld [vmem:[%s3962_s2 + $0x60] ss:$16 sps:$4 sm:$0xff]  }
  0x9d   :  { %1554 = vmatprep.subr.bf16.mxu1 %v2753_v0  ;;  %2512 = vmatprep.subr.bf16.mxu0 %v2857_v10  ;;  %v2694_v10 = vld [vmem:[%s3962_s2 + $0x84] ss:$16 sps:$4 sm:$0xff]  }
  0x9e   :  { %1241 = vmatmul.mubr.bf16.gmra.mrb[60].mxu1 %v2681_v2 }
  0x9f   :  { %2266 = vmatprep.mubr.msk.bf16.mxu1 %vm390_vm0, %v2685_v4  ;;  %1555 = vmatpush1.bf16.msra.mxu1 %v2844_v8  ;;  %v2691_v8 = vld [vmem:[%s3962_s2 + $0x6c] ss:$16 sps:$4 sm:$0xff]  }
  0xa0   :  { %2513 = vmatpush3.bf16.msra.mxu0 %v2870_v12  ;;  %1556 = vmatprep.subr.bf16.mxu1 %v2753_v0  ;;  %v2697_v12 = vld [vmem:[%s3962_s2 + $0x8c] ss:$16 sps:$4 sm:$0xff]  }
  0xa1   :  { %2514 = vmatprep.subr.bf16.mxu0 %v2876_v13  ;;  %v2696_v13 = vld [vmem:[%s3962_s2 + $0x80] ss:$16 sps:$4 sm:$0xff]  }
  0xa3   :  { %1161 = vmatmul.mubr.bf16.gmra.mrb[64].mxu0 %v2684_v6  ;;  %1557 = vmatpush1.bf16.msra.mxu1 %v2863_v11  ;;  %v2693_v11 = vld [vmem:[%s3962_s2 + $0x68] ss:$16 sps:$4 sm:$0xff]  }
  0xa4   :  { %1168 = vmatprep.mubr.bf16.mxu0 %v2688_v5  ;;  %2515 = vmatpush3.bf16.msra.mxu0 %v2889_v15  ;;  %v2699_v15 = vld [vmem:[%s3962_s2 + $0x88] ss:$16 sps:$4 sm:$0xff]  }
  0xa5   :  { %1558 = vmatprep.subr.bf16.mxu1 %v2753_v0  ;;  %2516 = vmatprep.subr.bf16.mxu0 %v2895_v16  ;;  %v2703_v16 = vld [vmem:[%s3962_s2 + $0xac] ss:$16 sps:$4 sm:$0xff]  }
  0xa6   :  { %1249 = vmatmul.mubr.bf16.gmra.mrb[64].mxu1 %v2687_v7 }
  0xa7   :  { %2267 = vmatprep.mubr.msk.bf16.mxu1 %vm390_vm0, %v2691_v8  ;;  %1559 = vmatpush1.bf16.msra.mxu1 %v2882_v14  ;;  %v2700_v14 = vld [vmem:[%s3962_s2 + $0xa4] ss:$16 sps:$4 sm:$0xff]  }
  0xa8   :  { %2517 = vmatpush3.bf16.msra.mxu0 %v2908_v18  ;;  %1560 = vmatprep.subr.bf16.mxu1 %v2753_v0  ;;  %v2702_v18 = vld [vmem:[%s3962_s2 + $0xa0] ss:$16 sps:$4 sm:$0xff]  }
  0xa9   :  { %2518 = vmatprep.subr.bf16.mxu0 %v2914_v19 }
  0xab   :  { %1169 = vmatmul.mubr.bf16.gmra.mrb[68].mxu0 %v2690_v9  ;;  %1561 = vmatpush1.bf16.msra.mxu1 %v2901_v17  ;;  %v962_v17 = vld [vmem:[%s3962_s2 + $0xc0] sm:$0x11] }
  0xac   :  { %1176 = vmatprep.mubr.bf16.mxu0 %v2694_v10  ;;  %2519 = vmatpush3.bf16.msra.mxu0 %v2925_v21  ;;  %v2261_v19 = vcombine.high %v962_v17, %v962_v17 }
  0xad   :  { %1562 = vmatprep.subr.bf16.mxu1 %v2753_v0  ;;  %2520 = vmatprep.subr.bf16.mxu0 %v2932_v22  ;;  %v2260_v22 = vcombine.low %v962_v17, %v962_v17 }
  0xae   :  { %1257 = vmatmul.mubr.bf16.gmra.mrb[68].mxu1 %v2693_v11 }
  0xaf   :  { %2268 = vmatprep.mubr.msk.bf16.mxu1 %vm390_vm0, %v2697_v12  ;;  %1563 = vmatpush1.bf16.msra.mxu1 %v2919_v20  ;;  %v963_v20 = vld [vmem:[%s3962_s2 + $0xc8] sm:$0x11] }
  0xb0   :  { %1564 = vmatprep.subr.bf16.mxu1 %v2753_v0  ;;  %2521 = vmatpush3.bf16.msra.mxu0 %v2952_v26  ;;  %v2263_v21 = vcombine.high %v963_v20, %v963_v20  ;;  %v2262_v26 = vcombine.low %v963_v20, %v963_v20 }
  0xb3   :  { %1177 = vmatmul.mubr.bf16.gmra.mrb[72].mxu0 %v2696_v13  ;;  %1565 = vmatpush1.bf16.msra.mxu1 %v2942_v24  ;;  %v2712_v24 = vld [vmem:[%s3963_s3 + $0x4] ss:$16 sps:$4 sm:$0xff]  }
  0xb4   :  { %1184 = vmatprep.mubr.bf16.mxu0 %v2700_v14  ;;  %1566 = vmatprep.subr.bf16.mxu1 %v2753_v0  ;;  %v2705_v0 = vld [vmem:[%s3962_s2 + $0xa8] ss:$16 sps:$4 sm:$0xff]  }
  0xb6   :  { %1265 = vmatmul.mubr.bf16.gmra.mrb[72].mxu1 %v2699_v15 }
  0xb7   :  { %2269 = vmatprep.mubr.msk.bf16.mxu1 %vm390_vm0, %v2703_v16  ;;  %1567 = vmatpush1.bf16.msra.mxu1 %v2963_v28  ;;  %v2715_v28 = vld [vmem:[%s3963_s3 + $0xc] ss:$16 sps:$4 sm:$0xff]  }
  0xbb   :  { %1185 = vmatmul.mubr.bf16.gmra.mrb[76].mxu0 %v2702_v18 }
  0xbc   :  { %1192 = vmatprep.mubr.bf16.mxu0 %v2261_v19 }
  0xbe   :  { %1273 = vmatmul.mubr.bf16.gmra.mrb[76].mxu1 %v2705_v0 }
  0xbf   :  { %2270 = vmatprep.mubr.msk.bf16.mxu1 %vm390_vm0, %v2263_v21 }
  0xc3   :  { %1193 = vmatmul.mubr.bf16.gmra.mrb[80].mxu0 %v2260_v22 }
  0xc4   :  { %1494 = vmatprep.mubr.bf16.mxu0 %v2712_v24 }
  0xc6   :  { %1281 = vmatmul.mubr.bf16.gmra.mrb[80].mxu1 %v2262_v26 }
  0xc7   :  { %2299 = vmatprep.mubr.msk.bf16.mxu1 %vm390_vm0, %v2715_v28 }
  0xcb   :  { %1495 = vmatmul.mubr.bf16.vlgmr.msra.gmra.mrb[84].mxu0 %v2710_v54 }
  0xcc   :  { %1502 = vmatprep.mubr.bf16.mxu0 %v2716_v55 }
  0xce   :  { %1583 = vmatmul.mubr.bf16.vlgmr.msra.gmra.mrb[84].mxu1 %v2713_v56 }
  0xcf   :  { %2300 = vmatprep.mubr.msk.bf16.mxu1 %vm390_vm0, %v2719_v57 }
  0xd3   :  { %1503 = vmatmul.mubr.bf16.gmra.mrb[88].mxu0 %v2718_v58 }
  0xd4   :  { %1510 = vmatprep.mubr.bf16.mxu0 %v2722_v59 }
  0xd6   :  { %1591 = vmatmul.mubr.bf16.gmra.mrb[88].mxu1 %v2721_v60 }
  0xd7   :  { %2301 = vmatprep.mubr.msk.bf16.mxu1 %vm390_vm0, %v2725_v61 }
  0xdb   :  { %1511 = vmatmul.mubr.bf16.gmra.mrb[92].mxu0 %v2724_v62 }
  0xdc   :  { %1518 = vmatprep.mubr.bf16.mxu0 %v2728_v63 }
  0xde   :  { %1599 = vmatmul.mubr.bf16.gmra.mrb[92].mxu1 %v2727_v23 }
  0xdf   :  { %2302 = vmatprep.mubr.msk.bf16.mxu1 %vm390_vm0, %v2731_v25 }
  0xe3   :  { %1519 = vmatmul.mubr.bf16.gmra.mrb[96].mxu0 %v2730_v27 }
  0xe4   :  { %1526 = vmatprep.mubr.bf16.mxu0 %v2734_v29 }
  0xe6   :  { %1607 = vmatmul.mubr.bf16.gmra.mrb[96].mxu1 %v2733_v30 }
  0xe7   :  { %2303 = vmatprep.mubr.msk.bf16.mxu1 %vm390_vm0, %v2737_v31 }
  0xeb   :  { %1527 = vmatmul.mubr.bf16.gmra.mrb[100].mxu0 %v2736_v32 }
  0xec   :  { %1534 = vmatprep.mubr.bf16.mxu0 %v2740_v33 }
  0xee   :  { %1615 = vmatmul.mubr.bf16.gmra.mrb[100].mxu1 %v2739_v34 }
  0xef   :  { %2304 = vmatprep.mubr.msk.bf16.mxu1 %vm390_vm0, %v2743_v35 }
  0xf3   :  { %1535 = vmatmul.mubr.bf16.gmra.mrb[104].mxu0 %v2742_v37 }
  0xf4   :  { %1542 = vmatprep.mubr.bf16.mxu0 %v2296_v38 }
  0xf6   :  { %v2348_v41 = vpop.f32.mrb[0].mxu0  ;;  %1623 = vmatmul.mubr.bf16.gmra.mrb[104].mxu1 %v2745_v40 }
  0xf7   :  { %v2349_v42 = vpop.f32.mrb[1].mxu0  ;;  %2305 = vmatprep.mubr.msk.bf16.mxu1 %vm390_vm0, %v2298_v1 }
  0xf8   :  { %v2350_v45 = vadd.f32 %v2349_v42, %v2348_v41  ;;  %v2351_v46 = vpop.f32.mrb[2].mxu0 }
  0xf9   :  { %v2352_v47 = vpop.f32.mrb[3].mxu0  ;;  %v534_v48 = vpop.f32.mrb[0].mxu1 }
  0xfa   :  { %v2353_v49 = vadd.f32 %v2352_v47, %v2351_v46  ;;  %v447_v50 = vadd.f32 %v2350_v45, %v3402_v43  ;;  %v536_v51 = vpop.f32.mrb[1].mxu1 }
  0xfb   :  { %v537_v53 = vpop.f32.mrb[2].mxu1  ;;  %1543 = vmatmul.mubr.bf16.gmra.mrb[108].mxu0 %v2295_v44 }
  0xfc   :  { %v3406_v3 = vadd.f32 %v534_v48, %v447_v50  ;;  %v450_v2 = vadd.f32 %v2353_v49, %v3402_v43  ;;  %v539_v4 = vpop.f32.mrb[3].mxu1 }
  0xfe   :  { %v3409_v6 = vadd.f32 %v537_v53, %v450_v2  ;;  %v2354_v5 = vpop.f32.mrb[4].mxu0  ;;  %1631 = vmatmul.mubr.bf16.gmra.mrb[108].mxu1 %v2297_v52  ;;  %v1658_v20 = vmul.f32 %v3406_v3, %v3406_v3 }
  0xff   :  { %v2355_v7 = vpop.f32.mrb[5].mxu0 }
 0x100   :  { %v2356_v8 = vadd.f32 %v2355_v7, %v2354_v5  ;;  %v2357_v9 = vpop.f32.mrb[6].mxu0  ;;  %v1659_v16 = vmul.f32 %v3409_v6, %v3409_v6  ;;  %v1638_v0 = vadd.f32 %v3409_v6, %v3406_v3 }
 0x101   :  { %v2358_v10 = vpop.f32.mrb[7].mxu0  ;;  %v542_v11 = vpop.f32.mrb[4].mxu1 }
 0x102   :  { %v2359_v12 = vadd.f32 %v2358_v10, %v2357_v9  ;;  %v455_v13 = vadd.f32 %v2356_v8, %v3402_v43  ;;  %v544_v14 = vpop.f32.mrb[5].mxu1  ;;  %v1671_v28 = vadd.f32 %v1659_v16, %v1658_v20 }
 0x103   :  { %v545_v15 = vpop.f32.mrb[6].mxu1 }
 0x104   :  { %v3414_v17 = vadd.f32 %v542_v11, %v455_v13  ;;  %v458_v18 = vadd.f32 %v2359_v12, %v3402_v43  ;;  %v547_v19 = vpop.f32.mrb[7].mxu1 }
 0x106   :  { %v1660_v21 = vmul.f32 %v3414_v17, %v3414_v17  ;;  %v3423_v22 = vadd.f32 %v545_v15, %v458_v18  ;;  %v2360_v24 = vpop.f32.mrb[8].mxu0  ;;  %v1639_v54 = vadd.f32 %v1638_v0, %v3414_v17 }
 0x107   :  { %v2361_v26 = vpop.f32.mrb[9].mxu0 }
 0x108   :  { %v2362_v55 = vadd.f32 %v2361_v26, %v2360_v24  ;;  %v2363_v56 = vpop.f32.mrb[10].mxu0  ;;  %v1672_v59 = vadd.f32 %v1671_v28, %v1660_v21  ;;  %v1661_v60 = vmul.f32 %v3423_v22, %v3423_v22  ;;  %v1640_v25 = vadd.f32 %v1639_v54, %v3423_v22 }
 0x109   :  { %v2364_v57 = vpop.f32.mrb[11].mxu0  ;;  %v550_v58 = vpop.f32.mrb[8].mxu1 }
 0x10a   :  { %v2365_v61 = vadd.f32 %v2364_v57, %v2363_v56  ;;  %v463_v62 = vadd.f32 %v2362_v55, %v3402_v43  ;;  %v552_v63 = vpop.f32.mrb[9].mxu1  ;;  %v1673_v31 = vadd.f32 %v1672_v59, %v1661_v60 }
 0x10b   :  { %v553_v23 = vpop.f32.mrb[10].mxu1 }
 0x10c   :  { %v3430_v27 = vadd.f32 %v550_v58, %v463_v62  ;;  %v466_v29 = vadd.f32 %v2365_v61, %v3402_v43  ;;  %v555_v30 = vpop.f32.mrb[11].mxu1 }
 0x10e   :  { %v1641_v32 = vadd.f32 %v1640_v25, %v3430_v27  ;;  %v1662_v33 = vmul.f32 %v3430_v27, %v3430_v27  ;;  %v3436_v34 = vadd.f32 %v553_v23, %v466_v29  ;;  %v2366_v35 = vpop.f32.mrb[12].mxu0 }
 0x10f   :  { %v2367_v36 = vpop.f32.mrb[13].mxu0 }
 0x110   :  { %v1674_v37 = vadd.f32 %v1673_v31, %v1662_v33  ;;  %v1642_v38 = vadd.f32 %v1641_v32, %v3436_v34  ;;  %v1663_v39 = vmul.f32 %v3436_v34, %v3436_v34  ;;  %v2368_v40 = vadd.f32 %v2367_v36, %v2366_v35  ;;  %v2369_v1 = vpop.f32.mrb[14].mxu0 }
 0x111   :  { %v2370_v41 = vpop.f32.mrb[15].mxu0  ;;  %v558_v42 = vpop.f32.mrb[12].mxu1 }
 0x112   :  { %v1675_v44 = vadd.f32 %v1674_v37, %v1663_v39  ;;  %v2371_v45 = vadd.f32 %v2370_v41, %v2369_v1  ;;  %v471_v46 = vadd.f32 %v2368_v40, %v3402_v43  ;;  %v560_v47 = vpop.f32.mrb[13].mxu1 }
 0x113   :  { %v561_v48 = vpop.f32.mrb[14].mxu1 }
 0x114   :  { %v3442_v49 = vadd.f32 %v558_v42, %v471_v46  ;;  %v474_v50 = vadd.f32 %v2371_v45, %v3402_v43  ;;  %v563_v51 = vpop.f32.mrb[15].mxu1 }
 0x116   :  { %v1643_v52 = vadd.f32 %v1642_v38, %v3442_v49  ;;  %v1664_v53 = vmul.f32 %v3442_v49, %v3442_v49  ;;  %v3448_v2 = vadd.f32 %v561_v48, %v474_v50  ;;  %v2372_v4 = vpop.f32.mrb[16].mxu0 }
 0x117   :  { %v2373_v5 = vpop.f32.mrb[17].mxu0 }
 0x118   :  { %v1676_v7 = vadd.f32 %v1675_v44, %v1664_v53  ;;  %v1644_v8 = vadd.f32 %v1643_v52, %v3448_v2  ;;  %v1665_v9 = vmul.f32 %v3448_v2, %v3448_v2  ;;  %v2374_v10 = vadd.f32 %v2373_v5, %v2372_v4  ;;  %v2375_v11 = vpop.f32.mrb[18].mxu0 }
 0x119   :  { %v2376_v12 = vpop.f32.mrb[19].mxu0  ;;  %v566_v13 = vpop.f32.mrb[16].mxu1 }
 0x11a   :  { %v1677_v14 = vadd.f32 %v1676_v7, %v1665_v9  ;;  %v2377_v15 = vadd.f32 %v2376_v12, %v2375_v11  ;;  %v479_v16 = vadd.f32 %v2374_v10, %v3402_v43  ;;  %v568_v18 = vpop.f32.mrb[17].mxu1 }
 0x11b   :  { %v569_v19 = vpop.f32.mrb[18].mxu1 }
 0x11c   :  { %v3454_v20 = vadd.f32 %v566_v13, %v479_v16  ;;  %v482_v0 = vadd.f32 %v2377_v15, %v3402_v43  ;;  %v571_v21 = vpop.f32.mrb[19].mxu1 }
 0x11e   :  { %v1645_v24 = vadd.f32 %v1644_v8, %v3454_v20  ;;  %v1666_v26 = vmul.f32 %v3454_v20, %v3454_v20  ;;  %v3460_v28 = vadd.f32 %v569_v19, %v482_v0  ;;  %v2378_v54 = vpop.f32.mrb[20].mxu0 }
 0x11f   :  { %v2379_v55 = vpop.f32.mrb[21].mxu0 }
 0x120   :  { %v1678_v56 = vadd.f32 %v1677_v14, %v1666_v26  ;;  %v1646_v57 = vadd.f32 %v1645_v24, %v3460_v28  ;;  %v1667_v58 = vmul.f32 %v3460_v28, %v3460_v28  ;;  %v2380_v59 = vadd.f32 %v2379_v55, %v2378_v54  ;;  %v2381_v60 = vpop.f32.mrb[22].mxu0 }
 0x121   :  { %v2382_v61 = vpop.f32.mrb[23].mxu0  ;;  %v574_v62 = vpop.f32.mrb[20].mxu1 }
 0x122   :  { %v1679_v63 = vadd.f32 %v1678_v56, %v1667_v58  ;;  %v2383_v23 = vadd.f32 %v2382_v61, %v2381_v60  ;;  %v487_v25 = vadd.f32 %v2380_v59, %v3402_v43  ;;  %v576_v29 = vpop.f32.mrb[21].mxu1 }
 0x123   :  { %v577_v30 = vpop.f32.mrb[22].mxu1 }
 0x124   :  { %v3466_v31 = vadd.f32 %v574_v62, %v487_v25  ;;  %v490_v32 = vadd.f32 %v2383_v23, %v3402_v43  ;;  %v579_v33 = vpop.f32.mrb[23].mxu1 }
 0x126   :  { %v1647_v35 = vadd.f32 %v1646_v57, %v3466_v31  ;;  %v1668_v36 = vmul.f32 %v3466_v31, %v3466_v31  ;;  %v3472_v37 = vadd.f32 %v577_v30, %v490_v32  ;;  %v2384_v38 = vpop.f32.mrb[24].mxu0 }
 0x127   :  { %v2385_v39 = vpop.f32.mrb[25].mxu0 }
 0x128   :  { %v1680_v40 = vadd.f32 %v1679_v63, %v1668_v36  ;;  %v1648_v1 = vadd.f32 %v1647_v35, %v3472_v37  ;;  %v1669_v41 = vmul.f32 %v3472_v37, %v3472_v37  ;;  %v2386_v42 = vadd.f32 %v2385_v39, %v2384_v38  ;;  %v2387_v44 = vpop.f32.mrb[26].mxu0 }
 0x129   :  { %v2388_v45 = vpop.f32.mrb[27].mxu0  ;;  %v582_v46 = vpop.f32.mrb[24].mxu1 }
 0x12a   :  { %v1681_v47 = vadd.f32 %v1680_v40, %v1669_v41  ;;  %v495_v48 = vadd.f32 %v2386_v42, %v3402_v43  ;;  %v584_v50 = vpop.f32.mrb[25].mxu1 }
 0x12b   :  { %v585_v51 = vpop.f32.mrb[26].mxu1 }
 0x12c   :  { %v3478_v52 = vadd.f32 %v582_v46, %v495_v48  ;;  %v586_v53 = vpop.f32.mrb[27].mxu1 }
 0x12e   :  { %v1650_v4 = vsel %vm1649_vm1, %v3478_v52, 0.0  ;;  %v1670_v5 = vmul.f32 %v3478_v52, %v3478_v52  ;;  %v2406_v7 = vpop.f32.mrb[28].mxu0 }
 0x12f   :  { %v3484_v8 = vadd.f32 %v1650_v4, %v1648_v1  ;;  %v2407_v9 = vpop.f32.mrb[29].mxu0 }
 0x130   :  { %v1682_v10 = vsel %vm1649_vm1, %v1670_v5, 0.0  ;;  %v2408_v11 = vadd.f32 %v2407_v9, %v2406_v7  ;;  %v2409_v12 = vpop.f32.mrb[30].mxu0 }
 0x131   :  { %v3487_v13 = vadd.f32 %v1682_v10, %v1681_v47  ;;  %v2410_v14 = vpop.f32.mrb[31].mxu0  ;;  %v884_v15 = vpop.f32.mrb[28].mxu1 }
 0x132   :  { %v2411_v16 = vadd.f32 %v2410_v14, %v2409_v12  ;;  %v797_v18 = vadd.f32 %v2408_v11, %v3402_v43  ;;  %v886_v19 = vpop.f32.mrb[29].mxu1 }
 0x133   :  { %v887_v0 = vpop.f32.mrb[30].mxu1 }
 0x134   :  { %v3490_v21 = vadd.f32 %v884_v15, %v797_v18  ;;  %v800_v24 = vadd.f32 %v2411_v16, %v3402_v43  ;;  %v889_v26 = vpop.f32.mrb[31].mxu1 }
 0x136   :  { %v3493_v54 = vadd.f32 %v887_v0, %v800_v24  ;;  %v2412_v55 = vpop.f32.mrb[32].mxu0  ;;  %v1710_v33 = vmul.f32 %v3490_v21, %v3490_v21 }
 0x137   :  { %v2413_v56 = vpop.f32.mrb[33].mxu0 }
 0x138   :  { %v2414_v57 = vadd.f32 %v2413_v56, %v2412_v55  ;;  %v2415_v58 = vpop.f32.mrb[34].mxu0  ;;  %v1711_v25 = vmul.f32 %v3493_v54, %v3493_v54  ;;  %v1690_v35 = vadd.f32 %v3493_v54, %v3490_v21 }
 0x139   :  { %v2416_v59 = vpop.f32.mrb[35].mxu0  ;;  %v892_v60 = vpop.f32.mrb[32].mxu1 }
 0x13a   :  { %v2417_v61 = vadd.f32 %v2416_v59, %v2415_v58  ;;  %v805_v62 = vadd.f32 %v2414_v57, %v3402_v43  ;;  %v894_v63 = vpop.f32.mrb[33].mxu1  ;;  %v1723_v1 = vadd.f32 %v1711_v25, %v1710_v33 }
 0x13b   :  { %v895_v23 = vpop.f32.mrb[34].mxu1 }
 0x13c   :  { %v3498_v29 = vadd.f32 %v892_v60, %v805_v62  ;;  %v808_v30 = vadd.f32 %v2417_v61, %v3402_v43  ;;  %v897_v32 = vpop.f32.mrb[35].mxu1 }
 0x13e   :  { %v1712_v36 = vmul.f32 %v3498_v29, %v3498_v29  ;;  %v3507_v38 = vadd.f32 %v895_v23, %v808_v30  ;;  %v2418_v39 = vpop.f32.mrb[36].mxu0  ;;  %v1691_v41 = vadd.f32 %v1690_v35, %v3498_v29 }
 0x13f   :  { %v2419_v40 = vpop.f32.mrb[37].mxu0 }
 0x140   :  { %v2420_v42 = vadd.f32 %v2419_v40, %v2418_v39  ;;  %v2421_v44 = vpop.f32.mrb[38].mxu0  ;;  %v1724_v47 = vadd.f32 %v1723_v1, %v1712_v36  ;;  %v1713_v48 = vmul.f32 %v3507_v38, %v3507_v38  ;;  %v1692_v5 = vadd.f32 %v1691_v41, %v3507_v38 }
 0x141   :  { %v2422_v45 = vpop.f32.mrb[39].mxu0  ;;  %v900_v46 = vpop.f32.mrb[36].mxu1 }
 0x142   :  { %v2423_v50 = vadd.f32 %v2422_v45, %v2421_v44  ;;  %v813_v51 = vadd.f32 %v2420_v42, %v3402_v43  ;;  %v902_v53 = vpop.f32.mrb[37].mxu1  ;;  %v1725_v11 = vadd.f32 %v1724_v47, %v1713_v48 }
 0x143   :  { %v903_v4 = vpop.f32.mrb[38].mxu1 }
 0x144   :  { %v3514_v7 = vadd.f32 %v900_v46, %v813_v51  ;;  %v816_v9 = vadd.f32 %v2423_v50, %v3402_v43  ;;  %v905_v10 = vpop.f32.mrb[39].mxu1 }
 0x146   :  { %v1693_v12 = vadd.f32 %v1692_v5, %v3514_v7  ;;  %v1714_v14 = vmul.f32 %v3514_v7, %v3514_v7  ;;  %v3520_v15 = vadd.f32 %v903_v4, %v816_v9  ;;  %v2424_v16 = vpop.f32.mrb[40].mxu0 }
 0x147   :  { %v2425_v18 = vpop.f32.mrb[41].mxu0 }
 0x148   :  { %v1726_v19 = vadd.f32 %v1725_v11, %v1714_v14  ;;  %v1694_v0 = vadd.f32 %v1693_v12, %v3520_v15  ;;  %v1715_v24 = vmul.f32 %v3520_v15, %v3520_v15  ;;  %v2426_v26 = vadd.f32 %v2425_v18, %v2424_v16  ;;  %v2427_v55 = vpop.f32.mrb[42].mxu0 }
 0x149   :  { %v2428_v56 = vpop.f32.mrb[43].mxu0  ;;  %v908_v57 = vpop.f32.mrb[40].mxu1 }
 0x14a   :  { %v1727_v58 = vadd.f32 %v1726_v19, %v1715_v24  ;;  %v2429_v59 = vadd.f32 %v2428_v56, %v2427_v55  ;;  %v821_v60 = vadd.f32 %v2426_v26, %v3402_v43  ;;  %v910_v61 = vpop.f32.mrb[41].mxu1 }
 0x14b   :  { %v911_v62 = vpop.f32.mrb[42].mxu1 }
 0x14c   :  { %v3526_v63 = vadd.f32 %v908_v57, %v821_v60  ;;  %v824_v23 = vadd.f32 %v2429_v59, %v3402_v43  ;;  %v913_v25 = vpop.f32.mrb[43].mxu1 }
 0x14e   :  { %v1695_v30 = vadd.f32 %v1694_v0, %v3526_v63  ;;  %v1716_v32 = vmul.f32 %v3526_v63, %v3526_v63  ;;  %v3532_v33 = vadd.f32 %v911_v62, %v824_v23  ;;  %v2430_v35 = vpop.f32.mrb[44].mxu0 }
 0x14f   :  { %v2431_v36 = vpop.f32.mrb[45].mxu0 }
 0x150   :  { %v1728_v39 = vadd.f32 %v1727_v58, %v1716_v32  ;;  %v1696_v40 = vadd.f32 %v1695_v30, %v3532_v33  ;;  %v1717_v1 = vmul.f32 %v3532_v33, %v3532_v33  ;;  %v2432_v41 = vadd.f32 %v2431_v36, %v2430_v35  ;;  %v2433_v42 = vpop.f32.mrb[46].mxu0 }
 0x151   :  { %v2434_v44 = vpop.f32.mrb[47].mxu0  ;;  %v916_v45 = vpop.f32.mrb[44].mxu1  ;;  %v1652_v36 = vrot.slane %v3484_v8, 4 }
 0x152   :  { %v1729_v46 = vadd.f32 %v1728_v39, %v1717_v1  ;;  %v2435_v47 = vadd.f32 %v2434_v44, %v2433_v42  ;;  %v829_v48 = vadd.f32 %v2432_v41, %v3402_v43  ;;  %v918_v50 = vpop.f32.mrb[45].mxu1 }
 0x153   :  { %v919_v51 = vpop.f32.mrb[46].mxu1 }
 0x154   :  { %v3538_v53 = vadd.f32 %v916_v45, %v829_v48  ;;  %v832_v4 = vadd.f32 %v2435_v47, %v3402_v43  ;;  %v921_v5 = vpop.f32.mrb[47].mxu1  ;;  %v1684_v45 = vrot.slane %v3487_v13, 4 }
 0x156   :  { %v1697_v9 = vadd.f32 %v1696_v40, %v3538_v53  ;;  %v1718_v10 = vmul.f32 %v3538_v53, %v3538_v53  ;;  %v3544_v11 = vadd.f32 %v919_v51, %v832_v4  ;;  %v2436_v12 = vpop.f32.mrb[48].mxu0  ;;  %v1653_v4 = vadd.f32 %v1652_v36, %v3484_v8 }
 0x157   :  { %v2437_v14 = vpop.f32.mrb[49].mxu0 }
 0x158   :  { %v1730_v16 = vadd.f32 %v1729_v46, %v1718_v10  ;;  %v1698_v18 = vadd.f32 %v1697_v9, %v3544_v11  ;;  %v1719_v19 = vmul.f32 %v3544_v11, %v3544_v11  ;;  %v2438_v0 = vadd.f32 %v2437_v14, %v2436_v12  ;;  %v2439_v24 = vpop.f32.mrb[50].mxu0 }
 0x159   :  { %v2440_v26 = vpop.f32.mrb[51].mxu0  ;;  %v924_v55 = vpop.f32.mrb[48].mxu1  ;;  %v1685_v12 = vadd.f32 %v1684_v45, %v3487_v13 }
 0x15a   :  { %v1731_v56 = vadd.f32 %v1730_v16, %v1719_v19  ;;  %v2441_v57 = vadd.f32 %v2440_v26, %v2439_v24  ;;  %v837_v58 = vadd.f32 %v2438_v0, %v3402_v43  ;;  %v926_v59 = vpop.f32.mrb[49].mxu1  ;;  %v1654_v19 = vrot.slane %v1653_v4, 2 }
 0x15b   :  { %v927_v60 = vpop.f32.mrb[50].mxu1 }
 0x15c   :  { %v3550_v61 = vadd.f32 %v924_v55, %v837_v58  ;;  %v840_v62 = vadd.f32 %v2441_v57, %v3402_v43  ;;  %v929_v23 = vpop.f32.mrb[51].mxu1 }
 0x15e   :  { %v1699_v25 = vadd.f32 %v1698_v18, %v3550_v61  ;;  %v1720_v30 = vmul.f32 %v3550_v61, %v3550_v61  ;;  %v3556_v32 = vadd.f32 %v927_v60, %v840_v62  ;;  %v2442_v35 = vpop.f32.mrb[52].mxu0 }
 0x15f   :  { %v2443_v39 = vpop.f32.mrb[53].mxu0 }
 0x160   :  { %v1732_v40 = vadd.f32 %v1731_v56, %v1720_v30  ;;  %v1700_v1 = vadd.f32 %v1699_v25, %v3556_v32  ;;  %v1721_v41 = vmul.f32 %v3556_v32, %v3556_v32  ;;  %v2444_v42 = vadd.f32 %v2443_v39, %v2442_v35  ;;  %v2445_v44 = vpop.f32.mrb[54].mxu0 }
 0x161   :  { %v2446_v46 = vpop.f32.mrb[55].mxu0  ;;  %v932_v47 = vpop.f32.mrb[52].mxu1  ;;  %v1686_v56 = vrot.slane %v1685_v12, 2  ;;  %v1655_v25 = vadd.f32 %v1654_v19, %v1653_v4 }
 0x162   :  { %v1733_v48 = vadd.f32 %v1732_v40, %v1721_v41  ;;  %v845_v50 = vadd.f32 %v2444_v42, %v3402_v43  ;;  %v934_v51 = vpop.f32.mrb[53].mxu1 }
 0x163   :  { %v935_v5 = vpop.f32.mrb[54].mxu1  ;;  %v1687_v41 = vadd.f32 %v1686_v56, %v1685_v12 }
 0x164   :  { %v3565_v9 = vadd.f32 %v932_v47, %v845_v50  ;;  %v936_v10 = vpop.f32.mrb[55].mxu1  ;;  %v1656_v47 = vrot.slane %v1655_v25, 1 }
 0x165   :  { %v1688_v10 = vrot.slane %v1687_v41, 1 }
 0x166   :  { %v1701_v14 = vsel %vm1649_vm1, %v3565_v9, 0.0  ;;  %v1722_v16 = vmul.f32 %v3565_v9, %v3565_v9  ;;  %v2464_v18 = vpop.f32.mrb[56].mxu0 }
 0x167   :  { %v1702_v0 = vadd.f32 %v1701_v14, %v1700_v1  ;;  %v2465_v24 = vpop.f32.mrb[57].mxu0 }
 0x168   :  { %v1734_v26 = vsel %vm1649_vm1, %v1722_v16, 0.0  ;;  %v2466_v55 = vadd.f32 %v2465_v24, %v2464_v18  ;;  %v2467_v8 = vpop.f32.mrb[58].mxu0 }
 0x169   :  { %v1703_v57 = vrot.slane %v1702_v0, 4  ;;  %v1735_v58 = vadd.f32 %v1734_v26, %v1733_v48  ;;  %v2468_v59 = vpop.f32.mrb[59].mxu0  ;;  %v1234_v60 = vpop.f32.mrb[56].mxu1  ;;  %v1657_v26 = vadd.f32 %v1656_v47, %v1655_v25 }
 0x16a   :  { %v2469_v13 = vadd.f32 %v2468_v59, %v2467_v8  ;;  %v1147_v62 = vadd.f32 %v2466_v55, %v3402_v43  ;;  %v1236_v23 = vpop.f32.mrb[57].mxu1 }
 0x16b   :  { %v1704_v30 = vadd.f32 %v1703_v57, %v1702_v0  ;;  %v1736_v35 = vrot.slane %v1735_v58, 4  ;;  %v1237_v36 = vpop.f32.mrb[58].mxu1 }
 0x16c   :  { %v3574_v39 = vadd.f32 %v1234_v60, %v1147_v62  ;;  %v1150_v40 = vadd.f32 %v2469_v13, %v3402_v43  ;;  %v1239_v1 = vpop.f32.mrb[59].mxu1  ;;  %v1689_v13 = vadd.f32 %v1688_v10, %v1687_v41 }
 0x16d   :  { %v1705_v42 = vrot.slane %v1704_v30, 2  ;;  %v1737_v44 = vadd.f32 %v1736_v35, %v1735_v58 }
 0x16e   :  { %v3577_v45 = vadd.f32 %v1237_v36, %v1150_v40  ;;  %v2470_v46 = vpop.f32.mrb[60].mxu0 }
 0x16f   :  { %v1706_v48 = vadd.f32 %v1705_v42, %v1704_v30  ;;  %v1738_v50 = vrot.slane %v1737_v44, 2  ;;  %v2471_v51 = vpop.f32.mrb[61].mxu0  ;;  %v1763_v30 = vmul.f32 %v3574_v39, %v3574_v39 }
 0x170   :  { %v2472_v5 = vadd.f32 %v2471_v51, %v2470_v46  ;;  %v2473_v4 = vpop.f32.mrb[62].mxu0  ;;  %v1764_v57 = vmul.f32 %v3577_v45, %v3577_v45  ;;  %v1743_v25 = vadd.f32 %v3577_v45, %v3574_v39 }
 0x171   :  { %v1707_v14 = vrot.slane %v1706_v48, 1  ;;  %v1739_v16 = vadd.f32 %v1738_v50, %v1737_v44  ;;  %v2474_v18 = vpop.f32.mrb[63].mxu0  ;;  %v1242_v19 = vpop.f32.mrb[60].mxu1 }
 0x172   :  { %v2475_v0 = vadd.f32 %v2474_v18, %v2473_v4  ;;  %v1155_v24 = vadd.f32 %v2472_v5, %v3402_v43  ;;  %v1244_v12 = vpop.f32.mrb[61].mxu1  ;;  %v1776_v44 = vadd.f32 %v1764_v57, %v1763_v30 }
 0x173   :  { %v1708_v55 = vadd.f32 %v1707_v14, %v1706_v48  ;;  %v1740_v8 = vrot.slane %v1739_v16, 1  ;;  %v1245_v56 = vpop.f32.mrb[62].mxu1 }
 0x174   :  { %v3582_v58 = vadd.f32 %v1242_v19, %v1155_v24  ;;  %v1158_v59 = vadd.f32 %v2475_v0, %v3402_v43  ;;  %v1247_v60 = vpop.f32.mrb[63].mxu1 }
 0x175   :  { %v3585_v62 = vadd.f32 %v1708_v55, %v1657_v26  ;;  %v1741_v23 = vadd.f32 %v1740_v8, %v1739_v16 }
 0x176   :  { %v1765_v35 = vmul.f32 %v3582_v58, %v3582_v58  ;;  %v3593_v36 = vadd.f32 %v1245_v56, %v1158_v59  ;;  %v2476_v40 = vpop.f32.mrb[64].mxu0  ;;  %v1744_v41 = vadd.f32 %v1743_v25, %v3582_v58 }
 0x177   :  { %v3595_v1 = vadd.f32 %v1741_v23, %v1689_v13  ;;  %v2477_v42 = vpop.f32.mrb[65].mxu0 }
 0x178   :  { %v2478_v46 = vadd.f32 %v2477_v42, %v2476_v40  ;;  %v2479_v47 = vpop.f32.mrb[66].mxu0  ;;  %v1777_v51 = vadd.f32 %v1776_v44, %v1765_v35  ;;  %v1766_v5 = vmul.f32 %v3593_v36, %v3593_v36  ;;  %v1745_v18 = vadd.f32 %v1744_v41, %v3593_v36 }
 0x179   :  { %v2480_v48 = vpop.f32.mrb[67].mxu0  ;;  %v1250_v50 = vpop.f32.mrb[64].mxu1 }
 0x17a   :  { %v2481_v4 = vadd.f32 %v2480_v48, %v2479_v47  ;;  %v1163_v10 = vadd.f32 %v2478_v46, %v3402_v43  ;;  %v1252_v14 = vpop.f32.mrb[65].mxu1  ;;  %v1778_v12 = vadd.f32 %v1777_v51, %v1766_v5 }
 0x17b   :  { %v1253_v16 = vpop.f32.mrb[66].mxu1 }
 0x17c   :  { %v3602_v19 = vadd.f32 %v1250_v50, %v1163_v10  ;;  %v1166_v0 = vadd.f32 %v2481_v4, %v3402_v43  ;;  %v1255_v24 = vpop.f32.mrb[67].mxu1 }
 0x17e   :  { %v1746_v26 = vadd.f32 %v1745_v18, %v3602_v19  ;;  %v1767_v55 = vmul.f32 %v3602_v19, %v3602_v19  ;;  %v3608_v8 = vadd.f32 %v1253_v16, %v1166_v0  ;;  %v2482_v56 = vpop.f32.mrb[68].mxu0 }
 0x17f   :  { %v2483_v57 = vpop.f32.mrb[69].mxu0 }
 0x180   :  { %v1779_v59 = vadd.f32 %v1778_v12, %v1767_v55  ;;  %v1747_v60 = vadd.f32 %v1746_v26, %v3608_v8  ;;  %v1768_v13 = vmul.f32 %v3608_v8, %v3608_v8  ;;  %v2484_v23 = vadd.f32 %v2483_v57, %v2482_v56  ;;  %v2485_v30 = vpop.f32.mrb[70].mxu0 }
 0x181   :  { %v2486_v25 = vpop.f32.mrb[71].mxu0  ;;  %v1258_v35 = vpop.f32.mrb[68].mxu1 }
 0x182   :  { %v1780_v40 = vadd.f32 %v1779_v59, %v1768_v13  ;;  %v2487_v42 = vadd.f32 %v2486_v25, %v2485_v30  ;;  %v1171_v44 = vadd.f32 %v2484_v23, %v3402_v43  ;;  %v1260_v41 = vpop.f32.mrb[69].mxu1 }
 0x183   :  { %v1261_v46 = vpop.f32.mrb[70].mxu1 }
 0x184   :  { %v3614_v47 = vadd.f32 %v1258_v35, %v1171_v44  ;;  %v1174_v48 = vadd.f32 %v2487_v42, %v3402_v43  ;;  %v1263_v50 = vpop.f32.mrb[71].mxu1 }
 0x186   :  { %v1748_v51 = vadd.f32 %v1747_v60, %v3614_v47  ;;  %v1769_v5 = vmul.f32 %v3614_v47, %v3614_v47  ;;  %v3620_v4 = vadd.f32 %v1261_v46, %v1174_v48  ;;  %v2488_v10 = vpop.f32.mrb[72].mxu0 }
 0x187   :  { %v2489_v14 = vpop.f32.mrb[73].mxu0 }
 0x188   :  { %v1781_v16 = vadd.f32 %v1780_v40, %v1769_v5  ;;  %v1749_v18 = vadd.f32 %v1748_v51, %v3620_v4  ;;  %v1770_v0 = vmul.f32 %v3620_v4, %v3620_v4  ;;  %v2490_v24 = vadd.f32 %v2489_v14, %v2488_v10  ;;  %v2491_v12 = vpop.f32.mrb[74].mxu0 }
 0x189   :  { %v2492_v26 = vpop.f32.mrb[75].mxu0  ;;  %v1266_v55 = vpop.f32.mrb[72].mxu1 }
 0x18a   :  { %v1782_v56 = vadd.f32 %v1781_v16, %v1770_v0  ;;  %v2493_v57 = vadd.f32 %v2492_v26, %v2491_v12  ;;  %v1179_v59 = vadd.f32 %v2490_v24, %v3402_v43  ;;  %v1268_v60 = vpop.f32.mrb[73].mxu1 }
 0x18b   :  { %v1269_v13 = vpop.f32.mrb[74].mxu1 }
 0x18c   :  { %v3626_v23 = vadd.f32 %v1266_v55, %v1179_v59  ;;  %v1182_v30 = vadd.f32 %v2493_v57, %v3402_v43  ;;  %v1271_v25 = vpop.f32.mrb[75].mxu1 }
 0x18e   :  { %v1750_v35 = vadd.f32 %v1749_v18, %v3626_v23  ;;  %v1771_v40 = vmul.f32 %v3626_v23, %v3626_v23  ;;  %v3632_v42 = vadd.f32 %v1269_v13, %v1182_v30  ;;  %v2494_v44 = vpop.f32.mrb[76].mxu0 }
 0x18f   :  { %v2495_v41 = vpop.f32.mrb[77].mxu0 }
 0x190   :  { %v1783_v46 = vadd.f32 %v1782_v56, %v1771_v40  ;;  %v1751_v48 = vadd.f32 %v1750_v35, %v3632_v42  ;;  %v1772_v50 = vmul.f32 %v3632_v42, %v3632_v42  ;;  %v2496_v51 = vadd.f32 %v2495_v41, %v2494_v44  ;;  %v2497_v5 = vpop.f32.mrb[78].mxu0 }
 0x191   :  { %v2498_v10 = vpop.f32.mrb[79].mxu0  ;;  %v1274_v14 = vpop.f32.mrb[76].mxu1 }
 0x192   :  { %v1784_v16 = vadd.f32 %v1783_v46, %v1772_v50  ;;  %v2499_v0 = vadd.f32 %v2498_v10, %v2497_v5  ;;  %v1187_v18 = vadd.f32 %v2496_v51, %v3402_v43  ;;  %v1276_v24 = vpop.f32.mrb[77].mxu1 }
 0x193   :  { %v1277_v12 = vpop.f32.mrb[78].mxu1 }
 0x194   :  { %v3638_v26 = vadd.f32 %v1274_v14, %v1187_v18  ;;  %v1190_v55 = vadd.f32 %v2499_v0, %v3402_v43  ;;  %v1279_v56 = vpop.f32.mrb[79].mxu1 }
 0x196   :  { %3980 = vst [vmem:[#allocation2_spill] sm:$0xff] %v3638_v26  ;;  %v1752_v57 = vadd.f32 %v1751_v48, %v3638_v26  ;;  %v1773_v59 = vmul.f32 %v3638_v26, %v3638_v26  ;;  %v3644_v60 = vadd.f32 %v1277_v12, %v1190_v55  ;;  %v2500_v13 = vpop.f32.mrb[80].mxu0 }
 0x197   :  { %v2501_v30 = vpop.f32.mrb[81].mxu0 }
 0x198   :  { %3981 = vst [vmem:[#allocation3_spill] sm:$0xff] %v3644_v60  ;;  %v1785_v25 = vadd.f32 %v1784_v16, %v1773_v59  ;;  %v1753_v35 = vadd.f32 %v1752_v57, %v3644_v60  ;;  %v1774_v40 = vmul.f32 %v3644_v60, %v3644_v60  ;;  %v2502_v44 = vadd.f32 %v2501_v30, %v2500_v13  ;;  %v2503_v41 = vpop.f32.mrb[82].mxu0 }
 0x199   :  { %v2504_v46 = vpop.f32.mrb[83].mxu0  ;;  %v1282_v50 = vpop.f32.mrb[80].mxu1 }
 0x19a   :  { %v1786_v51 = vadd.f32 %v1785_v25, %v1774_v40  ;;  %v1195_v48 = vadd.f32 %v2502_v44, %v3402_v43  ;;  %v1284_v5 = vpop.f32.mrb[81].mxu1 }
 0x19b   :  { %v1285_v10 = vpop.f32.mrb[82].mxu1 }
 0x19c   :  { %v3650_v14 = vadd.f32 %v1282_v50, %v1195_v48  ;;  %v1286_v0 = vpop.f32.mrb[83].mxu1 }
 0x19e   :  { %3982 = vst [vmem:[#allocation4_spill] sm:$0xff] %v3650_v14  ;;  %v1754_v16 = vsel %vm1649_vm1, %v3650_v14, 0.0  ;;  %v1775_v18 = vmul.f32 %v3650_v14, %v3650_v14  ;;  %v2522_v24 = vpop.f32.mrb[84].mxu0 }
 0x19f   :  { %v1755_v12 = vadd.f32 %v1754_v16, %v1753_v35  ;;  %v2523_v55 = vpop.f32.mrb[85].mxu0 }
 0x1a0   :  { %v1787_v56 = vsel %vm1649_vm1, %v1775_v18, 0.0  ;;  %v2524_v57 = vadd.f32 %v2523_v55, %v2522_v24  ;;  %v2525_v59 = vpop.f32.mrb[86].mxu0 }
 0x1a1   :  { %v1756_v13 = vrot.slane %v1755_v12, 4  ;;  %v1788_v30 = vadd.f32 %v1787_v56, %v1786_v51  ;;  %v2526_v25 = vpop.f32.mrb[87].mxu0  ;;  %v1584_v40 = vpop.f32.mrb[84].mxu1 }
 0x1a2   :  { %v2527_v44 = vadd.f32 %v2526_v25, %v2525_v59  ;;  %v1497_v41 = vadd.f32 %v2524_v57, %v3402_v43  ;;  %v1586_v46 = vpop.f32.mrb[85].mxu1 }
 0x1a3   :  { %v1757_v50 = vadd.f32 %v1756_v13, %v1755_v12  ;;  %v1789_v48 = vrot.slane %v1788_v30, 4  ;;  %v1587_v5 = vpop.f32.mrb[86].mxu1 }
 0x1a4   :  { %v3658_v10 = vadd.f32 %v1584_v40, %v1497_v41  ;;  %v1500_v35 = vadd.f32 %v2527_v44, %v3402_v43  ;;  %v1589_v0 = vpop.f32.mrb[87].mxu1 }
 0x1a5   :  { %v1758_v16 = vrot.slane %v1757_v50, 2  ;;  %v1790_v18 = vadd.f32 %v1789_v48, %v1788_v30 }
 0x1a6   :  { %v3661_v24 = vadd.f32 %v1587_v5, %v1500_v35  ;;  %v2528_v55 = vpop.f32.mrb[88].mxu0 }
 0x1a7   :  { %v1759_v51 = vadd.f32 %v1758_v16, %v1757_v50  ;;  %v1791_v56 = vrot.slane %v1790_v18, 2  ;;  %v2529_v14 = vpop.f32.mrb[89].mxu0  ;;  %v1816_v16 = vmul.f32 %v3658_v10, %v3658_v10 }
 0x1a8   :  { %v2530_v59 = vadd.f32 %v2529_v14, %v2528_v55  ;;  %v2531_v25 = vpop.f32.mrb[90].mxu0  ;;  %v1817_v30 = vmul.f32 %v3661_v24, %v3661_v24 }
 0x1a9   :  { %v1760_v57 = vrot.slane %v1759_v51, 1  ;;  %v1792_v46 = vadd.f32 %v1791_v56, %v1790_v18  ;;  %v2532_v12 = vpop.f32.mrb[91].mxu0  ;;  %v1592_v13 = vpop.f32.mrb[88].mxu1  ;;  %v1796_v18 = vadd.f32 %v3661_v24, %v3658_v10 }
 0x1aa   :  { %v2533_v60 = vadd.f32 %v2532_v12, %v2531_v25  ;;  %v1505_v40 = vadd.f32 %v2530_v59, %v3402_v43  ;;  %v1594_v41 = vpop.f32.mrb[89].mxu1  ;;  %v1829_v25 = vadd.f32 %v1817_v30, %v1816_v16 }
 0x1ab   :  { %v1761_v44 = vadd.f32 %v1760_v57, %v1759_v51  ;;  %v1793_v0 = vrot.slane %v1792_v46, 1  ;;  %v1595_v26 = vpop.f32.mrb[90].mxu1 }
 0x1ac   :  { %v3666_v48 = vadd.f32 %v1592_v13, %v1505_v40  ;;  %v1508_v50 = vadd.f32 %v2533_v60, %v3402_v43  ;;  %v1597_v14 = vpop.f32.mrb[91].mxu1 }
 0x1ad   :  { %v3670_v5 = vadd.f32 %v1761_v44, %v3585_v62  ;;  %v1794_v35 = vadd.f32 %v1793_v0, %v1792_v46 }
 0x1ae   :  { %v1818_v55 = vmul.f32 %v3666_v48, %v3666_v48  ;;  %v3678_v51 = vadd.f32 %v1595_v26, %v1508_v50  ;;  %v2534_v56 = vpop.f32.mrb[92].mxu0  ;;  %v1797_v62 = vadd.f32 %v1796_v18, %v3666_v48 }
 0x1af   :  { %v3681_v59 = vadd.f32 %v1794_v35, %v3595_v1  ;;  %v2535_v60 = vpop.f32.mrb[93].mxu0 }
 0x1b0   :  { %v2536_v57 = vadd.f32 %v2535_v60, %v2534_v56  ;;  %v2537_v46 = vpop.f32.mrb[94].mxu0  ;;  %v1830_v40 = vadd.f32 %v1829_v25, %v1818_v55  ;;  %v1819_v41 = vmul.f32 %v3678_v51, %v3678_v51  ;;  %v1798_v1 = vadd.f32 %v1797_v62, %v3678_v51 }
 0x1b1   :  { %v2538_v12 = vpop.f32.mrb[95].mxu0  ;;  %v1600_v13 = vpop.f32.mrb[92].mxu1 }
 0x1b2   :  { %v2539_v44 = vadd.f32 %v2538_v12, %v2537_v46  ;;  %v1513_v26 = vadd.f32 %v2536_v57, %v3402_v43  ;;  %v1602_v0 = vpop.f32.mrb[93].mxu1  ;;  %v1831_v16 = vadd.f32 %v1830_v40, %v1819_v41 }
 0x1b3   :  { %v1603_v50 = vpop.f32.mrb[94].mxu1 }
 0x1b4   :  { %v3688_v14 = vadd.f32 %v1600_v13, %v1513_v26  ;;  %v1516_v30 = vadd.f32 %v2539_v44, %v3402_v43  ;;  %v1605_v35 = vpop.f32.mrb[95].mxu1  ;;  %v2752_v26 = vld [vmem:[%s3964_s5] ss:$0 sm:$0xff] }
 0x1b6   :  { %3983 = vst [vmem:[#allocation5_spill] sm:$0xff] %v3688_v14  ;;  %v1799_v18 = vadd.f32 %v1798_v1, %v3688_v14  ;;  %v1820_v55 = vmul.f32 %v3688_v14, %v3688_v14  ;;  %v3694_v56 = vadd.f32 %v1603_v50, %v1516_v30  ;;  %v2540_v60 = vpop.f32.mrb[96].mxu0 }
 0x1b7   :  { %v2541_v25 = vpop.f32.mrb[97].mxu0 }
 0x1b8   :  { %3984 = vst [vmem:[#allocation6_spill] sm:$0xff] %v3694_v56  ;;  %v1832_v57 = vadd.f32 %v1831_v16, %v1820_v55  ;;  %v1800_v46 = vadd.f32 %v1799_v18, %v3694_v56  ;;  %v1821_v62 = vmul.f32 %v3694_v56, %v3694_v56  ;;  %v2542_v12 = vadd.f32 %v2541_v25, %v2540_v60  ;;  %v2543_v13 = vpop.f32.mrb[98].mxu0 }
 0x1b9   :  { %v2544_v43 = vpop.f32.mrb[99].mxu0  ;;  %v1608_v44 = vpop.f32.mrb[96].mxu1 }
 0x1ba   :  { %v1833_v40 = vadd.f32 %v1832_v57, %v1821_v62  ;;  %v2545_v41 = vadd.f32 %v2544_v43, %v2543_v13  ;;  %v1521_v0 = vadd.f32 %v2752_v26, %v2542_v12  ;;  %v1610_v50 = vpop.f32.mrb[97].mxu1 }
 0x1bb   :  { %v1611_v1 = vpop.f32.mrb[98].mxu1 }
 0x1bc   :  { %v3702_v30 = vadd.f32 %v1608_v44, %v1521_v0  ;;  %v1524_v35 = vadd.f32 %v2752_v26, %v2545_v41  ;;  %v1613_v16 = vpop.f32.mrb[99].mxu1 }
 0x1be   :  { %3985 = vst [vmem:[#allocation7_spill] sm:$0xff] %v3702_v30  ;;  %v1801_v18 = vadd.f32 %v1800_v46, %v3702_v30  ;;  %v1822_v55 = vmul.f32 %v3702_v30, %v3702_v30  ;;  %v3707_v60 = vadd.f32 %v1611_v1, %v1524_v35  ;;  %v2546_v25 = vpop.f32.mrb[100].mxu0 }
 0x1bf   :  { %v2547_v57 = vpop.f32.mrb[101].mxu0 }
 0x1c0   :  { %3986 = vst [vmem:[#allocation8_spill] sm:$0xff] %v3707_v60  ;;  %v1834_v62 = vadd.f32 %v1833_v40, %v1822_v55  ;;  %v1802_v13 = vadd.f32 %v1801_v18, %v3707_v60  ;;  %v1823_v12 = vmul.f32 %v3707_v60, %v3707_v60  ;;  %v2548_v43 = vadd.f32 %v2547_v57, %v2546_v25  ;;  %v2549_v44 = vpop.f32.mrb[102].mxu0 }
 0x1c1   :  { %v2550_v0 = vpop.f32.mrb[103].mxu0  ;;  %v1616_v41 = vpop.f32.mrb[100].mxu1 }
 0x1c2   :  { %v1835_v50 = vadd.f32 %v1834_v62, %v1823_v12  ;;  %v2551_v16 = vadd.f32 %v2550_v0, %v2549_v44  ;;  %v1529_v46 = vadd.f32 %v2752_v26, %v2548_v43  ;;  %v1618_v56 = vpop.f32.mrb[101].mxu1 }
 0x1c3   :  { %v1619_v14 = vpop.f32.mrb[102].mxu1 }
 0x1c4   :  { %v3712_v30 = vadd.f32 %v1616_v41, %v1529_v46  ;;  %v1532_v1 = vadd.f32 %v2752_v26, %v2551_v16  ;;  %v1621_v35 = vpop.f32.mrb[103].mxu1 }
 0x1c6   :  { %3987 = vst [vmem:[#allocation9_spill] sm:$0xff] %v3712_v30  ;;  %v1803_v40 = vadd.f32 %v1802_v13, %v3712_v30  ;;  %v1824_v18 = vmul.f32 %v3712_v30, %v3712_v30  ;;  %v3717_v55 = vadd.f32 %v1619_v14, %v1532_v1  ;;  %v2552_v25 = vpop.f32.mrb[104].mxu0 }
 0x1c7   :  { %v2553_v57 = vpop.f32.mrb[105].mxu0 }
 0x1c8   :  { %3988 = vst [vmem:[#allocation10_spill] sm:$0xff] %v3717_v55  ;;  %v1836_v60 = vadd.f32 %v1835_v50, %v1824_v18  ;;  %v1804_v62 = vadd.f32 %v1803_v40, %v3717_v55  ;;  %v1825_v56 = vmul.f32 %v3717_v55, %v3717_v55  ;;  %v2554_v12 = vadd.f32 %v2553_v57, %v2552_v25  ;;  %v2555_v43 = vpop.f32.mrb[106].mxu0 }
 0x1c9   :  { %v2556_v44 = vpop.f32.mrb[107].mxu0  ;;  %v1624_v0 = vpop.f32.mrb[104].mxu1 }
 0x1ca   :  { %v1837_v41 = vadd.f32 %v1836_v60, %v1825_v56  ;;  %v2557_v16 = vadd.f32 %v2556_v44, %v2555_v43  ;;  %v1537_v13 = vadd.f32 %v2752_v26, %v2554_v12  ;;  %v1626_v46 = vpop.f32.mrb[105].mxu1 }
 0x1cb   :  { %v1627_v35 = vpop.f32.mrb[106].mxu1 }
 0x1cc   :  { %v3722_v30 = vadd.f32 %v1624_v0, %v1537_v13  ;;  %v1540_v14 = vadd.f32 %v2752_v26, %v2557_v16  ;;  %v1629_v1 = vpop.f32.mrb[107].mxu1 }
 0x1ce   :  { %3989 = vst [vmem:[#allocation11_spill] sm:$0xff] %v3722_v30  ;;  %v1805_v50 = vadd.f32 %v1804_v62, %v3722_v30  ;;  %v1826_v40 = vmul.f32 %v3722_v30, %v3722_v30  ;;  %v3727_v18 = vadd.f32 %v1627_v35, %v1540_v14  ;;  %v2558_v25 = vpop.f32.mrb[108].mxu0 }
 0x1cf   :  { %v2559_v57 = vpop.f32.mrb[109].mxu0 }
 0x1d0   :  { %3990 = vst [vmem:[#allocation12_spill] sm:$0xff] %v3727_v18  ;;  %v1838_v55 = vadd.f32 %v1837_v41, %v1826_v40  ;;  %v1806_v60 = vadd.f32 %v1805_v50, %v3727_v18  ;;  %v1827_v56 = vmul.f32 %v3727_v18, %v3727_v18  ;;  %v2560_v12 = vadd.f32 %v2559_v57, %v2558_v25  ;;  %v2561_v43 = vpop.f32.mrb[110].mxu0 }
 0x1d1   :  { %v2562_v44 = vpop.f32.mrb[111].mxu0  ;;  %v1632_v0 = vpop.f32.mrb[108].mxu1 }
 0x1d2   :  { %v1839_v16 = vadd.f32 %v1838_v55, %v1827_v56  ;;  %v1545_v13 = vadd.f32 %v2752_v26, %v2560_v12  ;;  %v1634_v62 = vpop.f32.mrb[109].mxu1 }
 0x1d3   :  { %v1635_v46 = vpop.f32.mrb[110].mxu1 }
 0x1d4   :  { %v3732_v1 = vadd.f32 %v1632_v0, %v1545_v13  ;;  %v1636_v35 = vpop.f32.mrb[111].mxu1 }
 0x1d6   :  { %3991 = vst [vmem:[#allocation13_spill] sm:$0xff] %v3732_v1  ;;  %v1807_v14 = vsel %vm1649_vm1, %v3732_v1, 0.0  ;;  %v1828_v41 = vmul.f32 %v3732_v1, %v3732_v1 }
 0x1d7   :  { %v1808_v50 = vadd.f32 %v1807_v14, %v1806_v60 }
 0x1d8   :  { %v1840_v40 = vsel %vm1649_vm1, %v1828_v41, 0.0 }
 0x1d9   :  { %v1809_v25 = vrot.slane %v1808_v50, 4  ;;  %v1841_v57 = vadd.f32 %v1840_v40, %v1839_v16  ;;  %v1862_v40 = vlaneseq }
 0x1db   :  { %v1810_v43 = vadd.f32 %v1809_v25, %v1808_v50  ;;  %v1842_v44 = vrot.slane %v1841_v57, 4  ;;  %v1863_v25 = vshrl.u32 %v1862_v40, 7 }
 0x1dd   :  { %v1811_v55 = vrot.slane %v1810_v43, 2  ;;  %v1843_v26 = vadd.f32 %v1842_v44, %v1841_v57  ;;  %v1854_v57 = vld [vmem:[%s3965_s6] sm:$0x1] }
 0x1df   :  { %v1812_v56 = vadd.f32 %v1811_v55, %v1810_v43  ;;  %v1844_v12 = vrot.slane %v1843_v26, 2  ;;  %v1864_v43 = vsub.s32 0, %v1863_v25 }
 0x1e1   :  { %v1813_v0 = vrot.slane %v1812_v56, 1  ;;  %v1845_v13 = vadd.f32 %v1844_v12, %v1843_v26 }
 0x1e3   :  { %v1814_v62 = vadd.f32 %v1813_v0, %v1812_v56  ;;  %v1846_v46 = vrot.slane %v1845_v13, 1 }
 0x1e5   :  { %v1815_v35 = vadd.f32 %v1814_v62, %v3670_v5  ;;  %v1847_v18 = vadd.f32 %v1846_v46, %v1845_v13  ;;  %v1858_v5 = vld [vmem:[%s3966_s7] sm:$0x1] }
 0x1e7   :  { %v1848_v1 = vadd.f32 %v1847_v18, %v3681_v59  ;;  %v1849_v60 = vmul.f32 0.0025510204, %v1815_v35 }
 0x1e9   :  { %v1850_v14 = vmul.f32 0.0025510204, %v1848_v1  ;;  %v1851_v41 = vmul.f32 %v1849_v60, %v1849_v60 }
 0x1eb   :  { %v1852_v30 = vsub.f32 %v1850_v14, %v1851_v41 }
 0x1ed   :  { %v1853_v16 = vmax.f32 %v1852_v30, 0.0 }
 0x1ef   :  { %v1855_v50 = vadd.f32 1e-05, %v1853_v16 }
 0x1f1   :  { %2750 = vrsqrt.f32 %v1855_v50 }
 0x1fb   :  { %v2751_v44 = vpop.eup %2750 }
 0x1fc   :  { %v1857_v55 = vmul.f32 %v2751_v44, %v1854_v57 }
 0x1fe   :  { %v1859_v59 = vmul.f32 %v1857_v55, %v1849_v60  ;;  %v3747_v18 = vrot.slane %v1857_v55, %v1864_v43 }
 0x200   :  { %v1860_v1 = vsub.f32 %v1858_v5, %v1859_v59  ;;  %v1867_v30 = vmul.f32 %v3747_v18, %v3406_v3  ;;  %v1868_v26 = vmul.f32 %v3747_v18, %v3409_v6  ;;  %v1869_v56 = vmul.f32 %v3747_v18, %v3414_v17 }
 0x201   :  { %v1870_v12 = vmul.f32 %v3747_v18, %v3423_v22  ;;  %v1871_v0 = vmul.f32 %v3747_v18, %v3430_v27  ;;  %v1872_v13 = vmul.f32 %v3747_v18, %v3436_v34  ;;  %v1873_v62 = vmul.f32 %v3747_v18, %v3442_v49 }
 0x202   :  { %v1874_v3 = vmul.f32 %v3747_v18, %v3448_v2  ;;  %v1875_v6 = vmul.f32 %v3747_v18, %v3454_v20  ;;  %v1876_v17 = vmul.f32 %v3747_v18, %v3460_v28  ;;  %v1877_v22 = vmul.f32 %v3747_v18, %v3466_v31 }
 0x203   :  { %v1878_v27 = vmul.f32 %v3747_v18, %v3472_v37  ;;  %v1879_v34 = vmul.f32 %v3747_v18, %v3478_v52  ;;  %v3775_v46 = vrot.slane %v1860_v1, %v1864_v43  ;;  %v1912_v49 = vmul.f32 %v3747_v18, %v3490_v21 }
 0x204   :  { %v1913_v2 = vmul.f32 %v3747_v18, %v3493_v54  ;;  %v1914_v20 = vmul.f32 %v3747_v18, %v3498_v29  ;;  %v1915_v28 = vmul.f32 %v3747_v18, %v3507_v38  ;;  %v1916_v31 = vmul.f32 %v3747_v18, %v3514_v7 }
 0x205   :  { %v1886_v37 = vadd.f32 %v3775_v46, %v1867_v30  ;;  %v1887_v52 = vadd.f32 %v3775_v46, %v1868_v26  ;;  %v1888_v35 = vadd.f32 %v3775_v46, %v1869_v56  ;;  %v1889_v21 = vadd.f32 %v3775_v46, %v1870_v12 }
 0x206   :  { %v1890_v60 = vadd.f32 %v3775_v46, %v1871_v0  ;;  %v1891_v54 = vadd.f32 %v3775_v46, %v1872_v13  ;;  %v1892_v29 = vadd.f32 %v3775_v46, %v1873_v62  ;;  %v1893_v14 = vadd.f32 %v3775_v46, %v1874_v3 }
 0x207   :  { %v1894_v38 = vadd.f32 %v3775_v46, %v1875_v6  ;;  %v1895_v7 = vadd.f32 %v3775_v46, %v1876_v17  ;;  %v1896_v41 = vadd.f32 %v3775_v46, %v1877_v22  ;;  %v1897_v16 = vadd.f32 %v3775_v46, %v1878_v27 }
 0x208   :  { %v1898_v50 = vadd.f32 %v3775_v46, %v1879_v34  ;;  %v1899_v40 = vmax.f32 %v1886_v37, 0.0  ;;  %v1900_v25 = vmax.f32 %v1887_v52, 0.0  ;;  %v1901_v57 = vmax.f32 %v1888_v35, 0.0 }
 0x209   :  { %v1902_v43 = vmax.f32 %v1889_v21, 0.0  ;;  %v1903_v44 = vmax.f32 %v1890_v60, 0.0  ;;  %v1904_v55 = vmax.f32 %v1891_v54, 0.0  ;;  %v1905_v5 = vmax.f32 %v1892_v29, 0.0 }
 0x20a   :  { %v1906_v59 = vmax.f32 %v1893_v14, 0.0  ;;  %v1907_v1 = vmax.f32 %v1894_v38, 0.0  ;;  %v1908_v30 = vmax.f32 %v1895_v7, 0.0  ;;  %v1909_v26 = vmax.f32 %v1896_v41, 0.0 }
 0x20b   :  { %v1910_v56 = vmax.f32 %v1897_v16, 0.0  ;;  %v1911_v12 = vmax.f32 %v1898_v50, 0.0  ;;  %v1917_v0 = vmul.f32 %v3747_v18, %v3520_v15  ;;  %v1918_v13 = vmul.f32 %v3747_v18, %v3526_v63 }
 0x20c   :  { %v1919_v62 = vmul.f32 %v3747_v18, %v3532_v33  ;;  %v1920_v3 = vmul.f32 %v3747_v18, %v3538_v53  ;;  %v1921_v6 = vmul.f32 %v3747_v18, %v3544_v11  ;;  %v1922_v17 = vmul.f32 %v3747_v18, %v3550_v61 }
 0x20d   :  { %v1923_v22 = vmul.f32 %v3747_v18, %v3556_v32  ;;  %v1924_v15 = vmul.f32 %v3747_v18, %v3565_v9  ;;  %v1925_v63 = vadd.f32 %v1912_v49, %v3775_v46  ;;  %v1926_v27 = vadd.f32 %v1913_v2, %v3775_v46 }
 0x20e   :  { %v1927_v33 = vadd.f32 %v1914_v20, %v3775_v46  ;;  %v1928_v53 = vadd.f32 %v1915_v28, %v3775_v46  ;;  %v1929_v34 = vadd.f32 %v1916_v31, %v3775_v46  ;;  %v1930_v11 = vadd.f32 %v1917_v0, %v3775_v46 }
 0x20f   :  { %v1931_v61 = vadd.f32 %v1918_v13, %v3775_v46  ;;  %v1932_v37 = vadd.f32 %v1919_v62, %v3775_v46  ;;  %v1933_v32 = vadd.f32 %v1920_v3, %v3775_v46  ;;  %v1934_v9 = vadd.f32 %v1921_v6, %v3775_v46 }
 0x210   :  { %v1935_v49 = vadd.f32 %v1922_v17, %v3775_v46  ;;  %v1936_v2 = vadd.f32 %v1923_v22, %v3775_v46  ;;  %v1937_v20 = vadd.f32 %v1924_v15, %v3775_v46  ;;  %v1938_v52 = vmax.f32 %v1925_v63, 0.0 }
 0x211   :  { %v1939_v28 = vmax.f32 %v1926_v27, 0.0  ;;  %v1940_v35 = vmax.f32 %v1927_v33, 0.0  ;;  %v1941_v31 = vmax.f32 %v1928_v53, 0.0  ;;  %v1942_v21 = vmax.f32 %v1929_v34, 0.0 }
 0x212   :  { %v1943_v60 = vmax.f32 %v1930_v11, 0.0  ;;  %v1944_v54 = vmax.f32 %v1931_v61, 0.0  ;;  %v1945_v29 = vmax.f32 %v1932_v37, 0.0  ;;  %v1946_v14 = vmax.f32 %v1933_v32, 0.0 }
 0x213   :  { %v1947_v38 = vmax.f32 %v1934_v9, 0.0  ;;  %v1948_v7 = vmax.f32 %v1935_v49, 0.0  ;;  %v1949_v41 = vmax.f32 %v1936_v2, 0.0  ;;  %v1950_v16 = vmax.f32 %v1937_v20, 0.0 }
 0x214   :  { %v1951_v50 = vmax.f32 %v1899_v40, %v1938_v52  ;;  %v1952_v0 = vmax.f32 %v1900_v25, %v1939_v28  ;;  %v1953_v13 = vmax.f32 %v1901_v57, %v1940_v35  ;;  %v1954_v62 = vmax.f32 %v1902_v43, %v1941_v31 }
 0x215   :  { %v1955_v3 = vmax.f32 %v1903_v44, %v1942_v21  ;;  %v1956_v6 = vmax.f32 %v1904_v55, %v1943_v60  ;;  %v1957_v17 = vmax.f32 %v1905_v5, %v1944_v54  ;;  %v1958_v22 = vmax.f32 %v1906_v59, %v1945_v29  ;;  %v3992_v55 = vld [vmem:[#allocation2_spill] sm:$0xff]  ;;  %v3993_v5 = vld [vmem:[#allocation3_spill] sm:$0xff]  ;;  %v3994_v59 = vld [vmem:[#allocation4_spill] sm:$0xff] }
 0x216   :  { %v1959_v15 = vmax.f32 %v1907_v1, %v1946_v14  ;;  %v1960_v63 = vmax.f32 %v1908_v30, %v1947_v38  ;;  %v1961_v27 = vmax.f32 %v1909_v26, %v1948_v7  ;;  %v1962_v33 = vmax.f32 %v1910_v56, %v1949_v41 }
 0x217   :  { %v1963_v53 = vmax.f32 %v1911_v12, %v1950_v16  ;;  %v1964_v34 = vmul.f32 %v3747_v18, %v3574_v39  ;;  %v1965_v11 = vmul.f32 %v3747_v18, %v3577_v45  ;;  %v1966_v40 = vmul.f32 %v3747_v18, %v3582_v58 }
 0x218   :  { %v1967_v25 = vmul.f32 %v3747_v18, %v3593_v36  ;;  %v1968_v57 = vmul.f32 %v3747_v18, %v3602_v19  ;;  %v1969_v43 = vmul.f32 %v3747_v18, %v3608_v8  ;;  %v1970_v44 = vmul.f32 %v3747_v18, %v3614_v47 }
 0x219   :  { %v1971_v39 = vmul.f32 %v3747_v18, %v3620_v4  ;;  %v1972_v45 = vmul.f32 %v3747_v18, %v3626_v23  ;;  %v1973_v58 = vmul.f32 %v3747_v18, %v3632_v42  ;;  %v1974_v36 = vmul.f32 %v3747_v18, %v3992_v55 }
 0x21a   :  { %v1975_v19 = vmul.f32 %v3747_v18, %v3993_v5  ;;  %v1976_v8 = vmul.f32 %v3747_v18, %v3994_v59  ;;  %v1977_v47 = vadd.f32 %v1964_v34, %v3775_v46  ;;  %v1978_v1 = vadd.f32 %v1965_v11, %v3775_v46 }
 0x21b   :  { %v1979_v4 = vadd.f32 %v1966_v40, %v3775_v46  ;;  %v1980_v23 = vadd.f32 %v1967_v25, %v3775_v46  ;;  %v1981_v30 = vadd.f32 %v1968_v57, %v3775_v46  ;;  %v1982_v42 = vadd.f32 %v1969_v43, %v3775_v46 }
 0x21c   :  { %v1983_v26 = vadd.f32 %v1970_v44, %v3775_v46  ;;  %v1984_v56 = vadd.f32 %v1971_v39, %v3775_v46  ;;  %v1985_v12 = vadd.f32 %v1972_v45, %v3775_v46  ;;  %v1986_v61 = vadd.f32 %v1973_v58, %v3775_v46 }
 0x21d   :  { %v1987_v37 = vadd.f32 %v1974_v36, %v3775_v46  ;;  %v1988_v32 = vadd.f32 %v1975_v19, %v3775_v46  ;;  %v1989_v9 = vadd.f32 %v1976_v8, %v3775_v46  ;;  %v1990_v49 = vmax.f32 %v1977_v47, 0.0  ;;  %v4003_v19 = vld [vmem:[#allocation13_spill] sm:$0xff] }
 0x21e   :  { %v1991_v2 = vmax.f32 %v1978_v1, 0.0  ;;  %v1992_v20 = vmax.f32 %v1979_v4, 0.0  ;;  %v1993_v52 = vmax.f32 %v1980_v23, 0.0  ;;  %v1994_v28 = vmax.f32 %v1981_v30, 0.0 }
 0x21f   :  { %v1995_v35 = vmax.f32 %v1982_v42, 0.0  ;;  %v1996_v31 = vmax.f32 %v1983_v26, 0.0  ;;  %v1997_v21 = vmax.f32 %v1984_v56, 0.0  ;;  %v1998_v60 = vmax.f32 %v1985_v12, 0.0 }
 0x220   :  { %v1999_v54 = vmax.f32 %v1986_v61, 0.0  ;;  %v2000_v29 = vmax.f32 %v1987_v37, 0.0  ;;  %v2001_v14 = vmax.f32 %v1988_v32, 0.0  ;;  %v2002_v38 = vmax.f32 %v1989_v9, 0.0 }
 0x221   :  { %v2003_v7 = vmax.f32 %v1951_v50, %v1990_v49  ;;  %v2004_v41 = vmax.f32 %v1952_v0, %v1991_v2  ;;  %v2005_v16 = vmax.f32 %v1953_v13, %v1992_v20  ;;  %v2006_v34 = vmax.f32 %v1954_v62, %v1993_v52  ;;  %v3995_v13 = vld [vmem:[#allocation5_spill] sm:$0xff] }
 0x222   :  { %v2007_v11 = vmax.f32 %v1955_v3, %v1994_v28  ;;  %v2008_v40 = vmax.f32 %v1956_v6, %v1995_v35  ;;  %v2009_v25 = vmax.f32 %v1957_v17, %v1996_v31  ;;  %v2010_v57 = vmax.f32 %v1958_v22, %v1997_v21  ;;  %v3996_v3 = vld [vmem:[#allocation6_spill] sm:$0xff]  ;;  %v3997_v17 = vld [vmem:[#allocation7_spill] sm:$0xff] }
 0x223   :  { %v2011_v43 = vmax.f32 %v1959_v15, %v1998_v60  ;;  %v2012_v44 = vmax.f32 %v1960_v63, %v1999_v54  ;;  %v2013_v39 = vmax.f32 %v1961_v27, %v2000_v29  ;;  %v2014_v45 = vmax.f32 %v1962_v33, %v2001_v14  ;;  %v3998_v15 = vld [vmem:[#allocation8_spill] sm:$0xff]  ;;  %v3999_v63 = vld [vmem:[#allocation9_spill] sm:$0xff]  ;;  %v4000_v27 = vld [vmem:[#allocation10_spill] sm:$0xff] }
 0x224   :  { %v2015_v58 = vmax.f32 %v1963_v53, %v2002_v38  ;;  %v2016_v55 = vmul.f32 %v3747_v18, %v3658_v10  ;;  %v2017_v36 = vmul.f32 %v3747_v18, %v3661_v24  ;;  %v2018_v50 = vmul.f32 %v3747_v18, %v3666_v48  ;;  %v4001_v33 = vld [vmem:[#allocation11_spill] sm:$0xff]  ;;  %v4002_v53 = vld [vmem:[#allocation12_spill] sm:$0xff] }
 0x225   :  { %v2019_v0 = vmul.f32 %v3747_v18, %v3678_v51  ;;  %v2020_v62 = vmul.f32 %v3747_v18, %v3995_v13  ;;  %v2021_v6 = vmul.f32 %v3747_v18, %v3996_v3  ;;  %v2022_v22 = vmul.f32 %v3747_v18, %v3997_v17 }
 0x226   :  { %v2023_v10 = vmul.f32 %v3747_v18, %v3998_v15  ;;  %v2024_v24 = vmul.f32 %v3747_v18, %v3999_v63  ;;  %v2025_v48 = vmul.f32 %v3747_v18, %v4000_v27  ;;  %v2026_v51 = vmul.f32 %v3747_v18, %v4001_v33 }
 0x227   :  { %v2027_v5 = vmul.f32 %v3747_v18, %v4002_v53  ;;  %v2028_v59 = vmul.f32 %v3747_v18, %v4003_v19  ;;  %v2029_v8 = vadd.f32 %v2016_v55, %v3775_v46  ;;  %v2030_v47 = vadd.f32 %v2017_v36, %v3775_v46 }
 0x228   :  { %v2031_v1 = vadd.f32 %v2018_v50, %v3775_v46  ;;  %v2032_v4 = vadd.f32 %v2019_v0, %v3775_v46  ;;  %v2033_v23 = vadd.f32 %v2020_v62, %v3775_v46  ;;  %v2034_v30 = vadd.f32 %v2021_v6, %v3775_v46 }
 0x229   :  { %v2035_v42 = vadd.f32 %v2022_v22, %v3775_v46  ;;  %v2036_v26 = vadd.f32 %v2023_v10, %v3775_v46  ;;  %v2037_v56 = vadd.f32 %v2024_v24, %v3775_v46  ;;  %v2038_v18 = vadd.f32 %v2025_v48, %v3775_v46 }
 0x22a   :  { %v2039_v12 = vadd.f32 %v2026_v51, %v3775_v46  ;;  %v2040_v61 = vadd.f32 %v2027_v5, %v3775_v46  ;;  %v2041_v37 = vadd.f32 %v2028_v59, %v3775_v46  ;;  %v2042_v32 = vmax.f32 %v2029_v8, 0.0 }
 0x22b   :  { %v2043_v9 = vmax.f32 %v2030_v47, 0.0  ;;  %v2044_v49 = vmax.f32 %v2031_v1, 0.0  ;;  %v2045_v2 = vmax.f32 %v2032_v4, 0.0  ;;  %v2046_v20 = vmax.f32 %v2033_v23, 0.0 }
 0x22c   :  { %v2047_v52 = vmax.f32 %v2034_v30, 0.0  ;;  %v2048_v28 = vmax.f32 %v2035_v42, 0.0  ;;  %v2049_v35 = vmax.f32 %v2036_v26, 0.0  ;;  %v2050_v31 = vmax.f32 %v2037_v56, 0.0 }
 0x22d   :  { %v2051_v21 = vmax.f32 %v2038_v18, 0.0  ;;  %v2052_v60 = vmax.f32 %v2039_v12, 0.0  ;;  %v2053_v54 = vmax.f32 %v2040_v61, 0.0  ;;  %v2054_v29 = vmax.f32 %v2041_v37, 0.0 }
 0x22e   :  { %v2055_v14 = vmax.f32 %v2003_v7, %v2042_v32  ;;  %v2056_v38 = vmax.f32 %v2004_v41, %v2043_v9  ;;  %v2057_v55 = vmax.f32 %v2005_v16, %v2044_v49  ;;  %v2058_v36 = vmax.f32 %v2006_v34, %v2045_v2 }
 0x22f   :  { %v2059_v50 = vmax.f32 %v2007_v11, %v2046_v20  ;;  %v2060_v46 = vmax.f32 %v2008_v40, %v2047_v52  ;;  %v2061_v0 = vmax.f32 %v2009_v25, %v2048_v28  ;;  %v2062_v13 = vmax.f32 %v2010_v57, %v2049_v35 }
 0x230   :  { %v2063_v62 = vmax.f32 %v2011_v43, %v2050_v31  ;;  %v2064_v3 = vmax.f32 %v2012_v44, %v2051_v21  ;;  %v2065_v6 = vmax.f32 %v2013_v39, %v2052_v60  ;;  %v2066_v17 = vmax.f32 %v2014_v45, %v2053_v54 }
 0x231   :  { %v2067_v22 = vmax.f32 %v2015_v58, %v2054_v29  ;;  %v2319_v15 = vpack.c.bf16 %v2055_v14, %v2055_v14  ;;  %v2320_v10 = vpack.c.bf16 %v2056_v38, %v2056_v38  ;;  %v2321_v63 = vpack.c.bf16 %v2057_v55, %v2057_v55 }
 0x232   :  { %v2322_v24 = vpack.c.bf16 %v2058_v36, %v2058_v36  ;;  %v2323_v27 = vpack.c.bf16 %v2059_v50, %v2059_v50  ;;  %v2324_v48 = vpack.c.bf16 %v2060_v46, %v2060_v46  ;;  %v2325_v33 = vpack.c.bf16 %v2061_v0, %v2061_v0 }
 0x233   :  { %v2326_v7 = vpack.c.bf16 %v2062_v13, %v2062_v13  ;;  %v2327_v41 = vpack.c.bf16 %v2063_v62, %v2063_v62  ;;  %v2328_v16 = vpack.c.bf16 %v2064_v3, %v2064_v3  ;;  %v2329_v34 = vpack.c.bf16 %v2065_v6, %v2065_v6  ;;  %2122 = vst.msk [vmem:[%s3967_s8] sm:$0xf] %vm2121_vm2, %v2319_v15 }
 0x234   :  { %2123 = vst.msk [vmem:[%s3967_s8 + $0x4] sm:$0xf] %vm2121_vm2, %v2320_v10  ;;  %2124 = vst.msk [vmem:[%s3967_s8 + $0x8] sm:$0xf] %vm2121_vm2, %v2321_v63  ;;  %v2330_v11 = vpack.c.bf16 %v2066_v17, %v2066_v17  ;;  %v2331_v40 = vpack.c.bf16 %v2067_v22, %v2067_v22 }
 0x235   :  { %2125 = vst.msk [vmem:[%s3967_s8 + $0xc] sm:$0xf] %vm2121_vm2, %v2322_v24  ;;  %2126 = vst.msk [vmem:[%s3967_s8 + $0x10] sm:$0xf] %vm2121_vm2, %v2323_v27 }
 0x236   :  { %2127 = vst.msk [vmem:[%s3967_s8 + $0x14] sm:$0xf] %vm2121_vm2, %v2324_v48  ;;  %2128 = vst.msk [vmem:[%s3967_s8 + $0x18] sm:$0xf] %vm2121_vm2, %v2325_v33 }
 0x237   :  { %2129 = vst.msk [vmem:[%s3967_s8 + $0x1c] sm:$0xf] %vm2121_vm2, %v2326_v7  ;;  %2130 = vst.msk [vmem:[%s3967_s8 + $0x20] sm:$0xf] %vm2121_vm2, %v2327_v41 }
 0x238   :  { %2131 = vst.msk [vmem:[%s3967_s8 + $0x24] sm:$0xf] %vm2121_vm2, %v2328_v16  ;;  %2132 = vst.msk [vmem:[%s3967_s8 + $0x28] sm:$0xf] %vm2121_vm2, %v2329_v34 }
 0x239   :  { %2133 = vst.msk [vmem:[%s3967_s8 + $0x2c] sm:$0xf] %vm2121_vm2, %v2330_v11 }
 0x23a   :  { %2135 = vst.msk [vmem:[%s3967_s8 + $0x30] sm:$0x1] %vm2134_vm3, %v2331_v40 }

</bundles_post_ra>
